<compile_context>
chip_gen: v7x
topology: tpu7x:2x2x1
jax: 0.10.0
libtpu: 0.0.40
codegen_flags: <defaults>
</compile_context>

<pallas_src>
import functools

import jax
import jax.numpy as jnp
from jax.experimental import pallas as pl
from jax.experimental.pallas import tpu as pltpu


def _offsets(k):
    """For a stride-2 / pad-1 conv tap k: input coord = 2*o + k - 1.

    Returns (parity, shift) such that input coord = 2*(o + shift) + parity.
    """
    e = k - 1
    parity = e % 2
    shift = (e - parity) // 2
    return parity, shift


def _disc_kernel(a1_ref, w1_ref, w2_ref, w3_ref, w4_ref,
                 g2_ref, b2_ref, g3_ref, b3_ref,
                 o_ref, buf1_ref, buf2_ref, *, n):
    leaky = lambda t: jnp.where(t > 0, t, 0.2 * t)

    # Zero-init the padded, parity-grouped activation buffers (the zero rows
    # implement the spatial conv padding).
    buf1_ref[...] = jnp.zeros(buf1_ref.shape, buf1_ref.dtype)
    buf2_ref[...] = jnp.zeros(buf2_ref.shape, buf2_ref.dtype)

    # -------- layer 1: conv 6->64 (k4 s2 p1) + LeakyReLU ---------------------
    # a1 rows are ordered (ph, pw, i, j, n) with output coords (2i+ph, 2j+pw),
    # columns ordered (kh, kw, cin) to match w1.
    y1 = jnp.dot(a1_ref[...], w1_ref[...], preferred_element_type=jnp.float32)
    y1 = leaky(y1)                                      # [256n, 64]
    # Scatter into buf1: rows (cls=2*ph+pw, i+1, j+1, n) on a 10x10 padded
    # half-grid (valid half-grid is 8x8).  Contiguous 8n-row copies.
    for cls in range(4):
        for i in range(8):
            src = (cls * 8 + i) * 8 * n
            dst = ((cls * 10 + (i + 1)) * 10 + 1) * n
            buf1_ref[dst:dst + 8 * n, :] = y1[src:src + 8 * n, :]

    # -------- layer 2: conv 64->128 (k4 s2 p1) + BN + LeakyReLU --------------
    acc2 = jnp.zeros((64 * n, 128), jnp.float32)        # rows (oh, ow, n), 8x8
    for kh in range(4):
        ph, ah = _offsets(kh)
        for kw in range(4):
            pw, aw = _offsets(kw)
            cls = ph * 2 + pw
            parts = []
            for oh in range(8):
                s = ((cls * 10 + (oh + ah + 1)) * 10 + (aw + 1)) * n
                parts.append(buf1_ref[s:s + 8 * n, :])
            a2 = jnp.concatenate(parts, axis=0).astype(jnp.bfloat16)  # [64n,64]
            acc2 = acc2 + jnp.dot(a2, w2_ref[kh * 4 + kw],
                                  preferred_element_type=jnp.float32)
    m2 = jnp.mean(acc2, axis=0, keepdims=True)
    v2 = jnp.mean(jnp.square(acc2 - m2), axis=0, keepdims=True)
    y2 = (acc2 - m2) * jax.lax.rsqrt(v2 + 1e-5) * g2_ref[...] + b2_ref[...]
    y2 = leaky(y2)                                      # [64n, 128]
    # Scatter into buf2: parity-grouped 6x6 padded half-grid (valid 4x4).
    for oh in range(8):
        for ow in range(8):
            src = (oh * 8 + ow) * n
            cls = (oh % 2) * 2 + (ow % 2)
            dst = ((cls * 6 + (oh // 2 + 1)) * 6 + (ow // 2 + 1)) * n
            buf2_ref[dst:dst + n, :] = y2[src:src + n, :]

    # -------- layer 3: conv 128->256 (k4 s2 p1) + BN + LeakyReLU -------------
    acc3 = jnp.zeros((16 * n, 256), jnp.float32)        # rows (oh, ow, n), 4x4
    for kh in range(4):
        ph, ah = _offsets(kh)
        for kw in range(4):
            pw, aw = _offsets(kw)
            cls = ph * 2 + pw
            parts = []
            for oh in range(4):
                s = ((cls * 6 + (oh + ah + 1)) * 6 + (aw + 1)) * n
                parts.append(buf2_ref[s:s + 4 * n, :])
            a3 = jnp.concatenate(parts, axis=0).astype(jnp.bfloat16)  # [16n,128]
            acc3 = acc3 + jnp.dot(a3, w3_ref[kh * 4 + kw],
                                  preferred_element_type=jnp.float32)
    m3 = jnp.mean(acc3, axis=0, keepdims=True)
    v3 = jnp.mean(jnp.square(acc3 - m3), axis=0, keepdims=True)
    y3 = (acc3 - m3) * jax.lax.rsqrt(v3 + 1e-5) * g3_ref[...] + b3_ref[...]
    y3 = leaky(y3)                                      # [16n, 256]

    # -------- layer 4: conv 256->1 (k4 s1 p0) + sigmoid ----------------------
    # 1x1 output => weighted full reduction over (h, w, c) on the VPU instead
    # of a Cout=1 (fully masked store) MXU GEMM.  w4_ref rows are pre-ordered
    # to match y3's (oh, ow, n) row order.
    z = jnp.sum(y3 * w4_ref[...], axis=1, keepdims=True)          # [16n, 1]
    ridx = jax.lax.broadcasted_iota(jnp.int32, (16 * n, n), 0)
    cidx = jax.lax.broadcasted_iota(jnp.int32, (16 * n, n), 1)
    nmask = jnp.where((ridx % n) == cidx, 1.0, 0.0)               # sample mask
    logits = jnp.sum(z * nmask, axis=0, keepdims=True)            # [1, n]
    o_ref[...] = 1.0 / (1.0 + jnp.exp(-logits))


def init_params(key):
    ks = jax.random.split(key, 4)

    def w(k, kh, kw, cin, cout):
        # DCGAN-style init N(0, 0.02); stored as [(kh,kw,cin), cout].
        return 0.02 * jax.random.normal(k, (kh * kw * cin, cout), jnp.float32)

    return {
        "w1": w(ks[0], 4, 4, 6, 64),
        "w2": w(ks[1], 4, 4, 64, 128),
        "g2": jnp.ones((128,), jnp.float32),
        "b2": jnp.zeros((128,), jnp.float32),
        "w3": w(ks[2], 4, 4, 128, 256),
        "g3": jnp.ones((256,), jnp.float32),
        "b3": jnp.zeros((256,), jnp.float32),
        "w4": w(ks[3], 4, 4, 256, 1),
    }


def discriminator_forward(params, frame1, frame2):
    """frame1, frame2: NCHW [N, 3, 32, 32] -> NCHW [N, 1, 1, 1]."""
    n, _, h, w = frame1.shape
    assert (h, w) == (32, 32), "architecture reaches 1x1 only for 32x32 input"

    # NHWC, channel concat on the last axis (single cheap layout op).
    x = jnp.concatenate(
        [jnp.transpose(frame1, (0, 2, 3, 1)),
         jnp.transpose(frame2, (0, 2, 3, 1))], axis=-1).astype(jnp.float32)

    # Layer-1 im2col on the raw input.  Rows ordered (ph, pw, i, j, n) (output
    # coords (2i+ph, 2j+pw)) so the kernel scatters layer-1's output into its
    # parity-grouped buffer with contiguous row copies.  Cols are (kh, kw, ci).
    xp = jnp.pad(x, ((0, 0), (1, 1), (1, 1), (0, 0)))                # [n,34,34,6]
    cols = [xp[:, kh:kh + 31:2, kw:kw + 31:2, :]
            for kh in range(4) for kw in range(4)]                   # [n,16,16,6]
    p = jnp.stack(cols, axis=3)                                      # [n,16,16,16,6]
    p = p.reshape(n, 8, 2, 8, 2, 16, 6)                              # h->(i,ph), w->(j,pw)
    p = jnp.transpose(p, (2, 4, 1, 3, 0, 5, 6))                      # (ph,pw,i,j,n,k,ci)
    a1 = p.reshape(256 * n, 96).astype(jnp.bfloat16)

    w1 = params["w1"].astype(jnp.bfloat16)                           # [96, 64]
    w2 = params["w2"].reshape(16, 64, 128).astype(jnp.bfloat16)      # [(kh,kw),ci,co]
    w3 = params["w3"].reshape(16, 128, 256).astype(jnp.bfloat16)
    w4 = jnp.repeat(params["w4"].reshape(16, 256), n, axis=0)        # [16n, 256] f32
    g2 = params["g2"].reshape(1, 128)
    b2 = params["b2"].reshape(1, 128)
    g3 = params["g3"].reshape(1, 256)
    b3 = params["b3"].reshape(1, 256)

    out = pl.pallas_call(
        functools.partial(_disc_kernel, n=n),
        out_shape=jax.ShapeDtypeStruct((1, n), jnp.float32),
        scratch_shapes=[
            pltpu.VMEM((400 * n, 64), jnp.float32),    # padded layer-1 output
            pltpu.VMEM((144 * n, 128), jnp.float32),   # padded layer-2 output
        ],
    )(a1, w1, w2, w3, w4, g2, b2, g3, b3)
    return out.reshape(n, 1, 1, 1)


def _reference_forward(params, frame1, frame2):
    """Pure-JAX (XLA) reference with identical semantics, for validation."""
    x = jnp.concatenate([frame1, frame2], axis=1)
    x = jnp.transpose(x, (0, 2, 3, 1)).astype(jnp.float32)

    def conv(t, wmat, cin, cout, stride, pad):
        return jax.lax.conv_general_dilated(
            t, wmat.reshape(4, 4, cin, cout),
            window_strides=(stride, stride),
            padding=[(pad, pad), (pad, pad)],
            dimension_numbers=("NHWC", "HWIO", "NHWC"))

    def bn(t, g, b):
        m = jnp.mean(t, axis=(0, 1, 2))
        v = jnp.mean(jnp.square(t - m), axis=(0, 1, 2))
        return (t - m) * jax.lax.rsqrt(v + 1e-5) * g + b

    lrelu = lambda t: jnp.where(t > 0, t, 0.2 * t)
    t = lrelu(conv(x, params["w1"], 6, 64, 2, 1))
    t = lrelu(bn(conv(t, params["w2"], 64, 128, 2, 1), params["g2"], params["b2"]))
    t = lrelu(bn(conv(t, params["w3"], 128, 256, 2, 1), params["g3"], params["b3"]))
    t = jax.nn.sigmoid(conv(t, params["w4"], 256, 1, 1, 0))
    return jnp.transpose(t, (0, 3, 1, 2))


if __name__ == "__main__":
    key = jax.random.PRNGKey(0)
    k_par, k1, k2 = jax.random.split(key, 3)

    params = init_params(k_par)
    # 32x32 input -> 16 -> 8 -> 4 -> 1 spatial, batch 2.
    frame1 = jax.random.normal(k1, (2, 3, 32, 32), jnp.float32)
    frame2 = jax.random.normal(k2, (2, 3, 32, 32), jnp.float32)

    out = jax.jit(discriminator_forward)(params, frame1, frame2)
    jax.block_until_ready(out)
    assert out.shape == (2, 1, 1, 1), out.shape
    assert bool(jnp.all((out >= 0.0) & (out <= 1.0)))

    # Validate against the pure-JAX reference (bf16 MXU operands -> loose tol).
    ref = _reference_forward(params, frame1, frame2)
    assert float(jnp.max(jnp.abs(out - ref))) < 5e-2

    print("KERNEL_OK")
</pallas_src>

<mosaic_0001>
module attributes {stable_mosaic.version = 11 : i64} {
  func.func @_disc_kernel(%arg0: memref<512x96xbf16, #tpu.memory_space<vmem>>, %arg1: memref<96x64xbf16, #tpu.memory_space<vmem>>, %arg2: memref<16x64x128xbf16, #tpu.memory_space<vmem>>, %arg3: memref<16x128x256xbf16, #tpu.memory_space<vmem>>, %arg4: memref<32x256xf32, #tpu.memory_space<vmem>>, %arg5: memref<1x128xf32, #tpu.memory_space<vmem>>, %arg6: memref<1x128xf32, #tpu.memory_space<vmem>>, %arg7: memref<1x256xf32, #tpu.memory_space<vmem>>, %arg8: memref<1x256xf32, #tpu.memory_space<vmem>>, %arg9: memref<1x2xf32, #tpu.memory_space<vmem>>, %arg10: memref<800x64xf32, #tpu.memory_space<vmem>>, %arg11: memref<288x128xf32, #tpu.memory_space<vmem>>) attributes {dimension_semantics = [], scalar_prefetch = 0 : i64, scratch_operands = 2 : i64, tpu.core_type = #tpu.core_type<tc>} {
    %cst = arith.constant 0.000000e+00 : f32
    %0 = vector.broadcast %cst : f32 to vector<800x64xf32>
    %c0 = arith.constant 0 : index
    %c0_0 = arith.constant 0 : index
    %1 = vector.load %arg10[%c0, %c0_0] : memref<800x64xf32, #tpu.memory_space<vmem>>, vector<800x64xf32>
    tpu.vector_store %arg10[%c0, %c0_0], %0 {strides = array<i32>} : memref<800x64xf32, #tpu.memory_space<vmem>>, vector<800x64xf32>,
    %cst_1 = arith.constant 0.000000e+00 : f32
    %2 = vector.broadcast %cst_1 : f32 to vector<288x128xf32>
    %c0_2 = arith.constant 0 : index
    %c0_3 = arith.constant 0 : index
    %3 = vector.load %arg11[%c0_2, %c0_3] : memref<288x128xf32, #tpu.memory_space<vmem>>, vector<288x128xf32>
    tpu.vector_store %arg11[%c0_2, %c0_3], %2 {strides = array<i32>} : memref<288x128xf32, #tpu.memory_space<vmem>>, vector<288x128xf32>,
    %c0_4 = arith.constant 0 : index
    %c0_5 = arith.constant 0 : index
    %4 = vector.load %arg0[%c0_4, %c0_5] : memref<512x96xbf16, #tpu.memory_space<vmem>>, vector<512x96xbf16>
    %c0_6 = arith.constant 0 : index
    %c0_7 = arith.constant 0 : index
    %5 = vector.load %arg1[%c0_6, %c0_7] : memref<96x64xbf16, #tpu.memory_space<vmem>>, vector<96x64xbf16>
    %cst_8 = arith.constant dense<0.000000e+00> : vector<512x64xf32>
    %6 = tpu.matmul %4, %5, %cst_8 {dimension_numbers = #tpu.dot_dimension_numbers<[1], [0], [0], [1], [0, 0, 1, 1], [], []>} : vector<512x96xbf16>, vector<96x64xbf16>, vector<512x64xf32> -> vector<512x64xf32>
    %cst_9 = arith.constant 0.000000e+00 : f32
    %7 = vector.broadcast %cst_9 : f32 to vector<512x64xf32>
    %8 = arith.cmpf ogt, %6, %7 : vector<512x64xf32>
    %cst_10 = arith.constant 2.000000e-01 : f32
    %9 = vector.broadcast %cst_10 : f32 to vector<512x64xf32>
    %10 = arith.mulf %9, %6 : vector<512x64xf32>
    %11 = arith.select %8, %6, %10 : vector<512x64xi1>, vector<512x64xf32>
    %12 = vector.extract_strided_slice %11 {offsets = [0, 0], sizes = [16, 64], strides = [1, 1]} : vector<512x64xf32> to vector<16x64xf32>
    %c22 = arith.constant 22 : index
    %c0_11 = arith.constant 0 : index
    %13 = vector.load %arg10[%c22, %c0_11] : memref<800x64xf32, #tpu.memory_space<vmem>>, vector<16x64xf32>
    tpu.vector_store %arg10[%c22, %c0_11], %12 {strides = array<i32>} : memref<800x64xf32, #tpu.memory_space<vmem>>, vector<16x64xf32>,
    %14 = vector.extract_strided_slice %11 {offsets = [16, 0], sizes = [16, 64], strides = [1, 1]} : vector<512x64xf32> to vector<16x64xf32>
    %c42 = arith.constant 42 : index
    %c0_12 = arith.constant 0 : index
    %15 = vector.load %arg10[%c42, %c0_12] : memref<800x64xf32, #tpu.memory_space<vmem>>, vector<16x64xf32>
    tpu.vector_store %arg10[%c42, %c0_12], %14 {strides = array<i32>} : memref<800x64xf32, #tpu.memory_space<vmem>>, vector<16x64xf32>,
    %16 = vector.extract_strided_slice %11 {offsets = [32, 0], sizes = [16, 64], strides = [1, 1]} : vector<512x64xf32> to vector<16x64xf32>
    %c62 = arith.constant 62 : index
    %c0_13 = arith.constant 0 : index
    %17 = vector.load %arg10[%c62, %c0_13] : memref<800x64xf32, #tpu.memory_space<vmem>>, vector<16x64xf32>
    tpu.vector_store %arg10[%c62, %c0_13], %16 {strides = array<i32>} : memref<800x64xf32, #tpu.memory_space<vmem>>, vector<16x64xf32>,
    %18 = vector.extract_strided_slice %11 {offsets = [48, 0], sizes = [16, 64], strides = [1, 1]} : vector<512x64xf32> to vector<16x64xf32>
    %c82 = arith.constant 82 : index
    %c0_14 = arith.constant 0 : index
    %19 = vector.load %arg10[%c82, %c0_14] : memref<800x64xf32, #tpu.memory_space<vmem>>, vector<16x64xf32>
    tpu.vector_store %arg10[%c82, %c0_14], %18 {strides = array<i32>} : memref<800x64xf32, #tpu.memory_space<vmem>>, vector<16x64xf32>,
    %20 = vector.extract_strided_slice %11 {offsets = [64, 0], sizes = [16, 64], strides = [1, 1]} : vector<512x64xf32> to vector<16x64xf32>
    %c102 = arith.constant 102 : index
    %c0_15 = arith.constant 0 : index
    %21 = vector.load %arg10[%c102, %c0_15] : memref<800x64xf32, #tpu.memory_space<vmem>>, vector<16x64xf32>
    tpu.vector_store %arg10[%c102, %c0_15], %20 {strides = array<i32>} : memref<800x64xf32, #tpu.memory_space<vmem>>, vector<16x64xf32>,
    %22 = vector.extract_strided_slice %11 {offsets = [80, 0], sizes = [16, 64], strides = [1, 1]} : vector<512x64xf32> to vector<16x64xf32>
    %c122 = arith.constant 122 : index
    %c0_16 = arith.constant 0 : index
    %23 = vector.load %arg10[%c122, %c0_16] : memref<800x64xf32, #tpu.memory_space<vmem>>, vector<16x64xf32>
    tpu.vector_store %arg10[%c122, %c0_16], %22 {strides = array<i32>} : memref<800x64xf32, #tpu.memory_space<vmem>>, vector<16x64xf32>,
    %24 = vector.extract_strided_slice %11 {offsets = [96, 0], sizes = [16, 64], strides = [1, 1]} : vector<512x64xf32> to vector<16x64xf32>
    %c142 = arith.constant 142 : index
    %c0_17 = arith.constant 0 : index
    %25 = vector.load %arg10[%c142, %c0_17] : memref<800x64xf32, #tpu.memory_space<vmem>>, vector<16x64xf32>
    tpu.vector_store %arg10[%c142, %c0_17], %24 {strides = array<i32>} : memref<800x64xf32, #tpu.memory_space<vmem>>, vector<16x64xf32>,
    %26 = vector.extract_strided_slice %11 {offsets = [112, 0], sizes = [16, 64], strides = [1, 1]} : vector<512x64xf32> to vector<16x64xf32>
    %c162 = arith.constant 162 : index
    %c0_18 = arith.constant 0 : index
    %27 = vector.load %arg10[%c162, %c0_18] : memref<800x64xf32, #tpu.memory_space<vmem>>, vector<16x64xf32>
    tpu.vector_store %arg10[%c162, %c0_18], %26 {strides = array<i32>} : memref<800x64xf32, #tpu.memory_space<vmem>>, vector<16x64xf32>,
    %28 = vector.extract_strided_slice %11 {offsets = [128, 0], sizes = [16, 64], strides = [1, 1]} : vector<512x64xf32> to vector<16x64xf32>
    %c222 = arith.constant 222 : index
    %c0_19 = arith.constant 0 : index
    %29 = vector.load %arg10[%c222, %c0_19] : memref<800x64xf32, #tpu.memory_space<vmem>>, vector<16x64xf32>
    tpu.vector_store %arg10[%c222, %c0_19], %28 {strides = array<i32>} : memref<800x64xf32, #tpu.memory_space<vmem>>, vector<16x64xf32>,
    %30 = vector.extract_strided_slice %11 {offsets = [144, 0], sizes = [16, 64], strides = [1, 1]} : vector<512x64xf32> to vector<16x64xf32>
    %c242 = arith.constant 242 : index
    %c0_20 = arith.constant 0 : index
    %31 = vector.load %arg10[%c242, %c0_20] : memref<800x64xf32, #tpu.memory_space<vmem>>, vector<16x64xf32>
    tpu.vector_store %arg10[%c242, %c0_20], %30 {strides = array<i32>} : memref<800x64xf32, #tpu.memory_space<vmem>>, vector<16x64xf32>,
    %32 = vector.extract_strided_slice %11 {offsets = [160, 0], sizes = [16, 64], strides = [1, 1]} : vector<512x64xf32> to vector<16x64xf32>
    %c262 = arith.constant 262 : index
    %c0_21 = arith.constant 0 : index
    %33 = vector.load %arg10[%c262, %c0_21] : memref<800x64xf32, #tpu.memory_space<vmem>>, vector<16x64xf32>
    tpu.vector_store %arg10[%c262, %c0_21], %32 {strides = array<i32>} : memref<800x64xf32, #tpu.memory_space<vmem>>, vector<16x64xf32>,
    %34 = vector.extract_strided_slice %11 {offsets = [176, 0], sizes = [16, 64], strides = [1, 1]} : vector<512x64xf32> to vector<16x64xf32>
    %c282 = arith.constant 282 : index
    %c0_22 = arith.constant 0 : index
    %35 = vector.load %arg10[%c282, %c0_22] : memref<800x64xf32, #tpu.memory_space<vmem>>, vector<16x64xf32>
    tpu.vector_store %arg10[%c282, %c0_22], %34 {strides = array<i32>} : memref<800x64xf32, #tpu.memory_space<vmem>>, vector<16x64xf32>,
    %36 = vector.extract_strided_slice %11 {offsets = [192, 0], sizes = [16, 64], strides = [1, 1]} : vector<512x64xf32> to vector<16x64xf32>
    %c302 = arith.constant 302 : index
    %c0_23 = arith.constant 0 : index
    %37 = vector.load %arg10[%c302, %c0_23] : memref<800x64xf32, #tpu.memory_space<vmem>>, vector<16x64xf32>
    tpu.vector_store %arg10[%c302, %c0_23], %36 {strides = array<i32>} : memref<800x64xf32, #tpu.memory_space<vmem>>, vector<16x64xf32>,
    %38 = vector.extract_strided_slice %11 {offsets = [208, 0], sizes = [16, 64], strides = [1, 1]} : vector<512x64xf32> to vector<16x64xf32>
    %c322 = arith.constant 322 : index
    %c0_24 = arith.constant 0 : index
    %39 = vector.load %arg10[%c322, %c0_24] : memref<800x64xf32, #tpu.memory_space<vmem>>, vector<16x64xf32>
    tpu.vector_store %arg10[%c322, %c0_24], %38 {strides = array<i32>} : memref<800x64xf32, #tpu.memory_space<vmem>>, vector<16x64xf32>,
    %40 = vector.extract_strided_slice %11 {offsets = [224, 0], sizes = [16, 64], strides = [1, 1]} : vector<512x64xf32> to vector<16x64xf32>
    %c342 = arith.constant 342 : index
    %c0_25 = arith.constant 0 : index
    %41 = vector.load %arg10[%c342, %c0_25] : memref<800x64xf32, #tpu.memory_space<vmem>>, vector<16x64xf32>
    tpu.vector_store %arg10[%c342, %c0_25], %40 {strides = array<i32>} : memref<800x64xf32, #tpu.memory_space<vmem>>, vector<16x64xf32>,
    %42 = vector.extract_strided_slice %11 {offsets = [240, 0], sizes = [16, 64], strides = [1, 1]} : vector<512x64xf32> to vector<16x64xf32>
    %c362 = arith.constant 362 : index
    %c0_26 = arith.constant 0 : index
    %43 = vector.load %arg10[%c362, %c0_26] : memref<800x64xf32, #tpu.memory_space<vmem>>, vector<16x64xf32>
    tpu.vector_store %arg10[%c362, %c0_26], %42 {strides = array<i32>} : memref<800x64xf32, #tpu.memory_space<vmem>>, vector<16x64xf32>,
    %44 = vector.extract_strided_slice %11 {offsets = [256, 0], sizes = [16, 64], strides = [1, 1]} : vector<512x64xf32> to vector<16x64xf32>
    %c422 = arith.constant 422 : index
    %c0_27 = arith.constant 0 : index
    %45 = vector.load %arg10[%c422, %c0_27] : memref<800x64xf32, #tpu.memory_space<vmem>>, vector<16x64xf32>
    tpu.vector_store %arg10[%c422, %c0_27], %44 {strides = array<i32>} : memref<800x64xf32, #tpu.memory_space<vmem>>, vector<16x64xf32>,
    %46 = vector.extract_strided_slice %11 {offsets = [272, 0], sizes = [16, 64], strides = [1, 1]} : vector<512x64xf32> to vector<16x64xf32>
    %c442 = arith.constant 442 : index
    %c0_28 = arith.constant 0 : index
    %47 = vector.load %arg10[%c442, %c0_28] : memref<800x64xf32, #tpu.memory_space<vmem>>, vector<16x64xf32>
    tpu.vector_store %arg10[%c442, %c0_28], %46 {strides = array<i32>} : memref<800x64xf32, #tpu.memory_space<vmem>>, vector<16x64xf32>,
    %48 = vector.extract_strided_slice %11 {offsets = [288, 0], sizes = [16, 64], strides = [1, 1]} : vector<512x64xf32> to vector<16x64xf32>
    %c462 = arith.constant 462 : index
    %c0_29 = arith.constant 0 : index
    %49 = vector.load %arg10[%c462, %c0_29] : memref<800x64xf32, #tpu.memory_space<vmem>>, vector<16x64xf32>
    tpu.vector_store %arg10[%c462, %c0_29], %48 {strides = array<i32>} : memref<800x64xf32, #tpu.memory_space<vmem>>, vector<16x64xf32>,
    %50 = vector.extract_strided_slice %11 {offsets = [304, 0], sizes = [16, 64], strides = [1, 1]} : vector<512x64xf32> to vector<16x64xf32>
    %c482 = arith.constant 482 : index
    %c0_30 = arith.constant 0 : index
    %51 = vector.load %arg10[%c482, %c0_30] : memref<800x64xf32, #tpu.memory_space<vmem>>, vector<16x64xf32>
    tpu.vector_store %arg10[%c482, %c0_30], %50 {strides = array<i32>} : memref<800x64xf32, #tpu.memory_space<vmem>>, vector<16x64xf32>,
    %52 = vector.extract_strided_slice %11 {offsets = [320, 0], sizes = [16, 64], strides = [1, 1]} : vector<512x64xf32> to vector<16x64xf32>
    %c502 = arith.constant 502 : index
    %c0_31 = arith.constant 0 : index
    %53 = vector.load %arg10[%c502, %c0_31] : memref<800x64xf32, #tpu.memory_space<vmem>>, vector<16x64xf32>
    tpu.vector_store %arg10[%c502, %c0_31], %52 {strides = array<i32>} : memref<800x64xf32, #tpu.memory_space<vmem>>, vector<16x64xf32>,
    %54 = vector.extract_strided_slice %11 {offsets = [336, 0], sizes = [16, 64], strides = [1, 1]} : vector<512x64xf32> to vector<16x64xf32>
    %c522 = arith.constant 522 : index
    %c0_32 = arith.constant 0 : index
    %55 = vector.load %arg10[%c522, %c0_32] : memref<800x64xf32, #tpu.memory_space<vmem>>, vector<16x64xf32>
    tpu.vector_store %arg10[%c522, %c0_32], %54 {strides = array<i32>} : memref<800x64xf32, #tpu.memory_space<vmem>>, vector<16x64xf32>,
    %56 = vector.extract_strided_slice %11 {offsets = [352, 0], sizes = [16, 64], strides = [1, 1]} : vector<512x64xf32> to vector<16x64xf32>
    %c542 = arith.constant 542 : index
    %c0_33 = arith.constant 0 : index
    %57 = vector.load %arg10[%c542, %c0_33] : memref<800x64xf32, #tpu.memory_space<vmem>>, vector<16x64xf32>
    tpu.vector_store %arg10[%c542, %c0_33], %56 {strides = array<i32>} : memref<800x64xf32, #tpu.memory_space<vmem>>, vector<16x64xf32>,
    %58 = vector.extract_strided_slice %11 {offsets = [368, 0], sizes = [16, 64], strides = [1, 1]} : vector<512x64xf32> to vector<16x64xf32>
    %c562 = arith.constant 562 : index
    %c0_34 = arith.constant 0 : index
    %59 = vector.load %arg10[%c562, %c0_34] : memref<800x64xf32, #tpu.memory_space<vmem>>, vector<16x64xf32>
    tpu.vector_store %arg10[%c562, %c0_34], %58 {strides = array<i32>} : memref<800x64xf32, #tpu.memory_space<vmem>>, vector<16x64xf32>,
    %60 = vector.extract_strided_slice %11 {offsets = [384, 0], sizes = [16, 64], strides = [1, 1]} : vector<512x64xf32> to vector<16x64xf32>
    %c622 = arith.constant 622 : index
    %c0_35 = arith.constant 0 : index
    %61 = vector.load %arg10[%c622, %c0_35] : memref<800x64xf32, #tpu.memory_space<vmem>>, vector<16x64xf32>
    tpu.vector_store %arg10[%c622, %c0_35], %60 {strides = array<i32>} : memref<800x64xf32, #tpu.memory_space<vmem>>, vector<16x64xf32>,
    %62 = vector.extract_strided_slice %11 {offsets = [400, 0], sizes = [16, 64], strides = [1, 1]} : vector<512x64xf32> to vector<16x64xf32>
    %c642 = arith.constant 642 : index
    %c0_36 = arith.constant 0 : index
    %63 = vector.load %arg10[%c642, %c0_36] : memref<800x64xf32, #tpu.memory_space<vmem>>, vector<16x64xf32>
    tpu.vector_store %arg10[%c642, %c0_36], %62 {strides = array<i32>} : memref<800x64xf32, #tpu.memory_space<vmem>>, vector<16x64xf32>,
    %64 = vector.extract_strided_slice %11 {offsets = [416, 0], sizes = [16, 64], strides = [1, 1]} : vector<512x64xf32> to vector<16x64xf32>
    %c662 = arith.constant 662 : index
    %c0_37 = arith.constant 0 : index
    %65 = vector.load %arg10[%c662, %c0_37] : memref<800x64xf32, #tpu.memory_space<vmem>>, vector<16x64xf32>
    tpu.vector_store %arg10[%c662, %c0_37], %64 {strides = array<i32>} : memref<800x64xf32, #tpu.memory_space<vmem>>, vector<16x64xf32>,
    %66 = vector.extract_strided_slice %11 {offsets = [432, 0], sizes = [16, 64], strides = [1, 1]} : vector<512x64xf32> to vector<16x64xf32>
    %c682 = arith.constant 682 : index
    %c0_38 = arith.constant 0 : index
    %67 = vector.load %arg10[%c682, %c0_38] : memref<800x64xf32, #tpu.memory_space<vmem>>, vector<16x64xf32>
    tpu.vector_store %arg10[%c682, %c0_38], %66 {strides = array<i32>} : memref<800x64xf32, #tpu.memory_space<vmem>>, vector<16x64xf32>,
    %68 = vector.extract_strided_slice %11 {offsets = [448, 0], sizes = [16, 64], strides = [1, 1]} : vector<512x64xf32> to vector<16x64xf32>
    %c702 = arith.constant 702 : index
    %c0_39 = arith.constant 0 : index
    %69 = vector.load %arg10[%c702, %c0_39] : memref<800x64xf32, #tpu.memory_space<vmem>>, vector<16x64xf32>
    tpu.vector_store %arg10[%c702, %c0_39], %68 {strides = array<i32>} : memref<800x64xf32, #tpu.memory_space<vmem>>, vector<16x64xf32>,
    %70 = vector.extract_strided_slice %11 {offsets = [464, 0], sizes = [16, 64], strides = [1, 1]} : vector<512x64xf32> to vector<16x64xf32>
    %c722 = arith.constant 722 : index
    %c0_40 = arith.constant 0 : index
    %71 = vector.load %arg10[%c722, %c0_40] : memref<800x64xf32, #tpu.memory_space<vmem>>, vector<16x64xf32>
    tpu.vector_store %arg10[%c722, %c0_40], %70 {strides = array<i32>} : memref<800x64xf32, #tpu.memory_space<vmem>>, vector<16x64xf32>,
    %72 = vector.extract_strided_slice %11 {offsets = [480, 0], sizes = [16, 64], strides = [1, 1]} : vector<512x64xf32> to vector<16x64xf32>
    %c742 = arith.constant 742 : index
    %c0_41 = arith.constant 0 : index
    %73 = vector.load %arg10[%c742, %c0_41] : memref<800x64xf32, #tpu.memory_space<vmem>>, vector<16x64xf32>
    tpu.vector_store %arg10[%c742, %c0_41], %72 {strides = array<i32>} : memref<800x64xf32, #tpu.memory_space<vmem>>, vector<16x64xf32>,
    %74 = vector.extract_strided_slice %11 {offsets = [496, 0], sizes = [16, 64], strides = [1, 1]} : vector<512x64xf32> to vector<16x64xf32>
    %c762 = arith.constant 762 : index
    %c0_42 = arith.constant 0 : index
    %75 = vector.load %arg10[%c762, %c0_42] : memref<800x64xf32, #tpu.memory_space<vmem>>, vector<16x64xf32>
    tpu.vector_store %arg10[%c762, %c0_42], %74 {strides = array<i32>} : memref<800x64xf32, #tpu.memory_space<vmem>>, vector<16x64xf32>,
    %cst_43 = arith.constant 0.000000e+00 : f32
    %76 = vector.broadcast %cst_43 : f32 to vector<128x128xf32>
    %c600 = arith.constant 600 : index
    %c0_44 = arith.constant 0 : index
    %77 = vector.load %arg10[%c600, %c0_44] : memref<800x64xf32, #tpu.memory_space<vmem>>, vector<16x64xf32>
    %c620 = arith.constant 620 : index
    %c0_45 = arith.constant 0 : index
    %78 = vector.load %arg10[%c620, %c0_45] : memref<800x64xf32, #tpu.memory_space<vmem>>, vector<16x64xf32>
    %c640 = arith.constant 640 : index
    %c0_46 = arith.constant 0 : index
    %79 = vector.load %arg10[%c640, %c0_46] : memref<800x64xf32, #tpu.memory_space<vmem>>, vector<16x64xf32>
    %c660 = arith.constant 660 : index
    %c0_47 = arith.constant 0 : index
    %80 = vector.load %arg10[%c660, %c0_47] : memref<800x64xf32, #tpu.memory_space<vmem>>, vector<16x64xf32>
    %c680 = arith.constant 680 : index
    %c0_48 = arith.constant 0 : index
    %81 = vector.load %arg10[%c680, %c0_48] : memref<800x64xf32, #tpu.memory_space<vmem>>, vector<16x64xf32>
    %c700 = arith.constant 700 : index
    %c0_49 = arith.constant 0 : index
    %82 = vector.load %arg10[%c700, %c0_49] : memref<800x64xf32, #tpu.memory_space<vmem>>, vector<16x64xf32>
    %c720 = arith.constant 720 : index
    %c0_50 = arith.constant 0 : index
    %83 = vector.load %arg10[%c720, %c0_50] : memref<800x64xf32, #tpu.memory_space<vmem>>, vector<16x64xf32>
    %c740 = arith.constant 740 : index
    %c0_51 = arith.constant 0 : index
    %84 = vector.load %arg10[%c740, %c0_51] : memref<800x64xf32, #tpu.memory_space<vmem>>, vector<16x64xf32>
    %85 = tpu.concatenate %77, %78, %79, %80, %81, %82, %83, %84 in 0 : vector<16x64xf32>, vector<16x64xf32>, vector<16x64xf32>, vector<16x64xf32>, vector<16x64xf32>, vector<16x64xf32>, vector<16x64xf32>, vector<16x64xf32> -> vector<128x64xf32>
    %86 = arith.truncf %85 : vector<128x64xf32> to vector<128x64xbf16>
    %c0_52 = arith.constant 0 : index
    %c0_53 = arith.constant 0 : index
    %c0_54 = arith.constant 0 : index
    %87 = vector.load %arg2[%c0_52, %c0_53, %c0_54] : memref<16x64x128xbf16, #tpu.memory_space<vmem>>, vector<1x64x128xbf16>
    %88 = vector.shape_cast %87 : vector<1x64x128xbf16> to vector<64x128xbf16>
    %cst_55 = arith.constant dense<0.000000e+00> : vector<128x128xf32>
    %89 = tpu.matmul %86, %88, %cst_55 {dimension_numbers = #tpu.dot_dimension_numbers<[1], [0], [0], [1], [0, 0, 1, 1], [], []>} : vector<128x64xbf16>, vector<64x128xbf16>, vector<128x128xf32> -> vector<128x128xf32>
    %90 = arith.addf %76, %89 : vector<128x128xf32>
    %c402 = arith.constant 402 : index
    %c0_56 = arith.constant 0 : index
    %91 = vector.load %arg10[%c402, %c0_56] : memref<800x64xf32, #tpu.memory_space<vmem>>, vector<16x64xf32>
    %c422_57 = arith.constant 422 : index
    %c0_58 = arith.constant 0 : index
    %92 = vector.load %arg10[%c422_57, %c0_58] : memref<800x64xf32, #tpu.memory_space<vmem>>, vector<16x64xf32>
    %c442_59 = arith.constant 442 : index
    %c0_60 = arith.constant 0 : index
    %93 = vector.load %arg10[%c442_59, %c0_60] : memref<800x64xf32, #tpu.memory_space<vmem>>, vector<16x64xf32>
    %c462_61 = arith.constant 462 : index
    %c0_62 = arith.constant 0 : index
    %94 = vector.load %arg10[%c462_61, %c0_62] : memref<800x64xf32, #tpu.memory_space<vmem>>, vector<16x64xf32>
    %c482_63 = arith.constant 482 : index
    %c0_64 = arith.constant 0 : index
    %95 = vector.load %arg10[%c482_63, %c0_64] : memref<800x64xf32, #tpu.memory_space<vmem>>, vector<16x64xf32>
    %c502_65 = arith.constant 502 : index
    %c0_66 = arith.constant 0 : index
    %96 = vector.load %arg10[%c502_65, %c0_66] : memref<800x64xf32, #tpu.memory_space<vmem>>, vector<16x64xf32>
    %c522_67 = arith.constant 522 : index
    %c0_68 = arith.constant 0 : index
    %97 = vector.load %arg10[%c522_67, %c0_68] : memref<800x64xf32, #tpu.memory_space<vmem>>, vector<16x64xf32>
    %c542_69 = arith.constant 542 : index
    %c0_70 = arith.constant 0 : index
    %98 = vector.load %arg10[%c542_69, %c0_70] : memref<800x64xf32, #tpu.memory_space<vmem>>, vector<16x64xf32>
    %99 = tpu.concatenate %91, %92, %93, %94, %95, %96, %97, %98 in 0 : vector<16x64xf32>, vector<16x64xf32>, vector<16x64xf32>, vector<16x64xf32>, vector<16x64xf32>, vector<16x64xf32>, vector<16x64xf32>, vector<16x64xf32> -> vector<128x64xf32>
    %100 = arith.truncf %99 : vector<128x64xf32> to vector<128x64xbf16>
    %c1 = arith.constant 1 : index
    %c0_71 = arith.constant 0 : index
    %c0_72 = arith.constant 0 : index
    %101 = vector.load %arg2[%c1, %c0_71, %c0_72] : memref<16x64x128xbf16, #tpu.memory_space<vmem>>, vector<1x64x128xbf16>
    %102 = vector.shape_cast %101 : vector<1x64x128xbf16> to vector<64x128xbf16>
    %cst_73 = arith.constant dense<0.000000e+00> : vector<128x128xf32>
    %103 = tpu.matmul %100, %102, %cst_73 {dimension_numbers = #tpu.dot_dimension_numbers<[1], [0], [0], [1], [0, 0, 1, 1], [], []>} : vector<128x64xbf16>, vector<64x128xbf16>, vector<128x128xf32> -> vector<128x128xf32>
    %104 = arith.addf %90, %103 : vector<128x128xf32>
    %c602 = arith.constant 602 : index
    %c0_74 = arith.constant 0 : index
    %105 = vector.load %arg10[%c602, %c0_74] : memref<800x64xf32, #tpu.memory_space<vmem>>, vector<16x64xf32>
    %c622_75 = arith.constant 622 : index
    %c0_76 = arith.constant 0 : index
    %106 = vector.load %arg10[%c622_75, %c0_76] : memref<800x64xf32, #tpu.memory_space<vmem>>, vector<16x64xf32>
    %c642_77 = arith.constant 642 : index
    %c0_78 = arith.constant 0 : index
    %107 = vector.load %arg10[%c642_77, %c0_78] : memref<800x64xf32, #tpu.memory_space<vmem>>, vector<16x64xf32>
    %c662_79 = arith.constant 662 : index
    %c0_80 = arith.constant 0 : index
    %108 = vector.load %arg10[%c662_79, %c0_80] : memref<800x64xf32, #tpu.memory_space<vmem>>, vector<16x64xf32>
    %c682_81 = arith.constant 682 : index
    %c0_82 = arith.constant 0 : index
    %109 = vector.load %arg10[%c682_81, %c0_82] : memref<800x64xf32, #tpu.memory_space<vmem>>, vector<16x64xf32>
    %c702_83 = arith.constant 702 : index
    %c0_84 = arith.constant 0 : index
    %110 = vector.load %arg10[%c702_83, %c0_84] : memref<800x64xf32, #tpu.memory_space<vmem>>, vector<16x64xf32>
    %c722_85 = arith.constant 722 : index
    %c0_86 = arith.constant 0 : index
    %111 = vector.load %arg10[%c722_85, %c0_86] : memref<800x64xf32, #tpu.memory_space<vmem>>, vector<16x64xf32>
    %c742_87 = arith.constant 742 : index
    %c0_88 = arith.constant 0 : index
    %112 = vector.load %arg10[%c742_87, %c0_88] : memref<800x64xf32, #tpu.memory_space<vmem>>, vector<16x64xf32>
    %113 = tpu.concatenate %105, %106, %107, %108, %109, %110, %111, %112 in 0 : vector<16x64xf32>, vector<16x64xf32>, vector<16x64xf32>, vector<16x64xf32>, vector<16x64xf32>, vector<16x64xf32>, vector<16x64xf32>, vector<16x64xf32> -> vector<128x64xf32>
    %114 = arith.truncf %113 : vector<128x64xf32> to vector<128x64xbf16>
    %c2 = arith.constant 2 : index
    %c0_89 = arith.constant 0 : index
    %c0_90 = arith.constant 0 : index
    %115 = vector.load %arg2[%c2, %c0_89, %c0_90] : memref<16x64x128xbf16, #tpu.memory_space<vmem>>, vector<1x64x128xbf16>
    %116 = vector.shape_cast %115 : vector<1x64x128xbf16> to vector<64x128xbf16>
    %cst_91 = arith.constant dense<0.000000e+00> : vector<128x128xf32>
    %117 = tpu.matmul %114, %116, %cst_91 {dimension_numbers = #tpu.dot_dimension_numbers<[1], [0], [0], [1], [0, 0, 1, 1], [], []>} : vector<128x64xbf16>, vector<64x128xbf16>, vector<128x128xf32> -> vector<128x128xf32>
    %118 = arith.addf %104, %117 : vector<128x128xf32>
    %c404 = arith.constant 404 : index
    %c0_92 = arith.constant 0 : index
    %119 = vector.load %arg10[%c404, %c0_92] : memref<800x64xf32, #tpu.memory_space<vmem>>, vector<16x64xf32>
    %c424 = arith.constant 424 : index
    %c0_93 = arith.constant 0 : index
    %120 = vector.load %arg10[%c424, %c0_93] : memref<800x64xf32, #tpu.memory_space<vmem>>, vector<16x64xf32>
    %c444 = arith.constant 444 : index
    %c0_94 = arith.constant 0 : index
    %121 = vector.load %arg10[%c444, %c0_94] : memref<800x64xf32, #tpu.memory_space<vmem>>, vector<16x64xf32>
    %c464 = arith.constant 464 : index
    %c0_95 = arith.constant 0 : index
    %122 = vector.load %arg10[%c464, %c0_95] : memref<800x64xf32, #tpu.memory_space<vmem>>, vector<16x64xf32>
    %c484 = arith.constant 484 : index
    %c0_96 = arith.constant 0 : index
    %123 = vector.load %arg10[%c484, %c0_96] : memref<800x64xf32, #tpu.memory_space<vmem>>, vector<16x64xf32>
    %c504 = arith.constant 504 : index
    %c0_97 = arith.constant 0 : index
    %124 = vector.load %arg10[%c504, %c0_97] : memref<800x64xf32, #tpu.memory_space<vmem>>, vector<16x64xf32>
    %c524 = arith.constant 524 : index
    %c0_98 = arith.constant 0 : index
    %125 = vector.load %arg10[%c524, %c0_98] : memref<800x64xf32, #tpu.memory_space<vmem>>, vector<16x64xf32>
    %c544 = arith.constant 544 : index
    %c0_99 = arith.constant 0 : index
    %126 = vector.load %arg10[%c544, %c0_99] : memref<800x64xf32, #tpu.memory_space<vmem>>, vector<16x64xf32>
    %127 = tpu.concatenate %119, %120, %121, %122, %123, %124, %125, %126 in 0 : vector<16x64xf32>, vector<16x64xf32>, vector<16x64xf32>, vector<16x64xf32>, vector<16x64xf32>, vector<16x64xf32>, vector<16x64xf32>, vector<16x64xf32> -> vector<128x64xf32>
    %128 = arith.truncf %127 : vector<128x64xf32> to vector<128x64xbf16>
    %c3 = arith.constant 3 : index
    %c0_100 = arith.constant 0 : index
    %c0_101 = arith.constant 0 : index
    %129 = vector.load %arg2[%c3, %c0_100, %c0_101] : memref<16x64x128xbf16, #tpu.memory_space<vmem>>, vector<1x64x128xbf16>
    %130 = vector.shape_cast %129 : vector<1x64x128xbf16> to vector<64x128xbf16>
    %cst_102 = arith.constant dense<0.000000e+00> : vector<128x128xf32>
    %131 = tpu.matmul %128, %130, %cst_102 {dimension_numbers = #tpu.dot_dimension_numbers<[1], [0], [0], [1], [0, 0, 1, 1], [], []>} : vector<128x64xbf16>, vector<64x128xbf16>, vector<128x128xf32> -> vector<128x128xf32>
    %132 = arith.addf %118, %131 : vector<128x128xf32>
    %c220 = arith.constant 220 : index
    %c0_103 = arith.constant 0 : index
    %133 = vector.load %arg10[%c220, %c0_103] : memref<800x64xf32, #tpu.memory_space<vmem>>, vector<16x64xf32>
    %c240 = arith.constant 240 : index
    %c0_104 = arith.constant 0 : index
    %134 = vector.load %arg10[%c240, %c0_104] : memref<800x64xf32, #tpu.memory_space<vmem>>, vector<16x64xf32>
    %c260 = arith.constant 260 : index
    %c0_105 = arith.constant 0 : index
    %135 = vector.load %arg10[%c260, %c0_105] : memref<800x64xf32, #tpu.memory_space<vmem>>, vector<16x64xf32>
    %c280 = arith.constant 280 : index
    %c0_106 = arith.constant 0 : index
    %136 = vector.load %arg10[%c280, %c0_106] : memref<800x64xf32, #tpu.memory_space<vmem>>, vector<16x64xf32>
    %c300 = arith.constant 300 : index
    %c0_107 = arith.constant 0 : index
    %137 = vector.load %arg10[%c300, %c0_107] : memref<800x64xf32, #tpu.memory_space<vmem>>, vector<16x64xf32>
    %c320 = arith.constant 320 : index
    %c0_108 = arith.constant 0 : index
    %138 = vector.load %arg10[%c320, %c0_108] : memref<800x64xf32, #tpu.memory_space<vmem>>, vector<16x64xf32>
    %c340 = arith.constant 340 : index
    %c0_109 = arith.constant 0 : index
    %139 = vector.load %arg10[%c340, %c0_109] : memref<800x64xf32, #tpu.memory_space<vmem>>, vector<16x64xf32>
    %c360 = arith.constant 360 : index
    %c0_110 = arith.constant 0 : index
    %140 = vector.load %arg10[%c360, %c0_110] : memref<800x64xf32, #tpu.memory_space<vmem>>, vector<16x64xf32>
    %141 = tpu.concatenate %133, %134, %135, %136, %137, %138, %139, %140 in 0 : vector<16x64xf32>, vector<16x64xf32>, vector<16x64xf32>, vector<16x64xf32>, vector<16x64xf32>, vector<16x64xf32>, vector<16x64xf32>, vector<16x64xf32> -> vector<128x64xf32>
    %142 = arith.truncf %141 : vector<128x64xf32> to vector<128x64xbf16>
    %c4 = arith.constant 4 : index
    %c0_111 = arith.constant 0 : index
    %c0_112 = arith.constant 0 : index
    %143 = vector.load %arg2[%c4, %c0_111, %c0_112] : memref<16x64x128xbf16, #tpu.memory_space<vmem>>, vector<1x64x128xbf16>
    %144 = vector.shape_cast %143 : vector<1x64x128xbf16> to vector<64x128xbf16>
    %cst_113 = arith.constant dense<0.000000e+00> : vector<128x128xf32>
    %145 = tpu.matmul %142, %144, %cst_113 {dimension_numbers = #tpu.dot_dimension_numbers<[1], [0], [0], [1], [0, 0, 1, 1], [], []>} : vector<128x64xbf16>, vector<64x128xbf16>, vector<128x128xf32> -> vector<128x128xf32>
    %146 = arith.addf %132, %145 : vector<128x128xf32>
    %c22_114 = arith.constant 22 : index
    %c0_115 = arith.constant 0 : index
    %147 = vector.load %arg10[%c22_114, %c0_115] : memref<800x64xf32, #tpu.memory_space<vmem>>, vector<16x64xf32>
    %c42_116 = arith.constant 42 : index
    %c0_117 = arith.constant 0 : index
    %148 = vector.load %arg10[%c42_116, %c0_117] : memref<800x64xf32, #tpu.memory_space<vmem>>, vector<16x64xf32>
    %c62_118 = arith.constant 62 : index
    %c0_119 = arith.constant 0 : index
    %149 = vector.load %arg10[%c62_118, %c0_119] : memref<800x64xf32, #tpu.memory_space<vmem>>, vector<16x64xf32>
    %c82_120 = arith.constant 82 : index
    %c0_121 = arith.constant 0 : index
    %150 = vector.load %arg10[%c82_120, %c0_121] : memref<800x64xf32, #tpu.memory_space<vmem>>, vector<16x64xf32>
    %c102_122 = arith.constant 102 : index
    %c0_123 = arith.constant 0 : index
    %151 = vector.load %arg10[%c102_122, %c0_123] : memref<800x64xf32, #tpu.memory_space<vmem>>, vector<16x64xf32>
    %c122_124 = arith.constant 122 : index
    %c0_125 = arith.constant 0 : index
    %152 = vector.load %arg10[%c122_124, %c0_125] : memref<800x64xf32, #tpu.memory_space<vmem>>, vector<16x64xf32>
    %c142_126 = arith.constant 142 : index
    %c0_127 = arith.constant 0 : index
    %153 = vector.load %arg10[%c142_126, %c0_127] : memref<800x64xf32, #tpu.memory_space<vmem>>, vector<16x64xf32>
    %c162_128 = arith.constant 162 : index
    %c0_129 = arith.constant 0 : index
    %154 = vector.load %arg10[%c162_128, %c0_129] : memref<800x64xf32, #tpu.memory_space<vmem>>, vector<16x64xf32>
    %155 = tpu.concatenate %147, %148, %149, %150, %151, %152, %153, %154 in 0 : vector<16x64xf32>, vector<16x64xf32>, vector<16x64xf32>, vector<16x64xf32>, vector<16x64xf32>, vector<16x64xf32>, vector<16x64xf32>, vector<16x64xf32> -> vector<128x64xf32>
    %156 = arith.truncf %155 : vector<128x64xf32> to vector<128x64xbf16>
    %c5 = arith.constant 5 : index
    %c0_130 = arith.constant 0 : index
    %c0_131 = arith.constant 0 : index
    %157 = vector.load %arg2[%c5, %c0_130, %c0_131] : memref<16x64x128xbf16, #tpu.memory_space<vmem>>, vector<1x64x128xbf16>
    %158 = vector.shape_cast %157 : vector<1x64x128xbf16> to vector<64x128xbf16>
    %cst_132 = arith.constant dense<0.000000e+00> : vector<128x128xf32>
    %159 = tpu.matmul %156, %158, %cst_132 {dimension_numbers = #tpu.dot_dimension_numbers<[1], [0], [0], [1], [0, 0, 1, 1], [], []>} : vector<128x64xbf16>, vector<64x128xbf16>, vector<128x128xf32> -> vector<128x128xf32>
    %160 = arith.addf %146, %159 : vector<128x128xf32>
    %c222_133 = arith.constant 222 : index
    %c0_134 = arith.constant 0 : index
    %161 = vector.load %arg10[%c222_133, %c0_134] : memref<800x64xf32, #tpu.memory_space<vmem>>, vector<16x64xf32>
    %c242_135 = arith.constant 242 : index
    %c0_136 = arith.constant 0 : index
    %162 = vector.load %arg10[%c242_135, %c0_136] : memref<800x64xf32, #tpu.memory_space<vmem>>, vector<16x64xf32>
    %c262_137 = arith.constant 262 : index
    %c0_138 = arith.constant 0 : index
    %163 = vector.load %arg10[%c262_137, %c0_138] : memref<800x64xf32, #tpu.memory_space<vmem>>, vector<16x64xf32>
    %c282_139 = arith.constant 282 : index
    %c0_140 = arith.constant 0 : index
    %164 = vector.load %arg10[%c282_139, %c0_140] : memref<800x64xf32, #tpu.memory_space<vmem>>, vector<16x64xf32>
    %c302_141 = arith.constant 302 : index
    %c0_142 = arith.constant 0 : index
    %165 = vector.load %arg10[%c302_141, %c0_142] : memref<800x64xf32, #tpu.memory_space<vmem>>, vector<16x64xf32>
    %c322_143 = arith.constant 322 : index
    %c0_144 = arith.constant 0 : index
    %166 = vector.load %arg10[%c322_143, %c0_144] : memref<800x64xf32, #tpu.memory_space<vmem>>, vector<16x64xf32>
    %c342_145 = arith.constant 342 : index
    %c0_146 = arith.constant 0 : index
    %167 = vector.load %arg10[%c342_145, %c0_146] : memref<800x64xf32, #tpu.memory_space<vmem>>, vector<16x64xf32>
    %c362_147 = arith.constant 362 : index
    %c0_148 = arith.constant 0 : index
    %168 = vector.load %arg10[%c362_147, %c0_148] : memref<800x64xf32, #tpu.memory_space<vmem>>, vector<16x64xf32>
    %169 = tpu.concatenate %161, %162, %163, %164, %165, %166, %167, %168 in 0 : vector<16x64xf32>, vector<16x64xf32>, vector<16x64xf32>, vector<16x64xf32>, vector<16x64xf32>, vector<16x64xf32>, vector<16x64xf32>, vector<16x64xf32> -> vector<128x64xf32>
    %170 = arith.truncf %169 : vector<128x64xf32> to vector<128x64xbf16>
    %c6 = arith.constant 6 : index
    %c0_149 = arith.constant 0 : index
    %c0_150 = arith.constant 0 : index
    %171 = vector.load %arg2[%c6, %c0_149, %c0_150] : memref<16x64x128xbf16, #tpu.memory_space<vmem>>, vector<1x64x128xbf16>
    %172 = vector.shape_cast %171 : vector<1x64x128xbf16> to vector<64x128xbf16>
    %cst_151 = arith.constant dense<0.000000e+00> : vector<128x128xf32>
    %173 = tpu.matmul %170, %172, %cst_151 {dimension_numbers = #tpu.dot_dimension_numbers<[1], [0], [0], [1], [0, 0, 1, 1], [], []>} : vector<128x64xbf16>, vector<64x128xbf16>, vector<128x128xf32> -> vector<128x128xf32>
    %174 = arith.addf %160, %173 : vector<128x128xf32>
    %c24 = arith.constant 24 : index
    %c0_152 = arith.constant 0 : index
    %175 = vector.load %arg10[%c24, %c0_152] : memref<800x64xf32, #tpu.memory_space<vmem>>, vector<16x64xf32>
    %c44 = arith.constant 44 : index
    %c0_153 = arith.constant 0 : index
    %176 = vector.load %arg10[%c44, %c0_153] : memref<800x64xf32, #tpu.memory_space<vmem>>, vector<16x64xf32>
    %c64 = arith.constant 64 : index
    %c0_154 = arith.constant 0 : index
    %177 = vector.load %arg10[%c64, %c0_154] : memref<800x64xf32, #tpu.memory_space<vmem>>, vector<16x64xf32>
    %c84 = arith.constant 84 : index
    %c0_155 = arith.constant 0 : index
    %178 = vector.load %arg10[%c84, %c0_155] : memref<800x64xf32, #tpu.memory_space<vmem>>, vector<16x64xf32>
    %c104 = arith.constant 104 : index
    %c0_156 = arith.constant 0 : index
    %179 = vector.load %arg10[%c104, %c0_156] : memref<800x64xf32, #tpu.memory_space<vmem>>, vector<16x64xf32>
    %c124 = arith.constant 124 : index
    %c0_157 = arith.constant 0 : index
    %180 = vector.load %arg10[%c124, %c0_157] : memref<800x64xf32, #tpu.memory_space<vmem>>, vector<16x64xf32>
    %c144 = arith.constant 144 : index
    %c0_158 = arith.constant 0 : index
    %181 = vector.load %arg10[%c144, %c0_158] : memref<800x64xf32, #tpu.memory_space<vmem>>, vector<16x64xf32>
    %c164 = arith.constant 164 : index
    %c0_159 = arith.constant 0 : index
    %182 = vector.load %arg10[%c164, %c0_159] : memref<800x64xf32, #tpu.memory_space<vmem>>, vector<16x64xf32>
    %183 = tpu.concatenate %175, %176, %177, %178, %179, %180, %181, %182 in 0 : vector<16x64xf32>, vector<16x64xf32>, vector<16x64xf32>, vector<16x64xf32>, vector<16x64xf32>, vector<16x64xf32>, vector<16x64xf32>, vector<16x64xf32> -> vector<128x64xf32>
    %184 = arith.truncf %183 : vector<128x64xf32> to vector<128x64xbf16>
    %c7 = arith.constant 7 : index
    %c0_160 = arith.constant 0 : index
    %c0_161 = arith.constant 0 : index
    %185 = vector.load %arg2[%c7, %c0_160, %c0_161] : memref<16x64x128xbf16, #tpu.memory_space<vmem>>, vector<1x64x128xbf16>
    %186 = vector.shape_cast %185 : vector<1x64x128xbf16> to vector<64x128xbf16>
    %cst_162 = arith.constant dense<0.000000e+00> : vector<128x128xf32>
    %187 = tpu.matmul %184, %186, %cst_162 {dimension_numbers = #tpu.dot_dimension_numbers<[1], [0], [0], [1], [0, 0, 1, 1], [], []>} : vector<128x64xbf16>, vector<64x128xbf16>, vector<128x128xf32> -> vector<128x128xf32>
    %188 = arith.addf %174, %187 : vector<128x128xf32>
    %c620_163 = arith.constant 620 : index
    %c0_164 = arith.constant 0 : index
    %189 = vector.load %arg10[%c620_163, %c0_164] : memref<800x64xf32, #tpu.memory_space<vmem>>, vector<16x64xf32>
    %c640_165 = arith.constant 640 : index
    %c0_166 = arith.constant 0 : index
    %190 = vector.load %arg10[%c640_165, %c0_166] : memref<800x64xf32, #tpu.memory_space<vmem>>, vector<16x64xf32>
    %c660_167 = arith.constant 660 : index
    %c0_168 = arith.constant 0 : index
    %191 = vector.load %arg10[%c660_167, %c0_168] : memref<800x64xf32, #tpu.memory_space<vmem>>, vector<16x64xf32>
    %c680_169 = arith.constant 680 : index
    %c0_170 = arith.constant 0 : index
    %192 = vector.load %arg10[%c680_169, %c0_170] : memref<800x64xf32, #tpu.memory_space<vmem>>, vector<16x64xf32>
    %c700_171 = arith.constant 700 : index
    %c0_172 = arith.constant 0 : index
    %193 = vector.load %arg10[%c700_171, %c0_172] : memref<800x64xf32, #tpu.memory_space<vmem>>, vector<16x64xf32>
    %c720_173 = arith.constant 720 : index
    %c0_174 = arith.constant 0 : index
    %194 = vector.load %arg10[%c720_173, %c0_174] : memref<800x64xf32, #tpu.memory_space<vmem>>, vector<16x64xf32>
    %c740_175 = arith.constant 740 : index
    %c0_176 = arith.constant 0 : index
    %195 = vector.load %arg10[%c740_175, %c0_176] : memref<800x64xf32, #tpu.memory_space<vmem>>, vector<16x64xf32>
    %c760 = arith.constant 760 : index
    %c0_177 = arith.constant 0 : index
    %196 = vector.load %arg10[%c760, %c0_177] : memref<800x64xf32, #tpu.memory_space<vmem>>, vector<16x64xf32>
    %197 = tpu.concatenate %189, %190, %191, %192, %193, %194, %195, %196 in 0 : vector<16x64xf32>, vector<16x64xf32>, vector<16x64xf32>, vector<16x64xf32>, vector<16x64xf32>, vector<16x64xf32>, vector<16x64xf32>, vector<16x64xf32> -> vector<128x64xf32>
    %198 = arith.truncf %197 : vector<128x64xf32> to vector<128x64xbf16>
    %c8 = arith.constant 8 : index
    %c0_178 = arith.constant 0 : index
    %c0_179 = arith.constant 0 : index
    %199 = vector.load %arg2[%c8, %c0_178, %c0_179] : memref<16x64x128xbf16, #tpu.memory_space<vmem>>, vector<1x64x128xbf16>
    %200 = vector.shape_cast %199 : vector<1x64x128xbf16> to vector<64x128xbf16>
    %cst_180 = arith.constant dense<0.000000e+00> : vector<128x128xf32>
    %201 = tpu.matmul %198, %200, %cst_180 {dimension_numbers = #tpu.dot_dimension_numbers<[1], [0], [0], [1], [0, 0, 1, 1], [], []>} : vector<128x64xbf16>, vector<64x128xbf16>, vector<128x128xf32> -> vector<128x128xf32>
    %202 = arith.addf %188, %201 : vector<128x128xf32>
    %c422_181 = arith.constant 422 : index
    %c0_182 = arith.constant 0 : index
    %203 = vector.load %arg10[%c422_181, %c0_182] : memref<800x64xf32, #tpu.memory_space<vmem>>, vector<16x64xf32>
    %c442_183 = arith.constant 442 : index
    %c0_184 = arith.constant 0 : index
    %204 = vector.load %arg10[%c442_183, %c0_184] : memref<800x64xf32, #tpu.memory_space<vmem>>, vector<16x64xf32>
    %c462_185 = arith.constant 462 : index
    %c0_186 = arith.constant 0 : index
    %205 = vector.load %arg10[%c462_185, %c0_186] : memref<800x64xf32, #tpu.memory_space<vmem>>, vector<16x64xf32>
    %c482_187 = arith.constant 482 : index
    %c0_188 = arith.constant 0 : index
    %206 = vector.load %arg10[%c482_187, %c0_188] : memref<800x64xf32, #tpu.memory_space<vmem>>, vector<16x64xf32>
    %c502_189 = arith.constant 502 : index
    %c0_190 = arith.constant 0 : index
    %207 = vector.load %arg10[%c502_189, %c0_190] : memref<800x64xf32, #tpu.memory_space<vmem>>, vector<16x64xf32>
    %c522_191 = arith.constant 522 : index
    %c0_192 = arith.constant 0 : index
    %208 = vector.load %arg10[%c522_191, %c0_192] : memref<800x64xf32, #tpu.memory_space<vmem>>, vector<16x64xf32>
    %c542_193 = arith.constant 542 : index
    %c0_194 = arith.constant 0 : index
    %209 = vector.load %arg10[%c542_193, %c0_194] : memref<800x64xf32, #tpu.memory_space<vmem>>, vector<16x64xf32>
    %c562_195 = arith.constant 562 : index
    %c0_196 = arith.constant 0 : index
    %210 = vector.load %arg10[%c562_195, %c0_196] : memref<800x64xf32, #tpu.memory_space<vmem>>, vector<16x64xf32>
    %211 = tpu.concatenate %203, %204, %205, %206, %207, %208, %209, %210 in 0 : vector<16x64xf32>, vector<16x64xf32>, vector<16x64xf32>, vector<16x64xf32>, vector<16x64xf32>, vector<16x64xf32>, vector<16x64xf32>, vector<16x64xf32> -> vector<128x64xf32>
    %212 = arith.truncf %211 : vector<128x64xf32> to vector<128x64xbf16>
    %c9 = arith.constant 9 : index
    %c0_197 = arith.constant 0 : index
    %c0_198 = arith.constant 0 : index
    %213 = vector.load %arg2[%c9, %c0_197, %c0_198] : memref<16x64x128xbf16, #tpu.memory_space<vmem>>, vector<1x64x128xbf16>
    %214 = vector.shape_cast %213 : vector<1x64x128xbf16> to vector<64x128xbf16>
    %cst_199 = arith.constant dense<0.000000e+00> : vector<128x128xf32>
    %215 = tpu.matmul %212, %214, %cst_199 {dimension_numbers = #tpu.dot_dimension_numbers<[1], [0], [0], [1], [0, 0, 1, 1], [], []>} : vector<128x64xbf16>, vector<64x128xbf16>, vector<128x128xf32> -> vector<128x128xf32>
    %216 = arith.addf %202, %215 : vector<128x128xf32>
    %c622_200 = arith.constant 622 : index
    %c0_201 = arith.constant 0 : index
    %217 = vector.load %arg10[%c622_200, %c0_201] : memref<800x64xf32, #tpu.memory_space<vmem>>, vector<16x64xf32>
    %c642_202 = arith.constant 642 : index
    %c0_203 = arith.constant 0 : index
    %218 = vector.load %arg10[%c642_202, %c0_203] : memref<800x64xf32, #tpu.memory_space<vmem>>, vector<16x64xf32>
    %c662_204 = arith.constant 662 : index
    %c0_205 = arith.constant 0 : index
    %219 = vector.load %arg10[%c662_204, %c0_205] : memref<800x64xf32, #tpu.memory_space<vmem>>, vector<16x64xf32>
    %c682_206 = arith.constant 682 : index
    %c0_207 = arith.constant 0 : index
    %220 = vector.load %arg10[%c682_206, %c0_207] : memref<800x64xf32, #tpu.memory_space<vmem>>, vector<16x64xf32>
    %c702_208 = arith.constant 702 : index
    %c0_209 = arith.constant 0 : index
    %221 = vector.load %arg10[%c702_208, %c0_209] : memref<800x64xf32, #tpu.memory_space<vmem>>, vector<16x64xf32>
    %c722_210 = arith.constant 722 : index
    %c0_211 = arith.constant 0 : index
    %222 = vector.load %arg10[%c722_210, %c0_211] : memref<800x64xf32, #tpu.memory_space<vmem>>, vector<16x64xf32>
    %c742_212 = arith.constant 742 : index
    %c0_213 = arith.constant 0 : index
    %223 = vector.load %arg10[%c742_212, %c0_213] : memref<800x64xf32, #tpu.memory_space<vmem>>, vector<16x64xf32>
    %c762_214 = arith.constant 762 : index
    %c0_215 = arith.constant 0 : index
    %224 = vector.load %arg10[%c762_214, %c0_215] : memref<800x64xf32, #tpu.memory_space<vmem>>, vector<16x64xf32>
    %225 = tpu.concatenate %217, %218, %219, %220, %221, %222, %223, %224 in 0 : vector<16x64xf32>, vector<16x64xf32>, vector<16x64xf32>, vector<16x64xf32>, vector<16x64xf32>, vector<16x64xf32>, vector<16x64xf32>, vector<16x64xf32> -> vector<128x64xf32>
    %226 = arith.truncf %225 : vector<128x64xf32> to vector<128x64xbf16>
    %c10 = arith.constant 10 : index
    %c0_216 = arith.constant 0 : index
    %c0_217 = arith.constant 0 : index
    %227 = vector.load %arg2[%c10, %c0_216, %c0_217] : memref<16x64x128xbf16, #tpu.memory_space<vmem>>, vector<1x64x128xbf16>
    %228 = vector.shape_cast %227 : vector<1x64x128xbf16> to vector<64x128xbf16>
    %cst_218 = arith.constant dense<0.000000e+00> : vector<128x128xf32>
    %229 = tpu.matmul %226, %228, %cst_218 {dimension_numbers = #tpu.dot_dimension_numbers<[1], [0], [0], [1], [0, 0, 1, 1], [], []>} : vector<128x64xbf16>, vector<64x128xbf16>, vector<128x128xf32> -> vector<128x128xf32>
    %230 = arith.addf %216, %229 : vector<128x128xf32>
    %c424_219 = arith.constant 424 : index
    %c0_220 = arith.constant 0 : index
    %231 = vector.load %arg10[%c424_219, %c0_220] : memref<800x64xf32, #tpu.memory_space<vmem>>, vector<16x64xf32>
    %c444_221 = arith.constant 444 : index
    %c0_222 = arith.constant 0 : index
    %232 = vector.load %arg10[%c444_221, %c0_222] : memref<800x64xf32, #tpu.memory_space<vmem>>, vector<16x64xf32>
    %c464_223 = arith.constant 464 : index
    %c0_224 = arith.constant 0 : index
    %233 = vector.load %arg10[%c464_223, %c0_224] : memref<800x64xf32, #tpu.memory_space<vmem>>, vector<16x64xf32>
    %c484_225 = arith.constant 484 : index
    %c0_226 = arith.constant 0 : index
    %234 = vector.load %arg10[%c484_225, %c0_226] : memref<800x64xf32, #tpu.memory_space<vmem>>, vector<16x64xf32>
    %c504_227 = arith.constant 504 : index
    %c0_228 = arith.constant 0 : index
    %235 = vector.load %arg10[%c504_227, %c0_228] : memref<800x64xf32, #tpu.memory_space<vmem>>, vector<16x64xf32>
    %c524_229 = arith.constant 524 : index
    %c0_230 = arith.constant 0 : index
    %236 = vector.load %arg10[%c524_229, %c0_230] : memref<800x64xf32, #tpu.memory_space<vmem>>, vector<16x64xf32>
    %c544_231 = arith.constant 544 : index
    %c0_232 = arith.constant 0 : index
    %237 = vector.load %arg10[%c544_231, %c0_232] : memref<800x64xf32, #tpu.memory_space<vmem>>, vector<16x64xf32>
    %c564 = arith.constant 564 : index
    %c0_233 = arith.constant 0 : index
    %238 = vector.load %arg10[%c564, %c0_233] : memref<800x64xf32, #tpu.memory_space<vmem>>, vector<16x64xf32>
    %239 = tpu.concatenate %231, %232, %233, %234, %235, %236, %237, %238 in 0 : vector<16x64xf32>, vector<16x64xf32>, vector<16x64xf32>, vector<16x64xf32>, vector<16x64xf32>, vector<16x64xf32>, vector<16x64xf32>, vector<16x64xf32> -> vector<128x64xf32>
    %240 = arith.truncf %239 : vector<128x64xf32> to vector<128x64xbf16>
    %c11 = arith.constant 11 : index
    %c0_234 = arith.constant 0 : index
    %c0_235 = arith.constant 0 : index
    %241 = vector.load %arg2[%c11, %c0_234, %c0_235] : memref<16x64x128xbf16, #tpu.memory_space<vmem>>, vector<1x64x128xbf16>
    %242 = vector.shape_cast %241 : vector<1x64x128xbf16> to vector<64x128xbf16>
    %cst_236 = arith.constant dense<0.000000e+00> : vector<128x128xf32>
    %243 = tpu.matmul %240, %242, %cst_236 {dimension_numbers = #tpu.dot_dimension_numbers<[1], [0], [0], [1], [0, 0, 1, 1], [], []>} : vector<128x64xbf16>, vector<64x128xbf16>, vector<128x128xf32> -> vector<128x128xf32>
    %244 = arith.addf %230, %243 : vector<128x128xf32>
    %c240_237 = arith.constant 240 : index
    %c0_238 = arith.constant 0 : index
    %245 = vector.load %arg10[%c240_237, %c0_238] : memref<800x64xf32, #tpu.memory_space<vmem>>, vector<16x64xf32>
    %c260_239 = arith.constant 260 : index
    %c0_240 = arith.constant 0 : index
    %246 = vector.load %arg10[%c260_239, %c0_240] : memref<800x64xf32, #tpu.memory_space<vmem>>, vector<16x64xf32>
    %c280_241 = arith.constant 280 : index
    %c0_242 = arith.constant 0 : index
    %247 = vector.load %arg10[%c280_241, %c0_242] : memref<800x64xf32, #tpu.memory_space<vmem>>, vector<16x64xf32>
    %c300_243 = arith.constant 300 : index
    %c0_244 = arith.constant 0 : index
    %248 = vector.load %arg10[%c300_243, %c0_244] : memref<800x64xf32, #tpu.memory_space<vmem>>, vector<16x64xf32>
    %c320_245 = arith.constant 320 : index
    %c0_246 = arith.constant 0 : index
    %249 = vector.load %arg10[%c320_245, %c0_246] : memref<800x64xf32, #tpu.memory_space<vmem>>, vector<16x64xf32>
    %c340_247 = arith.constant 340 : index
    %c0_248 = arith.constant 0 : index
    %250 = vector.load %arg10[%c340_247, %c0_248] : memref<800x64xf32, #tpu.memory_space<vmem>>, vector<16x64xf32>
    %c360_249 = arith.constant 360 : index
    %c0_250 = arith.constant 0 : index
    %251 = vector.load %arg10[%c360_249, %c0_250] : memref<800x64xf32, #tpu.memory_space<vmem>>, vector<16x64xf32>
    %c380 = arith.constant 380 : index
    %c0_251 = arith.constant 0 : index
    %252 = vector.load %arg10[%c380, %c0_251] : memref<800x64xf32, #tpu.memory_space<vmem>>, vector<16x64xf32>
    %253 = tpu.concatenate %245, %246, %247, %248, %249, %250, %251, %252 in 0 : vector<16x64xf32>, vector<16x64xf32>, vector<16x64xf32>, vector<16x64xf32>, vector<16x64xf32>, vector<16x64xf32>, vector<16x64xf32>, vector<16x64xf32> -> vector<128x64xf32>
    %254 = arith.truncf %253 : vector<128x64xf32> to vector<128x64xbf16>
    %c12 = arith.constant 12 : index
    %c0_252 = arith.constant 0 : index
    %c0_253 = arith.constant 0 : index
    %255 = vector.load %arg2[%c12, %c0_252, %c0_253] : memref<16x64x128xbf16, #tpu.memory_space<vmem>>, vector<1x64x128xbf16>
    %256 = vector.shape_cast %255 : vector<1x64x128xbf16> to vector<64x128xbf16>
    %cst_254 = arith.constant dense<0.000000e+00> : vector<128x128xf32>
    %257 = tpu.matmul %254, %256, %cst_254 {dimension_numbers = #tpu.dot_dimension_numbers<[1], [0], [0], [1], [0, 0, 1, 1], [], []>} : vector<128x64xbf16>, vector<64x128xbf16>, vector<128x128xf32> -> vector<128x128xf32>
    %258 = arith.addf %244, %257 : vector<128x128xf32>
    %c42_255 = arith.constant 42 : index
    %c0_256 = arith.constant 0 : index
    %259 = vector.load %arg10[%c42_255, %c0_256] : memref<800x64xf32, #tpu.memory_space<vmem>>, vector<16x64xf32>
    %c62_257 = arith.constant 62 : index
    %c0_258 = arith.constant 0 : index
    %260 = vector.load %arg10[%c62_257, %c0_258] : memref<800x64xf32, #tpu.memory_space<vmem>>, vector<16x64xf32>
    %c82_259 = arith.constant 82 : index
    %c0_260 = arith.constant 0 : index
    %261 = vector.load %arg10[%c82_259, %c0_260] : memref<800x64xf32, #tpu.memory_space<vmem>>, vector<16x64xf32>
    %c102_261 = arith.constant 102 : index
    %c0_262 = arith.constant 0 : index
    %262 = vector.load %arg10[%c102_261, %c0_262] : memref<800x64xf32, #tpu.memory_space<vmem>>, vector<16x64xf32>
    %c122_263 = arith.constant 122 : index
    %c0_264 = arith.constant 0 : index
    %263 = vector.load %arg10[%c122_263, %c0_264] : memref<800x64xf32, #tpu.memory_space<vmem>>, vector<16x64xf32>
    %c142_265 = arith.constant 142 : index
    %c0_266 = arith.constant 0 : index
    %264 = vector.load %arg10[%c142_265, %c0_266] : memref<800x64xf32, #tpu.memory_space<vmem>>, vector<16x64xf32>
    %c162_267 = arith.constant 162 : index
    %c0_268 = arith.constant 0 : index
    %265 = vector.load %arg10[%c162_267, %c0_268] : memref<800x64xf32, #tpu.memory_space<vmem>>, vector<16x64xf32>
    %c182 = arith.constant 182 : index
    %c0_269 = arith.constant 0 : index
    %266 = vector.load %arg10[%c182, %c0_269] : memref<800x64xf32, #tpu.memory_space<vmem>>, vector<16x64xf32>
    %267 = tpu.concatenate %259, %260, %261, %262, %263, %264, %265, %266 in 0 : vector<16x64xf32>, vector<16x64xf32>, vector<16x64xf32>, vector<16x64xf32>, vector<16x64xf32>, vector<16x64xf32>, vector<16x64xf32>, vector<16x64xf32> -> vector<128x64xf32>
    %268 = arith.truncf %267 : vector<128x64xf32> to vector<128x64xbf16>
    %c13 = arith.constant 13 : index
    %c0_270 = arith.constant 0 : index
    %c0_271 = arith.constant 0 : index
    %269 = vector.load %arg2[%c13, %c0_270, %c0_271] : memref<16x64x128xbf16, #tpu.memory_space<vmem>>, vector<1x64x128xbf16>
    %270 = vector.shape_cast %269 : vector<1x64x128xbf16> to vector<64x128xbf16>
    %cst_272 = arith.constant dense<0.000000e+00> : vector<128x128xf32>
    %271 = tpu.matmul %268, %270, %cst_272 {dimension_numbers = #tpu.dot_dimension_numbers<[1], [0], [0], [1], [0, 0, 1, 1], [], []>} : vector<128x64xbf16>, vector<64x128xbf16>, vector<128x128xf32> -> vector<128x128xf32>
    %272 = arith.addf %258, %271 : vector<128x128xf32>
    %c242_273 = arith.constant 242 : index
    %c0_274 = arith.constant 0 : index
    %273 = vector.load %arg10[%c242_273, %c0_274] : memref<800x64xf32, #tpu.memory_space<vmem>>, vector<16x64xf32>
    %c262_275 = arith.constant 262 : index
    %c0_276 = arith.constant 0 : index
    %274 = vector.load %arg10[%c262_275, %c0_276] : memref<800x64xf32, #tpu.memory_space<vmem>>, vector<16x64xf32>
    %c282_277 = arith.constant 282 : index
    %c0_278 = arith.constant 0 : index
    %275 = vector.load %arg10[%c282_277, %c0_278] : memref<800x64xf32, #tpu.memory_space<vmem>>, vector<16x64xf32>
    %c302_279 = arith.constant 302 : index
    %c0_280 = arith.constant 0 : index
    %276 = vector.load %arg10[%c302_279, %c0_280] : memref<800x64xf32, #tpu.memory_space<vmem>>, vector<16x64xf32>
    %c322_281 = arith.constant 322 : index
    %c0_282 = arith.constant 0 : index
    %277 = vector.load %arg10[%c322_281, %c0_282] : memref<800x64xf32, #tpu.memory_space<vmem>>, vector<16x64xf32>
    %c342_283 = arith.constant 342 : index
    %c0_284 = arith.constant 0 : index
    %278 = vector.load %arg10[%c342_283, %c0_284] : memref<800x64xf32, #tpu.memory_space<vmem>>, vector<16x64xf32>
    %c362_285 = arith.constant 362 : index
    %c0_286 = arith.constant 0 : index
    %279 = vector.load %arg10[%c362_285, %c0_286] : memref<800x64xf32, #tpu.memory_space<vmem>>, vector<16x64xf32>
    %c382 = arith.constant 382 : index
    %c0_287 = arith.constant 0 : index
    %280 = vector.load %arg10[%c382, %c0_287] : memref<800x64xf32, #tpu.memory_space<vmem>>, vector<16x64xf32>
    %281 = tpu.concatenate %273, %274, %275, %276, %277, %278, %279, %280 in 0 : vector<16x64xf32>, vector<16x64xf32>, vector<16x64xf32>, vector<16x64xf32>, vector<16x64xf32>, vector<16x64xf32>, vector<16x64xf32>, vector<16x64xf32> -> vector<128x64xf32>
    %282 = arith.truncf %281 : vector<128x64xf32> to vector<128x64xbf16>
    %c14 = arith.constant 14 : index
    %c0_288 = arith.constant 0 : index
    %c0_289 = arith.constant 0 : index
    %283 = vector.load %arg2[%c14, %c0_288, %c0_289] : memref<16x64x128xbf16, #tpu.memory_space<vmem>>, vector<1x64x128xbf16>
    %284 = vector.shape_cast %283 : vector<1x64x128xbf16> to vector<64x128xbf16>
    %cst_290 = arith.constant dense<0.000000e+00> : vector<128x128xf32>
    %285 = tpu.matmul %282, %284, %cst_290 {dimension_numbers = #tpu.dot_dimension_numbers<[1], [0], [0], [1], [0, 0, 1, 1], [], []>} : vector<128x64xbf16>, vector<64x128xbf16>, vector<128x128xf32> -> vector<128x128xf32>
    %286 = arith.addf %272, %285 : vector<128x128xf32>
    %c44_291 = arith.constant 44 : index
    %c0_292 = arith.constant 0 : index
    %287 = vector.load %arg10[%c44_291, %c0_292] : memref<800x64xf32, #tpu.memory_space<vmem>>, vector<16x64xf32>
    %c64_293 = arith.constant 64 : index
    %c0_294 = arith.constant 0 : index
    %288 = vector.load %arg10[%c64_293, %c0_294] : memref<800x64xf32, #tpu.memory_space<vmem>>, vector<16x64xf32>
    %c84_295 = arith.constant 84 : index
    %c0_296 = arith.constant 0 : index
    %289 = vector.load %arg10[%c84_295, %c0_296] : memref<800x64xf32, #tpu.memory_space<vmem>>, vector<16x64xf32>
    %c104_297 = arith.constant 104 : index
    %c0_298 = arith.constant 0 : index
    %290 = vector.load %arg10[%c104_297, %c0_298] : memref<800x64xf32, #tpu.memory_space<vmem>>, vector<16x64xf32>
    %c124_299 = arith.constant 124 : index
    %c0_300 = arith.constant 0 : index
    %291 = vector.load %arg10[%c124_299, %c0_300] : memref<800x64xf32, #tpu.memory_space<vmem>>, vector<16x64xf32>
    %c144_301 = arith.constant 144 : index
    %c0_302 = arith.constant 0 : index
    %292 = vector.load %arg10[%c144_301, %c0_302] : memref<800x64xf32, #tpu.memory_space<vmem>>, vector<16x64xf32>
    %c164_303 = arith.constant 164 : index
    %c0_304 = arith.constant 0 : index
    %293 = vector.load %arg10[%c164_303, %c0_304] : memref<800x64xf32, #tpu.memory_space<vmem>>, vector<16x64xf32>
    %c184 = arith.constant 184 : index
    %c0_305 = arith.constant 0 : index
    %294 = vector.load %arg10[%c184, %c0_305] : memref<800x64xf32, #tpu.memory_space<vmem>>, vector<16x64xf32>
    %295 = tpu.concatenate %287, %288, %289, %290, %291, %292, %293, %294 in 0 : vector<16x64xf32>, vector<16x64xf32>, vector<16x64xf32>, vector<16x64xf32>, vector<16x64xf32>, vector<16x64xf32>, vector<16x64xf32>, vector<16x64xf32> -> vector<128x64xf32>
    %296 = arith.truncf %295 : vector<128x64xf32> to vector<128x64xbf16>
    %c15 = arith.constant 15 : index
    %c0_306 = arith.constant 0 : index
    %c0_307 = arith.constant 0 : index
    %297 = vector.load %arg2[%c15, %c0_306, %c0_307] : memref<16x64x128xbf16, #tpu.memory_space<vmem>>, vector<1x64x128xbf16>
    %298 = vector.shape_cast %297 : vector<1x64x128xbf16> to vector<64x128xbf16>
    %cst_308 = arith.constant dense<0.000000e+00> : vector<128x128xf32>
    %299 = tpu.matmul %296, %298, %cst_308 {dimension_numbers = #tpu.dot_dimension_numbers<[1], [0], [0], [1], [0, 0, 1, 1], [], []>} : vector<128x64xbf16>, vector<64x128xbf16>, vector<128x128xf32> -> vector<128x128xf32>
    %300 = arith.addf %286, %299 : vector<128x128xf32>
    %cst_309 = arith.constant dense<0.000000e+00> : vector<128xf32>
    %301 = vector.multi_reduction <add>, %300, %cst_309 [0] : vector<128x128xf32> to vector<128xf32>
    %302 = vector.shape_cast %301 : vector<128xf32> to vector<1x128xf32>
    %cst_310 = arith.constant 1.280000e+02 : f32
    %303 = vector.broadcast %cst_310 : f32 to vector<1x128xf32>
    %304 = arith.divf %302, %303 : vector<1x128xf32>
    %305 = vector.broadcast %304 : vector<1x128xf32> to vector<128x128xf32>
    %306 = arith.subf %300, %305 : vector<128x128xf32>
    %307 = arith.mulf %306, %306 : vector<128x128xf32>
    %cst_311 = arith.constant dense<0.000000e+00> : vector<128xf32>
    %308 = vector.multi_reduction <add>, %307, %cst_311 [0] : vector<128x128xf32> to vector<128xf32>
    %309 = vector.shape_cast %308 : vector<128xf32> to vector<1x128xf32>
    %cst_312 = arith.constant 1.280000e+02 : f32
    %310 = vector.broadcast %cst_312 : f32 to vector<1x128xf32>
    %311 = arith.divf %309, %310 : vector<1x128xf32>
    %312 = vector.broadcast %304 : vector<1x128xf32> to vector<128x128xf32>
    %313 = arith.subf %300, %312 : vector<128x128xf32>
    %cst_313 = arith.constant 9.99999974E-6 : f32
    %314 = vector.broadcast %cst_313 : f32 to vector<1x128xf32>
    %315 = arith.addf %311, %314 : vector<1x128xf32>
    %316 = math.rsqrt %315 : vector<1x128xf32>
    %317 = vector.broadcast %316 : vector<1x128xf32> to vector<128x128xf32>
    %318 = arith.mulf %313, %317 : vector<128x128xf32>
    %c0_314 = arith.constant 0 : index
    %c0_315 = arith.constant 0 : index
    %319 = vector.load %arg5[%c0_314, %c0_315] : memref<1x128xf32, #tpu.memory_space<vmem>>, vector<1x128xf32>
    %320 = vector.broadcast %319 : vector<1x128xf32> to vector<128x128xf32>
    %321 = arith.mulf %318, %320 : vector<128x128xf32>
    %c0_316 = arith.constant 0 : index
    %c0_317 = arith.constant 0 : index
    %322 = vector.load %arg6[%c0_316, %c0_317] : memref<1x128xf32, #tpu.memory_space<vmem>>, vector<1x128xf32>
    %323 = vector.broadcast %322 : vector<1x128xf32> to vector<128x128xf32>
    %324 = arith.addf %321, %323 : vector<128x128xf32>
    %cst_318 = arith.constant 0.000000e+00 : f32
    %325 = vector.broadcast %cst_318 : f32 to vector<128x128xf32>
    %326 = arith.cmpf ogt, %324, %325 : vector<128x128xf32>
    %cst_319 = arith.constant 2.000000e-01 : f32
    %327 = vector.broadcast %cst_319 : f32 to vector<128x128xf32>
    %328 = arith.mulf %327, %324 : vector<128x128xf32>
    %329 = arith.select %326, %324, %328 : vector<128x128xi1>, vector<128x128xf32>
    %330 = vector.extract_strided_slice %329 {offsets = [0, 0], sizes = [2, 128], strides = [1, 1]} : vector<128x128xf32> to vector<2x128xf32>
    %c14_320 = arith.constant 14 : index
    %c0_321 = arith.constant 0 : index
    %331 = vector.load %arg11[%c14_320, %c0_321] : memref<288x128xf32, #tpu.memory_space<vmem>>, vector<2x128xf32>
    tpu.vector_store %arg11[%c14_320, %c0_321], %330 {strides = array<i32>} : memref<288x128xf32, #tpu.memory_space<vmem>>, vector<2x128xf32>,
    %332 = vector.extract_strided_slice %329 {offsets = [2, 0], sizes = [2, 128], strides = [1, 1]} : vector<128x128xf32> to vector<2x128xf32>
    %c86 = arith.constant 86 : index
    %c0_322 = arith.constant 0 : index
    %333 = vector.load %arg11[%c86, %c0_322] : memref<288x128xf32, #tpu.memory_space<vmem>>, vector<2x128xf32>
    tpu.vector_store %arg11[%c86, %c0_322], %332 {strides = array<i32>} : memref<288x128xf32, #tpu.memory_space<vmem>>, vector<2x128xf32>,
    %334 = vector.extract_strided_slice %329 {offsets = [4, 0], sizes = [2, 128], strides = [1, 1]} : vector<128x128xf32> to vector<2x128xf32>
    %c16 = arith.constant 16 : index
    %c0_323 = arith.constant 0 : index
    %335 = vector.load %arg11[%c16, %c0_323] : memref<288x128xf32, #tpu.memory_space<vmem>>, vector<2x128xf32>
    tpu.vector_store %arg11[%c16, %c0_323], %334 {strides = array<i32>} : memref<288x128xf32, #tpu.memory_space<vmem>>, vector<2x128xf32>,
    %336 = vector.extract_strided_slice %329 {offsets = [6, 0], sizes = [2, 128], strides = [1, 1]} : vector<128x128xf32> to vector<2x128xf32>
    %c88 = arith.constant 88 : index
    %c0_324 = arith.constant 0 : index
    %337 = vector.load %arg11[%c88, %c0_324] : memref<288x128xf32, #tpu.memory_space<vmem>>, vector<2x128xf32>
    tpu.vector_store %arg11[%c88, %c0_324], %336 {strides = array<i32>} : memref<288x128xf32, #tpu.memory_space<vmem>>, vector<2x128xf32>,
    %338 = vector.extract_strided_slice %329 {offsets = [8, 0], sizes = [2, 128], strides = [1, 1]} : vector<128x128xf32> to vector<2x128xf32>
    %c18 = arith.constant 18 : index
    %c0_325 = arith.constant 0 : index
    %339 = vector.load %arg11[%c18, %c0_325] : memref<288x128xf32, #tpu.memory_space<vmem>>, vector<2x128xf32>
    tpu.vector_store %arg11[%c18, %c0_325], %338 {strides = array<i32>} : memref<288x128xf32, #tpu.memory_space<vmem>>, vector<2x128xf32>,
    %340 = vector.extract_strided_slice %329 {offsets = [10, 0], sizes = [2, 128], strides = [1, 1]} : vector<128x128xf32> to vector<2x128xf32>
    %c90 = arith.constant 90 : index
    %c0_326 = arith.constant 0 : index
    %341 = vector.load %arg11[%c90, %c0_326] : memref<288x128xf32, #tpu.memory_space<vmem>>, vector<2x128xf32>
    tpu.vector_store %arg11[%c90, %c0_326], %340 {strides = array<i32>} : memref<288x128xf32, #tpu.memory_space<vmem>>, vector<2x128xf32>,
    %342 = vector.extract_strided_slice %329 {offsets = [12, 0], sizes = [2, 128], strides = [1, 1]} : vector<128x128xf32> to vector<2x128xf32>
    %c20 = arith.constant 20 : index
    %c0_327 = arith.constant 0 : index
    %343 = vector.load %arg11[%c20, %c0_327] : memref<288x128xf32, #tpu.memory_space<vmem>>, vector<2x128xf32>
    tpu.vector_store %arg11[%c20, %c0_327], %342 {strides = array<i32>} : memref<288x128xf32, #tpu.memory_space<vmem>>, vector<2x128xf32>,
    %344 = vector.extract_strided_slice %329 {offsets = [14, 0], sizes = [2, 128], strides = [1, 1]} : vector<128x128xf32> to vector<2x128xf32>
    %c92 = arith.constant 92 : index
    %c0_328 = arith.constant 0 : index
    %345 = vector.load %arg11[%c92, %c0_328] : memref<288x128xf32, #tpu.memory_space<vmem>>, vector<2x128xf32>
    tpu.vector_store %arg11[%c92, %c0_328], %344 {strides = array<i32>} : memref<288x128xf32, #tpu.memory_space<vmem>>, vector<2x128xf32>,
    %346 = vector.extract_strided_slice %329 {offsets = [16, 0], sizes = [2, 128], strides = [1, 1]} : vector<128x128xf32> to vector<2x128xf32>
    %c158 = arith.constant 158 : index
    %c0_329 = arith.constant 0 : index
    %347 = vector.load %arg11[%c158, %c0_329] : memref<288x128xf32, #tpu.memory_space<vmem>>, vector<2x128xf32>
    tpu.vector_store %arg11[%c158, %c0_329], %346 {strides = array<i32>} : memref<288x128xf32, #tpu.memory_space<vmem>>, vector<2x128xf32>,
    %348 = vector.extract_strided_slice %329 {offsets = [18, 0], sizes = [2, 128], strides = [1, 1]} : vector<128x128xf32> to vector<2x128xf32>
    %c230 = arith.constant 230 : index
    %c0_330 = arith.constant 0 : index
    %349 = vector.load %arg11[%c230, %c0_330] : memref<288x128xf32, #tpu.memory_space<vmem>>, vector<2x128xf32>
    tpu.vector_store %arg11[%c230, %c0_330], %348 {strides = array<i32>} : memref<288x128xf32, #tpu.memory_space<vmem>>, vector<2x128xf32>,
    %350 = vector.extract_strided_slice %329 {offsets = [20, 0], sizes = [2, 128], strides = [1, 1]} : vector<128x128xf32> to vector<2x128xf32>
    %c160 = arith.constant 160 : index
    %c0_331 = arith.constant 0 : index
    %351 = vector.load %arg11[%c160, %c0_331] : memref<288x128xf32, #tpu.memory_space<vmem>>, vector<2x128xf32>
    tpu.vector_store %arg11[%c160, %c0_331], %350 {strides = array<i32>} : memref<288x128xf32, #tpu.memory_space<vmem>>, vector<2x128xf32>,
    %352 = vector.extract_strided_slice %329 {offsets = [22, 0], sizes = [2, 128], strides = [1, 1]} : vector<128x128xf32> to vector<2x128xf32>
    %c232 = arith.constant 232 : index
    %c0_332 = arith.constant 0 : index
    %353 = vector.load %arg11[%c232, %c0_332] : memref<288x128xf32, #tpu.memory_space<vmem>>, vector<2x128xf32>
    tpu.vector_store %arg11[%c232, %c0_332], %352 {strides = array<i32>} : memref<288x128xf32, #tpu.memory_space<vmem>>, vector<2x128xf32>,
    %354 = vector.extract_strided_slice %329 {offsets = [24, 0], sizes = [2, 128], strides = [1, 1]} : vector<128x128xf32> to vector<2x128xf32>
    %c162_333 = arith.constant 162 : index
    %c0_334 = arith.constant 0 : index
    %355 = vector.load %arg11[%c162_333, %c0_334] : memref<288x128xf32, #tpu.memory_space<vmem>>, vector<2x128xf32>
    tpu.vector_store %arg11[%c162_333, %c0_334], %354 {strides = array<i32>} : memref<288x128xf32, #tpu.memory_space<vmem>>, vector<2x128xf32>,
    %356 = vector.extract_strided_slice %329 {offsets = [26, 0], sizes = [2, 128], strides = [1, 1]} : vector<128x128xf32> to vector<2x128xf32>
    %c234 = arith.constant 234 : index
    %c0_335 = arith.constant 0 : index
    %357 = vector.load %arg11[%c234, %c0_335] : memref<288x128xf32, #tpu.memory_space<vmem>>, vector<2x128xf32>
    tpu.vector_store %arg11[%c234, %c0_335], %356 {strides = array<i32>} : memref<288x128xf32, #tpu.memory_space<vmem>>, vector<2x128xf32>,
    %358 = vector.extract_strided_slice %329 {offsets = [28, 0], sizes = [2, 128], strides = [1, 1]} : vector<128x128xf32> to vector<2x128xf32>
    %c164_336 = arith.constant 164 : index
    %c0_337 = arith.constant 0 : index
    %359 = vector.load %arg11[%c164_336, %c0_337] : memref<288x128xf32, #tpu.memory_space<vmem>>, vector<2x128xf32>
    tpu.vector_store %arg11[%c164_336, %c0_337], %358 {strides = array<i32>} : memref<288x128xf32, #tpu.memory_space<vmem>>, vector<2x128xf32>,
    %360 = vector.extract_strided_slice %329 {offsets = [30, 0], sizes = [2, 128], strides = [1, 1]} : vector<128x128xf32> to vector<2x128xf32>
    %c236 = arith.constant 236 : index
    %c0_338 = arith.constant 0 : index
    %361 = vector.load %arg11[%c236, %c0_338] : memref<288x128xf32, #tpu.memory_space<vmem>>, vector<2x128xf32>
    tpu.vector_store %arg11[%c236, %c0_338], %360 {strides = array<i32>} : memref<288x128xf32, #tpu.memory_space<vmem>>, vector<2x128xf32>,
    %362 = vector.extract_strided_slice %329 {offsets = [32, 0], sizes = [2, 128], strides = [1, 1]} : vector<128x128xf32> to vector<2x128xf32>
    %c26 = arith.constant 26 : index
    %c0_339 = arith.constant 0 : index
    %363 = vector.load %arg11[%c26, %c0_339] : memref<288x128xf32, #tpu.memory_space<vmem>>, vector<2x128xf32>
    tpu.vector_store %arg11[%c26, %c0_339], %362 {strides = array<i32>} : memref<288x128xf32, #tpu.memory_space<vmem>>, vector<2x128xf32>,
    %364 = vector.extract_strided_slice %329 {offsets = [34, 0], sizes = [2, 128], strides = [1, 1]} : vector<128x128xf32> to vector<2x128xf32>
    %c98 = arith.constant 98 : index
    %c0_340 = arith.constant 0 : index
    %365 = vector.load %arg11[%c98, %c0_340] : memref<288x128xf32, #tpu.memory_space<vmem>>, vector<2x128xf32>
    tpu.vector_store %arg11[%c98, %c0_340], %364 {strides = array<i32>} : memref<288x128xf32, #tpu.memory_space<vmem>>, vector<2x128xf32>,
    %366 = vector.extract_strided_slice %329 {offsets = [36, 0], sizes = [2, 128], strides = [1, 1]} : vector<128x128xf32> to vector<2x128xf32>
    %c28 = arith.constant 28 : index
    %c0_341 = arith.constant 0 : index
    %367 = vector.load %arg11[%c28, %c0_341] : memref<288x128xf32, #tpu.memory_space<vmem>>, vector<2x128xf32>
    tpu.vector_store %arg11[%c28, %c0_341], %366 {strides = array<i32>} : memref<288x128xf32, #tpu.memory_space<vmem>>, vector<2x128xf32>,
    %368 = vector.extract_strided_slice %329 {offsets = [38, 0], sizes = [2, 128], strides = [1, 1]} : vector<128x128xf32> to vector<2x128xf32>
    %c100 = arith.constant 100 : index
    %c0_342 = arith.constant 0 : index
    %369 = vector.load %arg11[%c100, %c0_342] : memref<288x128xf32, #tpu.memory_space<vmem>>, vector<2x128xf32>
    tpu.vector_store %arg11[%c100, %c0_342], %368 {strides = array<i32>} : memref<288x128xf32, #tpu.memory_space<vmem>>, vector<2x128xf32>,
    %370 = vector.extract_strided_slice %329 {offsets = [40, 0], sizes = [2, 128], strides = [1, 1]} : vector<128x128xf32> to vector<2x128xf32>
    %c30 = arith.constant 30 : index
    %c0_343 = arith.constant 0 : index
    %371 = vector.load %arg11[%c30, %c0_343] : memref<288x128xf32, #tpu.memory_space<vmem>>, vector<2x128xf32>
    tpu.vector_store %arg11[%c30, %c0_343], %370 {strides = array<i32>} : memref<288x128xf32, #tpu.memory_space<vmem>>, vector<2x128xf32>,
    %372 = vector.extract_strided_slice %329 {offsets = [42, 0], sizes = [2, 128], strides = [1, 1]} : vector<128x128xf32> to vector<2x128xf32>
    %c102_344 = arith.constant 102 : index
    %c0_345 = arith.constant 0 : index
    %373 = vector.load %arg11[%c102_344, %c0_345] : memref<288x128xf32, #tpu.memory_space<vmem>>, vector<2x128xf32>
    tpu.vector_store %arg11[%c102_344, %c0_345], %372 {strides = array<i32>} : memref<288x128xf32, #tpu.memory_space<vmem>>, vector<2x128xf32>,
    %374 = vector.extract_strided_slice %329 {offsets = [44, 0], sizes = [2, 128], strides = [1, 1]} : vector<128x128xf32> to vector<2x128xf32>
    %c32 = arith.constant 32 : index
    %c0_346 = arith.constant 0 : index
    %375 = vector.load %arg11[%c32, %c0_346] : memref<288x128xf32, #tpu.memory_space<vmem>>, vector<2x128xf32>
    tpu.vector_store %arg11[%c32, %c0_346], %374 {strides = array<i32>} : memref<288x128xf32, #tpu.memory_space<vmem>>, vector<2x128xf32>,
    %376 = vector.extract_strided_slice %329 {offsets = [46, 0], sizes = [2, 128], strides = [1, 1]} : vector<128x128xf32> to vector<2x128xf32>
    %c104_347 = arith.constant 104 : index
    %c0_348 = arith.constant 0 : index
    %377 = vector.load %arg11[%c104_347, %c0_348] : memref<288x128xf32, #tpu.memory_space<vmem>>, vector<2x128xf32>
    tpu.vector_store %arg11[%c104_347, %c0_348], %376 {strides = array<i32>} : memref<288x128xf32, #tpu.memory_space<vmem>>, vector<2x128xf32>,
    %378 = vector.extract_strided_slice %329 {offsets = [48, 0], sizes = [2, 128], strides = [1, 1]} : vector<128x128xf32> to vector<2x128xf32>
    %c170 = arith.constant 170 : index
    %c0_349 = arith.constant 0 : index
    %379 = vector.load %arg11[%c170, %c0_349] : memref<288x128xf32, #tpu.memory_space<vmem>>, vector<2x128xf32>
    tpu.vector_store %arg11[%c170, %c0_349], %378 {strides = array<i32>} : memref<288x128xf32, #tpu.memory_space<vmem>>, vector<2x128xf32>,
    %380 = vector.extract_strided_slice %329 {offsets = [50, 0], sizes = [2, 128], strides = [1, 1]} : vector<128x128xf32> to vector<2x128xf32>
    %c242_350 = arith.constant 242 : index
    %c0_351 = arith.constant 0 : index
    %381 = vector.load %arg11[%c242_350, %c0_351] : memref<288x128xf32, #tpu.memory_space<vmem>>, vector<2x128xf32>
    tpu.vector_store %arg11[%c242_350, %c0_351], %380 {strides = array<i32>} : memref<288x128xf32, #tpu.memory_space<vmem>>, vector<2x128xf32>,
    %382 = vector.extract_strided_slice %329 {offsets = [52, 0], sizes = [2, 128], strides = [1, 1]} : vector<128x128xf32> to vector<2x128xf32>
    %c172 = arith.constant 172 : index
    %c0_352 = arith.constant 0 : index
    %383 = vector.load %arg11[%c172, %c0_352] : memref<288x128xf32, #tpu.memory_space<vmem>>, vector<2x128xf32>
    tpu.vector_store %arg11[%c172, %c0_352], %382 {strides = array<i32>} : memref<288x128xf32, #tpu.memory_space<vmem>>, vector<2x128xf32>,
    %384 = vector.extract_strided_slice %329 {offsets = [54, 0], sizes = [2, 128], strides = [1, 1]} : vector<128x128xf32> to vector<2x128xf32>
    %c244 = arith.constant 244 : index
    %c0_353 = arith.constant 0 : index
    %385 = vector.load %arg11[%c244, %c0_353] : memref<288x128xf32, #tpu.memory_space<vmem>>, vector<2x128xf32>
    tpu.vector_store %arg11[%c244, %c0_353], %384 {strides = array<i32>} : memref<288x128xf32, #tpu.memory_space<vmem>>, vector<2x128xf32>,
    %386 = vector.extract_strided_slice %329 {offsets = [56, 0], sizes = [2, 128], strides = [1, 1]} : vector<128x128xf32> to vector<2x128xf32>
    %c174 = arith.constant 174 : index
    %c0_354 = arith.constant 0 : index
    %387 = vector.load %arg11[%c174, %c0_354] : memref<288x128xf32, #tpu.memory_space<vmem>>, vector<2x128xf32>
    tpu.vector_store %arg11[%c174, %c0_354], %386 {strides = array<i32>} : memref<288x128xf32, #tpu.memory_space<vmem>>, vector<2x128xf32>,
    %388 = vector.extract_strided_slice %329 {offsets = [58, 0], sizes = [2, 128], strides = [1, 1]} : vector<128x128xf32> to vector<2x128xf32>
    %c246 = arith.constant 246 : index
    %c0_355 = arith.constant 0 : index
    %389 = vector.load %arg11[%c246, %c0_355] : memref<288x128xf32, #tpu.memory_space<vmem>>, vector<2x128xf32>
    tpu.vector_store %arg11[%c246, %c0_355], %388 {strides = array<i32>} : memref<288x128xf32, #tpu.memory_space<vmem>>, vector<2x128xf32>,
    %390 = vector.extract_strided_slice %329 {offsets = [60, 0], sizes = [2, 128], strides = [1, 1]} : vector<128x128xf32> to vector<2x128xf32>
    %c176 = arith.constant 176 : index
    %c0_356 = arith.constant 0 : index
    %391 = vector.load %arg11[%c176, %c0_356] : memref<288x128xf32, #tpu.memory_space<vmem>>, vector<2x128xf32>
    tpu.vector_store %arg11[%c176, %c0_356], %390 {strides = array<i32>} : memref<288x128xf32, #tpu.memory_space<vmem>>, vector<2x128xf32>,
    %392 = vector.extract_strided_slice %329 {offsets = [62, 0], sizes = [2, 128], strides = [1, 1]} : vector<128x128xf32> to vector<2x128xf32>
    %c248 = arith.constant 248 : index
    %c0_357 = arith.constant 0 : index
    %393 = vector.load %arg11[%c248, %c0_357] : memref<288x128xf32, #tpu.memory_space<vmem>>, vector<2x128xf32>
    tpu.vector_store %arg11[%c248, %c0_357], %392 {strides = array<i32>} : memref<288x128xf32, #tpu.memory_space<vmem>>, vector<2x128xf32>,
    %394 = vector.extract_strided_slice %329 {offsets = [64, 0], sizes = [2, 128], strides = [1, 1]} : vector<128x128xf32> to vector<2x128xf32>
    %c38 = arith.constant 38 : index
    %c0_358 = arith.constant 0 : index
    %395 = vector.load %arg11[%c38, %c0_358] : memref<288x128xf32, #tpu.memory_space<vmem>>, vector<2x128xf32>
    tpu.vector_store %arg11[%c38, %c0_358], %394 {strides = array<i32>} : memref<288x128xf32, #tpu.memory_space<vmem>>, vector<2x128xf32>,
    %396 = vector.extract_strided_slice %329 {offsets = [66, 0], sizes = [2, 128], strides = [1, 1]} : vector<128x128xf32> to vector<2x128xf32>
    %c110 = arith.constant 110 : index
    %c0_359 = arith.constant 0 : index
    %397 = vector.load %arg11[%c110, %c0_359] : memref<288x128xf32, #tpu.memory_space<vmem>>, vector<2x128xf32>
    tpu.vector_store %arg11[%c110, %c0_359], %396 {strides = array<i32>} : memref<288x128xf32, #tpu.memory_space<vmem>>, vector<2x128xf32>,
    %398 = vector.extract_strided_slice %329 {offsets = [68, 0], sizes = [2, 128], strides = [1, 1]} : vector<128x128xf32> to vector<2x128xf32>
    %c40 = arith.constant 40 : index
    %c0_360 = arith.constant 0 : index
    %399 = vector.load %arg11[%c40, %c0_360] : memref<288x128xf32, #tpu.memory_space<vmem>>, vector<2x128xf32>
    tpu.vector_store %arg11[%c40, %c0_360], %398 {strides = array<i32>} : memref<288x128xf32, #tpu.memory_space<vmem>>, vector<2x128xf32>,
    %400 = vector.extract_strided_slice %329 {offsets = [70, 0], sizes = [2, 128], strides = [1, 1]} : vector<128x128xf32> to vector<2x128xf32>
    %c112 = arith.constant 112 : index
    %c0_361 = arith.constant 0 : index
    %401 = vector.load %arg11[%c112, %c0_361] : memref<288x128xf32, #tpu.memory_space<vmem>>, vector<2x128xf32>
    tpu.vector_store %arg11[%c112, %c0_361], %400 {strides = array<i32>} : memref<288x128xf32, #tpu.memory_space<vmem>>, vector<2x128xf32>,
    %402 = vector.extract_strided_slice %329 {offsets = [72, 0], sizes = [2, 128], strides = [1, 1]} : vector<128x128xf32> to vector<2x128xf32>
    %c42_362 = arith.constant 42 : index
    %c0_363 = arith.constant 0 : index
    %403 = vector.load %arg11[%c42_362, %c0_363] : memref<288x128xf32, #tpu.memory_space<vmem>>, vector<2x128xf32>
    tpu.vector_store %arg11[%c42_362, %c0_363], %402 {strides = array<i32>} : memref<288x128xf32, #tpu.memory_space<vmem>>, vector<2x128xf32>,
    %404 = vector.extract_strided_slice %329 {offsets = [74, 0], sizes = [2, 128], strides = [1, 1]} : vector<128x128xf32> to vector<2x128xf32>
    %c114 = arith.constant 114 : index
    %c0_364 = arith.constant 0 : index
    %405 = vector.load %arg11[%c114, %c0_364] : memref<288x128xf32, #tpu.memory_space<vmem>>, vector<2x128xf32>
    tpu.vector_store %arg11[%c114, %c0_364], %404 {strides = array<i32>} : memref<288x128xf32, #tpu.memory_space<vmem>>, vector<2x128xf32>,
    %406 = vector.extract_strided_slice %329 {offsets = [76, 0], sizes = [2, 128], strides = [1, 1]} : vector<128x128xf32> to vector<2x128xf32>
    %c44_365 = arith.constant 44 : index
    %c0_366 = arith.constant 0 : index
    %407 = vector.load %arg11[%c44_365, %c0_366] : memref<288x128xf32, #tpu.memory_space<vmem>>, vector<2x128xf32>
    tpu.vector_store %arg11[%c44_365, %c0_366], %406 {strides = array<i32>} : memref<288x128xf32, #tpu.memory_space<vmem>>, vector<2x128xf32>,
    %408 = vector.extract_strided_slice %329 {offsets = [78, 0], sizes = [2, 128], strides = [1, 1]} : vector<128x128xf32> to vector<2x128xf32>
    %c116 = arith.constant 116 : index
    %c0_367 = arith.constant 0 : index
    %409 = vector.load %arg11[%c116, %c0_367] : memref<288x128xf32, #tpu.memory_space<vmem>>, vector<2x128xf32>
    tpu.vector_store %arg11[%c116, %c0_367], %408 {strides = array<i32>} : memref<288x128xf32, #tpu.memory_space<vmem>>, vector<2x128xf32>,
    %410 = vector.extract_strided_slice %329 {offsets = [80, 0], sizes = [2, 128], strides = [1, 1]} : vector<128x128xf32> to vector<2x128xf32>
    %c182_368 = arith.constant 182 : index
    %c0_369 = arith.constant 0 : index
    %411 = vector.load %arg11[%c182_368, %c0_369] : memref<288x128xf32, #tpu.memory_space<vmem>>, vector<2x128xf32>
    tpu.vector_store %arg11[%c182_368, %c0_369], %410 {strides = array<i32>} : memref<288x128xf32, #tpu.memory_space<vmem>>, vector<2x128xf32>,
    %412 = vector.extract_strided_slice %329 {offsets = [82, 0], sizes = [2, 128], strides = [1, 1]} : vector<128x128xf32> to vector<2x128xf32>
    %c254 = arith.constant 254 : index
    %c0_370 = arith.constant 0 : index
    %413 = vector.load %arg11[%c254, %c0_370] : memref<288x128xf32, #tpu.memory_space<vmem>>, vector<2x128xf32>
    tpu.vector_store %arg11[%c254, %c0_370], %412 {strides = array<i32>} : memref<288x128xf32, #tpu.memory_space<vmem>>, vector<2x128xf32>,
    %414 = vector.extract_strided_slice %329 {offsets = [84, 0], sizes = [2, 128], strides = [1, 1]} : vector<128x128xf32> to vector<2x128xf32>
    %c184_371 = arith.constant 184 : index
    %c0_372 = arith.constant 0 : index
    %415 = vector.load %arg11[%c184_371, %c0_372] : memref<288x128xf32, #tpu.memory_space<vmem>>, vector<2x128xf32>
    tpu.vector_store %arg11[%c184_371, %c0_372], %414 {strides = array<i32>} : memref<288x128xf32, #tpu.memory_space<vmem>>, vector<2x128xf32>,
    %416 = vector.extract_strided_slice %329 {offsets = [86, 0], sizes = [2, 128], strides = [1, 1]} : vector<128x128xf32> to vector<2x128xf32>
    %c256 = arith.constant 256 : index
    %c0_373 = arith.constant 0 : index
    %417 = vector.load %arg11[%c256, %c0_373] : memref<288x128xf32, #tpu.memory_space<vmem>>, vector<2x128xf32>
    tpu.vector_store %arg11[%c256, %c0_373], %416 {strides = array<i32>} : memref<288x128xf32, #tpu.memory_space<vmem>>, vector<2x128xf32>,
    %418 = vector.extract_strided_slice %329 {offsets = [88, 0], sizes = [2, 128], strides = [1, 1]} : vector<128x128xf32> to vector<2x128xf32>
    %c186 = arith.constant 186 : index
    %c0_374 = arith.constant 0 : index
    %419 = vector.load %arg11[%c186, %c0_374] : memref<288x128xf32, #tpu.memory_space<vmem>>, vector<2x128xf32>
    tpu.vector_store %arg11[%c186, %c0_374], %418 {strides = array<i32>} : memref<288x128xf32, #tpu.memory_space<vmem>>, vector<2x128xf32>,
    %420 = vector.extract_strided_slice %329 {offsets = [90, 0], sizes = [2, 128], strides = [1, 1]} : vector<128x128xf32> to vector<2x128xf32>
    %c258 = arith.constant 258 : index
    %c0_375 = arith.constant 0 : index
    %421 = vector.load %arg11[%c258, %c0_375] : memref<288x128xf32, #tpu.memory_space<vmem>>, vector<2x128xf32>
    tpu.vector_store %arg11[%c258, %c0_375], %420 {strides = array<i32>} : memref<288x128xf32, #tpu.memory_space<vmem>>, vector<2x128xf32>,
    %422 = vector.extract_strided_slice %329 {offsets = [92, 0], sizes = [2, 128], strides = [1, 1]} : vector<128x128xf32> to vector<2x128xf32>
    %c188 = arith.constant 188 : index
    %c0_376 = arith.constant 0 : index
    %423 = vector.load %arg11[%c188, %c0_376] : memref<288x128xf32, #tpu.memory_space<vmem>>, vector<2x128xf32>
    tpu.vector_store %arg11[%c188, %c0_376], %422 {strides = array<i32>} : memref<288x128xf32, #tpu.memory_space<vmem>>, vector<2x128xf32>,
    %424 = vector.extract_strided_slice %329 {offsets = [94, 0], sizes = [2, 128], strides = [1, 1]} : vector<128x128xf32> to vector<2x128xf32>
    %c260_377 = arith.constant 260 : index
    %c0_378 = arith.constant 0 : index
    %425 = vector.load %arg11[%c260_377, %c0_378] : memref<288x128xf32, #tpu.memory_space<vmem>>, vector<2x128xf32>
    tpu.vector_store %arg11[%c260_377, %c0_378], %424 {strides = array<i32>} : memref<288x128xf32, #tpu.memory_space<vmem>>, vector<2x128xf32>,
    %426 = vector.extract_strided_slice %329 {offsets = [96, 0], sizes = [2, 128], strides = [1, 1]} : vector<128x128xf32> to vector<2x128xf32>
    %c50 = arith.constant 50 : index
    %c0_379 = arith.constant 0 : index
    %427 = vector.load %arg11[%c50, %c0_379] : memref<288x128xf32, #tpu.memory_space<vmem>>, vector<2x128xf32>
    tpu.vector_store %arg11[%c50, %c0_379], %426 {strides = array<i32>} : memref<288x128xf32, #tpu.memory_space<vmem>>, vector<2x128xf32>,
    %428 = vector.extract_strided_slice %329 {offsets = [98, 0], sizes = [2, 128], strides = [1, 1]} : vector<128x128xf32> to vector<2x128xf32>
    %c122_380 = arith.constant 122 : index
    %c0_381 = arith.constant 0 : index
    %429 = vector.load %arg11[%c122_380, %c0_381] : memref<288x128xf32, #tpu.memory_space<vmem>>, vector<2x128xf32>
    tpu.vector_store %arg11[%c122_380, %c0_381], %428 {strides = array<i32>} : memref<288x128xf32, #tpu.memory_space<vmem>>, vector<2x128xf32>,
    %430 = vector.extract_strided_slice %329 {offsets = [100, 0], sizes = [2, 128], strides = [1, 1]} : vector<128x128xf32> to vector<2x128xf32>
    %c52 = arith.constant 52 : index
    %c0_382 = arith.constant 0 : index
    %431 = vector.load %arg11[%c52, %c0_382] : memref<288x128xf32, #tpu.memory_space<vmem>>, vector<2x128xf32>
    tpu.vector_store %arg11[%c52, %c0_382], %430 {strides = array<i32>} : memref<288x128xf32, #tpu.memory_space<vmem>>, vector<2x128xf32>,
    %432 = vector.extract_strided_slice %329 {offsets = [102, 0], sizes = [2, 128], strides = [1, 1]} : vector<128x128xf32> to vector<2x128xf32>
    %c124_383 = arith.constant 124 : index
    %c0_384 = arith.constant 0 : index
    %433 = vector.load %arg11[%c124_383, %c0_384] : memref<288x128xf32, #tpu.memory_space<vmem>>, vector<2x128xf32>
    tpu.vector_store %arg11[%c124_383, %c0_384], %432 {strides = array<i32>} : memref<288x128xf32, #tpu.memory_space<vmem>>, vector<2x128xf32>,
    %434 = vector.extract_strided_slice %329 {offsets = [104, 0], sizes = [2, 128], strides = [1, 1]} : vector<128x128xf32> to vector<2x128xf32>
    %c54 = arith.constant 54 : index
    %c0_385 = arith.constant 0 : index
    %435 = vector.load %arg11[%c54, %c0_385] : memref<288x128xf32, #tpu.memory_space<vmem>>, vector<2x128xf32>
    tpu.vector_store %arg11[%c54, %c0_385], %434 {strides = array<i32>} : memref<288x128xf32, #tpu.memory_space<vmem>>, vector<2x128xf32>,
    %436 = vector.extract_strided_slice %329 {offsets = [106, 0], sizes = [2, 128], strides = [1, 1]} : vector<128x128xf32> to vector<2x128xf32>
    %c126 = arith.constant 126 : index
    %c0_386 = arith.constant 0 : index
    %437 = vector.load %arg11[%c126, %c0_386] : memref<288x128xf32, #tpu.memory_space<vmem>>, vector<2x128xf32>
    tpu.vector_store %arg11[%c126, %c0_386], %436 {strides = array<i32>} : memref<288x128xf32, #tpu.memory_space<vmem>>, vector<2x128xf32>,
    %438 = vector.extract_strided_slice %329 {offsets = [108, 0], sizes = [2, 128], strides = [1, 1]} : vector<128x128xf32> to vector<2x128xf32>
    %c56 = arith.constant 56 : index
    %c0_387 = arith.constant 0 : index
    %439 = vector.load %arg11[%c56, %c0_387] : memref<288x128xf32, #tpu.memory_space<vmem>>, vector<2x128xf32>
    tpu.vector_store %arg11[%c56, %c0_387], %438 {strides = array<i32>} : memref<288x128xf32, #tpu.memory_space<vmem>>, vector<2x128xf32>,
    %440 = vector.extract_strided_slice %329 {offsets = [110, 0], sizes = [2, 128], strides = [1, 1]} : vector<128x128xf32> to vector<2x128xf32>
    %c128 = arith.constant 128 : index
    %c0_388 = arith.constant 0 : index
    %441 = vector.load %arg11[%c128, %c0_388] : memref<288x128xf32, #tpu.memory_space<vmem>>, vector<2x128xf32>
    tpu.vector_store %arg11[%c128, %c0_388], %440 {strides = array<i32>} : memref<288x128xf32, #tpu.memory_space<vmem>>, vector<2x128xf32>,
    %442 = vector.extract_strided_slice %329 {offsets = [112, 0], sizes = [2, 128], strides = [1, 1]} : vector<128x128xf32> to vector<2x128xf32>
    %c194 = arith.constant 194 : index
    %c0_389 = arith.constant 0 : index
    %443 = vector.load %arg11[%c194, %c0_389] : memref<288x128xf32, #tpu.memory_space<vmem>>, vector<2x128xf32>
    tpu.vector_store %arg11[%c194, %c0_389], %442 {strides = array<i32>} : memref<288x128xf32, #tpu.memory_space<vmem>>, vector<2x128xf32>,
    %444 = vector.extract_strided_slice %329 {offsets = [114, 0], sizes = [2, 128], strides = [1, 1]} : vector<128x128xf32> to vector<2x128xf32>
    %c266 = arith.constant 266 : index
    %c0_390 = arith.constant 0 : index
    %445 = vector.load %arg11[%c266, %c0_390] : memref<288x128xf32, #tpu.memory_space<vmem>>, vector<2x128xf32>
    tpu.vector_store %arg11[%c266, %c0_390], %444 {strides = array<i32>} : memref<288x128xf32, #tpu.memory_space<vmem>>, vector<2x128xf32>,
    %446 = vector.extract_strided_slice %329 {offsets = [116, 0], sizes = [2, 128], strides = [1, 1]} : vector<128x128xf32> to vector<2x128xf32>
    %c196 = arith.constant 196 : index
    %c0_391 = arith.constant 0 : index
    %447 = vector.load %arg11[%c196, %c0_391] : memref<288x128xf32, #tpu.memory_space<vmem>>, vector<2x128xf32>
    tpu.vector_store %arg11[%c196, %c0_391], %446 {strides = array<i32>} : memref<288x128xf32, #tpu.memory_space<vmem>>, vector<2x128xf32>,
    %448 = vector.extract_strided_slice %329 {offsets = [118, 0], sizes = [2, 128], strides = [1, 1]} : vector<128x128xf32> to vector<2x128xf32>
    %c268 = arith.constant 268 : index
    %c0_392 = arith.constant 0 : index
    %449 = vector.load %arg11[%c268, %c0_392] : memref<288x128xf32, #tpu.memory_space<vmem>>, vector<2x128xf32>
    tpu.vector_store %arg11[%c268, %c0_392], %448 {strides = array<i32>} : memref<288x128xf32, #tpu.memory_space<vmem>>, vector<2x128xf32>,
    %450 = vector.extract_strided_slice %329 {offsets = [120, 0], sizes = [2, 128], strides = [1, 1]} : vector<128x128xf32> to vector<2x128xf32>
    %c198 = arith.constant 198 : index
    %c0_393 = arith.constant 0 : index
    %451 = vector.load %arg11[%c198, %c0_393] : memref<288x128xf32, #tpu.memory_space<vmem>>, vector<2x128xf32>
    tpu.vector_store %arg11[%c198, %c0_393], %450 {strides = array<i32>} : memref<288x128xf32, #tpu.memory_space<vmem>>, vector<2x128xf32>,
    %452 = vector.extract_strided_slice %329 {offsets = [122, 0], sizes = [2, 128], strides = [1, 1]} : vector<128x128xf32> to vector<2x128xf32>
    %c270 = arith.constant 270 : index
    %c0_394 = arith.constant 0 : index
    %453 = vector.load %arg11[%c270, %c0_394] : memref<288x128xf32, #tpu.memory_space<vmem>>, vector<2x128xf32>
    tpu.vector_store %arg11[%c270, %c0_394], %452 {strides = array<i32>} : memref<288x128xf32, #tpu.memory_space<vmem>>, vector<2x128xf32>,
    %454 = vector.extract_strided_slice %329 {offsets = [124, 0], sizes = [2, 128], strides = [1, 1]} : vector<128x128xf32> to vector<2x128xf32>
    %c200 = arith.constant 200 : index
    %c0_395 = arith.constant 0 : index
    %455 = vector.load %arg11[%c200, %c0_395] : memref<288x128xf32, #tpu.memory_space<vmem>>, vector<2x128xf32>
    tpu.vector_store %arg11[%c200, %c0_395], %454 {strides = array<i32>} : memref<288x128xf32, #tpu.memory_space<vmem>>, vector<2x128xf32>,
    %456 = vector.extract_strided_slice %329 {offsets = [126, 0], sizes = [2, 128], strides = [1, 1]} : vector<128x128xf32> to vector<2x128xf32>
    %c272 = arith.constant 272 : index
    %c0_396 = arith.constant 0 : index
    %457 = vector.load %arg11[%c272, %c0_396] : memref<288x128xf32, #tpu.memory_space<vmem>>, vector<2x128xf32>
    tpu.vector_store %arg11[%c272, %c0_396], %456 {strides = array<i32>} : memref<288x128xf32, #tpu.memory_space<vmem>>, vector<2x128xf32>,
    %cst_397 = arith.constant 0.000000e+00 : f32
    %458 = vector.broadcast %cst_397 : f32 to vector<32x256xf32>
    %c216 = arith.constant 216 : index
    %c0_398 = arith.constant 0 : index
    %459 = vector.load %arg11[%c216, %c0_398] : memref<288x128xf32, #tpu.memory_space<vmem>>, vector<8x128xf32>
    %c228 = arith.constant 228 : index
    %c0_399 = arith.constant 0 : index
    %460 = vector.load %arg11[%c228, %c0_399] : memref<288x128xf32, #tpu.memory_space<vmem>>, vector<8x128xf32>
    %c240_400 = arith.constant 240 : index
    %c0_401 = arith.constant 0 : index
    %461 = vector.load %arg11[%c240_400, %c0_401] : memref<288x128xf32, #tpu.memory_space<vmem>>, vector<8x128xf32>
    %c252 = arith.constant 252 : index
    %c0_402 = arith.constant 0 : index
    %462 = vector.load %arg11[%c252, %c0_402] : memref<288x128xf32, #tpu.memory_space<vmem>>, vector<8x128xf32>
    %463 = tpu.concatenate %459, %460, %461, %462 in 0 : vector<8x128xf32>, vector<8x128xf32>, vector<8x128xf32>, vector<8x128xf32> -> vector<32x128xf32>
    %464 = arith.truncf %463 : vector<32x128xf32> to vector<32x128xbf16>
    %c0_403 = arith.constant 0 : index
    %c0_404 = arith.constant 0 : index
    %c0_405 = arith.constant 0 : index
    %465 = vector.load %arg3[%c0_403, %c0_404, %c0_405] : memref<16x128x256xbf16, #tpu.memory_space<vmem>>, vector<1x128x256xbf16>
    %466 = vector.shape_cast %465 : vector<1x128x256xbf16> to vector<128x256xbf16>
    %cst_406 = arith.constant dense<0.000000e+00> : vector<32x256xf32>
    %467 = tpu.matmul %464, %466, %cst_406 {dimension_numbers = #tpu.dot_dimension_numbers<[1], [0], [0], [1], [0, 0, 1, 1], [], []>} : vector<32x128xbf16>, vector<128x256xbf16>, vector<32x256xf32> -> vector<32x256xf32>
    %468 = arith.addf %458, %467 : vector<32x256xf32>
    %c146 = arith.constant 146 : index
    %c0_407 = arith.constant 0 : index
    %469 = vector.load %arg11[%c146, %c0_407] : memref<288x128xf32, #tpu.memory_space<vmem>>, vector<8x128xf32>
    %c158_408 = arith.constant 158 : index
    %c0_409 = arith.constant 0 : index
    %470 = vector.load %arg11[%c158_408, %c0_409] : memref<288x128xf32, #tpu.memory_space<vmem>>, vector<8x128xf32>
    %c170_410 = arith.constant 170 : index
    %c0_411 = arith.constant 0 : index
    %471 = vector.load %arg11[%c170_410, %c0_411] : memref<288x128xf32, #tpu.memory_space<vmem>>, vector<8x128xf32>
    %c182_412 = arith.constant 182 : index
    %c0_413 = arith.constant 0 : index
    %472 = vector.load %arg11[%c182_412, %c0_413] : memref<288x128xf32, #tpu.memory_space<vmem>>, vector<8x128xf32>
    %473 = tpu.concatenate %469, %470, %471, %472 in 0 : vector<8x128xf32>, vector<8x128xf32>, vector<8x128xf32>, vector<8x128xf32> -> vector<32x128xf32>
    %474 = arith.truncf %473 : vector<32x128xf32> to vector<32x128xbf16>
    %c1_414 = arith.constant 1 : index
    %c0_415 = arith.constant 0 : index
    %c0_416 = arith.constant 0 : index
    %475 = vector.load %arg3[%c1_414, %c0_415, %c0_416] : memref<16x128x256xbf16, #tpu.memory_space<vmem>>, vector<1x128x256xbf16>
    %476 = vector.shape_cast %475 : vector<1x128x256xbf16> to vector<128x256xbf16>
    %cst_417 = arith.constant dense<0.000000e+00> : vector<32x256xf32>
    %477 = tpu.matmul %474, %476, %cst_417 {dimension_numbers = #tpu.dot_dimension_numbers<[1], [0], [0], [1], [0, 0, 1, 1], [], []>} : vector<32x128xbf16>, vector<128x256xbf16>, vector<32x256xf32> -> vector<32x256xf32>
    %478 = arith.addf %468, %477 : vector<32x256xf32>
    %c218 = arith.constant 218 : index
    %c0_418 = arith.constant 0 : index
    %479 = vector.load %arg11[%c218, %c0_418] : memref<288x128xf32, #tpu.memory_space<vmem>>, vector<8x128xf32>
    %c230_419 = arith.constant 230 : index
    %c0_420 = arith.constant 0 : index
    %480 = vector.load %arg11[%c230_419, %c0_420] : memref<288x128xf32, #tpu.memory_space<vmem>>, vector<8x128xf32>
    %c242_421 = arith.constant 242 : index
    %c0_422 = arith.constant 0 : index
    %481 = vector.load %arg11[%c242_421, %c0_422] : memref<288x128xf32, #tpu.memory_space<vmem>>, vector<8x128xf32>
    %c254_423 = arith.constant 254 : index
    %c0_424 = arith.constant 0 : index
    %482 = vector.load %arg11[%c254_423, %c0_424] : memref<288x128xf32, #tpu.memory_space<vmem>>, vector<8x128xf32>
    %483 = tpu.concatenate %479, %480, %481, %482 in 0 : vector<8x128xf32>, vector<8x128xf32>, vector<8x128xf32>, vector<8x128xf32> -> vector<32x128xf32>
    %484 = arith.truncf %483 : vector<32x128xf32> to vector<32x128xbf16>
    %c2_425 = arith.constant 2 : index
    %c0_426 = arith.constant 0 : index
    %c0_427 = arith.constant 0 : index
    %485 = vector.load %arg3[%c2_425, %c0_426, %c0_427] : memref<16x128x256xbf16, #tpu.memory_space<vmem>>, vector<1x128x256xbf16>
    %486 = vector.shape_cast %485 : vector<1x128x256xbf16> to vector<128x256xbf16>
    %cst_428 = arith.constant dense<0.000000e+00> : vector<32x256xf32>
    %487 = tpu.matmul %484, %486, %cst_428 {dimension_numbers = #tpu.dot_dimension_numbers<[1], [0], [0], [1], [0, 0, 1, 1], [], []>} : vector<32x128xbf16>, vector<128x256xbf16>, vector<32x256xf32> -> vector<32x256xf32>
    %488 = arith.addf %478, %487 : vector<32x256xf32>
    %c148 = arith.constant 148 : index
    %c0_429 = arith.constant 0 : index
    %489 = vector.load %arg11[%c148, %c0_429] : memref<288x128xf32, #tpu.memory_space<vmem>>, vector<8x128xf32>
    %c160_430 = arith.constant 160 : index
    %c0_431 = arith.constant 0 : index
    %490 = vector.load %arg11[%c160_430, %c0_431] : memref<288x128xf32, #tpu.memory_space<vmem>>, vector<8x128xf32>
    %c172_432 = arith.constant 172 : index
    %c0_433 = arith.constant 0 : index
    %491 = vector.load %arg11[%c172_432, %c0_433] : memref<288x128xf32, #tpu.memory_space<vmem>>, vector<8x128xf32>
    %c184_434 = arith.constant 184 : index
    %c0_435 = arith.constant 0 : index
    %492 = vector.load %arg11[%c184_434, %c0_435] : memref<288x128xf32, #tpu.memory_space<vmem>>, vector<8x128xf32>
    %493 = tpu.concatenate %489, %490, %491, %492 in 0 : vector<8x128xf32>, vector<8x128xf32>, vector<8x128xf32>, vector<8x128xf32> -> vector<32x128xf32>
    %494 = arith.truncf %493 : vector<32x128xf32> to vector<32x128xbf16>
    %c3_436 = arith.constant 3 : index
    %c0_437 = arith.constant 0 : index
    %c0_438 = arith.constant 0 : index
    %495 = vector.load %arg3[%c3_436, %c0_437, %c0_438] : memref<16x128x256xbf16, #tpu.memory_space<vmem>>, vector<1x128x256xbf16>
    %496 = vector.shape_cast %495 : vector<1x128x256xbf16> to vector<128x256xbf16>
    %cst_439 = arith.constant dense<0.000000e+00> : vector<32x256xf32>
    %497 = tpu.matmul %494, %496, %cst_439 {dimension_numbers = #tpu.dot_dimension_numbers<[1], [0], [0], [1], [0, 0, 1, 1], [], []>} : vector<32x128xbf16>, vector<128x256xbf16>, vector<32x256xf32> -> vector<32x256xf32>
    %498 = arith.addf %488, %497 : vector<32x256xf32>
    %c84_440 = arith.constant 84 : index
    %c0_441 = arith.constant 0 : index
    %499 = vector.load %arg11[%c84_440, %c0_441] : memref<288x128xf32, #tpu.memory_space<vmem>>, vector<8x128xf32>
    %c96 = arith.constant 96 : index
    %c0_442 = arith.constant 0 : index
    %500 = vector.load %arg11[%c96, %c0_442] : memref<288x128xf32, #tpu.memory_space<vmem>>, vector<8x128xf32>
    %c108 = arith.constant 108 : index
    %c0_443 = arith.constant 0 : index
    %501 = vector.load %arg11[%c108, %c0_443] : memref<288x128xf32, #tpu.memory_space<vmem>>, vector<8x128xf32>
    %c120 = arith.constant 120 : index
    %c0_444 = arith.constant 0 : index
    %502 = vector.load %arg11[%c120, %c0_444] : memref<288x128xf32, #tpu.memory_space<vmem>>, vector<8x128xf32>
    %503 = tpu.concatenate %499, %500, %501, %502 in 0 : vector<8x128xf32>, vector<8x128xf32>, vector<8x128xf32>, vector<8x128xf32> -> vector<32x128xf32>
    %504 = arith.truncf %503 : vector<32x128xf32> to vector<32x128xbf16>
    %c4_445 = arith.constant 4 : index
    %c0_446 = arith.constant 0 : index
    %c0_447 = arith.constant 0 : index
    %505 = vector.load %arg3[%c4_445, %c0_446, %c0_447] : memref<16x128x256xbf16, #tpu.memory_space<vmem>>, vector<1x128x256xbf16>
    %506 = vector.shape_cast %505 : vector<1x128x256xbf16> to vector<128x256xbf16>
    %cst_448 = arith.constant dense<0.000000e+00> : vector<32x256xf32>
    %507 = tpu.matmul %504, %506, %cst_448 {dimension_numbers = #tpu.dot_dimension_numbers<[1], [0], [0], [1], [0, 0, 1, 1], [], []>} : vector<32x128xbf16>, vector<128x256xbf16>, vector<32x256xf32> -> vector<32x256xf32>
    %508 = arith.addf %498, %507 : vector<32x256xf32>
    %c14_449 = arith.constant 14 : index
    %c0_450 = arith.constant 0 : index
    %509 = vector.load %arg11[%c14_449, %c0_450] : memref<288x128xf32, #tpu.memory_space<vmem>>, vector<8x128xf32>
    %c26_451 = arith.constant 26 : index
    %c0_452 = arith.constant 0 : index
    %510 = vector.load %arg11[%c26_451, %c0_452] : memref<288x128xf32, #tpu.memory_space<vmem>>, vector<8x128xf32>
    %c38_453 = arith.constant 38 : index
    %c0_454 = arith.constant 0 : index
    %511 = vector.load %arg11[%c38_453, %c0_454] : memref<288x128xf32, #tpu.memory_space<vmem>>, vector<8x128xf32>
    %c50_455 = arith.constant 50 : index
    %c0_456 = arith.constant 0 : index
    %512 = vector.load %arg11[%c50_455, %c0_456] : memref<288x128xf32, #tpu.memory_space<vmem>>, vector<8x128xf32>
    %513 = tpu.concatenate %509, %510, %511, %512 in 0 : vector<8x128xf32>, vector<8x128xf32>, vector<8x128xf32>, vector<8x128xf32> -> vector<32x128xf32>
    %514 = arith.truncf %513 : vector<32x128xf32> to vector<32x128xbf16>
    %c5_457 = arith.constant 5 : index
    %c0_458 = arith.constant 0 : index
    %c0_459 = arith.constant 0 : index
    %515 = vector.load %arg3[%c5_457, %c0_458, %c0_459] : memref<16x128x256xbf16, #tpu.memory_space<vmem>>, vector<1x128x256xbf16>
    %516 = vector.shape_cast %515 : vector<1x128x256xbf16> to vector<128x256xbf16>
    %cst_460 = arith.constant dense<0.000000e+00> : vector<32x256xf32>
    %517 = tpu.matmul %514, %516, %cst_460 {dimension_numbers = #tpu.dot_dimension_numbers<[1], [0], [0], [1], [0, 0, 1, 1], [], []>} : vector<32x128xbf16>, vector<128x256xbf16>, vector<32x256xf32> -> vector<32x256xf32>
    %518 = arith.addf %508, %517 : vector<32x256xf32>
    %c86_461 = arith.constant 86 : index
    %c0_462 = arith.constant 0 : index
    %519 = vector.load %arg11[%c86_461, %c0_462] : memref<288x128xf32, #tpu.memory_space<vmem>>, vector<8x128xf32>
    %c98_463 = arith.constant 98 : index
    %c0_464 = arith.constant 0 : index
    %520 = vector.load %arg11[%c98_463, %c0_464] : memref<288x128xf32, #tpu.memory_space<vmem>>, vector<8x128xf32>
    %c110_465 = arith.constant 110 : index
    %c0_466 = arith.constant 0 : index
    %521 = vector.load %arg11[%c110_465, %c0_466] : memref<288x128xf32, #tpu.memory_space<vmem>>, vector<8x128xf32>
    %c122_467 = arith.constant 122 : index
    %c0_468 = arith.constant 0 : index
    %522 = vector.load %arg11[%c122_467, %c0_468] : memref<288x128xf32, #tpu.memory_space<vmem>>, vector<8x128xf32>
    %523 = tpu.concatenate %519, %520, %521, %522 in 0 : vector<8x128xf32>, vector<8x128xf32>, vector<8x128xf32>, vector<8x128xf32> -> vector<32x128xf32>
    %524 = arith.truncf %523 : vector<32x128xf32> to vector<32x128xbf16>
    %c6_469 = arith.constant 6 : index
    %c0_470 = arith.constant 0 : index
    %c0_471 = arith.constant 0 : index
    %525 = vector.load %arg3[%c6_469, %c0_470, %c0_471] : memref<16x128x256xbf16, #tpu.memory_space<vmem>>, vector<1x128x256xbf16>
    %526 = vector.shape_cast %525 : vector<1x128x256xbf16> to vector<128x256xbf16>
    %cst_472 = arith.constant dense<0.000000e+00> : vector<32x256xf32>
    %527 = tpu.matmul %524, %526, %cst_472 {dimension_numbers = #tpu.dot_dimension_numbers<[1], [0], [0], [1], [0, 0, 1, 1], [], []>} : vector<32x128xbf16>, vector<128x256xbf16>, vector<32x256xf32> -> vector<32x256xf32>
    %528 = arith.addf %518, %527 : vector<32x256xf32>
    %c16_473 = arith.constant 16 : index
    %c0_474 = arith.constant 0 : index
    %529 = vector.load %arg11[%c16_473, %c0_474] : memref<288x128xf32, #tpu.memory_space<vmem>>, vector<8x128xf32>
    %c28_475 = arith.constant 28 : index
    %c0_476 = arith.constant 0 : index
    %530 = vector.load %arg11[%c28_475, %c0_476] : memref<288x128xf32, #tpu.memory_space<vmem>>, vector<8x128xf32>
    %c40_477 = arith.constant 40 : index
    %c0_478 = arith.constant 0 : index
    %531 = vector.load %arg11[%c40_477, %c0_478] : memref<288x128xf32, #tpu.memory_space<vmem>>, vector<8x128xf32>
    %c52_479 = arith.constant 52 : index
    %c0_480 = arith.constant 0 : index
    %532 = vector.load %arg11[%c52_479, %c0_480] : memref<288x128xf32, #tpu.memory_space<vmem>>, vector<8x128xf32>
    %533 = tpu.concatenate %529, %530, %531, %532 in 0 : vector<8x128xf32>, vector<8x128xf32>, vector<8x128xf32>, vector<8x128xf32> -> vector<32x128xf32>
    %534 = arith.truncf %533 : vector<32x128xf32> to vector<32x128xbf16>
    %c7_481 = arith.constant 7 : index
    %c0_482 = arith.constant 0 : index
    %c0_483 = arith.constant 0 : index
    %535 = vector.load %arg3[%c7_481, %c0_482, %c0_483] : memref<16x128x256xbf16, #tpu.memory_space<vmem>>, vector<1x128x256xbf16>
    %536 = vector.shape_cast %535 : vector<1x128x256xbf16> to vector<128x256xbf16>
    %cst_484 = arith.constant dense<0.000000e+00> : vector<32x256xf32>
    %537 = tpu.matmul %534, %536, %cst_484 {dimension_numbers = #tpu.dot_dimension_numbers<[1], [0], [0], [1], [0, 0, 1, 1], [], []>} : vector<32x128xbf16>, vector<128x256xbf16>, vector<32x256xf32> -> vector<32x256xf32>
    %538 = arith.addf %528, %537 : vector<32x256xf32>
    %c228_485 = arith.constant 228 : index
    %c0_486 = arith.constant 0 : index
    %539 = vector.load %arg11[%c228_485, %c0_486] : memref<288x128xf32, #tpu.memory_space<vmem>>, vector<8x128xf32>
    %c240_487 = arith.constant 240 : index
    %c0_488 = arith.constant 0 : index
    %540 = vector.load %arg11[%c240_487, %c0_488] : memref<288x128xf32, #tpu.memory_space<vmem>>, vector<8x128xf32>
    %c252_489 = arith.constant 252 : index
    %c0_490 = arith.constant 0 : index
    %541 = vector.load %arg11[%c252_489, %c0_490] : memref<288x128xf32, #tpu.memory_space<vmem>>, vector<8x128xf32>
    %c264 = arith.constant 264 : index
    %c0_491 = arith.constant 0 : index
    %542 = vector.load %arg11[%c264, %c0_491] : memref<288x128xf32, #tpu.memory_space<vmem>>, vector<8x128xf32>
    %543 = tpu.concatenate %539, %540, %541, %542 in 0 : vector<8x128xf32>, vector<8x128xf32>, vector<8x128xf32>, vector<8x128xf32> -> vector<32x128xf32>
    %544 = arith.truncf %543 : vector<32x128xf32> to vector<32x128xbf16>
    %c8_492 = arith.constant 8 : index
    %c0_493 = arith.constant 0 : index
    %c0_494 = arith.constant 0 : index
    %545 = vector.load %arg3[%c8_492, %c0_493, %c0_494] : memref<16x128x256xbf16, #tpu.memory_space<vmem>>, vector<1x128x256xbf16>
    %546 = vector.shape_cast %545 : vector<1x128x256xbf16> to vector<128x256xbf16>
    %cst_495 = arith.constant dense<0.000000e+00> : vector<32x256xf32>
    %547 = tpu.matmul %544, %546, %cst_495 {dimension_numbers = #tpu.dot_dimension_numbers<[1], [0], [0], [1], [0, 0, 1, 1], [], []>} : vector<32x128xbf16>, vector<128x256xbf16>, vector<32x256xf32> -> vector<32x256xf32>
    %548 = arith.addf %538, %547 : vector<32x256xf32>
    %c158_496 = arith.constant 158 : index
    %c0_497 = arith.constant 0 : index
    %549 = vector.load %arg11[%c158_496, %c0_497] : memref<288x128xf32, #tpu.memory_space<vmem>>, vector<8x128xf32>
    %c170_498 = arith.constant 170 : index
    %c0_499 = arith.constant 0 : index
    %550 = vector.load %arg11[%c170_498, %c0_499] : memref<288x128xf32, #tpu.memory_space<vmem>>, vector<8x128xf32>
    %c182_500 = arith.constant 182 : index
    %c0_501 = arith.constant 0 : index
    %551 = vector.load %arg11[%c182_500, %c0_501] : memref<288x128xf32, #tpu.memory_space<vmem>>, vector<8x128xf32>
    %c194_502 = arith.constant 194 : index
    %c0_503 = arith.constant 0 : index
    %552 = vector.load %arg11[%c194_502, %c0_503] : memref<288x128xf32, #tpu.memory_space<vmem>>, vector<8x128xf32>
    %553 = tpu.concatenate %549, %550, %551, %552 in 0 : vector<8x128xf32>, vector<8x128xf32>, vector<8x128xf32>, vector<8x128xf32> -> vector<32x128xf32>
    %554 = arith.truncf %553 : vector<32x128xf32> to vector<32x128xbf16>
    %c9_504 = arith.constant 9 : index
    %c0_505 = arith.constant 0 : index
    %c0_506 = arith.constant 0 : index
    %555 = vector.load %arg3[%c9_504, %c0_505, %c0_506] : memref<16x128x256xbf16, #tpu.memory_space<vmem>>, vector<1x128x256xbf16>
    %556 = vector.shape_cast %555 : vector<1x128x256xbf16> to vector<128x256xbf16>
    %cst_507 = arith.constant dense<0.000000e+00> : vector<32x256xf32>
    %557 = tpu.matmul %554, %556, %cst_507 {dimension_numbers = #tpu.dot_dimension_numbers<[1], [0], [0], [1], [0, 0, 1, 1], [], []>} : vector<32x128xbf16>, vector<128x256xbf16>, vector<32x256xf32> -> vector<32x256xf32>
    %558 = arith.addf %548, %557 : vector<32x256xf32>
    %c230_508 = arith.constant 230 : index
    %c0_509 = arith.constant 0 : index
    %559 = vector.load %arg11[%c230_508, %c0_509] : memref<288x128xf32, #tpu.memory_space<vmem>>, vector<8x128xf32>
    %c242_510 = arith.constant 242 : index
    %c0_511 = arith.constant 0 : index
    %560 = vector.load %arg11[%c242_510, %c0_511] : memref<288x128xf32, #tpu.memory_space<vmem>>, vector<8x128xf32>
    %c254_512 = arith.constant 254 : index
    %c0_513 = arith.constant 0 : index
    %561 = vector.load %arg11[%c254_512, %c0_513] : memref<288x128xf32, #tpu.memory_space<vmem>>, vector<8x128xf32>
    %c266_514 = arith.constant 266 : index
    %c0_515 = arith.constant 0 : index
    %562 = vector.load %arg11[%c266_514, %c0_515] : memref<288x128xf32, #tpu.memory_space<vmem>>, vector<8x128xf32>
    %563 = tpu.concatenate %559, %560, %561, %562 in 0 : vector<8x128xf32>, vector<8x128xf32>, vector<8x128xf32>, vector<8x128xf32> -> vector<32x128xf32>
    %564 = arith.truncf %563 : vector<32x128xf32> to vector<32x128xbf16>
    %c10_516 = arith.constant 10 : index
    %c0_517 = arith.constant 0 : index
    %c0_518 = arith.constant 0 : index
    %565 = vector.load %arg3[%c10_516, %c0_517, %c0_518] : memref<16x128x256xbf16, #tpu.memory_space<vmem>>, vector<1x128x256xbf16>
    %566 = vector.shape_cast %565 : vector<1x128x256xbf16> to vector<128x256xbf16>
    %cst_519 = arith.constant dense<0.000000e+00> : vector<32x256xf32>
    %567 = tpu.matmul %564, %566, %cst_519 {dimension_numbers = #tpu.dot_dimension_numbers<[1], [0], [0], [1], [0, 0, 1, 1], [], []>} : vector<32x128xbf16>, vector<128x256xbf16>, vector<32x256xf32> -> vector<32x256xf32>
    %568 = arith.addf %558, %567 : vector<32x256xf32>
    %c160_520 = arith.constant 160 : index
    %c0_521 = arith.constant 0 : index
    %569 = vector.load %arg11[%c160_520, %c0_521] : memref<288x128xf32, #tpu.memory_space<vmem>>, vector<8x128xf32>
    %c172_522 = arith.constant 172 : index
    %c0_523 = arith.constant 0 : index
    %570 = vector.load %arg11[%c172_522, %c0_523] : memref<288x128xf32, #tpu.memory_space<vmem>>, vector<8x128xf32>
    %c184_524 = arith.constant 184 : index
    %c0_525 = arith.constant 0 : index
    %571 = vector.load %arg11[%c184_524, %c0_525] : memref<288x128xf32, #tpu.memory_space<vmem>>, vector<8x128xf32>
    %c196_526 = arith.constant 196 : index
    %c0_527 = arith.constant 0 : index
    %572 = vector.load %arg11[%c196_526, %c0_527] : memref<288x128xf32, #tpu.memory_space<vmem>>, vector<8x128xf32>
    %573 = tpu.concatenate %569, %570, %571, %572 in 0 : vector<8x128xf32>, vector<8x128xf32>, vector<8x128xf32>, vector<8x128xf32> -> vector<32x128xf32>
    %574 = arith.truncf %573 : vector<32x128xf32> to vector<32x128xbf16>
    %c11_528 = arith.constant 11 : index
    %c0_529 = arith.constant 0 : index
    %c0_530 = arith.constant 0 : index
    %575 = vector.load %arg3[%c11_528, %c0_529, %c0_530] : memref<16x128x256xbf16, #tpu.memory_space<vmem>>, vector<1x128x256xbf16>
    %576 = vector.shape_cast %575 : vector<1x128x256xbf16> to vector<128x256xbf16>
    %cst_531 = arith.constant dense<0.000000e+00> : vector<32x256xf32>
    %577 = tpu.matmul %574, %576, %cst_531 {dimension_numbers = #tpu.dot_dimension_numbers<[1], [0], [0], [1], [0, 0, 1, 1], [], []>} : vector<32x128xbf16>, vector<128x256xbf16>, vector<32x256xf32> -> vector<32x256xf32>
    %578 = arith.addf %568, %577 : vector<32x256xf32>
    %c96_532 = arith.constant 96 : index
    %c0_533 = arith.constant 0 : index
    %579 = vector.load %arg11[%c96_532, %c0_533] : memref<288x128xf32, #tpu.memory_space<vmem>>, vector<8x128xf32>
    %c108_534 = arith.constant 108 : index
    %c0_535 = arith.constant 0 : index
    %580 = vector.load %arg11[%c108_534, %c0_535] : memref<288x128xf32, #tpu.memory_space<vmem>>, vector<8x128xf32>
    %c120_536 = arith.constant 120 : index
    %c0_537 = arith.constant 0 : index
    %581 = vector.load %arg11[%c120_536, %c0_537] : memref<288x128xf32, #tpu.memory_space<vmem>>, vector<8x128xf32>
    %c132 = arith.constant 132 : index
    %c0_538 = arith.constant 0 : index
    %582 = vector.load %arg11[%c132, %c0_538] : memref<288x128xf32, #tpu.memory_space<vmem>>, vector<8x128xf32>
    %583 = tpu.concatenate %579, %580, %581, %582 in 0 : vector<8x128xf32>, vector<8x128xf32>, vector<8x128xf32>, vector<8x128xf32> -> vector<32x128xf32>
    %584 = arith.truncf %583 : vector<32x128xf32> to vector<32x128xbf16>
    %c12_539 = arith.constant 12 : index
    %c0_540 = arith.constant 0 : index
    %c0_541 = arith.constant 0 : index
    %585 = vector.load %arg3[%c12_539, %c0_540, %c0_541] : memref<16x128x256xbf16, #tpu.memory_space<vmem>>, vector<1x128x256xbf16>
    %586 = vector.shape_cast %585 : vector<1x128x256xbf16> to vector<128x256xbf16>
    %cst_542 = arith.constant dense<0.000000e+00> : vector<32x256xf32>
    %587 = tpu.matmul %584, %586, %cst_542 {dimension_numbers = #tpu.dot_dimension_numbers<[1], [0], [0], [1], [0, 0, 1, 1], [], []>} : vector<32x128xbf16>, vector<128x256xbf16>, vector<32x256xf32> -> vector<32x256xf32>
    %588 = arith.addf %578, %587 : vector<32x256xf32>
    %c26_543 = arith.constant 26 : index
    %c0_544 = arith.constant 0 : index
    %589 = vector.load %arg11[%c26_543, %c0_544] : memref<288x128xf32, #tpu.memory_space<vmem>>, vector<8x128xf32>
    %c38_545 = arith.constant 38 : index
    %c0_546 = arith.constant 0 : index
    %590 = vector.load %arg11[%c38_545, %c0_546] : memref<288x128xf32, #tpu.memory_space<vmem>>, vector<8x128xf32>
    %c50_547 = arith.constant 50 : index
    %c0_548 = arith.constant 0 : index
    %591 = vector.load %arg11[%c50_547, %c0_548] : memref<288x128xf32, #tpu.memory_space<vmem>>, vector<8x128xf32>
    %c62_549 = arith.constant 62 : index
    %c0_550 = arith.constant 0 : index
    %592 = vector.load %arg11[%c62_549, %c0_550] : memref<288x128xf32, #tpu.memory_space<vmem>>, vector<8x128xf32>
    %593 = tpu.concatenate %589, %590, %591, %592 in 0 : vector<8x128xf32>, vector<8x128xf32>, vector<8x128xf32>, vector<8x128xf32> -> vector<32x128xf32>
    %594 = arith.truncf %593 : vector<32x128xf32> to vector<32x128xbf16>
    %c13_551 = arith.constant 13 : index
    %c0_552 = arith.constant 0 : index
    %c0_553 = arith.constant 0 : index
    %595 = vector.load %arg3[%c13_551, %c0_552, %c0_553] : memref<16x128x256xbf16, #tpu.memory_space<vmem>>, vector<1x128x256xbf16>
    %596 = vector.shape_cast %595 : vector<1x128x256xbf16> to vector<128x256xbf16>
    %cst_554 = arith.constant dense<0.000000e+00> : vector<32x256xf32>
    %597 = tpu.matmul %594, %596, %cst_554 {dimension_numbers = #tpu.dot_dimension_numbers<[1], [0], [0], [1], [0, 0, 1, 1], [], []>} : vector<32x128xbf16>, vector<128x256xbf16>, vector<32x256xf32> -> vector<32x256xf32>
    %598 = arith.addf %588, %597 : vector<32x256xf32>
    %c98_555 = arith.constant 98 : index
    %c0_556 = arith.constant 0 : index
    %599 = vector.load %arg11[%c98_555, %c0_556] : memref<288x128xf32, #tpu.memory_space<vmem>>, vector<8x128xf32>
    %c110_557 = arith.constant 110 : index
    %c0_558 = arith.constant 0 : index
    %600 = vector.load %arg11[%c110_557, %c0_558] : memref<288x128xf32, #tpu.memory_space<vmem>>, vector<8x128xf32>
    %c122_559 = arith.constant 122 : index
    %c0_560 = arith.constant 0 : index
    %601 = vector.load %arg11[%c122_559, %c0_560] : memref<288x128xf32, #tpu.memory_space<vmem>>, vector<8x128xf32>
    %c134 = arith.constant 134 : index
    %c0_561 = arith.constant 0 : index
    %602 = vector.load %arg11[%c134, %c0_561] : memref<288x128xf32, #tpu.memory_space<vmem>>, vector<8x128xf32>
    %603 = tpu.concatenate %599, %600, %601, %602 in 0 : vector<8x128xf32>, vector<8x128xf32>, vector<8x128xf32>, vector<8x128xf32> -> vector<32x128xf32>
    %604 = arith.truncf %603 : vector<32x128xf32> to vector<32x128xbf16>
    %c14_562 = arith.constant 14 : index
    %c0_563 = arith.constant 0 : index
    %c0_564 = arith.constant 0 : index
    %605 = vector.load %arg3[%c14_562, %c0_563, %c0_564] : memref<16x128x256xbf16, #tpu.memory_space<vmem>>, vector<1x128x256xbf16>
    %606 = vector.shape_cast %605 : vector<1x128x256xbf16> to vector<128x256xbf16>
    %cst_565 = arith.constant dense<0.000000e+00> : vector<32x256xf32>
    %607 = tpu.matmul %604, %606, %cst_565 {dimension_numbers = #tpu.dot_dimension_numbers<[1], [0], [0], [1], [0, 0, 1, 1], [], []>} : vector<32x128xbf16>, vector<128x256xbf16>, vector<32x256xf32> -> vector<32x256xf32>
    %608 = arith.addf %598, %607 : vector<32x256xf32>
    %c28_566 = arith.constant 28 : index
    %c0_567 = arith.constant 0 : index
    %609 = vector.load %arg11[%c28_566, %c0_567] : memref<288x128xf32, #tpu.memory_space<vmem>>, vector<8x128xf32>
    %c40_568 = arith.constant 40 : index
    %c0_569 = arith.constant 0 : index
    %610 = vector.load %arg11[%c40_568, %c0_569] : memref<288x128xf32, #tpu.memory_space<vmem>>, vector<8x128xf32>
    %c52_570 = arith.constant 52 : index
    %c0_571 = arith.constant 0 : index
    %611 = vector.load %arg11[%c52_570, %c0_571] : memref<288x128xf32, #tpu.memory_space<vmem>>, vector<8x128xf32>
    %c64_572 = arith.constant 64 : index
    %c0_573 = arith.constant 0 : index
    %612 = vector.load %arg11[%c64_572, %c0_573] : memref<288x128xf32, #tpu.memory_space<vmem>>, vector<8x128xf32>
    %613 = tpu.concatenate %609, %610, %611, %612 in 0 : vector<8x128xf32>, vector<8x128xf32>, vector<8x128xf32>, vector<8x128xf32> -> vector<32x128xf32>
    %614 = arith.truncf %613 : vector<32x128xf32> to vector<32x128xbf16>
    %c15_574 = arith.constant 15 : index
    %c0_575 = arith.constant 0 : index
    %c0_576 = arith.constant 0 : index
    %615 = vector.load %arg3[%c15_574, %c0_575, %c0_576] : memref<16x128x256xbf16, #tpu.memory_space<vmem>>, vector<1x128x256xbf16>
    %616 = vector.shape_cast %615 : vector<1x128x256xbf16> to vector<128x256xbf16>
    %cst_577 = arith.constant dense<0.000000e+00> : vector<32x256xf32>
    %617 = tpu.matmul %614, %616, %cst_577 {dimension_numbers = #tpu.dot_dimension_numbers<[1], [0], [0], [1], [0, 0, 1, 1], [], []>} : vector<32x128xbf16>, vector<128x256xbf16>, vector<32x256xf32> -> vector<32x256xf32>
    %618 = arith.addf %608, %617 : vector<32x256xf32>
    %cst_578 = arith.constant dense<0.000000e+00> : vector<256xf32>
    %619 = vector.multi_reduction <add>, %618, %cst_578 [0] : vector<32x256xf32> to vector<256xf32>
    %620 = vector.shape_cast %619 : vector<256xf32> to vector<1x256xf32>
    %cst_579 = arith.constant 3.200000e+01 : f32
    %621 = vector.broadcast %cst_579 : f32 to vector<1x256xf32>
    %622 = arith.divf %620, %621 : vector<1x256xf32>
    %623 = vector.broadcast %622 : vector<1x256xf32> to vector<32x256xf32>
    %624 = arith.subf %618, %623 : vector<32x256xf32>
    %625 = arith.mulf %624, %624 : vector<32x256xf32>
    %cst_580 = arith.constant dense<0.000000e+00> : vector<256xf32>
    %626 = vector.multi_reduction <add>, %625, %cst_580 [0] : vector<32x256xf32> to vector<256xf32>
    %627 = vector.shape_cast %626 : vector<256xf32> to vector<1x256xf32>
    %cst_581 = arith.constant 3.200000e+01 : f32
    %628 = vector.broadcast %cst_581 : f32 to vector<1x256xf32>
    %629 = arith.divf %627, %628 : vector<1x256xf32>
    %630 = vector.broadcast %622 : vector<1x256xf32> to vector<32x256xf32>
    %631 = arith.subf %618, %630 : vector<32x256xf32>
    %cst_582 = arith.constant 9.99999974E-6 : f32
    %632 = vector.broadcast %cst_582 : f32 to vector<1x256xf32>
    %633 = arith.addf %629, %632 : vector<1x256xf32>
    %634 = math.rsqrt %633 : vector<1x256xf32>
    %635 = vector.broadcast %634 : vector<1x256xf32> to vector<32x256xf32>
    %636 = arith.mulf %631, %635 : vector<32x256xf32>
    %c0_583 = arith.constant 0 : index
    %c0_584 = arith.constant 0 : index
    %637 = vector.load %arg7[%c0_583, %c0_584] : memref<1x256xf32, #tpu.memory_space<vmem>>, vector<1x256xf32>
    %638 = vector.broadcast %637 : vector<1x256xf32> to vector<32x256xf32>
    %639 = arith.mulf %636, %638 : vector<32x256xf32>
    %c0_585 = arith.constant 0 : index
    %c0_586 = arith.constant 0 : index
    %640 = vector.load %arg8[%c0_585, %c0_586] : memref<1x256xf32, #tpu.memory_space<vmem>>, vector<1x256xf32>
    %641 = vector.broadcast %640 : vector<1x256xf32> to vector<32x256xf32>
    %642 = arith.addf %639, %641 : vector<32x256xf32>
    %cst_587 = arith.constant 0.000000e+00 : f32
    %643 = vector.broadcast %cst_587 : f32 to vector<32x256xf32>
    %644 = arith.cmpf ogt, %642, %643 : vector<32x256xf32>
    %cst_588 = arith.constant 2.000000e-01 : f32
    %645 = vector.broadcast %cst_588 : f32 to vector<32x256xf32>
    %646 = arith.mulf %645, %642 : vector<32x256xf32>
    %647 = arith.select %644, %642, %646 : vector<32x256xi1>, vector<32x256xf32>
    %c0_589 = arith.constant 0 : index
    %c0_590 = arith.constant 0 : index
    %648 = vector.load %arg4[%c0_589, %c0_590] : memref<32x256xf32, #tpu.memory_space<vmem>>, vector<32x256xf32>
    %649 = arith.mulf %647, %648 : vector<32x256xf32>
    %cst_591 = arith.constant dense<0.000000e+00> : vector<32xf32>
    %650 = vector.multi_reduction <add>, %649, %cst_591 [1] : vector<32x256xf32> to vector<32xf32>
    %651 = vector.shape_cast %650 : vector<32xf32> to vector<32x1xf32>
    %652 = tpu.iota {dimensions = array<i32: 0>} : vector<32x2xi32>
    %653 = tpu.iota {dimensions = array<i32: 1>} : vector<32x2xi32>
    %c2_i32 = arith.constant 2 : i32
    %c0_i32 = arith.constant 0 : i32
    %654 = arith.cmpi eq, %c2_i32, %c0_i32 : i32
    %c1_i32 = arith.constant 1 : i32
    %655 = arith.select %654, %c1_i32, %c2_i32 : i32
    %656 = vector.broadcast %655 : i32 to vector<32x2xi32>
    %657 = arith.remsi %652, %656 : vector<32x2xi32>
    %c0_i32_592 = arith.constant 0 : i32
    %658 = vector.broadcast %c0_i32_592 : i32 to vector<32x2xi32>
    %659 = arith.cmpi ne, %657, %658 : vector<32x2xi32>
    %c0_i32_593 = arith.constant 0 : i32
    %660 = vector.broadcast %c0_i32_593 : i32 to vector<32x2xi32>
    %661 = arith.cmpi slt, %657, %660 : vector<32x2xi32>
    %c0_i32_594 = arith.constant 0 : i32
    %662 = arith.cmpi slt, %655, %c0_i32_594 : i32
    %663 = vector.broadcast %662 : i1 to vector<32x2xi1>
    %664 = vector.broadcast %663 : vector<32x2xi1> to vector<32x2xi1>
    %665 = arith.xori %661, %664 : vector<32x2xi1>
    %666 = arith.andi %665, %659 : vector<32x2xi1>
    %667 = vector.broadcast %655 : i32 to vector<32x2xi32>
    %668 = arith.addi %657, %667 : vector<32x2xi32>
    %669 = arith.select %666, %668, %657 : vector<32x2xi1>, vector<32x2xi32>
    %670 = arith.cmpi eq, %669, %653 : vector<32x2xi32>
    %cst_595 = arith.constant 1.000000e+00 : f32
    %cst_596 = arith.constant 0.000000e+00 : f32
    %671 = vector.broadcast %cst_595 : f32 to vector<32x2xf32>
    %672 = vector.broadcast %cst_596 : f32 to vector<32x2xf32>
    %673 = arith.select %670, %671, %672 : vector<32x2xi1>, vector<32x2xf32>
    %674 = vector.broadcast %651 : vector<32x1xf32> to vector<32x2xf32>
    %675 = arith.mulf %674, %673 : vector<32x2xf32>
    %cst_597 = arith.constant dense<0.000000e+00> : vector<2xf32>
    %676 = vector.multi_reduction <add>, %675, %cst_597 [0] : vector<32x2xf32> to vector<2xf32>
    %677 = vector.shape_cast %676 : vector<2xf32> to vector<1x2xf32>
    %cst_598 = arith.constant 0.000000e+00 : f32
    %678 = vector.broadcast %cst_598 : f32 to vector<1x2xf32>
    %679 = arith.subf %678, %677 : vector<1x2xf32>
    %680 = math.exp %679 : vector<1x2xf32>
    %cst_599 = arith.constant 1.000000e+00 : f32
    %681 = vector.broadcast %cst_599 : f32 to vector<1x2xf32>
    %682 = arith.addf %681, %680 : vector<1x2xf32>
    %cst_600 = arith.constant 1.000000e+00 : f32
    %683 = vector.broadcast %cst_600 : f32 to vector<1x2xf32>
    %684 = arith.divf %683, %682 : vector<1x2xf32>
    %c0_601 = arith.constant 0 : index
    %c0_602 = arith.constant 0 : index
    %685 = vector.load %arg9[%c0_601, %c0_602] : memref<1x2xf32, #tpu.memory_space<vmem>>, vector<1x2xf32>
    tpu.vector_store %arg9[%c0_601, %c0_602], %684 {strides = array<i32>} : memref<1x2xf32, #tpu.memory_space<vmem>>, vector<1x2xf32>,
    return
  }
}

</mosaic_0001>

<bundles_post_ra>
// kernel: discriminator_forward.1
= control target key start
LH: loop header
LB: loop body
LE: loop exit
PB: predicated region body
PF: predicated region fallthrough
CT: control target
= control target key end

     0   :  { %vm34_vm0 = vcmask 523264   ;;  %v9387_v2 = vmov 0.0   ;;  %vm443_vm1 = vcmask 785408   ;;  %s11468_s0 = inlined_call_operand.vmem [shape: bf16[512,96], index: 0, kind: input, shape index: {}]   ;;  %s11469_s1 = inlined_call_operand.vmem [shape: bf16[96,64], index: 1, kind: input, shape index: {}]   ;;  %s11470_s2 = inlined_call_operand.vmem [shape: bf16[16,64,128], index: 2, kind: input, shape index: {}]   ;;  %s11471_s3 = inlined_call_operand.vmem [shape: bf16[16,128,256], index: 3, kind: input, shape index: {}]   ;;  %s11472_s4 = inlined_call_operand.vmem [shape: f32[32,256], index: 4, kind: input, shape index: {}]   ;;  %s11473_s5 = inlined_call_operand.vmem [shape: f32[1,128], index: 5, kind: input, shape index: {}]   ;;  %s11474_s6 = inlined_call_operand.vmem [shape: f32[1,128], index: 6, kind: input, shape index: {}]   ;;  %s11475_s7 = inlined_call_operand.vmem [shape: f32[1,256], index: 7, kind: input, shape index: {}]   ;;  %s11476_s8 = inlined_call_operand.vmem [shape: f32[1,256], index: 8, kind: input, shape index: {}]   ;;  %s11477_s9 = inlined_call_operand.hbm [shape: f32[1,2], index: 9, kind: output, shape index: {}]  }
   0x1   :  { %v8865_v0 = vld [vmem:[%s11469_s1] sm:$0xff]   ;;  %v9446_v1 = vld [vmem:[%s11469_s1 + $0x8] sm:$0xff]   ;;  %40 = vst.msk [vmem:[#allocation2 + $0x28] sm:$0xff] %vm34_vm0, %v9387_v2  ;;  %41 = vst.msk [vmem:[#allocation2 + $0x30] sm:$0xff] %vm34_vm0, %v9387_v2 }
   0x2   :  { %8030 = vmatprep.subr.bf16.mxu0 %v8865_v0  ;;  %8490 = vmatprep.subr.bf16.mxu1 %v8865_v0  ;;  %135 = vst [vmem:[#allocation3] sm:$0xff] %v9387_v2  ;;  %37 = vst.msk [vmem:[#allocation2 + $0x10] sm:$0xff] %vm34_vm0, %v9387_v2  ;;  %v8867_v3 = vld [vmem:[%s11469_s1 + $0x10] sm:$0xff]   ;;  %v8871_v4 = vld [vmem:[%s11468_s0] sm:$0xff]  }
   0x3   :  { %8031 = vmatpush3.bf16.msra.mxu0 %v8865_v0  ;;  %8496 = vmatpush3.bf16.msra.mxu1 %v8865_v0  ;;  %38 = vst.msk [vmem:[#allocation2 + $0x18] sm:$0xff] %vm34_vm0, %v9387_v2  ;;  %39 = vst.msk [vmem:[#allocation2 + $0x20] sm:$0xff] %vm34_vm0, %v9387_v2  ;;  %v8868_v5 = vld [vmem:[%s11469_s1 + $0x18] sm:$0xff]   ;;  %v8869_v6 = vld [vmem:[%s11469_s1 + $0x20] sm:$0xff]  }
   0x4   :  { %42 = vst.msk [vmem:[#allocation2 + $0x38] sm:$0xff] %vm34_vm0, %v9387_v2  ;;  %43 = vst.msk [vmem:[#allocation2 + $0x40] sm:$0xff] %vm34_vm0, %v9387_v2  ;;  %8032 = vmatprep.subr.bf16.mxu0 %v9446_v1  ;;  %8491 = vmatprep.subr.bf16.mxu1 %v9446_v1  ;;  %v8870_v7 = vld [vmem:[%s11469_s1 + $0x28] sm:$0xff]   ;;  %v8873_v9 = vld [vmem:[%s11468_s0 + $0x10] sm:$0xff]  }
   0x5   :  { %44 = vst.msk [vmem:[#allocation2 + $0x48] sm:$0xff] %vm34_vm0, %v9387_v2  ;;  %45 = vst.msk [vmem:[#allocation2 + $0x50] sm:$0xff] %vm34_vm0, %v9387_v2  ;;  %8042 = vmatprep.mubr.msk.bf16.mxu0 %vm443_vm1, %v8871_v4  ;;  %v8872_v8 = vld [vmem:[%s11468_s0 + $0x8] sm:$0xff]   ;;  %v8889_v10 = vld [vmem:[%s11468_s0 + $0x90] sm:$0xff]  }
   0x6   :  { %46 = vst.msk [vmem:[#allocation2 + $0x58] sm:$0xff] %vm34_vm0, %v9387_v2  ;;  %47 = vst.msk [vmem:[#allocation2 + $0x60] sm:$0xff] %vm34_vm0, %v9387_v2  ;;  %v8890_v11 = vld [vmem:[%s11468_s0 + $0x98] sm:$0xff]   ;;  %8078 = vmatprep.mubr.msk.bf16.mxu1 %vm443_vm1, %v8889_v10  ;;  %v8891_v12 = vld [vmem:[%s11468_s0 + $0xa0] sm:$0xff]  }
   0x7   :  { %48 = vst.msk [vmem:[#allocation2 + $0x68] sm:$0xff] %vm34_vm0, %v9387_v2  ;;  %49 = vst.msk [vmem:[#allocation2 + $0x70] sm:$0xff] %vm34_vm0, %v9387_v2  ;;  %8033 = vmatpush3.bf16.msra.mxu0 %v9446_v1  ;;  %8497 = vmatpush3.bf16.msra.mxu1 %v9446_v1  ;;  %v8874_v13 = vld [vmem:[%s11468_s0 + $0x18] sm:$0xff]   ;;  %v8875_v14 = vld [vmem:[%s11468_s0 + $0x20] sm:$0xff]  }
   0x8   :  { %50 = vst.msk [vmem:[#allocation2 + $0x78] sm:$0xff] %vm34_vm0, %v9387_v2  ;;  %51 = vst.msk [vmem:[#allocation2 + $0x80] sm:$0xff] %vm34_vm0, %v9387_v2  ;;  %8034 = vmatprep.subr.bf16.mxu0 %v8867_v3  ;;  %8492 = vmatprep.subr.bf16.mxu1 %v8867_v3  ;;  %v8892_v15 = vld [vmem:[%s11468_s0 + $0xa8] sm:$0xff]   ;;  %v8893_v16 = vld [vmem:[%s11468_s0 + $0xb0] sm:$0xff]  }
   0x9   :  { %52 = vst.msk [vmem:[#allocation2 + $0x88] sm:$0xff] %vm34_vm0, %v9387_v2  ;;  %53 = vst.msk [vmem:[#allocation2 + $0x90] sm:$0xff] %vm34_vm0, %v9387_v2  ;;  %v8876_v17 = vld [vmem:[%s11468_s0 + $0x28] sm:$0xff]   ;;  %v8877_v18 = vld [vmem:[%s11468_s0 + $0x30] sm:$0xff]  }
   0xa   :  { %54 = vst.msk [vmem:[#allocation2 + $0x98] sm:$0xff] %vm34_vm0, %v9387_v2  ;;  %55 = vst.msk [vmem:[#allocation2 + $0xa0] sm:$0xff] %vm34_vm0, %v9387_v2  ;;  %v8894_v19 = vld [vmem:[%s11468_s0 + $0xb8] sm:$0xff]   ;;  %v8895_v20 = vld [vmem:[%s11468_s0 + $0xc0] sm:$0xff]  }
   0xb   :  { %56 = vst.msk [vmem:[#allocation2 + $0xa8] sm:$0xff] %vm34_vm0, %v9387_v2  ;;  %57 = vst.msk [vmem:[#allocation2 + $0xb0] sm:$0xff] %vm34_vm0, %v9387_v2  ;;  %8035 = vmatpush3.bf16.msra.mxu0 %v8867_v3  ;;  %8498 = vmatpush3.bf16.msra.mxu1 %v8867_v3  ;;  %v8878_v21 = vld [vmem:[%s11468_s0 + $0x38] sm:$0xff]   ;;  %v8879_v22 = vld [vmem:[%s11468_s0 + $0x40] sm:$0xff]  }
   0xc   :  { %58 = vst.msk [vmem:[#allocation2 + $0xb8] sm:$0xff] %vm34_vm0, %v9387_v2  ;;  %59 = vst.msk [vmem:[#allocation2 + $0xc0] sm:$0xff] %vm34_vm0, %v9387_v2  ;;  %8036 = vmatprep.subr.bf16.mxu0 %v8868_v5  ;;  %8493 = vmatprep.subr.bf16.mxu1 %v8868_v5  ;;  %v8896_v23 = vld [vmem:[%s11468_s0 + $0xc8] sm:$0xff]   ;;  %v8897_v24 = vld [vmem:[%s11468_s0 + $0xd0] sm:$0xff]  }
   0xd   :  { %62 = vst.msk [vmem:[#allocation2 + $0xd8] sm:$0xff] %vm34_vm0, %v9387_v2  ;;  %63 = vst.msk [vmem:[#allocation2 + $0xe0] sm:$0xff] %vm34_vm0, %v9387_v2  ;;  %v8880_v25 = vld [vmem:[%s11468_s0 + $0x48] sm:$0xff]   ;;  %v8881_v26 = vld [vmem:[%s11468_s0 + $0x50] sm:$0xff]  }
   0xe   :  { %64 = vst.msk [vmem:[#allocation2 + $0xe8] sm:$0xff] %vm34_vm0, %v9387_v2  ;;  %65 = vst.msk [vmem:[#allocation2 + $0xf0] sm:$0xff] %vm34_vm0, %v9387_v2  ;;  %v8898_v27 = vld [vmem:[%s11468_s0 + $0xd8] sm:$0xff]   ;;  %v8899_v28 = vld [vmem:[%s11468_s0 + $0xe0] sm:$0xff]  }
   0xf   :  { %66 = vst.msk [vmem:[#allocation2 + $0xf8] sm:$0xff] %vm34_vm0, %v9387_v2  ;;  %67 = vst.msk [vmem:[#allocation2 + $0x100] sm:$0xff] %vm34_vm0, %v9387_v2  ;;  %8037 = vmatpush3.bf16.msra.mxu0 %v8868_v5  ;;  %8499 = vmatpush3.bf16.msra.mxu1 %v8868_v5  ;;  %v8882_v29 = vld [vmem:[%s11468_s0 + $0x58] sm:$0xff]   ;;  %v8883_v30 = vld [vmem:[%s11468_s0 + $0x60] sm:$0xff]  }
  0x10   :  { %68 = vst.msk [vmem:[#allocation2 + $0x108] sm:$0xff] %vm34_vm0, %v9387_v2  ;;  %69 = vst.msk [vmem:[#allocation2 + $0x110] sm:$0xff] %vm34_vm0, %v9387_v2  ;;  %8038 = vmatprep.subr.bf16.mxu0 %v8869_v6  ;;  %8494 = vmatprep.subr.bf16.mxu1 %v8869_v6  ;;  %v8900_v31 = vld [vmem:[%s11468_s0 + $0xe8] sm:$0xff]   ;;  %v8901_v32 = vld [vmem:[%s11468_s0 + $0xf0] sm:$0xff]  }
  0x11   :  { %70 = vst.msk [vmem:[#allocation2 + $0x118] sm:$0xff] %vm34_vm0, %v9387_v2  ;;  %71 = vst.msk [vmem:[#allocation2 + $0x120] sm:$0xff] %vm34_vm0, %v9387_v2  ;;  %v8884_v33 = vld [vmem:[%s11468_s0 + $0x68] sm:$0xff]   ;;  %v8885_v34 = vld [vmem:[%s11468_s0 + $0x70] sm:$0xff]  }
  0x12   :  { %72 = vst.msk [vmem:[#allocation2 + $0x128] sm:$0xff] %vm34_vm0, %v9387_v2  ;;  %73 = vst.msk [vmem:[#allocation2 + $0x130] sm:$0xff] %vm34_vm0, %v9387_v2  ;;  %v8902_v35 = vld [vmem:[%s11468_s0 + $0xf8] sm:$0xff]   ;;  %v8887_v37 = vld [vmem:[%s11468_s0 + $0x80] sm:$0xff]  }
  0x13   :  { %74 = vst.msk [vmem:[#allocation2 + $0x138] sm:$0xff] %vm34_vm0, %v9387_v2  ;;  %75 = vst.msk [vmem:[#allocation2 + $0x140] sm:$0xff] %vm34_vm0, %v9387_v2  ;;  %8039 = vmatpush3.bf16.msra.mxu0 %v8869_v6  ;;  %8500 = vmatpush3.bf16.msra.mxu1 %v8869_v6  ;;  %v8886_v36 = vld [vmem:[%s11468_s0 + $0x78] sm:$0xff]   ;;  %v8888_v38 = vld [vmem:[%s11468_s0 + $0x88] sm:$0xff]  }
  0x14   :  { %76 = vst.msk [vmem:[#allocation2 + $0x148] sm:$0xff] %vm34_vm0, %v9387_v2  ;;  %77 = vst.msk [vmem:[#allocation2 + $0x150] sm:$0xff] %vm34_vm0, %v9387_v2  ;;  %8040 = vmatprep.subr.bf16.mxu0 %v8870_v7  ;;  %8495 = vmatprep.subr.bf16.mxu1 %v8870_v7  ;;  %v8903_v39 = vld [vmem:[%s11470_s2 + $0x20] sm:$0xff]   ;;  %v8904_v40 = vld [vmem:[%s11470_s2 + $0x28] sm:$0xff]  }
  0x15   :  { %78 = vst.msk [vmem:[#allocation2 + $0x158] sm:$0xff] %vm34_vm0, %v9387_v2  ;;  %79 = vst.msk [vmem:[#allocation2 + $0x160] sm:$0xff] %vm34_vm0, %v9387_v2  ;;  %v8905_v41 = vld [vmem:[%s11470_s2 + $0x30] sm:$0xff]  }
  0x16   :  { %80 = vst.msk [vmem:[#allocation2 + $0x168] sm:$0xff] %vm34_vm0, %v9387_v2  ;;  %81 = vst.msk [vmem:[#allocation2 + $0x170] sm:$0xff] %vm34_vm0, %v9387_v2 }
  0x17   :  { %82 = vst.msk [vmem:[#allocation2 + $0x178] sm:$0xff] %vm34_vm0, %v9387_v2  ;;  %83 = vst.msk [vmem:[#allocation2 + $0x180] sm:$0xff] %vm34_vm0, %v9387_v2  ;;  %8041 = vmatpush3.bf16.msra.mxu0 %v8870_v7  ;;  %8501 = vmatpush3.bf16.msra.mxu1 %v8870_v7 }
  0x18   :  { %84 = vst.msk [vmem:[#allocation2 + $0x188] sm:$0xff] %vm34_vm0, %v9387_v2  ;;  %85 = vst.msk [vmem:[#allocation2 + $0x190] sm:$0xff] %vm34_vm0, %v9387_v2  ;;  %8106 = vmatprep.subr.bf16.mxu1 %v8903_v39 }
  0x19   :  { %86 = vst.msk [vmem:[#allocation2 + $0x198] sm:$0xff] %vm34_vm0, %v9387_v2  ;;  %87 = vst.msk [vmem:[#allocation2 + $0x1a0] sm:$0xff] %vm34_vm0, %v9387_v2 }
  0x1a   :  { %88 = vst.msk [vmem:[#allocation2 + $0x1a8] sm:$0xff] %vm34_vm0, %v9387_v2  ;;  %89 = vst.msk [vmem:[#allocation2 + $0x1b0] sm:$0xff] %vm34_vm0, %v9387_v2  ;;  %8043 = vmatmul.mubr.msk.bf16.vlgmr.msra.gmra.mrb[0].mxu0 %vm443_vm1, %v8872_v8  ;;  %8079 = vmatmul.mubr.msk.bf16.vlgmr.msra.gmra.mrb[0].mxu1 %vm443_vm1, %v8890_v11 }
  0x1b   :  { %90 = vst.msk [vmem:[#allocation2 + $0x1b8] sm:$0xff] %vm34_vm0, %v9387_v2  ;;  %91 = vst.msk [vmem:[#allocation2 + $0x1c0] sm:$0xff] %vm34_vm0, %v9387_v2  ;;  %8046 = vmatprep.mubr.msk.bf16.mxu0 %vm443_vm1, %v8873_v9  ;;  %8082 = vmatprep.mubr.msk.bf16.mxu1 %vm443_vm1, %v8891_v12 }
  0x1c   :  { %92 = vst.msk [vmem:[#allocation2 + $0x1c8] sm:$0xff] %vm34_vm0, %v9387_v2  ;;  %93 = vst.msk [vmem:[#allocation2 + $0x1d0] sm:$0xff] %vm34_vm0, %v9387_v2  ;;  %8107 = vmatpush3.bf16.msra.mxu1 %v8903_v39 }
  0x1d   :  { %94 = vst.msk [vmem:[#allocation2 + $0x1d8] sm:$0xff] %vm34_vm0, %v9387_v2  ;;  %95 = vst.msk [vmem:[#allocation2 + $0x1e0] sm:$0xff] %vm34_vm0, %v9387_v2  ;;  %8108 = vmatprep.subr.bf16.mxu1 %v8904_v40 }
  0x1e   :  { %96 = vst.msk [vmem:[#allocation2 + $0x1e8] sm:$0xff] %vm34_vm0, %v9387_v2  ;;  %97 = vst.msk [vmem:[#allocation2 + $0x1f0] sm:$0xff] %vm34_vm0, %v9387_v2 }
  0x1f   :  { %98 = vst.msk [vmem:[#allocation2 + $0x1f8] sm:$0xff] %vm34_vm0, %v9387_v2  ;;  %99 = vst.msk [vmem:[#allocation2 + $0x200] sm:$0xff] %vm34_vm0, %v9387_v2 }
  0x20   :  { %100 = vst.msk [vmem:[#allocation2 + $0x208] sm:$0xff] %vm34_vm0, %v9387_v2  ;;  %101 = vst.msk [vmem:[#allocation2 + $0x210] sm:$0xff] %vm34_vm0, %v9387_v2  ;;  %8109 = vmatpush3.bf16.msra.mxu1 %v8904_v40 }
  0x21   :  { %102 = vst.msk [vmem:[#allocation2 + $0x218] sm:$0xff] %vm34_vm0, %v9387_v2  ;;  %103 = vst.msk [vmem:[#allocation2 + $0x220] sm:$0xff] %vm34_vm0, %v9387_v2  ;;  %8110 = vmatprep.subr.bf16.mxu1 %v8905_v41 }
  0x22   :  { %104 = vst.msk [vmem:[#allocation2 + $0x228] sm:$0xff] %vm34_vm0, %v9387_v2  ;;  %105 = vst.msk [vmem:[#allocation2 + $0x230] sm:$0xff] %vm34_vm0, %v9387_v2  ;;  %8047 = vmatmul.mubr.msk.bf16.gmra.mrb[4].mxu0 %vm443_vm1, %v8874_v13  ;;  %8083 = vmatmul.mubr.msk.bf16.gmra.mrb[4].mxu1 %vm443_vm1, %v8892_v15 }
  0x23   :  { %106 = vst.msk [vmem:[#allocation2 + $0x238] sm:$0xff] %vm34_vm0, %v9387_v2  ;;  %107 = vst.msk [vmem:[#allocation2 + $0x240] sm:$0xff] %vm34_vm0, %v9387_v2  ;;  %8050 = vmatprep.mubr.msk.bf16.mxu0 %vm443_vm1, %v8875_v14  ;;  %8086 = vmatprep.mubr.msk.bf16.mxu1 %vm443_vm1, %v8893_v16 }
  0x24   :  { %110 = vst.msk [vmem:[#allocation2 + $0x258] sm:$0xff] %vm34_vm0, %v9387_v2  ;;  %111 = vst.msk [vmem:[#allocation2 + $0x260] sm:$0xff] %vm34_vm0, %v9387_v2  ;;  %8111 = vmatpush3.bf16.msra.mxu1 %v8905_v41 }
  0x25   :  { %112 = vst.msk [vmem:[#allocation2 + $0x268] sm:$0xff] %vm34_vm0, %v9387_v2  ;;  %113 = vst.msk [vmem:[#allocation2 + $0x270] sm:$0xff] %vm34_vm0, %v9387_v2 }
  0x26   :  { %114 = vst.msk [vmem:[#allocation2 + $0x278] sm:$0xff] %vm34_vm0, %v9387_v2  ;;  %115 = vst.msk [vmem:[#allocation2 + $0x280] sm:$0xff] %vm34_vm0, %v9387_v2 }
  0x27   :  { %116 = vst.msk [vmem:[#allocation2 + $0x288] sm:$0xff] %vm34_vm0, %v9387_v2  ;;  %117 = vst.msk [vmem:[#allocation2 + $0x290] sm:$0xff] %vm34_vm0, %v9387_v2 }
  0x28   :  { %118 = vst.msk [vmem:[#allocation2 + $0x298] sm:$0xff] %vm34_vm0, %v9387_v2  ;;  %119 = vst.msk [vmem:[#allocation2 + $0x2a0] sm:$0xff] %vm34_vm0, %v9387_v2 }
  0x29   :  { %120 = vst.msk [vmem:[#allocation2 + $0x2a8] sm:$0xff] %vm34_vm0, %v9387_v2  ;;  %121 = vst.msk [vmem:[#allocation2 + $0x2b0] sm:$0xff] %vm34_vm0, %v9387_v2 }
  0x2a   :  { %122 = vst.msk [vmem:[#allocation2 + $0x2b8] sm:$0xff] %vm34_vm0, %v9387_v2  ;;  %123 = vst.msk [vmem:[#allocation2 + $0x2c0] sm:$0xff] %vm34_vm0, %v9387_v2  ;;  %8051 = vmatmul.mubr.msk.bf16.gmra.mrb[8].mxu0 %vm443_vm1, %v8876_v17  ;;  %8087 = vmatmul.mubr.msk.bf16.gmra.mrb[8].mxu1 %vm443_vm1, %v8894_v19 }
  0x2b   :  { %124 = vst.msk [vmem:[#allocation2 + $0x2c8] sm:$0xff] %vm34_vm0, %v9387_v2  ;;  %125 = vst.msk [vmem:[#allocation2 + $0x2d0] sm:$0xff] %vm34_vm0, %v9387_v2  ;;  %8054 = vmatprep.mubr.msk.bf16.mxu0 %vm443_vm1, %v8877_v18  ;;  %8090 = vmatprep.mubr.msk.bf16.mxu1 %vm443_vm1, %v8895_v20 }
  0x2c   :  { %126 = vst.msk [vmem:[#allocation2 + $0x2d8] sm:$0xff] %vm34_vm0, %v9387_v2  ;;  %127 = vst.msk [vmem:[#allocation2 + $0x2e0] sm:$0xff] %vm34_vm0, %v9387_v2 }
  0x2d   :  { %128 = vst.msk [vmem:[#allocation2 + $0x2e8] sm:$0xff] %vm34_vm0, %v9387_v2  ;;  %129 = vst.msk [vmem:[#allocation2 + $0x2f0] sm:$0xff] %vm34_vm0, %v9387_v2 }
  0x2e   :  { %130 = vst.msk [vmem:[#allocation2 + $0x2f8] sm:$0xff] %vm34_vm0, %v9387_v2  ;;  %131 = vst.msk [vmem:[#allocation2 + $0x300] sm:$0xff] %vm34_vm0, %v9387_v2 }
  0x2f   :  { %132 = vst.msk [vmem:[#allocation2 + $0x308] sm:$0xff] %vm34_vm0, %v9387_v2  ;;  %136 = vst [vmem:[#allocation3 + $0x8] sm:$0xff] %v9387_v2 }
  0x30   :  { %137 = vst [vmem:[#allocation3 + $0x10] sm:$0xff] %v9387_v2  ;;  %138 = vst [vmem:[#allocation3 + $0x18] sm:$0xff] %v9387_v2 }
  0x31   :  { %139 = vst [vmem:[#allocation3 + $0x20] sm:$0xff] %v9387_v2  ;;  %140 = vst [vmem:[#allocation3 + $0x28] sm:$0xff] %v9387_v2 }
  0x32   :  { %141 = vst [vmem:[#allocation3 + $0x30] sm:$0xff] %v9387_v2  ;;  %142 = vst [vmem:[#allocation3 + $0x38] sm:$0xff] %v9387_v2  ;;  %8055 = vmatmul.mubr.msk.bf16.gmra.mrb[12].mxu0 %vm443_vm1, %v8878_v21  ;;  %8091 = vmatmul.mubr.msk.bf16.gmra.mrb[12].mxu1 %vm443_vm1, %v8896_v23 }
  0x33   :  { %143 = vst [vmem:[#allocation3 + $0x40] sm:$0xff] %v9387_v2  ;;  %145 = vst [vmem:[#allocation3 + $0x50] sm:$0xff] %v9387_v2  ;;  %8058 = vmatprep.mubr.msk.bf16.mxu0 %vm443_vm1, %v8879_v22  ;;  %8094 = vmatprep.mubr.msk.bf16.mxu1 %vm443_vm1, %v8897_v24 }
  0x34   :  { %146 = vst [vmem:[#allocation3 + $0x58] sm:$0xff] %v9387_v2  ;;  %147 = vst [vmem:[#allocation3 + $0x60] sm:$0xff] %v9387_v2 }
  0x35   :  { %148 = vst [vmem:[#allocation3 + $0x68] sm:$0xff] %v9387_v2  ;;  %149 = vst [vmem:[#allocation3 + $0x70] sm:$0xff] %v9387_v2 }
  0x36   :  { %150 = vst [vmem:[#allocation3 + $0x78] sm:$0xff] %v9387_v2  ;;  %151 = vst [vmem:[#allocation3 + $0x80] sm:$0xff] %v9387_v2 }
  0x37   :  { %152 = vst [vmem:[#allocation3 + $0x88] sm:$0xff] %v9387_v2  ;;  %153 = vst [vmem:[#allocation3 + $0x90] sm:$0xff] %v9387_v2 }
  0x38   :  { %154 = vst [vmem:[#allocation3 + $0x98] sm:$0xff] %v9387_v2  ;;  %155 = vst [vmem:[#allocation3 + $0xa0] sm:$0xff] %v9387_v2 }
  0x39   :  { %156 = vst [vmem:[#allocation3 + $0xa8] sm:$0xff] %v9387_v2  ;;  %157 = vst [vmem:[#allocation3 + $0xb0] sm:$0xff] %v9387_v2 }
  0x3a   :  { %158 = vst [vmem:[#allocation3 + $0xb8] sm:$0xff] %v9387_v2  ;;  %159 = vst [vmem:[#allocation3 + $0xc0] sm:$0xff] %v9387_v2  ;;  %8059 = vmatmul.mubr.msk.bf16.gmra.mrb[16].mxu0 %vm443_vm1, %v8880_v25  ;;  %8095 = vmatmul.mubr.msk.bf16.gmra.mrb[16].mxu1 %vm443_vm1, %v8898_v27 }
  0x3b   :  { %160 = vst [vmem:[#allocation3 + $0xc8] sm:$0xff] %v9387_v2  ;;  %162 = vst [vmem:[#allocation3 + $0xd8] sm:$0xff] %v9387_v2  ;;  %8062 = vmatprep.mubr.msk.bf16.mxu0 %vm443_vm1, %v8881_v26  ;;  %8098 = vmatprep.mubr.msk.bf16.mxu1 %vm443_vm1, %v8899_v28 }
  0x3c   :  { %163 = vst [vmem:[#allocation3 + $0xe0] sm:$0xff] %v9387_v2  ;;  %164 = vst [vmem:[#allocation3 + $0xe8] sm:$0xff] %v9387_v2 }
  0x3d   :  { %165 = vst [vmem:[#allocation3 + $0xf0] sm:$0xff] %v9387_v2  ;;  %166 = vst [vmem:[#allocation3 + $0xf8] sm:$0xff] %v9387_v2 }
  0x3e   :  { %167 = vst [vmem:[#allocation3 + $0x100] sm:$0xff] %v9387_v2  ;;  %168 = vst [vmem:[#allocation3 + $0x108] sm:$0xff] %v9387_v2 }
  0x3f   :  { %169 = vst [vmem:[#allocation3 + $0x110] sm:$0xff] %v9387_v2 }
  0x42   :  { %8063 = vmatmul.mubr.msk.bf16.gmra.mrb[20].mxu0 %vm443_vm1, %v8882_v29  ;;  %8099 = vmatmul.mubr.msk.bf16.gmra.mrb[20].mxu1 %vm443_vm1, %v8900_v31 }
  0x43   :  { %8066 = vmatprep.mubr.msk.bf16.mxu0 %vm443_vm1, %v8883_v30  ;;  %8102 = vmatprep.mubr.msk.bf16.mxu1 %vm443_vm1, %v8901_v32 }
  0x4a   :  { %8067 = vmatmul.mubr.msk.bf16.gmra.mrb[24].mxu0 %vm443_vm1, %v8884_v33  ;;  %8103 = vmatmul.mubr.msk.bf16.gmra.mrb[24].mxu1 %vm443_vm1, %v8902_v35 }
  0x4b   :  { %8070 = vmatprep.mubr.msk.bf16.mxu0 %vm443_vm1, %v8885_v34 }
  0x52   :  { %8071 = vmatmul.mubr.msk.bf16.gmra.mrb[28].mxu0 %vm443_vm1, %v8886_v36 }
  0x53   :  { %8074 = vmatprep.mubr.msk.bf16.mxu0 %vm443_vm1, %v8887_v37 }
  0x5a   :  { %8075 = vmatmul.mubr.msk.bf16.gmra.mrb[32].mxu0 %vm443_vm1, %v8888_v38 }
  0x5b   :  { %14 = vsyncpa [#allocation5], 0  ;;  %v8906_v42 = vld [vmem:[%s11470_s2 + $0x38] sm:$0xff]   ;;  %v9824_v45 = vld [vmem:[%s11470_s2] sm:$0xff]  }
  0x5c   :  { %v1117_v43 = vld [vmem:[#allocation2 + $0x192] sm:$0xff]  ;;  %v1118_v44 = vld [vmem:[#allocation2 + $0x19a] sm:$0xff]  ;;  %8112 = vmatprep.subr.bf16.mxu1 %v8906_v42 }
  0x5d   :  { %v1133_v46 = vpack.c.bf16 %v1118_v44, %v1117_v43  ;;  %8113 = vmatpush3.bf16.msra.mxu1 %v8906_v42 }
  0x5e   :  { %8130 = vmatprep.subr.bf16.mxu1 %v9824_v45 }
  0x5f   :  { %8114 = vmatprep.mubr.msk.bf16.mxu1 %vm34_vm0, %v1133_v46 }
  0xed   :  { %v8044_v47 = vpop.f32.mrb[0].mxu0  ;;  %v8080_v50 = vpop.f32.mrb[0].mxu1 }
  0xee   :  { %vm831_vm2 = vcmp.gt.f32.partialorder %v8044_v47, 0.0  ;;  %v895_v48 = vmul.f32 0.2, %v8044_v47  ;;  %v574_v49 = vpop.f32.mrb[1].mxu0  ;;  %vm867_vm4 = vcmp.gt.f32.partialorder %v8080_v50, 0.0  ;;  %v718_v53 = vpop.f32.mrb[1].mxu1 }
  0xef   :  { %vm829_vm3 = vcmp.gt.f32.partialorder %v574_v49, 0.0  ;;  %v893_v51 = vmul.f32 0.2, %v574_v49  ;;  %v8045_v52 = vpop.f32.mrb[2].mxu0  ;;  %v931_v57 = vmul.f32 0.2, %v8080_v50 }
  0xf0   :  { %v959_v54 = vsel %vm831_vm2, %v8044_v47, %v895_v48  ;;  %vm832_vm5 = vcmp.gt.f32.partialorder %v8045_v52, 0.0  ;;  %v896_v55 = vmul.f32 0.2, %v8045_v52  ;;  %v577_v56 = vpop.f32.mrb[3].mxu0  ;;  %vm865_vm7 = vcmp.gt.f32.partialorder %v718_v53, 0.0  ;;  %v8081_v60 = vpop.f32.mrb[2].mxu1 }
  0xf1   :  { %1023 = vst.msk [vmem:[#allocation2 + $0x2a] sm:$0xff] %vm34_vm0, %v959_v54  ;;  %v957_v58 = vsel %vm829_vm3, %v574_v49, %v893_v51  ;;  %vm830_vm6 = vcmp.gt.f32.partialorder %v577_v56, 0.0  ;;  %v894_v59 = vmul.f32 0.2, %v577_v56  ;;  %v995_v62 = vsel %vm867_vm4, %v8080_v50, %v931_v57  ;;  %v721_v0 = vpop.f32.mrb[3].mxu1 }
  0xf2   :  { %1021 = vst.msk [vmem:[#allocation2 + $0x16] sm:$0xff] %vm34_vm0, %v957_v58  ;;  %v960_v61 = vsel %vm832_vm5, %v8045_v52, %v896_v55  ;;  %v929_v63 = vmul.f32 0.2, %v718_v53  ;;  %vm868_vm8 = vcmp.gt.f32.partialorder %v8081_v60, 0.0  ;;  %1059 = vst.msk [vmem:[#allocation2 + $0x1e2] sm:$0xff] %vm34_vm0, %v995_v62  ;;  %vm866_vm9 = vcmp.gt.f32.partialorder %v721_v0, 0.0 }
  0xf3   :  { %1024 = vst.msk [vmem:[#allocation2 + $0x32] sm:$0xff] %vm34_vm0, %v960_v61  ;;  %v958_v1 = vsel %vm830_vm6, %v577_v56, %v894_v59  ;;  %v932_v2 = vmul.f32 0.2, %v8081_v60  ;;  %v930_v3 = vmul.f32 0.2, %v721_v0 }
  0xf4   :  { %1022 = vst.msk [vmem:[#allocation2 + $0x1e] sm:$0xff] %vm34_vm0, %v958_v1  ;;  %v993_v4 = vsel %vm865_vm7, %v718_v53, %v929_v63 }
  0xf5   :  { %v8048_v5 = vpop.f32.mrb[4].mxu0  ;;  %1057 = vst.msk [vmem:[#allocation2 + $0x1ce] sm:$0xff] %vm34_vm0, %v993_v4  ;;  %v996_v6 = vsel %vm868_vm8, %v8081_v60, %v932_v2  ;;  %v994_v7 = vsel %vm866_vm9, %v721_v0, %v930_v3  ;;  %v8084_v10 = vpop.f32.mrb[4].mxu1 }
  0xf6   :  { %vm835_vm10 = vcmp.gt.f32.partialorder %v8048_v5, 0.0  ;;  %v899_v8 = vmul.f32 0.2, %v8048_v5  ;;  %v590_v9 = vpop.f32.mrb[5].mxu0  ;;  %1060 = vst.msk [vmem:[#allocation2 + $0x1ea] sm:$0xff] %vm34_vm0, %v996_v6  ;;  %1058 = vst.msk [vmem:[#allocation2 + $0x1d6] sm:$0xff] %vm34_vm0, %v994_v7 }
  0xf7   :  { %vm833_vm11 = vcmp.gt.f32.partialorder %v590_v9, 0.0  ;;  %v897_v11 = vmul.f32 0.2, %v590_v9  ;;  %v8049_v12 = vpop.f32.mrb[6].mxu0  ;;  %vm871_vm12 = vcmp.gt.f32.partialorder %v8084_v10, 0.0  ;;  %v734_v13 = vpop.f32.mrb[5].mxu1 }
  0xf8   :  { %v963_v14 = vsel %vm835_vm10, %v8048_v5, %v899_v8  ;;  %vm836_vm13 = vcmp.gt.f32.partialorder %v8049_v12, 0.0  ;;  %v900_v15 = vmul.f32 0.2, %v8049_v12  ;;  %v593_v16 = vpop.f32.mrb[7].mxu0  ;;  %v935_v17 = vmul.f32 0.2, %v8084_v10 }
  0xf9   :  { %1027 = vst.msk [vmem:[#allocation2 + $0x52] sm:$0xff] %vm34_vm0, %v963_v14  ;;  %v961_v18 = vsel %vm833_vm11, %v590_v9, %v897_v11  ;;  %vm834_vm14 = vcmp.gt.f32.partialorder %v593_v16, 0.0  ;;  %v898_v19 = vmul.f32 0.2, %v593_v16  ;;  %vm869_vm15 = vcmp.gt.f32.partialorder %v734_v13, 0.0  ;;  %v8085_v20 = vpop.f32.mrb[6].mxu1 }
  0xfa   :  { %1025 = vst.msk [vmem:[#allocation2 + $0x3e] sm:$0xff] %vm34_vm0, %v961_v18  ;;  %v964_v21 = vsel %vm836_vm13, %v8049_v12, %v900_v15  ;;  %v999_v22 = vsel %vm871_vm12, %v8084_v10, %v935_v17  ;;  %v933_v23 = vmul.f32 0.2, %v734_v13  ;;  %vm872_vm1 = vcmp.gt.f32.partialorder %v8085_v20, 0.0  ;;  %v737_v24 = vpop.f32.mrb[7].mxu1 }
  0xfb   :  { %1028 = vst.msk [vmem:[#allocation2 + $0x5a] sm:$0xff] %vm34_vm0, %v964_v21  ;;  %v962_v25 = vsel %vm834_vm14, %v593_v16, %v898_v19  ;;  %1063 = vst.msk [vmem:[#allocation2 + $0x20a] sm:$0xff] %vm34_vm0, %v999_v22  ;;  %v936_v26 = vmul.f32 0.2, %v8085_v20  ;;  %vm870_vm2 = vcmp.gt.f32.partialorder %v737_v24, 0.0 }
  0xfc   :  { %v934_v27 = vmul.f32 0.2, %v737_v24  ;;  %1026 = vst.msk [vmem:[#allocation2 + $0x46] sm:$0xff] %vm34_vm0, %v962_v25  ;;  %v997_v28 = vsel %vm869_vm15, %v734_v13, %v933_v23 }
  0xfd   :  { %v8052_v29 = vpop.f32.mrb[8].mxu0  ;;  %1061 = vst.msk [vmem:[#allocation2 + $0x1f6] sm:$0xff] %vm34_vm0, %v997_v28  ;;  %v1000_v30 = vsel %vm872_vm1, %v8085_v20, %v936_v26  ;;  %v8088_v34 = vpop.f32.mrb[8].mxu1 }
  0xfe   :  { %v998_v31 = vsel %vm870_vm2, %v737_v24, %v934_v27  ;;  %vm839_vm3 = vcmp.gt.f32.partialorder %v8052_v29, 0.0  ;;  %v903_v32 = vmul.f32 0.2, %v8052_v29  ;;  %v606_v33 = vpop.f32.mrb[9].mxu0  ;;  %1064 = vst.msk [vmem:[#allocation2 + $0x212] sm:$0xff] %vm34_vm0, %v1000_v30  ;;  %vm875_vm5 = vcmp.gt.f32.partialorder %v8088_v34, 0.0 }
  0xff   :  { %1062 = vst.msk [vmem:[#allocation2 + $0x1fe] sm:$0xff] %vm34_vm0, %v998_v31  ;;  %vm837_vm4 = vcmp.gt.f32.partialorder %v606_v33, 0.0  ;;  %v901_v35 = vmul.f32 0.2, %v606_v33  ;;  %v8053_v36 = vpop.f32.mrb[10].mxu0  ;;  %v750_v37 = vpop.f32.mrb[9].mxu1 }
 0x100   :  { %v967_v38 = vsel %vm839_vm3, %v8052_v29, %v903_v32  ;;  %vm840_vm6 = vcmp.gt.f32.partialorder %v8053_v36, 0.0  ;;  %v904_v39 = vmul.f32 0.2, %v8053_v36  ;;  %v609_v40 = vpop.f32.mrb[11].mxu0  ;;  %v939_v41 = vmul.f32 0.2, %v8088_v34 }
 0x101   :  { %1031 = vst.msk [vmem:[#allocation2 + $0x7a] sm:$0xff] %vm34_vm0, %v967_v38  ;;  %v965_v42 = vsel %vm837_vm4, %v606_v33, %v901_v35  ;;  %vm838_vm7 = vcmp.gt.f32.partialorder %v609_v40, 0.0  ;;  %v902_v43 = vmul.f32 0.2, %v609_v40  ;;  %vm873_vm8 = vcmp.gt.f32.partialorder %v750_v37, 0.0  ;;  %v8089_v44 = vpop.f32.mrb[10].mxu1 }
 0x102   :  { %1029 = vst.msk [vmem:[#allocation2 + $0x66] sm:$0xff] %vm34_vm0, %v965_v42  ;;  %v968_v46 = vsel %vm840_vm6, %v8053_v36, %v904_v39  ;;  %v1003_v47 = vsel %vm875_vm5, %v8088_v34, %v939_v41  ;;  %v937_v48 = vmul.f32 0.2, %v750_v37  ;;  %vm876_vm9 = vcmp.gt.f32.partialorder %v8089_v44, 0.0  ;;  %v753_v49 = vpop.f32.mrb[11].mxu1 }
 0x103   :  { %1032 = vst.msk [vmem:[#allocation2 + $0x82] sm:$0xff] %vm34_vm0, %v968_v46  ;;  %v966_v50 = vsel %vm838_vm7, %v609_v40, %v902_v43  ;;  %1067 = vst.msk [vmem:[#allocation2 + $0x232] sm:$0xff] %vm34_vm0, %v1003_v47  ;;  %v940_v51 = vmul.f32 0.2, %v8089_v44  ;;  %vm874_vm10 = vcmp.gt.f32.partialorder %v753_v49, 0.0 }
 0x104   :  { %v938_v52 = vmul.f32 0.2, %v753_v49  ;;  %1030 = vst.msk [vmem:[#allocation2 + $0x6e] sm:$0xff] %vm34_vm0, %v966_v50  ;;  %v1001_v53 = vsel %vm873_vm8, %v750_v37, %v937_v48 }
 0x105   :  { %v8056_v54 = vpop.f32.mrb[12].mxu0  ;;  %1065 = vst.msk [vmem:[#allocation2 + $0x21e] sm:$0xff] %vm34_vm0, %v1001_v53  ;;  %v1004_v55 = vsel %vm876_vm9, %v8089_v44, %v940_v51  ;;  %v8092_v59 = vpop.f32.mrb[12].mxu1 }
 0x106   :  { %v1002_v56 = vsel %vm874_vm10, %v753_v49, %v938_v52  ;;  %vm843_vm11 = vcmp.gt.f32.partialorder %v8056_v54, 0.0  ;;  %v907_v57 = vmul.f32 0.2, %v8056_v54  ;;  %v622_v58 = vpop.f32.mrb[13].mxu0  ;;  %1068 = vst.msk [vmem:[#allocation2 + $0x23a] sm:$0xff] %vm34_vm0, %v1004_v55  ;;  %vm879_vm13 = vcmp.gt.f32.partialorder %v8092_v59, 0.0 }
 0x107   :  { %1066 = vst.msk [vmem:[#allocation2 + $0x226] sm:$0xff] %vm34_vm0, %v1002_v56  ;;  %vm841_vm12 = vcmp.gt.f32.partialorder %v622_v58, 0.0  ;;  %v905_v60 = vmul.f32 0.2, %v622_v58  ;;  %v8057_v61 = vpop.f32.mrb[14].mxu0  ;;  %v766_v62 = vpop.f32.mrb[13].mxu1 }
 0x108   :  { %v971_v63 = vsel %vm843_vm11, %v8056_v54, %v907_v57  ;;  %vm844_vm14 = vcmp.gt.f32.partialorder %v8057_v61, 0.0  ;;  %v908_v0 = vmul.f32 0.2, %v8057_v61  ;;  %v625_v1 = vpop.f32.mrb[15].mxu0  ;;  %v943_v2 = vmul.f32 0.2, %v8092_v59 }
 0x109   :  { %1035 = vst.msk [vmem:[#allocation2 + $0xa2] sm:$0xff] %vm34_vm0, %v971_v63  ;;  %v969_v3 = vsel %vm841_vm12, %v622_v58, %v905_v60  ;;  %vm842_vm15 = vcmp.gt.f32.partialorder %v625_v1, 0.0  ;;  %v906_v4 = vmul.f32 0.2, %v625_v1  ;;  %vm877_vm1 = vcmp.gt.f32.partialorder %v766_v62, 0.0  ;;  %v8093_v5 = vpop.f32.mrb[14].mxu1 }
 0x10a   :  { %1033 = vst.msk [vmem:[#allocation2 + $0x8e] sm:$0xff] %vm34_vm0, %v969_v3  ;;  %v972_v6 = vsel %vm844_vm14, %v8057_v61, %v908_v0  ;;  %v1007_v7 = vsel %vm879_vm13, %v8092_v59, %v943_v2  ;;  %v941_v8 = vmul.f32 0.2, %v766_v62  ;;  %vm880_vm2 = vcmp.gt.f32.partialorder %v8093_v5, 0.0  ;;  %v769_v9 = vpop.f32.mrb[15].mxu1 }
 0x10b   :  { %1036 = vst.msk [vmem:[#allocation2 + $0xaa] sm:$0xff] %vm34_vm0, %v972_v6  ;;  %v970_v10 = vsel %vm842_vm15, %v625_v1, %v906_v4  ;;  %1071 = vst.msk [vmem:[#allocation2 + $0x282] sm:$0xff] %vm34_vm0, %v1007_v7  ;;  %v944_v11 = vmul.f32 0.2, %v8093_v5  ;;  %vm878_vm3 = vcmp.gt.f32.partialorder %v769_v9, 0.0 }
 0x10c   :  { %v942_v12 = vmul.f32 0.2, %v769_v9  ;;  %1034 = vst.msk [vmem:[#allocation2 + $0x96] sm:$0xff] %vm34_vm0, %v970_v10  ;;  %v1005_v13 = vsel %vm877_vm1, %v766_v62, %v941_v8 }
 0x10d   :  { %v8060_v14 = vpop.f32.mrb[16].mxu0  ;;  %1069 = vst.msk [vmem:[#allocation2 + $0x26e] sm:$0xff] %vm34_vm0, %v1005_v13  ;;  %v1008_v15 = vsel %vm880_vm2, %v8093_v5, %v944_v11  ;;  %v8096_v19 = vpop.f32.mrb[16].mxu1 }
 0x10e   :  { %v1006_v16 = vsel %vm878_vm3, %v769_v9, %v942_v12  ;;  %vm847_vm4 = vcmp.gt.f32.partialorder %v8060_v14, 0.0  ;;  %v911_v17 = vmul.f32 0.2, %v8060_v14  ;;  %v638_v18 = vpop.f32.mrb[17].mxu0  ;;  %1072 = vst.msk [vmem:[#allocation2 + $0x28a] sm:$0xff] %vm34_vm0, %v1008_v15  ;;  %vm883_vm6 = vcmp.gt.f32.partialorder %v8096_v19, 0.0 }
 0x10f   :  { %1070 = vst.msk [vmem:[#allocation2 + $0x276] sm:$0xff] %vm34_vm0, %v1006_v16  ;;  %vm845_vm5 = vcmp.gt.f32.partialorder %v638_v18, 0.0  ;;  %v909_v20 = vmul.f32 0.2, %v638_v18  ;;  %v8061_v21 = vpop.f32.mrb[18].mxu0  ;;  %v782_v22 = vpop.f32.mrb[17].mxu1 }
 0x110   :  { %v975_v23 = vsel %vm847_vm4, %v8060_v14, %v911_v17  ;;  %vm848_vm7 = vcmp.gt.f32.partialorder %v8061_v21, 0.0  ;;  %v912_v24 = vmul.f32 0.2, %v8061_v21  ;;  %v641_v25 = vpop.f32.mrb[19].mxu0  ;;  %v947_v26 = vmul.f32 0.2, %v8096_v19 }
 0x111   :  { %1039 = vst.msk [vmem:[#allocation2 + $0xf2] sm:$0xff] %vm34_vm0, %v975_v23  ;;  %v973_v27 = vsel %vm845_vm5, %v638_v18, %v909_v20  ;;  %vm846_vm8 = vcmp.gt.f32.partialorder %v641_v25, 0.0  ;;  %v910_v28 = vmul.f32 0.2, %v641_v25  ;;  %vm881_vm9 = vcmp.gt.f32.partialorder %v782_v22, 0.0  ;;  %v8097_v29 = vpop.f32.mrb[18].mxu1 }
 0x112   :  { %1037 = vst.msk [vmem:[#allocation2 + $0xde] sm:$0xff] %vm34_vm0, %v973_v27  ;;  %v976_v30 = vsel %vm848_vm7, %v8061_v21, %v912_v24  ;;  %v1011_v31 = vsel %vm883_vm6, %v8096_v19, %v947_v26  ;;  %v945_v32 = vmul.f32 0.2, %v782_v22  ;;  %vm884_vm10 = vcmp.gt.f32.partialorder %v8097_v29, 0.0  ;;  %v785_v33 = vpop.f32.mrb[19].mxu1 }
 0x113   :  { %1040 = vst.msk [vmem:[#allocation2 + $0xfa] sm:$0xff] %vm34_vm0, %v976_v30  ;;  %v974_v34 = vsel %vm846_vm8, %v641_v25, %v910_v28  ;;  %1075 = vst.msk [vmem:[#allocation2 + $0x2aa] sm:$0xff] %vm34_vm0, %v1011_v31  ;;  %v948_v35 = vmul.f32 0.2, %v8097_v29  ;;  %vm882_vm11 = vcmp.gt.f32.partialorder %v785_v33, 0.0 }
 0x114   :  { %v946_v36 = vmul.f32 0.2, %v785_v33  ;;  %1038 = vst.msk [vmem:[#allocation2 + $0xe6] sm:$0xff] %vm34_vm0, %v974_v34  ;;  %v1009_v37 = vsel %vm881_vm9, %v782_v22, %v945_v32 }
 0x115   :  { %v8064_v38 = vpop.f32.mrb[20].mxu0  ;;  %1073 = vst.msk [vmem:[#allocation2 + $0x296] sm:$0xff] %vm34_vm0, %v1009_v37  ;;  %v1012_v39 = vsel %vm884_vm10, %v8097_v29, %v948_v35  ;;  %v8100_v43 = vpop.f32.mrb[20].mxu1 }
 0x116   :  { %v1010_v40 = vsel %vm882_vm11, %v785_v33, %v946_v36  ;;  %vm851_vm12 = vcmp.gt.f32.partialorder %v8064_v38, 0.0  ;;  %v915_v41 = vmul.f32 0.2, %v8064_v38  ;;  %v654_v42 = vpop.f32.mrb[21].mxu0  ;;  %1076 = vst.msk [vmem:[#allocation2 + $0x2b2] sm:$0xff] %vm34_vm0, %v1012_v39  ;;  %vm887_vm14 = vcmp.gt.f32.partialorder %v8100_v43, 0.0 }
 0x117   :  { %1074 = vst.msk [vmem:[#allocation2 + $0x29e] sm:$0xff] %vm34_vm0, %v1010_v40  ;;  %vm849_vm13 = vcmp.gt.f32.partialorder %v654_v42, 0.0  ;;  %v913_v44 = vmul.f32 0.2, %v654_v42  ;;  %v8065_v46 = vpop.f32.mrb[22].mxu0  ;;  %v798_v47 = vpop.f32.mrb[21].mxu1 }
 0x118   :  { %v979_v48 = vsel %vm851_vm12, %v8064_v38, %v915_v41  ;;  %vm852_vm15 = vcmp.gt.f32.partialorder %v8065_v46, 0.0  ;;  %v916_v49 = vmul.f32 0.2, %v8065_v46  ;;  %v657_v50 = vpop.f32.mrb[23].mxu0  ;;  %v951_v51 = vmul.f32 0.2, %v8100_v43 }
 0x119   :  { %1043 = vst.msk [vmem:[#allocation2 + $0x11a] sm:$0xff] %vm34_vm0, %v979_v48  ;;  %v977_v52 = vsel %vm849_vm13, %v654_v42, %v913_v44  ;;  %vm850_vm1 = vcmp.gt.f32.partialorder %v657_v50, 0.0  ;;  %v914_v53 = vmul.f32 0.2, %v657_v50  ;;  %vm885_vm2 = vcmp.gt.f32.partialorder %v798_v47, 0.0  ;;  %v8101_v54 = vpop.f32.mrb[22].mxu1 }
 0x11a   :  { %1041 = vst.msk [vmem:[#allocation2 + $0x106] sm:$0xff] %vm34_vm0, %v977_v52  ;;  %v980_v55 = vsel %vm852_vm15, %v8065_v46, %v916_v49  ;;  %v1015_v56 = vsel %vm887_vm14, %v8100_v43, %v951_v51  ;;  %v949_v57 = vmul.f32 0.2, %v798_v47  ;;  %vm888_vm3 = vcmp.gt.f32.partialorder %v8101_v54, 0.0  ;;  %v801_v58 = vpop.f32.mrb[23].mxu1 }
 0x11b   :  { %1044 = vst.msk [vmem:[#allocation2 + $0x122] sm:$0xff] %vm34_vm0, %v980_v55  ;;  %v978_v59 = vsel %vm850_vm1, %v657_v50, %v914_v53  ;;  %1079 = vst.msk [vmem:[#allocation2 + $0x2d2] sm:$0xff] %vm34_vm0, %v1015_v56  ;;  %v952_v60 = vmul.f32 0.2, %v8101_v54  ;;  %vm886_vm4 = vcmp.gt.f32.partialorder %v801_v58, 0.0  ;;  %v8908_v55 = vld [vmem:[%s11470_s2 + $0x8] sm:$0xff]  }
 0x11c   :  { %v950_v61 = vmul.f32 0.2, %v801_v58  ;;  %1042 = vst.msk [vmem:[#allocation2 + $0x10e] sm:$0xff] %vm34_vm0, %v978_v59  ;;  %v1013_v62 = vsel %vm885_vm2, %v798_v47, %v949_v57  ;;  %v8909_v57 = vld [vmem:[%s11470_s2 + $0x10] sm:$0xff]  }
 0x11d   :  { %v8068_v63 = vpop.f32.mrb[24].mxu0  ;;  %1077 = vst.msk [vmem:[#allocation2 + $0x2be] sm:$0xff] %vm34_vm0, %v1013_v62  ;;  %v1016_v0 = vsel %vm888_vm3, %v8101_v54, %v952_v60  ;;  %v8104_v4 = vpop.f32.mrb[24].mxu1  ;;  %v1124_v59 = vld [vmem:[#allocation2 + $0x1d6] sm:$0xff]  ;;  %v1125_v60 = vld [vmem:[#allocation2 + $0x1e2] sm:$0xff] }
 0x11e   :  { %v1014_v1 = vsel %vm886_vm4, %v801_v58, %v950_v61  ;;  %vm855_vm5 = vcmp.gt.f32.partialorder %v8068_v63, 0.0  ;;  %v919_v2 = vmul.f32 0.2, %v8068_v63  ;;  %v670_v3 = vpop.f32.mrb[25].mxu0  ;;  %1080 = vst.msk [vmem:[#allocation2 + $0x2da] sm:$0xff] %vm34_vm0, %v1016_v0  ;;  %vm891_vm7 = vcmp.gt.f32.partialorder %v8104_v4, 0.0 }
 0x11f   :  { %1078 = vst.msk [vmem:[#allocation2 + $0x2c6] sm:$0xff] %vm34_vm0, %v1014_v1  ;;  %vm853_vm6 = vcmp.gt.f32.partialorder %v670_v3, 0.0  ;;  %v917_v5 = vmul.f32 0.2, %v670_v3  ;;  %v8069_v6 = vpop.f32.mrb[26].mxu0  ;;  %v814_v7 = vpop.f32.mrb[25].mxu1 }
 0x120   :  { %v983_v8 = vsel %vm855_vm5, %v8068_v63, %v919_v2  ;;  %vm856_vm8 = vcmp.gt.f32.partialorder %v8069_v6, 0.0  ;;  %v920_v9 = vmul.f32 0.2, %v8069_v6  ;;  %v673_v10 = vpop.f32.mrb[27].mxu0  ;;  %v955_v11 = vmul.f32 0.2, %v8104_v4 }
 0x121   :  { %1047 = vst.msk [vmem:[#allocation2 + $0x142] sm:$0xff] %vm34_vm0, %v983_v8  ;;  %v981_v12 = vsel %vm853_vm6, %v670_v3, %v917_v5  ;;  %vm854_vm9 = vcmp.gt.f32.partialorder %v673_v10, 0.0  ;;  %v918_v13 = vmul.f32 0.2, %v673_v10  ;;  %vm889_vm10 = vcmp.gt.f32.partialorder %v814_v7, 0.0  ;;  %v8105_v14 = vpop.f32.mrb[26].mxu1 }
 0x122   :  { %1045 = vst.msk [vmem:[#allocation2 + $0x12e] sm:$0xff] %vm34_vm0, %v981_v12  ;;  %v984_v15 = vsel %vm856_vm8, %v8069_v6, %v920_v9  ;;  %v1019_v16 = vsel %vm891_vm7, %v8104_v4, %v955_v11  ;;  %v953_v17 = vmul.f32 0.2, %v814_v7  ;;  %vm892_vm11 = vcmp.gt.f32.partialorder %v8105_v14, 0.0  ;;  %v817_v18 = vpop.f32.mrb[27].mxu1  ;;  %v1123_v58 = vld [vmem:[#allocation2 + $0x1ce] sm:$0xff] }
 0x123   :  { %1048 = vst.msk [vmem:[#allocation2 + $0x14a] sm:$0xff] %vm34_vm0, %v984_v15  ;;  %v982_v19 = vsel %vm854_vm9, %v673_v10, %v918_v13  ;;  %1083 = vst.msk [vmem:[#allocation2 + $0x2fa] sm:$0xff] %vm34_vm0, %v1019_v16  ;;  %v956_v20 = vmul.f32 0.2, %v8105_v14  ;;  %vm890_vm12 = vcmp.gt.f32.partialorder %v817_v18, 0.0  ;;  %v1126_v61 = vld [vmem:[#allocation2 + $0x1ea] sm:$0xff]  ;;  %v9907_v62 = vpack.c.bf16 %v1124_v59, %v1123_v58 }
 0x124   :  { %v954_v21 = vmul.f32 0.2, %v817_v18  ;;  %1046 = vst.msk [vmem:[#allocation2 + $0x136] sm:$0xff] %vm34_vm0, %v982_v19  ;;  %v1017_v22 = vsel %vm889_vm10, %v814_v7, %v953_v17  ;;  %v9912_v63 = vpack.c.bf16 %v1126_v61, %v1125_v60  ;;  %v8911_v0 = vld [vmem:[%s11470_s2 + $0x40] sm:$0xff]   ;;  %v1127_v1 = vld [vmem:[#allocation2 + $0x1f6] sm:$0xff]  ;;  %v1129_v3 = vld [vmem:[#allocation2 + $0x20a] sm:$0xff] }
 0x125   :  { %v8072_v23 = vpop.f32.mrb[28].mxu0  ;;  %1081 = vst.msk [vmem:[#allocation2 + $0x2e6] sm:$0xff] %vm34_vm0, %v1017_v22  ;;  %v1020_v24 = vsel %vm892_vm11, %v8105_v14, %v956_v20  ;;  %v1128_v2 = vld [vmem:[#allocation2 + $0x1fe] sm:$0xff]  ;;  %v1130_v4 = vld [vmem:[#allocation2 + $0x212] sm:$0xff]  ;;  %v1132_v10 = vld [vmem:[#allocation2 + $0x226] sm:$0xff] }
 0x126   :  { %v1018_v25 = vsel %vm890_vm12, %v817_v18, %v954_v21  ;;  %vm859_vm13 = vcmp.gt.f32.partialorder %v8072_v23, 0.0  ;;  %v923_v26 = vmul.f32 0.2, %v8072_v23  ;;  %v686_v27 = vpop.f32.mrb[29].mxu0  ;;  %1084 = vst.msk [vmem:[#allocation2 + $0x302] sm:$0xff] %vm34_vm0, %v1020_v24  ;;  %v9921_v5 = vpack.c.bf16 %v1128_v2, %v1127_v1  ;;  %v1085_v7 = vld [vmem:[#allocation2 + $0x258] sm:$0xff] }
 0x127   :  { %1082 = vst.msk [vmem:[#allocation2 + $0x2ee] sm:$0xff] %vm34_vm0, %v1018_v25  ;;  %vm857_vm14 = vcmp.gt.f32.partialorder %v686_v27, 0.0  ;;  %v921_v28 = vmul.f32 0.2, %v686_v27  ;;  %v8073_v29 = vpop.f32.mrb[30].mxu0  ;;  %v9923_v6 = vpack.c.bf16 %v1130_v4, %v1129_v3  ;;  %v1086_v8 = vld [vmem:[#allocation2 + $0x260] sm:$0xff] }
 0x128   :  { %v987_v30 = vsel %vm859_vm13, %v8072_v23, %v923_v26  ;;  %vm860_vm15 = vcmp.gt.f32.partialorder %v8073_v29, 0.0  ;;  %v924_v31 = vmul.f32 0.2, %v8073_v29  ;;  %v689_v32 = vpop.f32.mrb[31].mxu0  ;;  %v1131_v9 = vld [vmem:[#allocation2 + $0x21e] sm:$0xff]  ;;  %v1101_v11 = vpack.c.bf16 %v1086_v8, %v1085_v7  ;;  %v1087_v13 = vld [vmem:[#allocation2 + $0x26c] sm:$0xff] }
 0x129   :  { %1051 = vst.msk [vmem:[#allocation2 + $0x16a] sm:$0xff] %vm34_vm0, %v987_v30  ;;  %v985_v33 = vsel %vm857_vm14, %v686_v27, %v921_v28  ;;  %vm858_vm1 = vcmp.gt.f32.partialorder %v689_v32, 0.0  ;;  %v922_v34 = vmul.f32 0.2, %v689_v32  ;;  %v9929_v12 = vpack.c.bf16 %v1132_v10, %v1131_v9  ;;  %v1088_v14 = vld [vmem:[#allocation2 + $0x274] sm:$0xff]  ;;  %v1089_v15 = vld [vmem:[#allocation2 + $0x280] sm:$0xff] }
 0x12a   :  { %1049 = vst.msk [vmem:[#allocation2 + $0x156] sm:$0xff] %vm34_vm0, %v985_v33  ;;  %v988_v35 = vsel %vm860_vm15, %v8073_v29, %v924_v31  ;;  %v1090_v16 = vld [vmem:[#allocation2 + $0x288] sm:$0xff]  ;;  %v9934_v17 = vpack.c.bf16 %v1088_v14, %v1087_v13  ;;  %v8913_v20 = vld [vmem:[%s11470_s2 + $0x50] sm:$0xff]   ;;  %v1092_v22 = vld [vmem:[#allocation2 + $0x29c] sm:$0xff] }
 0x12b   :  { %1052 = vst.msk [vmem:[#allocation2 + $0x172] sm:$0xff] %vm34_vm0, %v988_v35  ;;  %v986_v36 = vsel %vm858_vm1, %v689_v32, %v922_v34  ;;  %v8912_v18 = vld [vmem:[%s11470_s2 + $0x48] sm:$0xff]   ;;  %v9939_v19 = vpack.c.bf16 %v1090_v16, %v1089_v15  ;;  %v1091_v21 = vld [vmem:[#allocation2 + $0x294] sm:$0xff]  ;;  %v8915_v28 = vld [vmem:[%s11470_s2 + $0x60] sm:$0xff]  }
 0x12c   :  { %1050 = vst.msk [vmem:[#allocation2 + $0x15e] sm:$0xff] %vm34_vm0, %v986_v36  ;;  %v1093_v23 = vld [vmem:[#allocation2 + $0x2a8] sm:$0xff]  ;;  %v1094_v24 = vld [vmem:[#allocation2 + $0x2b0] sm:$0xff]  ;;  %v9948_v25 = vpack.c.bf16 %v1092_v22, %v1091_v21  ;;  %v8914_v26 = vld [vmem:[%s11470_s2 + $0x58] sm:$0xff]  }
 0x12d   :  { %v8076_v37 = vpop.f32.mrb[32].mxu0  ;;  %v9953_v27 = vpack.c.bf16 %v1094_v24, %v1093_v23  ;;  %v1095_v29 = vld [vmem:[#allocation2 + $0x2bc] sm:$0xff]  ;;  %v1096_v30 = vld [vmem:[#allocation2 + $0x2c4] sm:$0xff]  ;;  %v1097_v31 = vld [vmem:[#allocation2 + $0x2d0] sm:$0xff] }
 0x12e   :  { %vm863_vm2 = vcmp.gt.f32.partialorder %v8076_v37, 0.0  ;;  %v927_v38 = vmul.f32 0.2, %v8076_v37  ;;  %v702_v39 = vpop.f32.mrb[33].mxu0  ;;  %v1098_v32 = vld [vmem:[#allocation2 + $0x2d8] sm:$0xff]  ;;  %v9962_v33 = vpack.c.bf16 %v1096_v30, %v1095_v29  ;;  %v1441_v36 = vld [vmem:[#allocation2 + $0x262] sm:$0xff] }
 0x12f   :  { %vm861_vm3 = vcmp.gt.f32.partialorder %v702_v39, 0.0  ;;  %v925_v40 = vmul.f32 0.2, %v702_v39  ;;  %v8077_v41 = vpop.f32.mrb[34].mxu0  ;;  %v9964_v34 = vpack.c.bf16 %v1098_v32, %v1097_v31  ;;  %v1440_v35 = vld [vmem:[#allocation2 + $0x25a] sm:$0xff]  ;;  %v1451_v61 = vld [vmem:[#allocation2 + $0x2c6] sm:$0xff] }
 0x130   :  { %v991_v42 = vsel %vm863_vm2, %v8076_v37, %v927_v38  ;;  %vm864_vm4 = vcmp.gt.f32.partialorder %v8077_v41, 0.0  ;;  %v928_v43 = vmul.f32 0.2, %v8077_v41  ;;  %v705_v44 = vpop.f32.mrb[35].mxu0  ;;  %v1099_v37 = vld [vmem:[#allocation2 + $0x2e4] sm:$0xff]  ;;  %v1100_v38 = vld [vmem:[#allocation2 + $0x2ec] sm:$0xff] }
 0x131   :  { %1055 = vst.msk [vmem:[#allocation2 + $0x1ba] sm:$0xff] %vm34_vm0, %v991_v42  ;;  %v989_v46 = vsel %vm861_vm3, %v702_v39, %v925_v40  ;;  %vm862_vm5 = vcmp.gt.f32.partialorder %v705_v44, 0.0  ;;  %v926_v47 = vmul.f32 0.2, %v705_v44  ;;  %v1456_v39 = vpack.c.bf16 %v1441_v36, %v1440_v35  ;;  %v1443_v42 = vld [vmem:[#allocation2 + $0x276] sm:$0xff]  ;;  %v8919_v59 = vld [vmem:[%s11470_s2 + $0x80] sm:$0xff]  }
 0x132   :  { %1053 = vst.msk [vmem:[#allocation2 + $0x1a6] sm:$0xff] %vm34_vm0, %v989_v46  ;;  %v992_v48 = vsel %vm864_vm4, %v8077_v41, %v928_v43  ;;  %v9970_v40 = vpack.c.bf16 %v1100_v38, %v1099_v37  ;;  %v1442_v41 = vld [vmem:[#allocation2 + $0x26e] sm:$0xff]  ;;  %v1444_v43 = vld [vmem:[#allocation2 + $0x282] sm:$0xff]  ;;  %v1641_v23 = vld [vmem:[#allocation2 + $0x1d8] sm:$0xff] }
 0x133   :  { %1056 = vst.msk [vmem:[#allocation2 + $0x1c2] sm:$0xff] %vm34_vm0, %v992_v48  ;;  %v990_v49 = vsel %vm862_vm5, %v705_v44, %v926_v47  ;;  %v1445_v44 = vld [vmem:[#allocation2 + $0x28a] sm:$0xff]  ;;  %v9975_v46 = vpack.c.bf16 %v1443_v42, %v1442_v41  ;;  %v1450_v60 = vld [vmem:[#allocation2 + $0x2be] sm:$0xff]  ;;  %v1634_v3 = vld [vmem:[#allocation2 + $0x194] sm:$0xff] }
 0x134   :  { %1054 = vst.msk [vmem:[#allocation2 + $0x1ae] sm:$0xff] %vm34_vm0, %v990_v49  ;;  %v8916_v47 = vld [vmem:[%s11470_s2 + $0x68] sm:$0xff]   ;;  %v9980_v48 = vpack.c.bf16 %v1445_v44, %v1444_v43  ;;  %v8917_v49 = vld [vmem:[%s11470_s2 + $0x70] sm:$0xff]   ;;  %v10003_v1 = vpack.c.bf16 %v1451_v61, %v1450_v60  ;;  %v1635_v4 = vld [vmem:[#allocation2 + $0x19c] sm:$0xff] }
 0x135   :  { %v1454_v7 = vld [vmem:[#allocation2 + $0x2e6] sm:$0xff]  ;;  %v1455_v8 = vld [vmem:[#allocation2 + $0x2ee] sm:$0xff]  ;;  %v1650_v9 = vpack.c.bf16 %v1635_v4, %v1634_v3  ;;  %v8922_v29 = vld [vmem:[%s11470_s2 + $0x98] sm:$0xff]  }
 0x136   :  { %v10011_v10 = vpack.c.bf16 %v1455_v8, %v1454_v7  ;;  %v8921_v21 = vld [vmem:[%s11470_s2 + $0x90] sm:$0xff]   ;;  %v1642_v24 = vld [vmem:[#allocation2 + $0x1e4] sm:$0xff]  ;;  %v1644_v32 = vld [vmem:[#allocation2 + $0x1f8] sm:$0xff] }
 0x137   :  { %v1640_v22 = vld [vmem:[#allocation2 + $0x1d0] sm:$0xff]  ;;  %v8923_v31 = vld [vmem:[%s11470_s2 + $0xa0] sm:$0xff]   ;;  %v1649_v42 = vld [vmem:[#allocation2 + $0x228] sm:$0xff] }
 0x138   :  { %v1121_v54 = vld [vmem:[#allocation2 + $0x1ba] sm:$0xff]  ;;  %v1646_v36 = vld [vmem:[#allocation2 + $0x20c] sm:$0xff]  ;;  %v1829_v43 = vld [vmem:[#allocation2 + $0xe4] sm:$0xff] }
 0x139   :  { %v1119_v51 = vld [vmem:[#allocation2 + $0x1a6] sm:$0xff]  ;;  %v1647_v37 = vld [vmem:[#allocation2 + $0x214] sm:$0xff] }
 0x13a   :  { %v1122_v50 = vld [vmem:[#allocation2 + $0x1c2] sm:$0xff]  ;;  %v8925_v61 = vld [vmem:[%s11470_s2 + $0xb0] sm:$0xff]   ;;  %v1834_v3 = vld [vmem:[#allocation2 + $0x118] sm:$0xff] }
 0x13b   :  { %v1120_v52 = vld [vmem:[#allocation2 + $0x1ae] sm:$0xff]  ;;  %v9897_v56 = vpack.c.bf16 %v1122_v50, %v1121_v54  ;;  %v1446_v50 = vld [vmem:[#allocation2 + $0x296] sm:$0xff]  ;;  %v1639_v15 = vld [vmem:[#allocation2 + $0x1c4] sm:$0xff] }
 0x13c   :  { %v9892_v53 = vpack.c.bf16 %v1120_v52, %v1119_v51  ;;  %v1447_v51 = vld [vmem:[#allocation2 + $0x29e] sm:$0xff]  ;;  %v1448_v52 = vld [vmem:[#allocation2 + $0x2aa] sm:$0xff]  ;;  %v1449_v54 = vld [vmem:[#allocation2 + $0x2b2] sm:$0xff] }
 0x13d   :  { %v9994_v58 = vpack.c.bf16 %v1449_v54, %v1448_v52  ;;  %v1637_v13 = vld [vmem:[#allocation2 + $0x1b0] sm:$0xff]  ;;  %v1638_v14 = vld [vmem:[#allocation2 + $0x1bc] sm:$0xff] }
 0x13e   :  { %8115 = vmatmul.mubr.msk.bf16.vlgmr.msra.gmra.mrb[28].mxu1 %vm34_vm0, %v9892_v53  ;;  %v1645_v35 = vld [vmem:[#allocation2 + $0x200] sm:$0xff]  ;;  %v1830_v52 = vld [vmem:[#allocation2 + $0xf0] sm:$0xff]  ;;  %v8926_v8 = vld [vmem:[%s11470_s2 + $0xb8] sm:$0xff]  }
 0x13f   :  { %8131 = vmatpush3.bf16.msra.mxu1 %v9824_v45  ;;  %8118 = vmatprep.mubr.msk.bf16.mxu1 %vm34_vm0, %v9897_v56  ;;  %v8910_v45 = vld [vmem:[%s11470_s2 + $0x18] sm:$0xff]   ;;  %v10044_v38 = vpack.c.bf16 %v1645_v35, %v1644_v32  ;;  %v1648_v41 = vld [vmem:[#allocation2 + $0x220] sm:$0xff]  ;;  %v1836_v7 = vld [vmem:[#allocation2 + $0x12c] sm:$0xff] }
 0x140   :  { %8132 = vmatprep.subr.bf16.mxu1 %v8908_v55  ;;  %v10052_v44 = vpack.c.bf16 %v1649_v42, %v1648_v41  ;;  %v2025_v35 = vld [vmem:[#allocation2 + $0x32] sm:$0xff]  ;;  %v2026_v42 = vld [vmem:[#allocation2 + $0x3e] sm:$0xff] }
 0x143   :  { %8133 = vmatpush3.bf16.msra.mxu1 %v8908_v55  ;;  %v9989_v55 = vpack.c.bf16 %v1447_v51, %v1446_v50  ;;  %v1831_v50 = vld [vmem:[#allocation2 + $0xf8] sm:$0xff]  ;;  %v1833_v51 = vld [vmem:[#allocation2 + $0x10c] sm:$0xff] }
 0x144   :  { %8134 = vmatprep.subr.bf16.mxu1 %v8909_v57  ;;  %v10057_v54 = vpack.c.bf16 %v1831_v50, %v1830_v52  ;;  %v2029_v50 = vld [vmem:[#allocation2 + $0x5a] sm:$0xff]  ;;  %v2028_v52 = vld [vmem:[#allocation2 + $0x52] sm:$0xff] }
 0x146   :  { %8119 = vmatmul.mubr.msk.bf16.gmra.mrb[32].mxu1 %vm34_vm0, %v9907_v62 }
 0x147   :  { %8122 = vmatprep.mubr.msk.bf16.mxu1 %vm34_vm0, %v9912_v63  ;;  %8135 = vmatpush3.bf16.msra.mxu1 %v8909_v57  ;;  %v8918_v57 = vld [vmem:[%s11470_s2 + $0x78] sm:$0xff]  }
 0x148   :  { %8136 = vmatprep.subr.bf16.mxu1 %v8910_v45 }
 0x14b   :  { %8137 = vmatpush3.bf16.msra.mxu1 %v8910_v45  ;;  %v1452_v45 = vld [vmem:[#allocation2 + $0x2d2] sm:$0xff] }
 0x14c   :  { %8154 = vmatprep.subr.bf16.mxu1 %v8911_v0 }
 0x14e   :  { %8123 = vmatmul.mubr.msk.bf16.gmra.mrb[36].mxu1 %vm34_vm0, %v9921_v5 }
 0x14f   :  { %8126 = vmatprep.mubr.msk.bf16.mxu1 %vm34_vm0, %v9923_v6 }
 0x156   :  { %8127 = vmatmul.mubr.msk.bf16.gmra.mrb[40].mxu1 %vm34_vm0, %v9929_v12 }
 0x157   :  { %8138 = vmatprep.mubr.msk.bf16.mxu1 %vm34_vm0, %v1101_v11  ;;  %v1636_v11 = vld [vmem:[#allocation2 + $0x1a8] sm:$0xff] }
 0x158   :  { %v10016_v16 = vpack.c.bf16 %v1637_v13, %v1636_v11  ;;  %v8927_v11 = vld [vmem:[%s11470_s2 + $0xc0] sm:$0xff]   ;;  %v1839_v13 = vld [vmem:[#allocation2 + $0x148] sm:$0xff] }
 0x15e   :  { %8139 = vmatmul.mubr.msk.bf16.vlgmr.msra.gmra.mrb[28].mxu1 %vm34_vm0, %v9934_v17 }
 0x15f   :  { %8155 = vmatpush3.bf16.msra.mxu1 %v8911_v0  ;;  %8142 = vmatprep.mubr.msk.bf16.mxu1 %vm34_vm0, %v9939_v19  ;;  %v1453_v0 = vld [vmem:[#allocation2 + $0x2da] sm:$0xff] }
 0x160   :  { %8156 = vmatprep.subr.bf16.mxu1 %v8912_v18  ;;  %v10005_v2 = vpack.c.bf16 %v1453_v0, %v1452_v45  ;;  %v1835_v45 = vld [vmem:[#allocation2 + $0x120] sm:$0xff]  ;;  %v1837_v0 = vld [vmem:[#allocation2 + $0x134] sm:$0xff] }
 0x161   :  { %v10071_v4 = vpack.c.bf16 %v1835_v45, %v1834_v3  ;;  %v2033_v3 = vld [vmem:[#allocation2 + $0x82] sm:$0xff] }
 0x163   :  { %8157 = vmatpush3.bf16.msra.mxu1 %v8912_v18  ;;  %v8920_v18 = vld [vmem:[%s11470_s2 + $0x88] sm:$0xff]  }
 0x164   :  { %8158 = vmatprep.subr.bf16.mxu1 %v8913_v20 }
 0x166   :  { %8143 = vmatmul.mubr.msk.bf16.gmra.mrb[32].mxu1 %vm34_vm0, %v9948_v25 }
 0x167   :  { %8146 = vmatprep.mubr.msk.bf16.mxu1 %vm34_vm0, %v9953_v27  ;;  %8159 = vmatpush3.bf16.msra.mxu1 %v8913_v20  ;;  %v10021_v20 = vpack.c.bf16 %v1639_v15, %v1638_v14  ;;  %v1841_v14 = vld [vmem:[#allocation2 + $0x15c] sm:$0xff] }
 0x168   :  { %8160 = vmatprep.subr.bf16.mxu1 %v8914_v26  ;;  %v1838_v15 = vld [vmem:[#allocation2 + $0x140] sm:$0xff] }
 0x16b   :  { %8161 = vmatpush3.bf16.msra.mxu1 %v8914_v26  ;;  %v1643_v26 = vld [vmem:[#allocation2 + $0x1ec] sm:$0xff] }
 0x16c   :  { %8178 = vmatprep.subr.bf16.mxu1 %v8915_v28  ;;  %v10035_v30 = vpack.c.bf16 %v1643_v26, %v1642_v24  ;;  %v2023_v24 = vld [vmem:[#allocation2 + $0x1e] sm:$0xff]  ;;  %v1842_v26 = vld [vmem:[#allocation2 + $0x168] sm:$0xff] }
 0x16e   :  { %8147 = vmatmul.mubr.msk.bf16.gmra.mrb[36].mxu1 %vm34_vm0, %v9962_v33 }
 0x16f   :  { %8150 = vmatprep.mubr.msk.bf16.mxu1 %vm34_vm0, %v9964_v34 }
 0x176   :  { %8151 = vmatmul.mubr.msk.bf16.gmra.mrb[40].mxu1 %vm34_vm0, %v9970_v40 }
 0x177   :  { %8162 = vmatprep.mubr.msk.bf16.mxu1 %vm34_vm0, %v1456_v39  ;;  %v10046_v39 = vpack.c.bf16 %v1647_v37, %v1646_v36  ;;  %v2027_v36 = vld [vmem:[#allocation2 + $0x46] sm:$0xff] }
 0x178   :  { %v2024_v37 = vld [vmem:[#allocation2 + $0x2a] sm:$0xff] }
 0x179   :  { %v10098_v41 = vpack.c.bf16 %v2025_v35, %v2024_v37  ;;  %v2221_v35 = vld [vmem:[#allocation2 + $0x10e] sm:$0xff] }
 0x17e   :  { %8163 = vmatmul.mubr.msk.bf16.vlgmr.msra.gmra.mrb[28].mxu1 %vm34_vm0, %v9975_v46 }
 0x17f   :  { %8179 = vmatpush3.bf16.msra.mxu1 %v8915_v28  ;;  %8166 = vmatprep.mubr.msk.bf16.mxu1 %vm34_vm0, %v9980_v48  ;;  %v10030_v28 = vpack.c.bf16 %v1641_v23, %v1640_v22  ;;  %v1843_v23 = vld [vmem:[#allocation2 + $0x170] sm:$0xff] }
 0x180   :  { %8180 = vmatprep.subr.bf16.mxu1 %v8916_v47 }
 0x183   :  { %8181 = vmatpush3.bf16.msra.mxu1 %v8916_v47  ;;  %v1828_v47 = vld [vmem:[#allocation2 + $0xdc] sm:$0xff] }
 0x184   :  { %8182 = vmatprep.subr.bf16.mxu1 %v8917_v49 }
 0x186   :  { %8167 = vmatmul.mubr.msk.bf16.gmra.mrb[32].mxu1 %vm34_vm0, %v9989_v55 }
 0x187   :  { %8170 = vmatprep.mubr.msk.bf16.mxu1 %vm34_vm0, %v9994_v58  ;;  %8183 = vmatpush3.bf16.msra.mxu1 %v8917_v49  ;;  %v1844_v49 = vpack.c.bf16 %v1829_v43, %v1828_v47  ;;  %v8928_v43 = vld [vmem:[%s11470_s2 + $0xc8] sm:$0xff]   ;;  %v10103_v47 = vpack.c.bf16 %v2027_v36, %v2026_v42  ;;  %v2218_v36 = vld [vmem:[#allocation2 + $0xf2] sm:$0xff] }
 0x188   :  { %8184 = vmatprep.subr.bf16.mxu1 %v8918_v57  ;;  %v2220_v42 = vld [vmem:[#allocation2 + $0x106] sm:$0xff] }
 0x18b   :  { %8185 = vmatpush3.bf16.msra.mxu1 %v8918_v57  ;;  %v1832_v57 = vld [vmem:[#allocation2 + $0x104] sm:$0xff] }
 0x18c   :  { %8202 = vmatprep.subr.bf16.mxu1 %v8919_v59  ;;  %v10062_v60 = vpack.c.bf16 %v1833_v51, %v1832_v57  ;;  %v2031_v51 = vld [vmem:[#allocation2 + $0x6e] sm:$0xff]  ;;  %v10112_v57 = vpack.c.bf16 %v2029_v50, %v2028_v52  ;;  %v2225_v52 = vld [vmem:[#allocation2 + $0x136] sm:$0xff] }
 0x18d   :  { %v8933_v50 = vld [vmem:[%s11470_s2 + $0xf0] sm:$0xff]  }
 0x18e   :  { %8171 = vmatmul.mubr.msk.bf16.gmra.mrb[36].mxu1 %vm34_vm0, %v10003_v1 }
 0x18f   :  { %8174 = vmatprep.mubr.msk.bf16.mxu1 %vm34_vm0, %v10005_v2 }
 0x196   :  { %8175 = vmatmul.mubr.msk.bf16.gmra.mrb[40].mxu1 %vm34_vm0, %v10011_v10 }
 0x197   :  { %8186 = vmatprep.mubr.msk.bf16.mxu1 %vm34_vm0, %v1650_v9  ;;  %v10076_v9 = vpack.c.bf16 %v1837_v0, %v1836_v7  ;;  %v8931_v0 = vld [vmem:[%s11470_s2 + $0xe0] sm:$0xff]   ;;  %v2035_v7 = vld [vmem:[#allocation2 + $0x96] sm:$0xff] }
 0x19e   :  { %8187 = vmatmul.mubr.msk.bf16.vlgmr.msra.gmra.mrb[28].mxu1 %vm34_vm0, %v10016_v16 }
 0x19f   :  { %8203 = vmatpush3.bf16.msra.mxu1 %v8919_v59  ;;  %8190 = vmatprep.mubr.msk.bf16.mxu1 %vm34_vm0, %v10021_v20  ;;  %v8924_v59 = vld [vmem:[%s11470_s2 + $0xa8] sm:$0xff]  }
 0x1a0   :  { %8204 = vmatprep.subr.bf16.mxu1 %v8920_v18 }
 0x1a3   :  { %8205 = vmatpush3.bf16.msra.mxu1 %v8920_v18  ;;  %v10085_v18 = vpack.c.bf16 %v1839_v13, %v1838_v15  ;;  %v2034_v13 = vld [vmem:[#allocation2 + $0x8e] sm:$0xff] }
 0x1a4   :  { %8206 = vmatprep.subr.bf16.mxu1 %v8921_v21  ;;  %v2037_v15 = vld [vmem:[#allocation2 + $0xaa] sm:$0xff] }
 0x1a6   :  { %8191 = vmatmul.mubr.msk.bf16.gmra.mrb[32].mxu1 %vm34_vm0, %v10030_v28 }
 0x1a7   :  { %8194 = vmatprep.mubr.msk.bf16.mxu1 %vm34_vm0, %v10035_v30  ;;  %8207 = vmatpush3.bf16.msra.mxu1 %v8921_v21  ;;  %v1840_v21 = vld [vmem:[#allocation2 + $0x154] sm:$0xff] }
 0x1a8   :  { %8208 = vmatprep.subr.bf16.mxu1 %v8922_v29  ;;  %v10087_v22 = vpack.c.bf16 %v1841_v14, %v1840_v21  ;;  %v10128_v14 = vpack.c.bf16 %v2035_v7, %v2034_v13  ;;  %v2217_v21 = vld [vmem:[#allocation2 + $0xe6] sm:$0xff] }
 0x1a9   :  { %v2227_v13 = vld [vmem:[#allocation2 + $0x14a] sm:$0xff] }
 0x1ab   :  { %8209 = vmatpush3.bf16.msra.mxu1 %v8922_v29  ;;  %v10093_v29 = vpack.c.bf16 %v1843_v23, %v1842_v26  ;;  %v2036_v23 = vld [vmem:[#allocation2 + $0xa2] sm:$0xff] }
 0x1ac   :  { %8226 = vmatprep.subr.bf16.mxu1 %v8923_v31  ;;  %v2216_v26 = vld [vmem:[#allocation2 + $0xde] sm:$0xff] }
 0x1ae   :  { %8195 = vmatmul.mubr.msk.bf16.gmra.mrb[36].mxu1 %vm34_vm0, %v10044_v38 }
 0x1af   :  { %8198 = vmatprep.mubr.msk.bf16.mxu1 %vm34_vm0, %v10046_v39 }
 0x1b6   :  { %8199 = vmatmul.mubr.msk.bf16.gmra.mrb[40].mxu1 %vm34_vm0, %v10052_v44 }
 0x1b7   :  { %8210 = vmatprep.mubr.msk.bf16.mxu1 %vm34_vm0, %v1844_v49  ;;  %v8929_v49 = vld [vmem:[%s11470_s2 + $0xd0] sm:$0xff]  }
 0x1be   :  { %8211 = vmatmul.mubr.msk.bf16.vlgmr.msra.gmra.mrb[28].mxu1 %vm34_vm0, %v10057_v54 }
 0x1bf   :  { %8227 = vmatpush3.bf16.msra.mxu1 %v8923_v31  ;;  %8214 = vmatprep.mubr.msk.bf16.mxu1 %vm34_vm0, %v10062_v60  ;;  %v2022_v31 = vld [vmem:[#allocation2 + $0x16] sm:$0xff] }
 0x1c0   :  { %8228 = vmatprep.subr.bf16.mxu1 %v8924_v59  ;;  %v2038_v32 = vpack.c.bf16 %v2023_v24, %v2022_v31  ;;  %v10134_v24 = vpack.c.bf16 %v2037_v15, %v2036_v23  ;;  %v2232_v31 = vpack.c.bf16 %v2217_v21, %v2216_v26  ;;  %v2229_v15 = vld [vmem:[#allocation2 + $0x15e] sm:$0xff]  ;;  %v2228_v26 = vld [vmem:[#allocation2 + $0x156] sm:$0xff] }
 0x1c1   :  { %v2226_v21 = vld [vmem:[#allocation2 + $0x142] sm:$0xff] }
 0x1c2   :  { %v10167_v23 = vpack.c.bf16 %v2227_v13, %v2226_v21  ;;  %v8936_v13 = vld [vmem:[%s11470_s2 + $0x108] sm:$0xff]   ;;  %v8937_v21 = vld [vmem:[%s11470_s2 + $0x110] sm:$0xff]  }
 0x1c3   :  { %8229 = vmatpush3.bf16.msra.mxu1 %v8924_v59  ;;  %v2030_v59 = vld [vmem:[#allocation2 + $0x66] sm:$0xff] }
 0x1c4   :  { %8230 = vmatprep.subr.bf16.mxu1 %v8925_v61  ;;  %v10117_v45 = vpack.c.bf16 %v2031_v51, %v2030_v59  ;;  %v2223_v51 = vld [vmem:[#allocation2 + $0x122] sm:$0xff]  ;;  %v2222_v59 = vld [vmem:[#allocation2 + $0x11a] sm:$0xff] }
 0x1c6   :  { %8215 = vmatmul.mubr.msk.bf16.gmra.mrb[32].mxu1 %vm34_vm0, %v10071_v4 }
 0x1c7   :  { %8218 = vmatprep.mubr.msk.bf16.mxu1 %vm34_vm0, %v10076_v9  ;;  %8231 = vmatpush3.bf16.msra.mxu1 %v8925_v61  ;;  %v8930_v61 = vld [vmem:[%s11470_s2 + $0xd8] sm:$0xff]  }
 0x1c8   :  { %8232 = vmatprep.subr.bf16.mxu1 %v8926_v8 }
 0x1cb   :  { %8233 = vmatpush3.bf16.msra.mxu1 %v8926_v8  ;;  %v2032_v8 = vld [vmem:[#allocation2 + $0x7a] sm:$0xff] }
 0x1cc   :  { %8250 = vmatprep.subr.bf16.mxu1 %v8927_v11 }
 0x1ce   :  { %8219 = vmatmul.mubr.msk.bf16.gmra.mrb[36].mxu1 %vm34_vm0, %v10085_v18 }
 0x1cf   :  { %8222 = vmatprep.mubr.msk.bf16.mxu1 %vm34_vm0, %v10087_v22 }
 0x1d6   :  { %8223 = vmatmul.mubr.msk.bf16.gmra.mrb[40].mxu1 %vm34_vm0, %v10093_v29 }
 0x1d7   :  { %8234 = vmatprep.mubr.msk.bf16.mxu1 %vm34_vm0, %v2038_v32  ;;  %v2219_v32 = vld [vmem:[#allocation2 + $0xfa] sm:$0xff] }
 0x1d8   :  { %v10139_v37 = vpack.c.bf16 %v2219_v32, %v2218_v36  ;;  %v2231_v32 = vld [vmem:[#allocation2 + $0x172] sm:$0xff]  ;;  %v2411_v36 = vld [vmem:[#allocation2 + $0x20] sm:$0xff] }
 0x1de   :  { %8235 = vmatmul.mubr.msk.bf16.vlgmr.msra.gmra.mrb[28].mxu1 %vm34_vm0, %v10098_v41 }
 0x1df   :  { %8251 = vmatpush3.bf16.msra.mxu1 %v8927_v11  ;;  %8238 = vmatprep.mubr.msk.bf16.mxu1 %vm34_vm0, %v10103_v47  ;;  %v10126_v11 = vpack.c.bf16 %v2033_v3, %v2032_v8  ;;  %v2224_v3 = vld [vmem:[#allocation2 + $0x12e] sm:$0xff]  ;;  %v8935_v8 = vld [vmem:[%s11470_s2 + $0x100] sm:$0xff]  }
 0x1e0   :  { %8252 = vmatprep.subr.bf16.mxu1 %v8928_v43  ;;  %v10158_v7 = vpack.c.bf16 %v2225_v52, %v2224_v3  ;;  %v2413_v52 = vld [vmem:[#allocation2 + $0x34] sm:$0xff]  ;;  %v2415_v3 = vld [vmem:[#allocation2 + $0x48] sm:$0xff] }
 0x1e3   :  { %8253 = vmatpush3.bf16.msra.mxu1 %v8928_v43  ;;  %v8932_v43 = vld [vmem:[%s11470_s2 + $0xe8] sm:$0xff]  }
 0x1e4   :  { %8254 = vmatprep.subr.bf16.mxu1 %v8929_v49 }
 0x1e6   :  { %8239 = vmatmul.mubr.msk.bf16.gmra.mrb[32].mxu1 %vm34_vm0, %v10112_v57 }
 0x1e7   :  { %8242 = vmatprep.mubr.msk.bf16.mxu1 %vm34_vm0, %v10117_v45  ;;  %8255 = vmatpush3.bf16.msra.mxu1 %v8929_v49  ;;  %v10144_v49 = vpack.c.bf16 %v2221_v35, %v2220_v42  ;;  %v2410_v35 = vld [vmem:[#allocation2 + $0x18] sm:$0xff]  ;;  %v2230_v42 = vld [vmem:[#allocation2 + $0x16a] sm:$0xff] }
 0x1e8   :  { %8256 = vmatprep.subr.bf16.mxu1 %v8930_v61 }
 0x1eb   :  { %8257 = vmatpush3.bf16.msra.mxu1 %v8930_v61  ;;  %v10153_v61 = vpack.c.bf16 %v2223_v51, %v2222_v59  ;;  %v2412_v51 = vld [vmem:[#allocation2 + $0x2c] sm:$0xff]  ;;  %v2414_v59 = vld [vmem:[#allocation2 + $0x40] sm:$0xff] }
 0x1ec   :  { %8274 = vmatprep.subr.bf16.mxu1 %v8931_v0 }
 0x1ee   :  { %8243 = vmatmul.mubr.msk.bf16.gmra.mrb[36].mxu1 %vm34_vm0, %v10126_v11 }
 0x1ef   :  { %8246 = vmatprep.mubr.msk.bf16.mxu1 %vm34_vm0, %v10128_v14 }
 0x1f6   :  { %8247 = vmatmul.mubr.msk.bf16.gmra.mrb[40].mxu1 %vm34_vm0, %v10134_v24 }
 0x1f7   :  { %8258 = vmatprep.mubr.msk.bf16.mxu1 %vm34_vm0, %v2232_v31  ;;  %v10169_v31 = vpack.c.bf16 %v2229_v15, %v2228_v26  ;;  %v10185_v15 = vpack.c.bf16 %v2415_v3, %v2414_v59  ;;  %v2416_v26 = vld [vmem:[#allocation2 + $0x54] sm:$0xff]  ;;  %v2421_v59 = vld [vmem:[#allocation2 + $0x84] sm:$0xff] }
 0x1f8   :  { %v2422_v3 = vld [vmem:[#allocation2 + $0x90] sm:$0xff] }
 0x1fe   :  { %8259 = vmatmul.mubr.msk.bf16.vlgmr.msra.gmra.mrb[28].mxu1 %vm34_vm0, %v10139_v37 }
 0x1ff   :  { %8275 = vmatpush3.bf16.msra.mxu1 %v8931_v0  ;;  %8262 = vmatprep.mubr.msk.bf16.mxu1 %vm34_vm0, %v10144_v49  ;;  %v8934_v0 = vld [vmem:[%s11470_s2 + $0xf8] sm:$0xff]  }
 0x200   :  { %8276 = vmatprep.subr.bf16.mxu1 %v8932_v43 }
 0x203   :  { %8277 = vmatpush3.bf16.msra.mxu1 %v8932_v43  ;;  %v10175_v43 = vpack.c.bf16 %v2231_v32, %v2230_v42  ;;  %v2417_v32 = vld [vmem:[#allocation2 + $0x5c] sm:$0xff] }
 0x204   :  { %8278 = vmatprep.subr.bf16.mxu1 %v8933_v50  ;;  %v10194_v42 = vpack.c.bf16 %v2417_v32, %v2416_v26 }
 0x206   :  { %8263 = vmatmul.mubr.msk.bf16.gmra.mrb[32].mxu1 %vm34_vm0, %v10153_v61 }
 0x207   :  { %8266 = vmatprep.mubr.msk.bf16.mxu1 %vm34_vm0, %v10158_v7  ;;  %8279 = vmatpush3.bf16.msra.mxu1 %v8933_v50  ;;  %v2426_v50 = vpack.c.bf16 %v2411_v36, %v2410_v35  ;;  %v2418_v35 = vld [vmem:[#allocation2 + $0x68] sm:$0xff]  ;;  %v2419_v36 = vld [vmem:[#allocation2 + $0x70] sm:$0xff] }
 0x208   :  { %8280 = vmatprep.subr.bf16.mxu1 %v8934_v0 }
 0x20b   :  { %8281 = vmatpush3.bf16.msra.mxu1 %v8934_v0  ;;  %v10180_v0 = vpack.c.bf16 %v2413_v52, %v2412_v51  ;;  %v8939_v51 = vld [vmem:[%s11470_s2 + $0x120] sm:$0xff]  }
 0x20c   :  { %8298 = vmatprep.subr.bf16.mxu1 %v8935_v8  ;;  %v2420_v52 = vld [vmem:[#allocation2 + $0x7c] sm:$0xff] }
 0x20d   :  { %v10208_v26 = vpack.c.bf16 %v2421_v59, %v2420_v52  ;;  %v8941_v52 = vld [vmem:[%s11470_s2 + $0x130] sm:$0xff]  }
 0x20e   :  { %8267 = vmatmul.mubr.msk.bf16.gmra.mrb[36].mxu1 %vm34_vm0, %v10167_v23 }
 0x20f   :  { %8270 = vmatprep.mubr.msk.bf16.mxu1 %vm34_vm0, %v10169_v31 }
 0x216   :  { %8271 = vmatmul.mubr.msk.bf16.gmra.mrb[40].mxu1 %vm34_vm0, %v10175_v43 }
 0x217   :  { %8282 = vmatprep.mubr.msk.bf16.mxu1 %vm34_vm0, %v2426_v50  ;;  %v10199_v50 = vpack.c.bf16 %v2419_v36, %v2418_v35  ;;  %v2425_v35 = vld [vmem:[#allocation2 + $0xac] sm:$0xff] }
 0x21e   :  { %8283 = vmatmul.mubr.msk.bf16.vlgmr.msra.gmra.mrb[28].mxu1 %vm34_vm0, %v10180_v0 }
 0x21f   :  { %8299 = vmatpush3.bf16.msra.mxu1 %v8935_v8  ;;  %8286 = vmatprep.mubr.msk.bf16.mxu1 %vm34_vm0, %v10185_v15  ;;  %v8938_v8 = vld [vmem:[%s11470_s2 + $0x118] sm:$0xff]  }
 0x220   :  { %8300 = vmatprep.subr.bf16.mxu1 %v8936_v13 }
 0x223   :  { %8301 = vmatpush3.bf16.msra.mxu1 %v8936_v13  ;;  %v2423_v13 = vld [vmem:[#allocation2 + $0x98] sm:$0xff] }
 0x224   :  { %8302 = vmatprep.subr.bf16.mxu1 %v8937_v21  ;;  %v10210_v32 = vpack.c.bf16 %v2423_v13, %v2422_v3 }
 0x226   :  { %8287 = vmatmul.mubr.msk.bf16.gmra.mrb[32].mxu1 %vm34_vm0, %v10194_v42 }
 0x227   :  { %8290 = vmatprep.mubr.msk.bf16.mxu1 %vm34_vm0, %v10199_v50  ;;  %8303 = vmatpush3.bf16.msra.mxu1 %v8937_v21  ;;  %v2424_v21 = vld [vmem:[#allocation2 + $0xa4] sm:$0xff] }
 0x228   :  { %8304 = vmatprep.subr.bf16.mxu1 %v8938_v8  ;;  %v10216_v36 = vpack.c.bf16 %v2425_v35, %v2424_v21  ;;  %v8967_v35 = vld [vmem:[%s11471_s3 + $0x80] ss:$8 sps:$4 sm:$0xff]  }
 0x22b   :  { %8305 = vmatpush3.bf16.msra.mxu1 %v8938_v8  ;;  %v8940_v8 = vld [vmem:[%s11470_s2 + $0x128] sm:$0xff]  }
 0x22c   :  { %8322 = vmatprep.subr.bf16.mxu1 %v8939_v51 }
 0x22e   :  { %8291 = vmatmul.mubr.msk.bf16.gmra.mrb[36].mxu1 %vm34_vm0, %v10208_v26 }
 0x22f   :  { %8294 = vmatprep.mubr.msk.bf16.mxu1 %vm34_vm0, %v10210_v32 }
 0x236   :  { %8295 = vmatmul.mubr.msk.bf16.gmra.mrb[40].mxu1 %vm34_vm0, %v10216_v36 }
 0x237   :  { %8306 = vmatprep.mubr.msk.bf16.mxu1 %vm34_vm0, %v9934_v17  ;;  %v8942_v17 = vld [vmem:[%s11470_s2 + $0x138] sm:$0xff]  }
 0x23e   :  { %8307 = vmatmul.mubr.msk.bf16.vlgmr.msra.gmra.mrb[28].mxu1 %vm34_vm0, %v9939_v19  ;;  %v8943_v19 = vld [vmem:[%s11470_s2 + $0x140] sm:$0xff]  }
 0x23f   :  { %8323 = vmatpush3.bf16.msra.mxu1 %v8939_v51  ;;  %8310 = vmatprep.mubr.msk.bf16.mxu1 %vm34_vm0, %v9948_v25  ;;  %v2604_v25 = vld [vmem:[#allocation2 + $0x2f8] sm:$0xff]  ;;  %v2605_v51 = vld [vmem:[#allocation2 + $0x300] sm:$0xff] }
 0x240   :  { %8324 = vmatprep.subr.bf16.mxu1 %v8940_v8 }
 0x243   :  { %8325 = vmatpush3.bf16.msra.mxu1 %v8940_v8 }
 0x244   :  { %8326 = vmatprep.subr.bf16.mxu1 %v8941_v52 }
 0x246   :  { %8311 = vmatmul.mubr.msk.bf16.gmra.mrb[32].mxu1 %vm34_vm0, %v9953_v27  ;;  %v2606_v27 = vpack.c.bf16 %v2605_v51, %v2604_v25  ;;  %v8970_v25 = vld [vmem:[%s11471_s3 + $0x90] ss:$8 sps:$4 sm:$0xff]  }
 0x247   :  { %8314 = vmatprep.mubr.msk.bf16.mxu1 %vm34_vm0, %v9962_v33  ;;  %8327 = vmatpush3.bf16.msra.mxu1 %v8941_v52  ;;  %v8944_v33 = vld [vmem:[%s11470_s2 + $0x148] sm:$0xff]   ;;  %v8972_v52 = vld [vmem:[%s11471_s3 + $0x94] ss:$8 sps:$4 sm:$0xff]  }
 0x248   :  { %8328 = vmatprep.subr.bf16.mxu1 %v8942_v17 }
 0x24b   :  { %8329 = vmatpush3.bf16.msra.mxu1 %v8942_v17  ;;  %v9388_v17 = vmov 0  }
 0x24c   :  { %8346 = vmatprep.subr.bf16.mxu1 %v8943_v19  ;;  %4230 = vmatprep.mubr.bf16.mxu0 %v9388_v17 }
 0x24e   :  { %8315 = vmatmul.mubr.msk.bf16.gmra.mrb[36].mxu1 %vm34_vm0, %v9964_v34  ;;  %v8945_v34 = vld [vmem:[%s11470_s2 + $0x150] sm:$0xff]  }
 0x24f   :  { %8318 = vmatprep.mubr.msk.bf16.mxu1 %vm34_vm0, %v9970_v40  ;;  %v2757_v40 = vld [vmem:[#allocation2 + $0x23a] sm:$0xff] }
 0x256   :  { %8319 = vmatmul.mubr.msk.bf16.gmra.mrb[40].mxu1 %vm34_vm0, %v2606_v27  ;;  %v8975_v27 = vld [vmem:[%s11471_s3 + $0xa4] ss:$8 sps:$4 sm:$0xff]  }
 0x257   :  { %8330 = vmatprep.mubr.msk.bf16.mxu1 %vm34_vm0, %v9892_v53  ;;  %v8946_v53 = vld [vmem:[%s11470_s2 + $0x158] sm:$0xff]  }
 0x25e   :  { %8331 = vmatmul.mubr.msk.bf16.vlgmr.msra.gmra.mrb[28].mxu1 %vm34_vm0, %v9897_v56  ;;  %v8947_v56 = vld [vmem:[%s11470_s2 + $0x160] sm:$0xff]  }
 0x25f   :  { %8347 = vmatpush3.bf16.msra.mxu1 %v8943_v19  ;;  %8334 = vmatprep.mubr.msk.bf16.mxu1 %vm34_vm0, %v9907_v62  ;;  %v2756_v62 = vld [vmem:[#allocation2 + $0x232] sm:$0xff] }
 0x260   :  { %8348 = vmatprep.subr.bf16.mxu1 %v8944_v33 }
 0x263   :  { %8349 = vmatpush3.bf16.msra.mxu1 %v8944_v33 }
 0x264   :  { %8350 = vmatprep.subr.bf16.mxu1 %v8945_v34 }
 0x266   :  { %8335 = vmatmul.mubr.msk.bf16.gmra.mrb[32].mxu1 %vm34_vm0, %v9912_v63  ;;  %v2758_v63 = vpack.c.bf16 %v2757_v40, %v2756_v62 }
 0x267   :  { %8338 = vmatprep.mubr.msk.bf16.mxu1 %vm34_vm0, %v9921_v5  ;;  %8351 = vmatpush3.bf16.msra.mxu1 %v8945_v34  ;;  %v8948_v5 = vld [vmem:[%s11470_s2 + $0x168] sm:$0xff]  }
 0x268   :  { %8352 = vmatprep.subr.bf16.mxu1 %v8946_v53 }
 0x26b   :  { %8353 = vmatpush3.bf16.msra.mxu1 %v8946_v53 }
 0x26c   :  { %8370 = vmatprep.subr.bf16.mxu1 %v8947_v56 }
 0x26e   :  { %8339 = vmatmul.mubr.msk.bf16.gmra.mrb[36].mxu1 %vm34_vm0, %v9923_v6  ;;  %v8949_v6 = vld [vmem:[%s11470_s2 + $0x170] sm:$0xff]  }
 0x26f   :  { %8342 = vmatprep.mubr.msk.bf16.mxu1 %vm34_vm0, %v9929_v12  ;;  %v8950_v12 = vld [vmem:[%s11470_s2 + $0x178] sm:$0xff]  }
 0x276   :  { %8343 = vmatmul.mubr.msk.bf16.gmra.mrb[40].mxu1 %vm34_vm0, %v2758_v63  ;;  %v8978_v63 = vld [vmem:[%s11471_s3 + $0xb4] ss:$8 sps:$4 sm:$0xff]  }
 0x277   :  { %8354 = vmatprep.mubr.msk.bf16.mxu1 %vm34_vm0, %v9975_v46  ;;  %v8951_v46 = vld [vmem:[%s11470_s2 + $0x180] sm:$0xff]  }
 0x27e   :  { %8355 = vmatmul.mubr.msk.bf16.vlgmr.msra.gmra.mrb[28].mxu1 %vm34_vm0, %v9980_v48  ;;  %v2908_v48 = vld [vmem:[#allocation2 + $0x2fa] sm:$0xff] }
 0x27f   :  { %8371 = vmatpush3.bf16.msra.mxu1 %v8947_v56  ;;  %8358 = vmatprep.mubr.msk.bf16.mxu1 %vm34_vm0, %v9989_v55  ;;  %v2909_v55 = vld [vmem:[#allocation2 + $0x302] sm:$0xff] }
 0x280   :  { %8372 = vmatprep.subr.bf16.mxu1 %v8948_v5  ;;  %v8973_v56 = vld [vmem:[%s11471_s3 + $0xa0] ss:$8 sps:$4 sm:$0xff]  }
 0x283   :  { %8373 = vmatpush3.bf16.msra.mxu1 %v8948_v5 }
 0x284   :  { %8374 = vmatprep.subr.bf16.mxu1 %v8949_v6 }
 0x286   :  { %8359 = vmatmul.mubr.msk.bf16.gmra.mrb[32].mxu1 %vm34_vm0, %v9994_v58  ;;  %v2910_v58 = vpack.c.bf16 %v2909_v55, %v2908_v48  ;;  %v8981_v48 = vld [vmem:[%s11471_s3 + $0xc4] ss:$8 sps:$4 sm:$0xff]  }
 0x287   :  { %8362 = vmatprep.mubr.msk.bf16.mxu1 %vm34_vm0, %v10003_v1  ;;  %8375 = vmatpush3.bf16.msra.mxu1 %v8949_v6  ;;  %v8952_v1 = vld [vmem:[%s11470_s2 + $0x188] sm:$0xff]  }
 0x288   :  { %8376 = vmatprep.subr.bf16.mxu1 %v8950_v12 }
 0x28b   :  { %8377 = vmatpush3.bf16.msra.mxu1 %v8950_v12  ;;  %v8976_v12 = vld [vmem:[%s11471_s3 + $0xb0] ss:$8 sps:$4 sm:$0xff]  }
 0x28c   :  { %8394 = vmatprep.subr.bf16.mxu1 %v8951_v46 }
 0x28e   :  { %8363 = vmatmul.mubr.msk.bf16.gmra.mrb[36].mxu1 %vm34_vm0, %v10005_v2  ;;  %v8953_v2 = vld [vmem:[%s11470_s2 + $0x190] sm:$0xff]  }
 0x28f   :  { %8366 = vmatprep.mubr.msk.bf16.mxu1 %vm34_vm0, %v10011_v10  ;;  %v8954_v10 = vld [vmem:[%s11470_s2 + $0x198] sm:$0xff]  }
 0x296   :  { %8367 = vmatmul.mubr.msk.bf16.gmra.mrb[40].mxu1 %vm34_vm0, %v2910_v58 }
 0x297   :  { %8378 = vmatprep.mubr.msk.bf16.mxu1 %vm34_vm0, %v10016_v16  ;;  %v8955_v16 = vld [vmem:[%s11470_s2 + $0x1a0] sm:$0xff]  }
 0x29e   :  { %8379 = vmatmul.mubr.msk.bf16.vlgmr.msra.gmra.mrb[28].mxu1 %vm34_vm0, %v10021_v20  ;;  %v3060_v20 = vld [vmem:[#allocation2 + $0x234] sm:$0xff] }
 0x29f   :  { %8395 = vmatpush3.bf16.msra.mxu1 %v8951_v46  ;;  %8382 = vmatprep.mubr.msk.bf16.mxu1 %vm34_vm0, %v10030_v28  ;;  %v3061_v28 = vld [vmem:[#allocation2 + $0x23c] sm:$0xff] }
 0x2a0   :  { %8396 = vmatprep.subr.bf16.mxu1 %v8952_v1 }
 0x2a3   :  { %8397 = vmatpush3.bf16.msra.mxu1 %v8952_v1 }
 0x2a4   :  { %8398 = vmatprep.subr.bf16.mxu1 %v8953_v2 }
 0x2a6   :  { %8383 = vmatmul.mubr.msk.bf16.gmra.mrb[32].mxu1 %vm34_vm0, %v10035_v30  ;;  %v3062_v30 = vpack.c.bf16 %v3061_v28, %v3060_v20  ;;  %v8984_v20 = vld [vmem:[%s11471_s3 + $0xd4] ss:$8 sps:$4 sm:$0xff]  }
 0x2a7   :  { %8386 = vmatprep.mubr.msk.bf16.mxu1 %vm34_vm0, %v10044_v38  ;;  %8399 = vmatpush3.bf16.msra.mxu1 %v8953_v2  ;;  %v8956_v38 = vld [vmem:[%s11470_s2 + $0x1a8] sm:$0xff]  }
 0x2a8   :  { %8400 = vmatprep.subr.bf16.mxu1 %v8954_v10  ;;  %v8979_v2 = vld [vmem:[%s11471_s3 + $0xc0] ss:$8 sps:$4 sm:$0xff]  }
 0x2ab   :  { %8401 = vmatpush3.bf16.msra.mxu1 %v8954_v10 }
 0x2ac   :  { %8418 = vmatprep.subr.bf16.mxu1 %v8955_v16 }
 0x2ae   :  { %8387 = vmatmul.mubr.msk.bf16.gmra.mrb[36].mxu1 %vm34_vm0, %v10046_v39  ;;  %v8957_v39 = vld [vmem:[%s11470_s2 + $0x1b0] sm:$0xff]  }
 0x2af   :  { %8390 = vmatprep.mubr.msk.bf16.mxu1 %vm34_vm0, %v10052_v44  ;;  %v8958_v44 = vld [vmem:[%s11470_s2 + $0x1b8] sm:$0xff]  }
 0x2b6   :  { %8391 = vmatmul.mubr.msk.bf16.gmra.mrb[40].mxu1 %vm34_vm0, %v3062_v30 }
 0x2b7   :  { %8402 = vmatprep.mubr.msk.bf16.mxu1 %vm34_vm0, %v10057_v54  ;;  %v8959_v54 = vld [vmem:[%s11470_s2 + $0x1c0] sm:$0xff]  }
 0x2be   :  { %8403 = vmatmul.mubr.msk.bf16.vlgmr.msra.gmra.mrb[28].mxu1 %vm34_vm0, %v10062_v60  ;;  %v3212_v60 = vld [vmem:[#allocation2 + $0x17c] sm:$0xff] }
 0x2bf   :  { %8419 = vmatpush3.bf16.msra.mxu1 %v8955_v16  ;;  %8406 = vmatprep.mubr.msk.bf16.mxu1 %vm34_vm0, %v10071_v4  ;;  %v3213_v4 = vld [vmem:[#allocation2 + $0x184] sm:$0xff] }
 0x2c0   :  { %8420 = vmatprep.subr.bf16.mxu1 %v8956_v38 }
 0x2c3   :  { %8421 = vmatpush3.bf16.msra.mxu1 %v8956_v38  ;;  %v8982_v38 = vld [vmem:[%s11471_s3 + $0xd0] ss:$8 sps:$4 sm:$0xff]  }
 0x2c4   :  { %8422 = vmatprep.subr.bf16.mxu1 %v8957_v39 }
 0x2c6   :  { %8407 = vmatmul.mubr.msk.bf16.gmra.mrb[32].mxu1 %vm34_vm0, %v10076_v9  ;;  %v3214_v9 = vpack.c.bf16 %v3213_v4, %v3212_v60  ;;  %v8985_v60 = vld [vmem:[%s11471_s3 + $0xe0] ss:$8 sps:$4 sm:$0xff]  }
 0x2c7   :  { %8410 = vmatprep.mubr.msk.bf16.mxu1 %vm34_vm0, %v10085_v18  ;;  %8423 = vmatpush3.bf16.msra.mxu1 %v8957_v39  ;;  %v8960_v18 = vld [vmem:[%s11470_s2 + $0x1c8] sm:$0xff]  }
 0x2c8   :  { %8424 = vmatprep.subr.bf16.mxu1 %v8958_v44 }
 0x2cb   :  { %8425 = vmatpush3.bf16.msra.mxu1 %v8958_v44  ;;  %v8987_v44 = vld [vmem:[%s11471_s3 + $0xe4] ss:$8 sps:$4 sm:$0xff]  }
 0x2cc   :  { %8442 = vmatprep.subr.bf16.mxu1 %v8959_v54 }
 0x2ce   :  { %8411 = vmatmul.mubr.msk.bf16.gmra.mrb[36].mxu1 %vm34_vm0, %v10087_v22  ;;  %v8961_v22 = vld [vmem:[%s11470_s2 + $0x1d0] sm:$0xff]  }
 0x2cf   :  { %8414 = vmatprep.mubr.msk.bf16.mxu1 %vm34_vm0, %v10093_v29  ;;  %v8962_v29 = vld [vmem:[%s11470_s2 + $0x1d8] sm:$0xff]  }
 0x2d6   :  { %8415 = vmatmul.mubr.msk.bf16.gmra.mrb[40].mxu1 %vm34_vm0, %v3214_v9  ;;  %v8990_v9 = vld [vmem:[%s11471_s3 + $0xf4] ss:$8 sps:$4 sm:$0xff]  }
 0x2d7   :  { %8426 = vmatprep.mubr.msk.bf16.mxu1 %vm34_vm0, %v10098_v41  ;;  %v8963_v41 = vld [vmem:[%s11470_s2 + $0x1e0] sm:$0xff]  }
 0x2de   :  { %8427 = vmatmul.mubr.msk.bf16.vlgmr.msra.gmra.mrb[28].mxu1 %vm34_vm0, %v10103_v47  ;;  %v3364_v47 = vld [vmem:[#allocation2 + $0xb6] sm:$0xff] }
 0x2df   :  { %8443 = vmatpush3.bf16.msra.mxu1 %v8959_v54  ;;  %8430 = vmatprep.mubr.msk.bf16.mxu1 %vm34_vm0, %v10112_v57  ;;  %v3365_v57 = vld [vmem:[#allocation2 + $0xbe] sm:$0xff] }
 0x2e0   :  { %8444 = vmatprep.subr.bf16.mxu1 %v8960_v18 }
 0x2e3   :  { %8445 = vmatpush3.bf16.msra.mxu1 %v8960_v18 }
 0x2e4   :  { %8446 = vmatprep.subr.bf16.mxu1 %v8961_v22 }
 0x2e6   :  { %8431 = vmatmul.mubr.msk.bf16.gmra.mrb[32].mxu1 %vm34_vm0, %v10117_v45  ;;  %v3366_v45 = vpack.c.bf16 %v3365_v57, %v3364_v47 }
 0x2e7   :  { %8434 = vmatprep.mubr.msk.bf16.mxu1 %vm34_vm0, %v10126_v11  ;;  %8447 = vmatpush3.bf16.msra.mxu1 %v8961_v22  ;;  %v8964_v11 = vld [vmem:[%s11470_s2 + $0x1e8] sm:$0xff]   ;;  %v8988_v22 = vld [vmem:[%s11471_s3 + $0xf0] ss:$8 sps:$4 sm:$0xff]  }
 0x2e8   :  { %8448 = vmatprep.subr.bf16.mxu1 %v8962_v29 }
 0x2eb   :  { %8449 = vmatpush3.bf16.msra.mxu1 %v8962_v29 }
 0x2ec   :  { %8466 = vmatprep.subr.bf16.mxu1 %v8963_v41 }
 0x2ee   :  { %8435 = vmatmul.mubr.msk.bf16.gmra.mrb[36].mxu1 %vm34_vm0, %v10128_v14  ;;  %v8965_v14 = vld [vmem:[%s11470_s2 + $0x1f0] sm:$0xff]  }
 0x2ef   :  { %8438 = vmatprep.mubr.msk.bf16.mxu1 %vm34_vm0, %v10134_v24  ;;  %v8966_v24 = vld [vmem:[%s11470_s2 + $0x1f8] sm:$0xff]  }
 0x2f6   :  { %8439 = vmatmul.mubr.msk.bf16.gmra.mrb[40].mxu1 %vm34_vm0, %v3366_v45 }
 0x2f7   :  { %8450 = vmatprep.mubr.msk.bf16.mxu1 %vm34_vm0, %v10139_v37  ;;  %v3516_v37 = vld [vmem:[#allocation2 + $0x17e] sm:$0xff] }
 0x2fe   :  { %8451 = vmatmul.mubr.msk.bf16.vlgmr.msra.gmra.mrb[28].mxu1 %vm34_vm0, %v10144_v49  ;;  %v3517_v49 = vld [vmem:[#allocation2 + $0x186] sm:$0xff] }
 0x2ff   :  { %8467 = vmatpush3.bf16.msra.mxu1 %v8963_v41  ;;  %8454 = vmatprep.mubr.msk.bf16.mxu1 %vm34_vm0, %v10153_v61  ;;  %v3518_v61 = vpack.c.bf16 %v3517_v49, %v3516_v37  ;;  %v8993_v41 = vld [vmem:[%s11471_s3 + $0x4] ss:$8 sps:$4 sm:$0xff]  }
 0x300   :  { %8468 = vmatprep.subr.bf16.mxu1 %v8964_v11 }
 0x303   :  { %8469 = vmatpush3.bf16.msra.mxu1 %v8964_v11 }
 0x304   :  { %8470 = vmatprep.subr.bf16.mxu1 %v8965_v14 }
 0x306   :  { %8455 = vmatmul.mubr.msk.bf16.gmra.mrb[32].mxu1 %vm34_vm0, %v10158_v7  ;;  %v3668_v7 = vld [vmem:[#allocation2 + $0xb8] sm:$0xff] }
 0x307   :  { %8458 = vmatprep.mubr.msk.bf16.mxu1 %vm34_vm0, %v10167_v23  ;;  %8471 = vmatpush3.bf16.msra.mxu1 %v8965_v14  ;;  %v3669_v23 = vld [vmem:[#allocation2 + $0xc0] sm:$0xff] }
 0x308   :  { %8472 = vmatprep.subr.bf16.mxu1 %v8966_v24 }
 0x30b   :  { %8473 = vmatpush3.bf16.msra.mxu1 %v8966_v24 }
 0x30e   :  { %8459 = vmatmul.mubr.msk.bf16.gmra.mrb[36].mxu1 %vm34_vm0, %v10169_v31  ;;  %v3670_v31 = vpack.c.bf16 %v3669_v23, %v3668_v7 }
 0x30f   :  { %8462 = vmatprep.mubr.msk.bf16.mxu1 %vm34_vm0, %v10175_v43 }
 0x316   :  { %8463 = vmatmul.mubr.msk.bf16.gmra.mrb[40].mxu1 %vm34_vm0, %v3518_v61 }
 0x317   :  { %8474 = vmatprep.mubr.msk.bf16.mxu1 %vm34_vm0, %v10180_v0 }
 0x31e   :  { %8475 = vmatmul.mubr.msk.bf16.vlgmr.msra.gmra.mrb[28].mxu1 %vm34_vm0, %v10185_v15 }
 0x31f   :  { %8478 = vmatprep.mubr.msk.bf16.mxu1 %vm34_vm0, %v10194_v42 }
 0x326   :  { %8479 = vmatmul.mubr.msk.bf16.gmra.mrb[32].mxu1 %vm34_vm0, %v10199_v50 }
 0x327   :  { %8482 = vmatprep.mubr.msk.bf16.mxu1 %vm34_vm0, %v10208_v26 }
 0x32e   :  { %8483 = vmatmul.mubr.msk.bf16.gmra.mrb[36].mxu1 %vm34_vm0, %v10210_v32 }
 0x32f   :  { %8486 = vmatprep.mubr.msk.bf16.mxu1 %vm34_vm0, %v10216_v36  ;;  %v8969_v36 = vld [vmem:[%s11471_s3 + $0x84] ss:$8 sps:$4 sm:$0xff]  }
 0x330   :  { %4198 = vmatprep.subr.bf16.mxu0 %v8969_v36 }
 0x331   :  { %4199 = vmatpush1.bf16.msra.mxu0 %v8967_v35 }
 0x332   :  { %4200 = vmatprep.subr.bf16.mxu0 %v8972_v52 }
 0x335   :  { %4201 = vmatpush1.bf16.msra.mxu0 %v8970_v25 }
 0x336   :  { %8487 = vmatmul.mubr.msk.bf16.gmra.mrb[40].mxu1 %vm34_vm0, %v3670_v31  ;;  %4202 = vmatprep.subr.bf16.mxu0 %v8975_v27 }
 0x339   :  { %4203 = vmatpush1.bf16.msra.mxu0 %v8973_v56 }
 0x33a   :  { %4204 = vmatprep.subr.bf16.mxu0 %v8978_v63 }
 0x33d   :  { %4205 = vmatpush1.bf16.msra.mxu0 %v8976_v12 }
 0x33e   :  { %4206 = vmatprep.subr.bf16.mxu0 %v8981_v48 }
 0x341   :  { %4207 = vmatpush1.bf16.msra.mxu0 %v8979_v2 }
 0x342   :  { %4208 = vmatprep.subr.bf16.mxu0 %v8984_v20 }
 0x345   :  { %4209 = vmatpush1.bf16.msra.mxu0 %v8982_v38 }
 0x346   :  { %4210 = vmatprep.subr.bf16.mxu0 %v8987_v44 }
 0x349   :  { %4211 = vmatpush1.bf16.msra.mxu0 %v8985_v60 }
 0x34a   :  { %4212 = vmatprep.subr.bf16.mxu0 %v8990_v9 }
 0x34d   :  { %4213 = vmatpush1.bf16.msra.mxu0 %v8988_v22 }
 0x34e   :  { %4331 = vmatprep.subr.bf16.mxu0 %v8993_v41 }
 0x3f1   :  { %v10421_v43 = vpop.f32.mrb[28].mxu1 }
 0x3f2   :  { %v10423_v0 = vpop.f32.mrb[29].mxu1 }
 0x3f3   :  { %v10425_v15 = vpop.f32.mrb[30].mxu1 }
 0x3f4   :  { %v10427_v42 = vpop.f32.mrb[31].mxu1 }
 0x3f5   :  { %v3820_v50 = vadd.f32 %v10427_v42, %v10423_v0 }
 0x3f7   :  { %v3821_v59 = vadd.f32 %v10421_v43, %v3820_v50 }
 0x3f9   :  { %v10432_v3 = vpop.f32.mrb[32].mxu1  ;;  %v3822_v13 = vadd.f32 %v10425_v15, %v3821_v59 }
 0x3fa   :  { %v10435_v26 = vpop.f32.mrb[33].mxu1 }
 0x3fb   :  { %v3823_v32 = vadd.f32 %v3822_v13, %v10435_v26  ;;  %v10438_v21 = vpop.f32.mrb[34].mxu1 }
 0x3fc   :  { %v10446_v8 = vpop.f32.mrb[35].mxu1 }
 0x3fd   :  { %v3824_v19 = vadd.f32 %v3823_v32, %v10446_v8 }
 0x3ff   :  { %v3825_v51 = vadd.f32 %v10432_v3, %v3824_v19 }
 0x401   :  { %v8484_v33 = vpop.f32.mrb[36].mxu1  ;;  %v3826_v34 = vadd.f32 %v10438_v21, %v3825_v51 }
 0x402   :  { %v3773_v53 = vpop.f32.mrb[37].mxu1 }
 0x403   :  { %v3827_v62 = vadd.f32 %v3826_v34, %v3773_v53  ;;  %v8485_v40 = vpop.f32.mrb[38].mxu1 }
 0x404   :  { %v3776_v5 = vpop.f32.mrb[39].mxu1 }
 0x405   :  { %v3828_v6 = vadd.f32 %v3827_v62, %v3776_v5 }
 0x407   :  { %v3829_v46 = vadd.f32 %v8484_v33, %v3828_v6 }
 0x409   :  { %v8488_v55 = vpop.f32.mrb[40].mxu1  ;;  %v3830_v58 = vadd.f32 %v8485_v40, %v3829_v46 }
 0x40a   :  { %v3789_v1 = vpop.f32.mrb[41].mxu1 }
 0x40b   :  { %v3831_v10 = vadd.f32 %v3830_v58, %v3789_v1  ;;  %v8489_v16 = vpop.f32.mrb[42].mxu1 }
 0x40c   :  { %v3792_v28 = vpop.f32.mrb[43].mxu1 }
 0x40d   :  { %v3832_v30 = vadd.f32 %v3831_v10, %v3792_v28 }
 0x40f   :  { %v3833_v39 = vadd.f32 %v8488_v55, %v3832_v30 }
 0x411   :  { %v3834_v54 = vadd.f32 %v8489_v16, %v3833_v39 }
 0x413   :  { %v3835_v4 = vrot.slane %v3834_v54, 4 }
 0x415   :  { %v3836_v18 = vadd.f32 %v3835_v4, %v3834_v54 }
 0x417   :  { %v3837_v29 = vrot.slane %v3836_v18, 2 }
 0x419   :  { %v3838_v47 = vadd.f32 %v3837_v29, %v3836_v18 }
 0x41b   :  { %v3839_v57 = vrot.slane %v3838_v47, 1 }
 0x41d   :  { %v3840_v45 = vadd.f32 %v3839_v57, %v3838_v47 }
 0x41f   :  { %v3842_v11 = vmul.f32 0.0078125, %v3840_v45 }
 0x421   :  { %v3843_v14 = vsub.f32 %v10423_v0, %v3842_v11  ;;  %v3844_v24 = vsub.f32 %v10427_v42, %v3842_v11  ;;  %v3845_v37 = vsub.f32 %v10421_v43, %v3842_v11  ;;  %v3846_v49 = vsub.f32 %v10425_v15, %v3842_v11 }
 0x422   :  { %v3847_v61 = vsub.f32 %v10435_v26, %v3842_v11  ;;  %v3848_v7 = vsub.f32 %v10446_v8, %v3842_v11  ;;  %v3849_v23 = vsub.f32 %v10432_v3, %v3842_v11  ;;  %v3850_v31 = vsub.f32 %v10438_v21, %v3842_v11 }
 0x423   :  { %v3851_v50 = vsub.f32 %v3773_v53, %v3842_v11  ;;  %v3852_v59 = vsub.f32 %v3776_v5, %v3842_v11  ;;  %v3853_v13 = vsub.f32 %v8484_v33, %v3842_v11  ;;  %v3854_v32 = vsub.f32 %v8485_v40, %v3842_v11 }
 0x424   :  { %v3855_v35 = vsub.f32 %v3789_v1, %v3842_v11  ;;  %v3856_v0 = vsub.f32 %v3792_v28, %v3842_v11  ;;  %v3857_v36 = vsub.f32 %v8488_v55, %v3842_v11  ;;  %v3858_v42 = vsub.f32 %v8489_v16, %v3842_v11 }
 0x425   :  { %v3859_v52 = vmul.f32 %v3843_v14, %v3843_v14  ;;  %v3860_v43 = vmul.f32 %v3844_v24, %v3844_v24  ;;  %v3861_v19 = vmul.f32 %v3845_v37, %v3845_v37  ;;  %v3862_v25 = vmul.f32 %v3846_v49, %v3846_v49 }
 0x426   :  { %v3863_v51 = vmul.f32 %v3847_v61, %v3847_v61  ;;  %v3864_v27 = vmul.f32 %v3848_v7, %v3848_v7  ;;  %v3865_v34 = vmul.f32 %v3849_v23, %v3849_v23  ;;  %v3866_v53 = vmul.f32 %v3850_v31, %v3850_v31 }
 0x427   :  { %v3875_v15 = vadd.f32 %v3860_v43, %v3859_v52  ;;  %v3867_v33 = vmul.f32 %v3851_v50, %v3851_v50  ;;  %v3868_v40 = vmul.f32 %v3852_v59, %v3852_v59  ;;  %v3869_v5 = vmul.f32 %v3853_v13, %v3853_v13  ;;  %v7302_v43 = vld [vmem:[%s11473_s5] ss:$0 sm:$0xff] }
 0x428   :  { %v3870_v12 = vmul.f32 %v3854_v32, %v3854_v32  ;;  %v3871_v48 = vmul.f32 %v3855_v35, %v3855_v35  ;;  %v3872_v58 = vmul.f32 %v3856_v0, %v3856_v0  ;;  %v3873_v2 = vmul.f32 %v3857_v36, %v3857_v36 }
 0x429   :  { %v3876_v26 = vadd.f32 %v3875_v15, %v3861_v19  ;;  %v3874_v16 = vmul.f32 %v3858_v42, %v3858_v42 }
 0x42b   :  { %v3877_v8 = vadd.f32 %v3876_v26, %v3862_v25 }
 0x42d   :  { %v3878_v3 = vadd.f32 %v3877_v8, %v3863_v51 }
 0x42f   :  { %v3879_v21 = vadd.f32 %v3878_v3, %v3864_v27 }
 0x431   :  { %v3880_v56 = vadd.f32 %v3879_v21, %v3865_v34  ;;  %v7303_v34 = vld [vmem:[%s11474_s6] ss:$0 sm:$0xff] }
 0x433   :  { %v3881_v62 = vadd.f32 %v3880_v56, %v3866_v53 }
 0x435   :  { %v3882_v63 = vadd.f32 %v3881_v62, %v3867_v33 }
 0x437   :  { %v3883_v6 = vadd.f32 %v3882_v63, %v3868_v40 }
 0x439   :  { %v3884_v46 = vadd.f32 %v3883_v6, %v3869_v5 }
 0x43b   :  { %v3885_v55 = vadd.f32 %v3884_v46, %v3870_v12 }
 0x43d   :  { %v3886_v1 = vadd.f32 %v3885_v55, %v3871_v48 }
 0x43f   :  { %v3887_v10 = vadd.f32 %v3886_v1, %v3872_v58 }
 0x441   :  { %v3888_v20 = vadd.f32 %v3887_v10, %v3873_v2 }
 0x443   :  { %v3889_v28 = vadd.f32 %v3888_v20, %v3874_v16 }
 0x445   :  { %v3890_v30 = vrot.slane %v3889_v28, 4 }
 0x447   :  { %v3891_v38 = vadd.f32 %v3890_v30, %v3889_v28 }
 0x449   :  { %v3892_v39 = vrot.slane %v3891_v38, 2 }
 0x44b   :  { %v3893_v44 = vadd.f32 %v3892_v39, %v3891_v38 }
 0x44d   :  { %v3894_v54 = vrot.slane %v3893_v44, 1 }
 0x44f   :  { %v3895_v60 = vadd.f32 %v3894_v54, %v3893_v44 }
 0x451   :  { %v3896_v4 = vmul.f32 0.0078125, %v3895_v60 }
 0x453   :  { %v3897_v9 = vadd.f32 1e-05, %v3896_v4 }
 0x455   :  { %9351 = vrsqrt.f32 %v3897_v9 }
 0x45f   :  { %v9352_v18 = vpop.eup %9351 }
 0x460   :  { %v3899_v22 = vmul.f32 %v9352_v18, %v3843_v14  ;;  %v3900_v29 = vmul.f32 %v9352_v18, %v3844_v24  ;;  %v3901_v41 = vmul.f32 %v9352_v18, %v3845_v37  ;;  %v3902_v47 = vmul.f32 %v9352_v18, %v3846_v49 }
 0x461   :  { %v3903_v57 = vmul.f32 %v9352_v18, %v3847_v61  ;;  %v3904_v45 = vmul.f32 %v9352_v18, %v3848_v7  ;;  %v3905_v11 = vmul.f32 %v9352_v18, %v3849_v23  ;;  %v3906_v52 = vmul.f32 %v9352_v18, %v3850_v31 }
 0x462   :  { %v3907_v19 = vmul.f32 %v9352_v18, %v3851_v50  ;;  %v3908_v15 = vmul.f32 %v9352_v18, %v3852_v59  ;;  %v3909_v25 = vmul.f32 %v9352_v18, %v3853_v13  ;;  %v3910_v26 = vmul.f32 %v9352_v18, %v3854_v32 }
 0x463   :  { %v3911_v51 = vmul.f32 %v9352_v18, %v3855_v35  ;;  %v3912_v8 = vmul.f32 %v9352_v18, %v3856_v0  ;;  %v3913_v27 = vmul.f32 %v9352_v18, %v3857_v36  ;;  %v3914_v3 = vmul.f32 %v9352_v18, %v3858_v42 }
 0x464   :  { %v3922_v14 = vmul.f32 %v7302_v43, %v3899_v22  ;;  %v3923_v24 = vmul.f32 %v7302_v43, %v3900_v29  ;;  %v3924_v37 = vmul.f32 %v7302_v43, %v3901_v41  ;;  %v3925_v49 = vmul.f32 %v7302_v43, %v3902_v47 }
 0x465   :  { %v3926_v61 = vmul.f32 %v7302_v43, %v3903_v57  ;;  %v3927_v7 = vmul.f32 %v7302_v43, %v3904_v45  ;;  %v3928_v23 = vmul.f32 %v7302_v43, %v3905_v11  ;;  %v3929_v31 = vmul.f32 %v7302_v43, %v3906_v52 }
 0x466   :  { %v3930_v50 = vmul.f32 %v7302_v43, %v3907_v19  ;;  %v3931_v59 = vmul.f32 %v7302_v43, %v3908_v15  ;;  %v3932_v13 = vmul.f32 %v7302_v43, %v3909_v25  ;;  %v3933_v32 = vmul.f32 %v7302_v43, %v3910_v26 }
 0x467   :  { %v3934_v35 = vmul.f32 %v7302_v43, %v3911_v51  ;;  %v3935_v0 = vmul.f32 %v7302_v43, %v3912_v8  ;;  %v3936_v36 = vmul.f32 %v7302_v43, %v3913_v27  ;;  %v3937_v42 = vmul.f32 %v7302_v43, %v3914_v3 }
 0x468   :  { %v3945_v21 = vadd.f32 %v7303_v34, %v3922_v14  ;;  %v3946_v53 = vadd.f32 %v7303_v34, %v3923_v24  ;;  %v3947_v56 = vadd.f32 %v7303_v34, %v3924_v37  ;;  %v3948_v33 = vadd.f32 %v7303_v34, %v3925_v49  ;;  %v4095_v37 = vld [vmem:[#allocation3 + $0x92] sm:$0xff]  ;;  %v8991_v49 = vld [vmem:[%s11471_s3] ss:$8 sps:$4 sm:$0xff]  }
 0x469   :  { %v3949_v62 = vadd.f32 %v7303_v34, %v3926_v61  ;;  %v3950_v40 = vadd.f32 %v7303_v34, %v3927_v7  ;;  %v3951_v63 = vadd.f32 %v7303_v34, %v3928_v23  ;;  %v3952_v5 = vadd.f32 %v7303_v34, %v3929_v31  ;;  %v8996_v61 = vld [vmem:[%s11471_s3 + $0x14] ss:$8 sps:$4 sm:$0xff]  }
 0x46a   :  { %v3953_v6 = vadd.f32 %v7303_v34, %v3930_v50  ;;  %v3954_v12 = vadd.f32 %v7303_v34, %v3931_v59  ;;  %v3955_v46 = vadd.f32 %v7303_v34, %v3932_v13  ;;  %v3956_v48 = vadd.f32 %v7303_v34, %v3933_v32 }
 0x46b   :  { %v3957_v55 = vadd.f32 %v7303_v34, %v3934_v35  ;;  %v3958_v58 = vadd.f32 %v7303_v34, %v3935_v0  ;;  %v10511_v1 = vadd.f32 %v7303_v34, %v3936_v36  ;;  %v10513_v2 = vadd.f32 %v7303_v34, %v3937_v42 }
 0x46c   :  { %vm3961_vm0 = vcmp.gt.f32.partialorder %v3945_v21, 0.0  ;;  %vm3962_vm6 = vcmp.gt.f32.partialorder %v3946_v53, 0.0  ;;  %vm3963_vm7 = vcmp.gt.f32.partialorder %v3947_v56, 0.0  ;;  %vm3964_vm8 = vcmp.gt.f32.partialorder %v3948_v33, 0.0 }
 0x46d   :  { %vm3965_vm9 = vcmp.gt.f32.partialorder %v3949_v62, 0.0  ;;  %vm3966_vm10 = vcmp.gt.f32.partialorder %v3950_v40, 0.0  ;;  %vm3967_vm11 = vcmp.gt.f32.partialorder %v3951_v63, 0.0  ;;  %vm3968_vm12 = vcmp.gt.f32.partialorder %v3952_v5, 0.0 }
 0x46e   :  { %vm3969_vm13 = vcmp.gt.f32.partialorder %v3953_v6, 0.0  ;;  %vm3970_vm14 = vcmp.gt.f32.partialorder %v3954_v12, 0.0  ;;  %vm3971_vm15 = vcmp.gt.f32.partialorder %v3955_v46, 0.0  ;;  %vm3972_vm1 = vcmp.gt.f32.partialorder %v3956_v48, 0.0 }
 0x46f   :  { %vm3973_vm2 = vcmp.gt.f32.partialorder %v3957_v55, 0.0  ;;  %vm3974_vm3 = vcmp.gt.f32.partialorder %v3958_v58, 0.0  ;;  %vm3975_vm4 = vcmp.gt.f32.partialorder %v10511_v1, 0.0  ;;  %vm3976_vm5 = vcmp.gt.f32.partialorder %v10513_v2, 0.0 }
 0x470   :  { %v3977_v10 = vmul.f32 0.2, %v3945_v21  ;;  %v3978_v16 = vmul.f32 0.2, %v3946_v53  ;;  %v3979_v20 = vmul.f32 0.2, %v3947_v56 }
 0x471   :  { %v3980_v28 = vmul.f32 0.2, %v3948_v33  ;;  %v3981_v30 = vmul.f32 0.2, %v3949_v62  ;;  %v3982_v38 = vmul.f32 0.2, %v3950_v40 }
 0x472   :  { %v3983_v39 = vmul.f32 0.2, %v3951_v63  ;;  %v3984_v44 = vmul.f32 0.2, %v3952_v5  ;;  %v3985_v54 = vmul.f32 0.2, %v3953_v6  ;;  %v3993_v60 = vsel %vm3961_vm0, %v3945_v21, %v3977_v10 }
 0x473   :  { %v3986_v4 = vmul.f32 0.2, %v3954_v12  ;;  %v3987_v9 = vmul.f32 0.2, %v3955_v46  ;;  %v3988_v18 = vmul.f32 0.2, %v3956_v48  ;;  %v3994_v22 = vsel %vm3962_vm6, %v3946_v53, %v3978_v16 }
 0x474   :  { %4009 = vst [vmem:[#allocation3 + $0xe] ss:$72 sps:$4 sm:$0xc3] %v3993_v60   ;;  %4010 = vst [vmem:[#allocation3 + $0x54] ss:$-68 sps:$4 sm:$0x3c] %v3993_v60   ;;  %v3995_v57 = vsel %vm3963_vm7, %v3947_v56, %v3979_v20  ;;  %v3996_v11 = vsel %vm3964_vm8, %v3948_v33, %v3980_v28  ;;  %v3997_v52 = vsel %vm3965_vm9, %v3949_v62, %v3981_v30 }
 0x475   :  { %v3989_v29 = vmul.f32 0.2, %v3957_v55  ;;  %v3990_v41 = vmul.f32 0.2, %v3958_v58  ;;  %v3991_v47 = vmul.f32 0.2, %v10511_v1  ;;  %v3998_v43 = vsel %vm3966_vm10, %v3950_v40, %v3982_v38 }
 0x476   :  { %4013 = vst [vmem:[#allocation3 + $0x12] ss:$72 sps:$4 sm:$0xc3] %v3994_v22   ;;  %4014 = vst [vmem:[#allocation3 + $0x58] ss:$-68 sps:$4 sm:$0x3c] %v3994_v22   ;;  %v3999_v19 = vsel %vm3967_vm11, %v3951_v63, %v3983_v39  ;;  %v4000_v15 = vsel %vm3968_vm12, %v3952_v5, %v3984_v44  ;;  %v4001_v25 = vsel %vm3969_vm13, %v3953_v6, %v3985_v54 }
 0x477   :  { %v3992_v45 = vmul.f32 0.2, %v10513_v2  ;;  %4017 = vst [vmem:[#allocation3 + $0x9e] ss:$72 sps:$4 sm:$0xc3] %v3995_v57   ;;  %v4002_v26 = vsel %vm3970_vm14, %v3954_v12, %v3986_v4  ;;  %v4003_v51 = vsel %vm3971_vm15, %v3955_v46, %v3987_v9  ;;  %v4004_v8 = vsel %vm3972_vm1, %v3956_v48, %v3988_v18 }
 0x478   :  { %4018 = vst [vmem:[#allocation3 + $0xe4] ss:$-68 sps:$4 sm:$0x3c] %v3995_v57   ;;  %4021 = vst [vmem:[#allocation3 + $0xa2] ss:$72 sps:$4 sm:$0xc3] %v3996_v11   ;;  %v4005_v27 = vsel %vm3973_vm2, %v3957_v55, %v3989_v29  ;;  %v4006_v3 = vsel %vm3974_vm3, %v3958_v58, %v3990_v41  ;;  %v4007_v14 = vsel %vm3975_vm4, %v10511_v1, %v3991_v47 }
 0x479   :  { %4022 = vst [vmem:[#allocation3 + $0xe8] ss:$-68 sps:$4 sm:$0x3c] %v3996_v11   ;;  %4025 = vst [vmem:[#allocation3 + $0x1a] ss:$72 sps:$4 sm:$0xc3] %v3997_v52   ;;  %v4008_v24 = vsel %vm3976_vm5, %v10513_v2, %v3992_v45 }
 0x47a   :  { %4026 = vst [vmem:[#allocation3 + $0x60] ss:$-68 sps:$4 sm:$0x3c] %v3997_v52   ;;  %4029 = vst [vmem:[#allocation3 + $0x1e] ss:$72 sps:$4 sm:$0xc3] %v3998_v43  }
 0x47b   :  { %4030 = vst [vmem:[#allocation3 + $0x64] ss:$-68 sps:$4 sm:$0x3c] %v3998_v43   ;;  %4037 = vst [vmem:[#allocation3 + $0xae] ss:$72 sps:$4 sm:$0xc3] %v4000_v15  }
 0x47c   :  { %4038 = vst [vmem:[#allocation3 + $0xf4] ss:$-68 sps:$4 sm:$0x3c] %v4000_v15   ;;  %4041 = vst [vmem:[#allocation3 + $0x26] ss:$72 sps:$4 sm:$0xc3] %v4001_v25  }
 0x47d   :  { %4042 = vst [vmem:[#allocation3 + $0x6c] ss:$-68 sps:$4 sm:$0x3c] %v4001_v25   ;;  %4045 = vst [vmem:[#allocation3 + $0x2a] ss:$72 sps:$4 sm:$0xc3] %v4002_v26  }
 0x47e   :  { %4046 = vst [vmem:[#allocation3 + $0x70] ss:$-68 sps:$4 sm:$0x3c] %v4002_v26   ;;  %4033 = vst [vmem:[#allocation3 + $0xaa] ss:$72 sps:$4 sm:$0xc3] %v3999_v19  }
 0x47f   :  { %4034 = vst [vmem:[#allocation3 + $0xf0] ss:$-68 sps:$4 sm:$0x3c] %v3999_v19   ;;  %4049 = vst [vmem:[#allocation3 + $0xb6] ss:$72 sps:$4 sm:$0xc3] %v4003_v51  }
 0x480   :  { %4050 = vst [vmem:[#allocation3 + $0xfc] ss:$-68 sps:$4 sm:$0x3c] %v4003_v51   ;;  %4053 = vst [vmem:[#allocation3 + $0xba] ss:$72 sps:$4 sm:$0xc3] %v4004_v8  }
 0x481   :  { %4054 = vst [vmem:[#allocation3 + $0x100] ss:$-68 sps:$4 sm:$0x3c] %v4004_v8   ;;  %4057 = vst [vmem:[#allocation3 + $0x32] ss:$72 sps:$4 sm:$0xc3] %v4005_v27  }
 0x482   :  { %4058 = vst [vmem:[#allocation3 + $0x78] ss:$-68 sps:$4 sm:$0x3c] %v4005_v27   ;;  %4061 = vst [vmem:[#allocation3 + $0x36] ss:$72 sps:$4 sm:$0xc3] %v4006_v3  }
 0x483   :  { %4062 = vst [vmem:[#allocation3 + $0x7c] ss:$-68 sps:$4 sm:$0x3c] %v4006_v3   ;;  %4065 = vst [vmem:[#allocation3 + $0xc2] ss:$72 sps:$4 sm:$0xc3] %v4007_v14  }
 0x484   :  { %4066 = vst [vmem:[#allocation3 + $0x108] ss:$-68 sps:$4 sm:$0x3c] %v4007_v14   ;;  %4069 = vst [vmem:[#allocation3 + $0xc6] ss:$72 sps:$4 sm:$0xc3] %v4008_v24  }
 0x485   :  { %4070 = vst [vmem:[#allocation3 + $0x10c] ss:$-68 sps:$4 sm:$0x3c] %v4008_v24   ;;  %v10545_v7 = vld [vmem:[#allocation3 + $0x9e] sm:$0xff]  ;;  %v10549_v31 = vld [vmem:[#allocation3 + $0xe6] sm:$0xff]  ;;  %v10593_v48 = vld [vmem:[#allocation3 + $0x6e] sm:$0xff] }
 0x486   :  { %v10547_v23 = vld [vmem:[#allocation3 + $0xe4] sm:$0xff]  ;;  %v4099_v34 = vpack.c.bf16 %v10545_v7, %v4095_v37  ;;  %v10554_v59 = vld [vmem:[#allocation3 + $0xf0] sm:$0xff]  ;;  %v10585_v5 = vld [vmem:[#allocation3 + $0x1a] sm:$0xff]  ;;  %vm6884_vm2 = vcmask 15360   ;;  %vm6904_vm3 = vcmask 8192  }
 0x487   :  { %v10552_v50 = vld [vmem:[#allocation3 + $0xaa] sm:$0xff]  ;;  %v10556_v13 = vld [vmem:[#allocation3 + $0xf2] sm:$0xff]  ;;  %v5369_v35 = vpack.c.bf16 %v10554_v59, %v10547_v23  ;;  %v10564_v36 = vld [vmem:[#allocation3 + $0xa0] sm:$0xff] }
 0x488   :  { %v5530_v32 = vpack.c.bf16 %v10552_v50, %v10545_v7  ;;  %v5691_v0 = vpack.c.bf16 %v10556_v13, %v10549_v31  ;;  %4231 = vmatmul.mubr.bf16.vlgmr.msra.gmra.mrb[36].mxu0 %v4099_v34  ;;  %v10566_v42 = vld [vmem:[#allocation3 + $0xac] sm:$0xff]  ;;  %v10574_v56 = vld [vmem:[#allocation3 + $0x60] sm:$0xff]  ;;  %v10581_v40 = vld [vmem:[#allocation3 + $0xb6] sm:$0xff] }
 0x489   :  { %4332 = vmatpush1.bf16.msra.mxu0 %v8991_v49  ;;  %v8994_v21 = vld [vmem:[%s11471_s3 + $0x10] ss:$8 sps:$4 sm:$0xff]   ;;  %4240 = vmatprep.mubr.bf16.mxu0 %v9388_v17  ;;  %v5852_v53 = vpack.c.bf16 %v10566_v42, %v10564_v36  ;;  %v8999_v33 = vld [vmem:[%s11471_s3 + $0x24] ss:$8 sps:$4 sm:$0xff]   ;;  %v8997_v55 = vld [vmem:[%s11471_s3 + $0x20] ss:$8 sps:$4 sm:$0xff]   ;;  %v4100_v10 = vpack.c.bf16 %v10581_v40, %v10552_v50 }
 0x48a   :  { %4333 = vmatprep.subr.bf16.mxu0 %v8996_v61  ;;  %v10579_v62 = vld [vmem:[#allocation3 + $0x6c] sm:$0xff]  ;;  %v10591_v46 = vld [vmem:[#allocation3 + $0x62] sm:$0xff]  ;;  %v9002_v16 = vld [vmem:[%s11471_s3 + $0x34] ss:$8 sps:$4 sm:$0xff]  }
 0x48b   :  { %v6013_v63 = vpack.c.bf16 %v10579_v62, %v10574_v56  ;;  %v10587_v6 = vld [vmem:[#allocation3 + $0x26] sm:$0xff]  ;;  %v6335_v58 = vpack.c.bf16 %v10593_v48, %v10591_v46  ;;  %v10600_v1 = vld [vmem:[#allocation3 + $0x1c] sm:$0xff]  ;;  %v9000_v28 = vld [vmem:[%s11471_s3 + $0x30] ss:$8 sps:$4 sm:$0xff]  }
 0x48c   :  { %v6174_v12 = vpack.c.bf16 %v10587_v6, %v10585_v5  ;;  %v10602_v2 = vld [vmem:[#allocation3 + $0x28] sm:$0xff]  ;;  %v9008_v39 = vld [vmem:[%s11471_s3 + $0x54] ss:$8 sps:$4 sm:$0xff]   ;;  %v9006_v44 = vld [vmem:[%s11471_s3 + $0x50] ss:$8 sps:$4 sm:$0xff]  }
 0x48d   :  { %4334 = vmatpush1.bf16.msra.mxu0 %v8994_v21  ;;  %v6496_v20 = vpack.c.bf16 %v10602_v2, %v10600_v1  ;;  %v9005_v30 = vld [vmem:[%s11471_s3 + $0x44] ss:$8 sps:$4 sm:$0xff]   ;;  %v9003_v38 = vld [vmem:[%s11471_s3 + $0x40] ss:$8 sps:$4 sm:$0xff]   ;;  %v9014_v4 = vld [vmem:[%s11471_s3 + $0x74] ss:$8 sps:$4 sm:$0xff]  }
 0x48e   :  { %4335 = vmatprep.subr.bf16.mxu0 %v8999_v33  ;;  %v9011_v54 = vld [vmem:[%s11471_s3 + $0x64] ss:$8 sps:$4 sm:$0xff]   ;;  %v9009_v60 = vld [vmem:[%s11471_s3 + $0x60] ss:$8 sps:$4 sm:$0xff]   ;;  %v9012_v9 = vld [vmem:[%s11471_s3 + $0x70] ss:$8 sps:$4 sm:$0xff]  }
 0x48f   :  { %v9017_v18 = vld [vmem:[%s11471_s3 + $0x104] ss:$8 sps:$4 sm:$0xff]   ;;  %v9015_v22 = vld [vmem:[%s11471_s3 + $0x100] ss:$8 sps:$4 sm:$0xff]   ;;  %v9020_v47 = vld [vmem:[%s11471_s3 + $0x114] ss:$8 sps:$4 sm:$0xff]  }
 0x490   :  { %4241 = vmatmul.mubr.bf16.gmra.mrb[40].mxu0 %v4100_v10  ;;  %v9361_v29 = vld [vmem:[#allocation3] sm:$0xff]  ;;  %v9018_v57 = vld [vmem:[%s11471_s3 + $0x110] ss:$8 sps:$4 sm:$0xff]   ;;  %v9026_v19 = vld [vmem:[%s11471_s3 + $0x134] ss:$8 sps:$4 sm:$0xff]  }
 0x491   :  { %4336 = vmatpush1.bf16.msra.mxu0 %v8997_v55  ;;  %4363 = vmatprep.mubr.bf16.mxu0 %v9388_v17  ;;  %v4077_v41 = vpack.c.bf16 %v10547_v23, %v9361_v29  ;;  %v9023_v45 = vld [vmem:[%s11471_s3 + $0x124] ss:$8 sps:$4 sm:$0xff]   ;;  %v10656_v11 = vld [vmem:[#allocation3 + $0xfc] sm:$0xff]  ;;  %v9024_v15 = vld [vmem:[%s11471_s3 + $0x130] ss:$8 sps:$4 sm:$0xff]  }
 0x492   :  { %4337 = vmatprep.subr.bf16.mxu0 %v9002_v16  ;;  %v9021_v52 = vld [vmem:[%s11471_s3 + $0x120] ss:$8 sps:$4 sm:$0xff]   ;;  %v4078_v43 = vpack.c.bf16 %v10656_v11, %v10554_v59  ;;  %v9029_v25 = vld [vmem:[%s11471_s3 + $0x144] ss:$8 sps:$4 sm:$0xff]   ;;  %v9032_v51 = vld [vmem:[%s11471_s3 + $0x154] ss:$8 sps:$4 sm:$0xff]  }
 0x493   :  { %v9027_v26 = vld [vmem:[%s11471_s3 + $0x140] ss:$8 sps:$4 sm:$0xff]   ;;  %v9030_v8 = vld [vmem:[%s11471_s3 + $0x150] ss:$8 sps:$4 sm:$0xff]   ;;  %v9035_v27 = vld [vmem:[%s11471_s3 + $0x164] ss:$8 sps:$4 sm:$0xff]  }
 0x494   :  { %v9033_v3 = vld [vmem:[%s11471_s3 + $0x160] ss:$8 sps:$4 sm:$0xff]   ;;  %v9038_v14 = vld [vmem:[%s11471_s3 + $0x174] ss:$8 sps:$4 sm:$0xff]   ;;  %v9036_v24 = vld [vmem:[%s11471_s3 + $0x170] ss:$8 sps:$4 sm:$0xff]  }
 0x495   :  { %4338 = vmatpush1.bf16.msra.mxu0 %v9000_v28  ;;  %v9041_v37 = vld [vmem:[%s11471_s3 + $0x184] ss:$8 sps:$4 sm:$0xff]   ;;  %v4384_v49 = vld [vmem:[#allocation3 + $0xda] sm:$0xff] }
 0x496   :  { %4339 = vmatprep.subr.bf16.mxu0 %v9005_v30  ;;  %v9039_v61 = vld [vmem:[%s11471_s3 + $0x180] ss:$8 sps:$4 sm:$0xff]   ;;  %v4388_v34 = vpack.c.bf16 %v10549_v31, %v4384_v49  ;;  %v9044_v21 = vld [vmem:[%s11471_s3 + $0x194] ss:$8 sps:$4 sm:$0xff]   ;;  %v9042_v33 = vld [vmem:[%s11471_s3 + $0x190] ss:$8 sps:$4 sm:$0xff]  }
 0x497   :  { %v9047_v55 = vld [vmem:[%s11471_s3 + $0x1a4] ss:$8 sps:$4 sm:$0xff]   ;;  %v9045_v16 = vld [vmem:[%s11471_s3 + $0x1a0] ss:$8 sps:$4 sm:$0xff]   ;;  %v9050_v30 = vld [vmem:[%s11471_s3 + $0x1b4] ss:$8 sps:$4 sm:$0xff]  }
 0x498   :  { %v10711_v10 = vld [vmem:[#allocation3 + $0xfe] sm:$0xff] }
 0x499   :  { %4340 = vmatpush1.bf16.msra.mxu0 %v9003_v38  ;;  %v4389_v28 = vpack.c.bf16 %v10711_v10, %v10556_v13  ;;  %v9048_v38 = vld [vmem:[%s11471_s3 + $0x1b0] ss:$8 sps:$4 sm:$0xff]   ;;  %v9065_v29 = vld [vmem:[%s11471_s3 + $0x204] ss:$8 sps:$4 sm:$0xff]   ;;  %v9086_v49 = vld [vmem:[%s11471_s3 + $0x274] ss:$8 sps:$4 sm:$0xff]  }
 0x49a   :  { %4341 = vmatprep.subr.bf16.mxu0 %v9008_v39  ;;  %v9053_v39 = vld [vmem:[%s11471_s3 + $0x1c4] ss:$8 sps:$4 sm:$0xff]   ;;  %v9194_v59 = vld [vmem:[%s11471_s3 + $0x4b4] ss:$8 sps:$4 sm:$0xff]  }
 0x49b   :  { %v9218_v50 = vld [vmem:[%s11471_s3 + $0x534] ss:$8 sps:$4 sm:$0xff]  }
 0x49c   :  { %v9242_v13 = vld [vmem:[%s11471_s3 + $0x5b4] ss:$8 sps:$4 sm:$0xff]  }
 0x49d   :  { %4342 = vmatpush1.bf16.msra.mxu0 %v9006_v44  ;;  %v9051_v44 = vld [vmem:[%s11471_s3 + $0x1c0] ss:$8 sps:$4 sm:$0xff]  }
 0x49e   :  { %4343 = vmatprep.subr.bf16.mxu0 %v9011_v54  ;;  %v9056_v54 = vld [vmem:[%s11471_s3 + $0x1d4] ss:$8 sps:$4 sm:$0xff]  }
 0x4a1   :  { %4344 = vmatpush1.bf16.msra.mxu0 %v9009_v60  ;;  %v9054_v60 = vld [vmem:[%s11471_s3 + $0x1d0] ss:$8 sps:$4 sm:$0xff]  }
 0x4a2   :  { %4345 = vmatprep.subr.bf16.mxu0 %v9014_v4  ;;  %v9059_v4 = vld [vmem:[%s11471_s3 + $0x1e4] ss:$8 sps:$4 sm:$0xff]  }
 0x4a5   :  { %4346 = vmatpush1.bf16.msra.mxu0 %v9012_v9  ;;  %v9057_v9 = vld [vmem:[%s11471_s3 + $0x1e0] ss:$8 sps:$4 sm:$0xff]  }
 0x4a6   :  { %4487 = vmatprep.subr.bf16.mxu0 %v9017_v18  ;;  %v9062_v18 = vld [vmem:[%s11471_s3 + $0x1f4] ss:$8 sps:$4 sm:$0xff]  }
 0x4a8   :  { %4364 = vmatmul.mubr.bf16.vlgmr.msra.gmra.mrb[36].mxu0 %v4077_v41  ;;  %v4548_v41 = vld [vmem:[#allocation3 + $0x94] sm:$0xff] }
 0x4a9   :  { %4488 = vmatpush1.bf16.msra.mxu0 %v9015_v22  ;;  %4373 = vmatprep.mubr.bf16.mxu0 %v9388_v17  ;;  %v9060_v22 = vld [vmem:[%s11471_s3 + $0x1f0] ss:$8 sps:$4 sm:$0xff]  }
 0x4aa   :  { %4489 = vmatprep.subr.bf16.mxu0 %v9020_v47  ;;  %v9063_v47 = vld [vmem:[%s11471_s3 + $0x200] ss:$8 sps:$4 sm:$0xff]  }
 0x4ad   :  { %4490 = vmatpush1.bf16.msra.mxu0 %v9018_v57  ;;  %v4552_v57 = vpack.c.bf16 %v10564_v36, %v4548_v41  ;;  %v9105_v41 = vld [vmem:[%s11471_s3 + $0x2e0] ss:$8 sps:$4 sm:$0xff]  }
 0x4ae   :  { %4491 = vmatprep.subr.bf16.mxu0 %v9023_v45  ;;  %v9068_v45 = vld [vmem:[%s11471_s3 + $0x214] ss:$8 sps:$4 sm:$0xff]  }
 0x4b0   :  { %4374 = vmatmul.mubr.bf16.gmra.mrb[40].mxu0 %v4078_v43  ;;  %v9071_v43 = vld [vmem:[%s11471_s3 + $0x224] ss:$8 sps:$4 sm:$0xff]  }
 0x4b1   :  { %4492 = vmatpush1.bf16.msra.mxu0 %v9021_v52  ;;  %4519 = vmatprep.mubr.bf16.mxu0 %v9388_v17  ;;  %v9066_v52 = vld [vmem:[%s11471_s3 + $0x210] ss:$8 sps:$4 sm:$0xff]  }
 0x4b2   :  { %4493 = vmatprep.subr.bf16.mxu0 %v9026_v19  ;;  %v10766_v19 = vld [vmem:[#allocation3 + $0xb8] sm:$0xff] }
 0x4b5   :  { %4494 = vmatpush1.bf16.msra.mxu0 %v9024_v15  ;;  %v9069_v15 = vld [vmem:[%s11471_s3 + $0x220] ss:$8 sps:$4 sm:$0xff]  }
 0x4b6   :  { %4495 = vmatprep.subr.bf16.mxu0 %v9029_v25  ;;  %v4553_v25 = vpack.c.bf16 %v10766_v19, %v10566_v42  ;;  %v9266_v42 = vld [vmem:[%s11471_s3 + $0x634] ss:$8 sps:$4 sm:$0xff]  }
 0x4b9   :  { %4496 = vmatpush1.bf16.msra.mxu0 %v9027_v26  ;;  %v9074_v26 = vld [vmem:[%s11471_s3 + $0x234] ss:$8 sps:$4 sm:$0xff]  }
 0x4ba   :  { %4497 = vmatprep.subr.bf16.mxu0 %v9032_v51  ;;  %v9072_v51 = vld [vmem:[%s11471_s3 + $0x230] ss:$8 sps:$4 sm:$0xff]  }
 0x4bd   :  { %4498 = vmatpush1.bf16.msra.mxu0 %v9030_v8  ;;  %v9077_v8 = vld [vmem:[%s11471_s3 + $0x244] ss:$8 sps:$4 sm:$0xff]  }
 0x4be   :  { %4499 = vmatprep.subr.bf16.mxu0 %v9035_v27  ;;  %v9075_v27 = vld [vmem:[%s11471_s3 + $0x240] ss:$8 sps:$4 sm:$0xff]  }
 0x4c1   :  { %4500 = vmatpush1.bf16.msra.mxu0 %v9033_v3  ;;  %v9080_v3 = vld [vmem:[%s11471_s3 + $0x254] ss:$8 sps:$4 sm:$0xff]  }
 0x4c2   :  { %4501 = vmatprep.subr.bf16.mxu0 %v9038_v14  ;;  %v9078_v14 = vld [vmem:[%s11471_s3 + $0x250] ss:$8 sps:$4 sm:$0xff]  }
 0x4c5   :  { %4502 = vmatpush1.bf16.msra.mxu0 %v9036_v24  ;;  %v9083_v24 = vld [vmem:[%s11471_s3 + $0x264] ss:$8 sps:$4 sm:$0xff]  }
 0x4c6   :  { %4651 = vmatprep.subr.bf16.mxu0 %v9041_v37  ;;  %v9081_v37 = vld [vmem:[%s11471_s3 + $0x260] ss:$8 sps:$4 sm:$0xff]  }
 0x4c8   :  { %4520 = vmatmul.mubr.bf16.vlgmr.msra.gmra.mrb[36].mxu0 %v4388_v34  ;;  %v9089_v34 = vld [vmem:[%s11471_s3 + $0x284] ss:$8 sps:$4 sm:$0xff]  }
 0x4c9   :  { %4652 = vmatpush1.bf16.msra.mxu0 %v9039_v61  ;;  %4529 = vmatprep.mubr.bf16.mxu0 %v9388_v17  ;;  %v9084_v61 = vld [vmem:[%s11471_s3 + $0x270] ss:$8 sps:$4 sm:$0xff]  }
 0x4ca   :  { %4653 = vmatprep.subr.bf16.mxu0 %v9044_v21  ;;  %v4712_v21 = vld [vmem:[#allocation3 + $0x54] sm:$0xff] }
 0x4cd   :  { %4654 = vmatpush1.bf16.msra.mxu0 %v9042_v33  ;;  %v9087_v33 = vld [vmem:[%s11471_s3 + $0x280] ss:$8 sps:$4 sm:$0xff]  }
 0x4ce   :  { %4655 = vmatprep.subr.bf16.mxu0 %v9047_v55  ;;  %v4716_v55 = vpack.c.bf16 %v10574_v56, %v4712_v21  ;;  %v9131_v21 = vld [vmem:[%s11471_s3 + $0x364] ss:$8 sps:$4 sm:$0xff]  }
 0x4d0   :  { %4530 = vmatmul.mubr.bf16.gmra.mrb[40].mxu0 %v4389_v28  ;;  %v9090_v28 = vld [vmem:[%s11471_s3 + $0x290] ss:$8 sps:$4 sm:$0xff]  }
 0x4d1   :  { %4656 = vmatpush1.bf16.msra.mxu0 %v9045_v16  ;;  %4683 = vmatprep.mubr.bf16.mxu0 %v9388_v17  ;;  %v9092_v16 = vld [vmem:[%s11471_s3 + $0x294] ss:$8 sps:$4 sm:$0xff]  }
 0x4d2   :  { %4657 = vmatprep.subr.bf16.mxu0 %v9050_v30  ;;  %v9095_v30 = vld [vmem:[%s11471_s3 + $0x2a4] ss:$8 sps:$4 sm:$0xff]  }
 0x4d5   :  { %4658 = vmatpush1.bf16.msra.mxu0 %v9048_v38  ;;  %v10821_v38 = vld [vmem:[#allocation3 + $0x78] sm:$0xff] }
 0x4d6   :  { %4659 = vmatprep.subr.bf16.mxu0 %v9053_v39  ;;  %v9093_v39 = vld [vmem:[%s11471_s3 + $0x2a0] ss:$8 sps:$4 sm:$0xff]  }
 0x4d9   :  { %4660 = vmatpush1.bf16.msra.mxu0 %v9051_v44  ;;  %v4717_v44 = vpack.c.bf16 %v10821_v38, %v10579_v62  ;;  %v9290_v62 = vld [vmem:[%s11471_s3 + $0x6b4] ss:$8 sps:$4 sm:$0xff]  }
 0x4da   :  { %4661 = vmatprep.subr.bf16.mxu0 %v9056_v54  ;;  %v9098_v54 = vld [vmem:[%s11471_s3 + $0x2b4] ss:$8 sps:$4 sm:$0xff]  }
 0x4dd   :  { %4662 = vmatpush1.bf16.msra.mxu0 %v9054_v60  ;;  %v9096_v60 = vld [vmem:[%s11471_s3 + $0x2b0] ss:$8 sps:$4 sm:$0xff]  }
 0x4de   :  { %4663 = vmatprep.subr.bf16.mxu0 %v9059_v4  ;;  %v9101_v4 = vld [vmem:[%s11471_s3 + $0x2c4] ss:$8 sps:$4 sm:$0xff]  }
 0x4e1   :  { %4664 = vmatpush1.bf16.msra.mxu0 %v9057_v9  ;;  %v9099_v9 = vld [vmem:[%s11471_s3 + $0x2c0] ss:$8 sps:$4 sm:$0xff]  }
 0x4e2   :  { %4665 = vmatprep.subr.bf16.mxu0 %v9062_v18  ;;  %v9104_v18 = vld [vmem:[%s11471_s3 + $0x2d4] ss:$8 sps:$4 sm:$0xff]  }
 0x4e5   :  { %4666 = vmatpush1.bf16.msra.mxu0 %v9060_v22  ;;  %v9102_v22 = vld [vmem:[%s11471_s3 + $0x2d0] ss:$8 sps:$4 sm:$0xff]  }
 0x4e6   :  { %4815 = vmatprep.subr.bf16.mxu0 %v9065_v29  ;;  %v9107_v29 = vld [vmem:[%s11471_s3 + $0x2e4] ss:$8 sps:$4 sm:$0xff]  }
 0x4e8   :  { %4684 = vmatmul.mubr.bf16.vlgmr.msra.gmra.mrb[36].mxu0 %v4552_v57  ;;  %v9108_v57 = vld [vmem:[%s11471_s3 + $0x2f0] ss:$8 sps:$4 sm:$0xff]  }
 0x4e9   :  { %4816 = vmatpush1.bf16.msra.mxu0 %v9063_v47  ;;  %4693 = vmatprep.mubr.bf16.mxu0 %v9388_v17  ;;  %v9110_v47 = vld [vmem:[%s11471_s3 + $0x2f4] ss:$8 sps:$4 sm:$0xff]  }
 0x4ea   :  { %4817 = vmatprep.subr.bf16.mxu0 %v9068_v45  ;;  %v9113_v45 = vld [vmem:[%s11471_s3 + $0x304] ss:$8 sps:$4 sm:$0xff]  }
 0x4ed   :  { %4818 = vmatpush1.bf16.msra.mxu0 %v9066_v52  ;;  %v4876_v52 = vld [vmem:[#allocation3 + $0xe] sm:$0xff] }
 0x4ee   :  { %4819 = vmatprep.subr.bf16.mxu0 %v9071_v43  ;;  %v9111_v43 = vld [vmem:[%s11471_s3 + $0x300] ss:$8 sps:$4 sm:$0xff]  }
 0x4f0   :  { %4694 = vmatmul.mubr.bf16.gmra.mrb[40].mxu0 %v4553_v25  ;;  %v9116_v25 = vld [vmem:[%s11471_s3 + $0x314] ss:$8 sps:$4 sm:$0xff]  }
 0x4f1   :  { %4820 = vmatpush1.bf16.msra.mxu0 %v9069_v15  ;;  %4847 = vmatprep.mubr.bf16.mxu0 %v9388_v17  ;;  %v4880_v15 = vpack.c.bf16 %v10585_v5, %v4876_v52  ;;  %v9150_v52 = vld [vmem:[%s11471_s3 + $0x3d0] ss:$8 sps:$4 sm:$0xff]  }
 0x4f2   :  { %4821 = vmatprep.subr.bf16.mxu0 %v9074_v26  ;;  %v9114_v26 = vld [vmem:[%s11471_s3 + $0x310] ss:$8 sps:$4 sm:$0xff]  }
 0x4f5   :  { %4822 = vmatpush1.bf16.msra.mxu0 %v9072_v51  ;;  %v9119_v51 = vld [vmem:[%s11471_s3 + $0x324] ss:$8 sps:$4 sm:$0xff]  }
 0x4f6   :  { %4823 = vmatprep.subr.bf16.mxu0 %v9077_v8  ;;  %v10876_v8 = vld [vmem:[#allocation3 + $0x32] sm:$0xff] }
 0x4f9   :  { %4824 = vmatpush1.bf16.msra.mxu0 %v9075_v27  ;;  %v9117_v27 = vld [vmem:[%s11471_s3 + $0x320] ss:$8 sps:$4 sm:$0xff]  }
 0x4fa   :  { %4825 = vmatprep.subr.bf16.mxu0 %v9080_v3  ;;  %v4881_v3 = vpack.c.bf16 %v10876_v8, %v10587_v6  ;;  %v9314_v6 = vld [vmem:[%s11471_s3 + $0x734] ss:$8 sps:$4 sm:$0xff]  }
 0x4fd   :  { %4826 = vmatpush1.bf16.msra.mxu0 %v9078_v14  ;;  %v9122_v14 = vld [vmem:[%s11471_s3 + $0x334] ss:$8 sps:$4 sm:$0xff]  }
 0x4fe   :  { %4827 = vmatprep.subr.bf16.mxu0 %v9083_v24  ;;  %v9120_v24 = vld [vmem:[%s11471_s3 + $0x330] ss:$8 sps:$4 sm:$0xff]  }
 0x501   :  { %4828 = vmatpush1.bf16.msra.mxu0 %v9081_v37  ;;  %v9125_v37 = vld [vmem:[%s11471_s3 + $0x344] ss:$8 sps:$4 sm:$0xff]  }
 0x502   :  { %4829 = vmatprep.subr.bf16.mxu0 %v9086_v49  ;;  %v9123_v49 = vld [vmem:[%s11471_s3 + $0x340] ss:$8 sps:$4 sm:$0xff]  }
 0x505   :  { %4830 = vmatpush1.bf16.msra.mxu0 %v9084_v61  ;;  %v9128_v61 = vld [vmem:[%s11471_s3 + $0x354] ss:$8 sps:$4 sm:$0xff]  }
 0x506   :  { %4979 = vmatprep.subr.bf16.mxu0 %v9089_v34  ;;  %v9126_v34 = vld [vmem:[%s11471_s3 + $0x350] ss:$8 sps:$4 sm:$0xff]  }
 0x508   :  { %4848 = vmatmul.mubr.bf16.vlgmr.msra.gmra.mrb[36].mxu0 %v4716_v55  ;;  %v9134_v55 = vld [vmem:[%s11471_s3 + $0x374] ss:$8 sps:$4 sm:$0xff]  }
 0x509   :  { %4980 = vmatpush1.bf16.msra.mxu0 %v9087_v33  ;;  %4857 = vmatprep.mubr.bf16.mxu0 %v9388_v17  ;;  %v9129_v33 = vld [vmem:[%s11471_s3 + $0x360] ss:$8 sps:$4 sm:$0xff]  }
 0x50a   :  { %4981 = vmatprep.subr.bf16.mxu0 %v9092_v16  ;;  %v9132_v16 = vld [vmem:[%s11471_s3 + $0x370] ss:$8 sps:$4 sm:$0xff]  }
 0x50d   :  { %4982 = vmatpush1.bf16.msra.mxu0 %v9090_v28  ;;  %v9137_v28 = vld [vmem:[%s11471_s3 + $0x384] ss:$8 sps:$4 sm:$0xff]  }
 0x50e   :  { %4983 = vmatprep.subr.bf16.mxu0 %v9095_v30  ;;  %v5040_v30 = vld [vmem:[#allocation3 + $0x56] sm:$0xff] }
 0x510   :  { %4858 = vmatmul.mubr.bf16.gmra.mrb[40].mxu0 %v4717_v44  ;;  %v5044_v44 = vpack.c.bf16 %v10591_v46, %v5040_v30  ;;  %v9176_v30 = vld [vmem:[%s11471_s3 + $0x454] ss:$8 sps:$4 sm:$0xff]  }
 0x511   :  { %4984 = vmatpush1.bf16.msra.mxu0 %v9093_v39  ;;  %5011 = vmatprep.mubr.bf16.mxu0 %v9388_v17  ;;  %v9135_v39 = vld [vmem:[%s11471_s3 + $0x380] ss:$8 sps:$4 sm:$0xff]  }
 0x512   :  { %4985 = vmatprep.subr.bf16.mxu0 %v9098_v54  ;;  %v9140_v54 = vld [vmem:[%s11471_s3 + $0x394] ss:$8 sps:$4 sm:$0xff]  }
 0x515   :  { %4986 = vmatpush1.bf16.msra.mxu0 %v9096_v60  ;;  %v9138_v60 = vld [vmem:[%s11471_s3 + $0x390] ss:$8 sps:$4 sm:$0xff]  }
 0x516   :  { %4987 = vmatprep.subr.bf16.mxu0 %v9101_v4  ;;  %v9143_v4 = vld [vmem:[%s11471_s3 + $0x3a4] ss:$8 sps:$4 sm:$0xff]  }
 0x519   :  { %4988 = vmatpush1.bf16.msra.mxu0 %v9099_v9  ;;  %v10931_v9 = vld [vmem:[#allocation3 + $0x7a] sm:$0xff] }
 0x51a   :  { %4989 = vmatprep.subr.bf16.mxu0 %v9104_v18  ;;  %v9141_v18 = vld [vmem:[%s11471_s3 + $0x3a0] ss:$8 sps:$4 sm:$0xff]  }
 0x51d   :  { %4990 = vmatpush1.bf16.msra.mxu0 %v9102_v22  ;;  %v5045_v22 = vpack.c.bf16 %v10931_v9, %v10593_v48  ;;  %v9338_v48 = vld [vmem:[%s11471_s3 + $0x7b4] ss:$8 sps:$4 sm:$0xff]  }
 0x51e   :  { %4991 = vmatprep.subr.bf16.mxu0 %v9107_v29  ;;  %v9146_v29 = vld [vmem:[%s11471_s3 + $0x3b4] ss:$8 sps:$4 sm:$0xff]  }
 0x521   :  { %4992 = vmatpush1.bf16.msra.mxu0 %v9105_v41  ;;  %v9144_v41 = vld [vmem:[%s11471_s3 + $0x3b0] ss:$8 sps:$4 sm:$0xff]  }
 0x522   :  { %4993 = vmatprep.subr.bf16.mxu0 %v9110_v47  ;;  %v9149_v47 = vld [vmem:[%s11471_s3 + $0x3c4] ss:$8 sps:$4 sm:$0xff]  }
 0x525   :  { %4994 = vmatpush1.bf16.msra.mxu0 %v9108_v57  ;;  %v9147_v57 = vld [vmem:[%s11471_s3 + $0x3c0] ss:$8 sps:$4 sm:$0xff]  }
 0x526   :  { %5143 = vmatprep.subr.bf16.mxu0 %v9113_v45  ;;  %v9152_v45 = vld [vmem:[%s11471_s3 + $0x3d4] ss:$8 sps:$4 sm:$0xff]  }
 0x528   :  { %5012 = vmatmul.mubr.bf16.vlgmr.msra.gmra.mrb[36].mxu0 %v4880_v15  ;;  %v9153_v15 = vld [vmem:[%s11471_s3 + $0x3e0] ss:$8 sps:$4 sm:$0xff]  }
 0x529   :  { %5144 = vmatpush1.bf16.msra.mxu0 %v9111_v43  ;;  %5021 = vmatprep.mubr.bf16.mxu0 %v9388_v17  ;;  %v9155_v43 = vld [vmem:[%s11471_s3 + $0x3e4] ss:$8 sps:$4 sm:$0xff]  }
 0x52a   :  { %5145 = vmatprep.subr.bf16.mxu0 %v9116_v25  ;;  %v9158_v25 = vld [vmem:[%s11471_s3 + $0x3f4] ss:$8 sps:$4 sm:$0xff]  }
 0x52d   :  { %5146 = vmatpush1.bf16.msra.mxu0 %v9114_v26  ;;  %v9156_v26 = vld [vmem:[%s11471_s3 + $0x3f0] ss:$8 sps:$4 sm:$0xff]  }
 0x52e   :  { %5147 = vmatprep.subr.bf16.mxu0 %v9119_v51  ;;  %v9161_v51 = vld [vmem:[%s11471_s3 + $0x404] ss:$8 sps:$4 sm:$0xff]  }
 0x530   :  { %5022 = vmatmul.mubr.bf16.gmra.mrb[40].mxu0 %v4881_v3  ;;  %v9159_v3 = vld [vmem:[%s11471_s3 + $0x400] ss:$8 sps:$4 sm:$0xff]  }
 0x531   :  { %5148 = vmatpush1.bf16.msra.mxu0 %v9117_v27  ;;  %5175 = vmatprep.mubr.bf16.mxu0 %v9388_v17  ;;  %v5204_v27 = vld [vmem:[#allocation3 + $0x10] sm:$0xff] }
 0x532   :  { %5149 = vmatprep.subr.bf16.mxu0 %v9122_v14  ;;  %v5208_v14 = vpack.c.bf16 %v10600_v1, %v5204_v27  ;;  %v9204_v27 = vld [vmem:[%s11471_s3 + $0x4f0] ss:$8 sps:$4 sm:$0xff]  }
 0x535   :  { %5150 = vmatpush1.bf16.msra.mxu0 %v9120_v24  ;;  %v9164_v24 = vld [vmem:[%s11471_s3 + $0x414] ss:$8 sps:$4 sm:$0xff]  }
 0x536   :  { %5151 = vmatprep.subr.bf16.mxu0 %v9125_v37  ;;  %v9162_v37 = vld [vmem:[%s11471_s3 + $0x410] ss:$8 sps:$4 sm:$0xff]  }
 0x539   :  { %5152 = vmatpush1.bf16.msra.mxu0 %v9123_v49  ;;  %v9167_v49 = vld [vmem:[%s11471_s3 + $0x424] ss:$8 sps:$4 sm:$0xff]  }
 0x53a   :  { %5153 = vmatprep.subr.bf16.mxu0 %v9128_v61  ;;  %v10986_v61 = vld [vmem:[#allocation3 + $0x34] sm:$0xff] }
 0x53d   :  { %5154 = vmatpush1.bf16.msra.mxu0 %v9126_v34  ;;  %v9165_v34 = vld [vmem:[%s11471_s3 + $0x420] ss:$8 sps:$4 sm:$0xff]  }
 0x53e   :  { %5155 = vmatprep.subr.bf16.mxu0 %v9131_v21  ;;  %v5209_v21 = vpack.c.bf16 %v10986_v61, %v10602_v2 }
 0x541   :  { %5156 = vmatpush1.bf16.msra.mxu0 %v9129_v33  ;;  %v9170_v33 = vld [vmem:[%s11471_s3 + $0x434] ss:$8 sps:$4 sm:$0xff]  }
 0x542   :  { %5157 = vmatprep.subr.bf16.mxu0 %v9134_v55  ;;  %v9168_v55 = vld [vmem:[%s11471_s3 + $0x430] ss:$8 sps:$4 sm:$0xff]  }
 0x545   :  { %5158 = vmatpush1.bf16.msra.mxu0 %v9132_v16  ;;  %v9173_v16 = vld [vmem:[%s11471_s3 + $0x444] ss:$8 sps:$4 sm:$0xff]  }
 0x546   :  { %5307 = vmatprep.subr.bf16.mxu0 %v9137_v28  ;;  %v9171_v28 = vld [vmem:[%s11471_s3 + $0x440] ss:$8 sps:$4 sm:$0xff]  }
 0x548   :  { %5176 = vmatmul.mubr.bf16.vlgmr.msra.gmra.mrb[36].mxu0 %v5044_v44  ;;  %v9179_v44 = vld [vmem:[%s11471_s3 + $0x464] ss:$8 sps:$4 sm:$0xff]  }
 0x549   :  { %5308 = vmatpush1.bf16.msra.mxu0 %v9135_v39  ;;  %5185 = vmatprep.mubr.bf16.mxu0 %v9388_v17  ;;  %v9174_v39 = vld [vmem:[%s11471_s3 + $0x450] ss:$8 sps:$4 sm:$0xff]  }
 0x54a   :  { %5309 = vmatprep.subr.bf16.mxu0 %v9140_v54  ;;  %v9177_v54 = vld [vmem:[%s11471_s3 + $0x460] ss:$8 sps:$4 sm:$0xff]  }
 0x54d   :  { %5310 = vmatpush1.bf16.msra.mxu0 %v9138_v60  ;;  %v9182_v60 = vld [vmem:[%s11471_s3 + $0x474] ss:$8 sps:$4 sm:$0xff]  }
 0x54e   :  { %5311 = vmatprep.subr.bf16.mxu0 %v9143_v4  ;;  %v9180_v4 = vld [vmem:[%s11471_s3 + $0x470] ss:$8 sps:$4 sm:$0xff]  }
 0x550   :  { %5186 = vmatmul.mubr.bf16.gmra.mrb[40].mxu0 %v5045_v22  ;;  %v9183_v22 = vld [vmem:[%s11471_s3 + $0x480] ss:$8 sps:$4 sm:$0xff]  }
 0x551   :  { %5312 = vmatpush1.bf16.msra.mxu0 %v9141_v18  ;;  %5339 = vmatprep.mubr.bf16.mxu0 %v9388_v17  ;;  %v9185_v18 = vld [vmem:[%s11471_s3 + $0x484] ss:$8 sps:$4 sm:$0xff]  }
 0x552   :  { %5313 = vmatprep.subr.bf16.mxu0 %v9146_v29  ;;  %v9188_v29 = vld [vmem:[%s11471_s3 + $0x494] ss:$8 sps:$4 sm:$0xff]  }
 0x555   :  { %5314 = vmatpush1.bf16.msra.mxu0 %v9144_v41  ;;  %v9186_v41 = vld [vmem:[%s11471_s3 + $0x490] ss:$8 sps:$4 sm:$0xff]  }
 0x556   :  { %5315 = vmatprep.subr.bf16.mxu0 %v9149_v47  ;;  %v9191_v47 = vld [vmem:[%s11471_s3 + $0x4a4] ss:$8 sps:$4 sm:$0xff]  }
 0x559   :  { %5316 = vmatpush1.bf16.msra.mxu0 %v9147_v57  ;;  %v5368_v57 = vld [vmem:[#allocation3 + $0x108] sm:$0xff] }
 0x55a   :  { %5317 = vmatprep.subr.bf16.mxu0 %v9152_v45  ;;  %v9189_v45 = vld [vmem:[%s11471_s3 + $0x4a0] ss:$8 sps:$4 sm:$0xff]   ;;  %v5370_v23 = vpack.c.bf16 %v5368_v57, %v10656_v11  ;;  %v9248_v57 = vld [vmem:[%s11471_s3 + $0x5d4] ss:$8 sps:$4 sm:$0xff]  }
 0x55b   :  { %v9195_v11 = vld [vmem:[%s11471_s3 + $0x4c0] ss:$8 sps:$4 sm:$0xff]  }
 0x55d   :  { %5318 = vmatpush1.bf16.msra.mxu0 %v9150_v52  ;;  %v9197_v52 = vld [vmem:[%s11471_s3 + $0x4c4] ss:$8 sps:$4 sm:$0xff]  }
 0x55e   :  { %5319 = vmatprep.subr.bf16.mxu0 %v9155_v43  ;;  %v9200_v43 = vld [vmem:[%s11471_s3 + $0x4d4] ss:$8 sps:$4 sm:$0xff]  }
 0x561   :  { %5320 = vmatpush1.bf16.msra.mxu0 %v9153_v15  ;;  %v9198_v15 = vld [vmem:[%s11471_s3 + $0x4d0] ss:$8 sps:$4 sm:$0xff]  }
 0x562   :  { %5321 = vmatprep.subr.bf16.mxu0 %v9158_v25  ;;  %v9203_v25 = vld [vmem:[%s11471_s3 + $0x4e4] ss:$8 sps:$4 sm:$0xff]  }
 0x565   :  { %5322 = vmatpush1.bf16.msra.mxu0 %v9156_v26  ;;  %v9201_v26 = vld [vmem:[%s11471_s3 + $0x4e0] ss:$8 sps:$4 sm:$0xff]  }
 0x566   :  { %5468 = vmatprep.subr.bf16.mxu0 %v9161_v51  ;;  %v9206_v51 = vld [vmem:[%s11471_s3 + $0x4f4] ss:$8 sps:$4 sm:$0xff]  }
 0x568   :  { %5340 = vmatmul.mubr.bf16.vlgmr.msra.gmra.mrb[36].mxu0 %v5208_v14  ;;  %v9207_v14 = vld [vmem:[%s11471_s3 + $0x500] ss:$8 sps:$4 sm:$0xff]  }
 0x569   :  { %5469 = vmatpush1.bf16.msra.mxu0 %v9159_v3  ;;  %5349 = vmatprep.mubr.bf16.mxu0 %v9388_v17  ;;  %v9209_v3 = vld [vmem:[%s11471_s3 + $0x504] ss:$8 sps:$4 sm:$0xff]  }
 0x56a   :  { %5470 = vmatprep.subr.bf16.mxu0 %v9164_v24  ;;  %v9212_v24 = vld [vmem:[%s11471_s3 + $0x514] ss:$8 sps:$4 sm:$0xff]  }
 0x56d   :  { %5471 = vmatpush1.bf16.msra.mxu0 %v9162_v37  ;;  %v9210_v37 = vld [vmem:[%s11471_s3 + $0x510] ss:$8 sps:$4 sm:$0xff]  }
 0x56e   :  { %5472 = vmatprep.subr.bf16.mxu0 %v9167_v49  ;;  %v9215_v49 = vld [vmem:[%s11471_s3 + $0x524] ss:$8 sps:$4 sm:$0xff]  }
 0x570   :  { %5350 = vmatmul.mubr.bf16.gmra.mrb[40].mxu0 %v5209_v21  ;;  %v9213_v21 = vld [vmem:[%s11471_s3 + $0x520] ss:$8 sps:$4 sm:$0xff]  }
 0x571   :  { %5473 = vmatpush1.bf16.msra.mxu0 %v9165_v34  ;;  %5500 = vmatprep.mubr.bf16.mxu0 %v9388_v17  ;;  %v5529_v34 = vld [vmem:[#allocation3 + $0xc2] sm:$0xff] }
 0x572   :  { %5474 = vmatprep.subr.bf16.mxu0 %v9170_v33  ;;  %v5531_v7 = vpack.c.bf16 %v5529_v34, %v10581_v40  ;;  %v9221_v33 = vld [vmem:[%s11471_s3 + $0x544] ss:$8 sps:$4 sm:$0xff]   ;;  %v9219_v40 = vld [vmem:[%s11471_s3 + $0x540] ss:$8 sps:$4 sm:$0xff]   ;;  %v9278_v34 = vld [vmem:[%s11471_s3 + $0x674] ss:$8 sps:$4 sm:$0xff]  }
 0x575   :  { %5475 = vmatpush1.bf16.msra.mxu0 %v9168_v55  ;;  %v9224_v55 = vld [vmem:[%s11471_s3 + $0x554] ss:$8 sps:$4 sm:$0xff]  }
 0x576   :  { %5476 = vmatprep.subr.bf16.mxu0 %v9173_v16  ;;  %v9222_v16 = vld [vmem:[%s11471_s3 + $0x550] ss:$8 sps:$4 sm:$0xff]  }
 0x579   :  { %5477 = vmatpush1.bf16.msra.mxu0 %v9171_v28  ;;  %v9227_v28 = vld [vmem:[%s11471_s3 + $0x564] ss:$8 sps:$4 sm:$0xff]  }
 0x57a   :  { %5478 = vmatprep.subr.bf16.mxu0 %v9176_v30  ;;  %v9225_v30 = vld [vmem:[%s11471_s3 + $0x560] ss:$8 sps:$4 sm:$0xff]  }
 0x57d   :  { %5479 = vmatpush1.bf16.msra.mxu0 %v9174_v39  ;;  %v9230_v39 = vld [vmem:[%s11471_s3 + $0x574] ss:$8 sps:$4 sm:$0xff]  }
 0x57e   :  { %5480 = vmatprep.subr.bf16.mxu0 %v9179_v44  ;;  %v9228_v44 = vld [vmem:[%s11471_s3 + $0x570] ss:$8 sps:$4 sm:$0xff]  }
 0x581   :  { %5481 = vmatpush1.bf16.msra.mxu0 %v9177_v54  ;;  %v9233_v54 = vld [vmem:[%s11471_s3 + $0x584] ss:$8 sps:$4 sm:$0xff]  }
 0x582   :  { %5482 = vmatprep.subr.bf16.mxu0 %v9182_v60  ;;  %v9231_v60 = vld [vmem:[%s11471_s3 + $0x580] ss:$8 sps:$4 sm:$0xff]  }
 0x585   :  { %5483 = vmatpush1.bf16.msra.mxu0 %v9180_v4  ;;  %v9236_v4 = vld [vmem:[%s11471_s3 + $0x594] ss:$8 sps:$4 sm:$0xff]  }
 0x586   :  { %5629 = vmatprep.subr.bf16.mxu0 %v9185_v18  ;;  %v9234_v18 = vld [vmem:[%s11471_s3 + $0x590] ss:$8 sps:$4 sm:$0xff]  }
 0x588   :  { %5501 = vmatmul.mubr.bf16.vlgmr.msra.gmra.mrb[36].mxu0 %v5369_v35  ;;  %v9192_v35 = vld [vmem:[%s11471_s3 + $0x4b0] ss:$8 sps:$4 sm:$0xff]  }
 0x589   :  { %5630 = vmatpush1.bf16.msra.mxu0 %v9183_v22  ;;  %5510 = vmatprep.mubr.bf16.mxu0 %v9388_v17  ;;  %v9239_v22 = vld [vmem:[%s11471_s3 + $0x5a4] ss:$8 sps:$4 sm:$0xff]  }
 0x58a   :  { %5631 = vmatprep.subr.bf16.mxu0 %v9188_v29  ;;  %v5690_v29 = vld [vmem:[#allocation3 + $0x10a] sm:$0xff] }
 0x58b   :  { %v5692_v31 = vpack.c.bf16 %v5690_v29, %v10711_v10  ;;  %v9243_v10 = vld [vmem:[%s11471_s3 + $0x5c0] ss:$8 sps:$4 sm:$0xff]   ;;  %v9308_v29 = vld [vmem:[%s11471_s3 + $0x714] ss:$8 sps:$4 sm:$0xff]  }
 0x58d   :  { %5632 = vmatpush1.bf16.msra.mxu0 %v9186_v41  ;;  %v9237_v41 = vld [vmem:[%s11471_s3 + $0x5a0] ss:$8 sps:$4 sm:$0xff]  }
 0x58e   :  { %5633 = vmatprep.subr.bf16.mxu0 %v9191_v47  ;;  %v9245_v47 = vld [vmem:[%s11471_s3 + $0x5c4] ss:$8 sps:$4 sm:$0xff]  }
 0x590   :  { %5511 = vmatmul.mubr.bf16.gmra.mrb[40].mxu0 %v5370_v23  ;;  %v9251_v23 = vld [vmem:[%s11471_s3 + $0x5e4] ss:$8 sps:$4 sm:$0xff]  }
 0x591   :  { %5634 = vmatpush1.bf16.msra.mxu0 %v9189_v45  ;;  %5661 = vmatprep.mubr.bf16.mxu0 %v9388_v17  ;;  %v9246_v45 = vld [vmem:[%s11471_s3 + $0x5d0] ss:$8 sps:$4 sm:$0xff]  }
 0x592   :  { %5635 = vmatprep.subr.bf16.mxu0 %v9194_v59  ;;  %v9249_v59 = vld [vmem:[%s11471_s3 + $0x5e0] ss:$8 sps:$4 sm:$0xff]  }
 0x595   :  { %5636 = vmatpush1.bf16.msra.mxu0 %v9192_v35  ;;  %v9254_v35 = vld [vmem:[%s11471_s3 + $0x5f4] ss:$8 sps:$4 sm:$0xff]  }
 0x596   :  { %5637 = vmatprep.subr.bf16.mxu0 %v9197_v52  ;;  %v9252_v52 = vld [vmem:[%s11471_s3 + $0x5f0] ss:$8 sps:$4 sm:$0xff]  }
 0x599   :  { %5638 = vmatpush1.bf16.msra.mxu0 %v9195_v11  ;;  %v9257_v11 = vld [vmem:[%s11471_s3 + $0x604] ss:$8 sps:$4 sm:$0xff]  }
 0x59a   :  { %5639 = vmatprep.subr.bf16.mxu0 %v9200_v43  ;;  %v9255_v43 = vld [vmem:[%s11471_s3 + $0x600] ss:$8 sps:$4 sm:$0xff]  }
 0x59d   :  { %5640 = vmatpush1.bf16.msra.mxu0 %v9198_v15  ;;  %v9260_v15 = vld [vmem:[%s11471_s3 + $0x614] ss:$8 sps:$4 sm:$0xff]  }
 0x59e   :  { %5641 = vmatprep.subr.bf16.mxu0 %v9203_v25  ;;  %v9258_v25 = vld [vmem:[%s11471_s3 + $0x610] ss:$8 sps:$4 sm:$0xff]  }
 0x5a1   :  { %5642 = vmatpush1.bf16.msra.mxu0 %v9201_v26  ;;  %v9263_v26 = vld [vmem:[%s11471_s3 + $0x624] ss:$8 sps:$4 sm:$0xff]  }
 0x5a2   :  { %5643 = vmatprep.subr.bf16.mxu0 %v9206_v51  ;;  %v5851_v51 = vld [vmem:[#allocation3 + $0xc4] sm:$0xff] }
 0x5a3   :  { %v5853_v36 = vpack.c.bf16 %v5851_v51, %v10766_v19  ;;  %v9267_v19 = vld [vmem:[%s11471_s3 + $0x640] ss:$8 sps:$4 sm:$0xff]  }
 0x5a4   :  { %v9333_v51 = vld [vmem:[%s11471_s3 + $0x7a0] ss:$8 sps:$4 sm:$0xff]  }
 0x5a5   :  { %5644 = vmatpush1.bf16.msra.mxu0 %v9204_v27  ;;  %v9261_v27 = vld [vmem:[%s11471_s3 + $0x620] ss:$8 sps:$4 sm:$0xff]  }
 0x5a6   :  { %5790 = vmatprep.subr.bf16.mxu0 %v9209_v3  ;;  %v9269_v3 = vld [vmem:[%s11471_s3 + $0x644] ss:$8 sps:$4 sm:$0xff]  }
 0x5a8   :  { %5662 = vmatmul.mubr.bf16.vlgmr.msra.gmra.mrb[36].mxu0 %v5530_v32  ;;  %v9216_v32 = vld [vmem:[%s11471_s3 + $0x530] ss:$8 sps:$4 sm:$0xff]  }
 0x5a9   :  { %5791 = vmatpush1.bf16.msra.mxu0 %v9207_v14  ;;  %5671 = vmatprep.mubr.bf16.mxu0 %v9388_v17  ;;  %v9272_v14 = vld [vmem:[%s11471_s3 + $0x654] ss:$8 sps:$4 sm:$0xff]  }
 0x5aa   :  { %5792 = vmatprep.subr.bf16.mxu0 %v9212_v24  ;;  %v9270_v24 = vld [vmem:[%s11471_s3 + $0x650] ss:$8 sps:$4 sm:$0xff]  }
 0x5ad   :  { %5793 = vmatpush1.bf16.msra.mxu0 %v9210_v37  ;;  %v9275_v37 = vld [vmem:[%s11471_s3 + $0x664] ss:$8 sps:$4 sm:$0xff]  }
 0x5ae   :  { %5794 = vmatprep.subr.bf16.mxu0 %v9215_v49  ;;  %v9273_v49 = vld [vmem:[%s11471_s3 + $0x660] ss:$8 sps:$4 sm:$0xff]  }
 0x5b0   :  { %5672 = vmatmul.mubr.bf16.gmra.mrb[40].mxu0 %v5531_v7  ;;  %v9281_v7 = vld [vmem:[%s11471_s3 + $0x684] ss:$8 sps:$4 sm:$0xff]  }
 0x5b1   :  { %5795 = vmatpush1.bf16.msra.mxu0 %v9213_v21  ;;  %5822 = vmatprep.mubr.bf16.mxu0 %v9388_v17  ;;  %v9276_v21 = vld [vmem:[%s11471_s3 + $0x670] ss:$8 sps:$4 sm:$0xff]  }
 0x5b2   :  { %5796 = vmatprep.subr.bf16.mxu0 %v9218_v50  ;;  %v9279_v50 = vld [vmem:[%s11471_s3 + $0x680] ss:$8 sps:$4 sm:$0xff]  }
 0x5b5   :  { %5797 = vmatpush1.bf16.msra.mxu0 %v9216_v32  ;;  %v9284_v32 = vld [vmem:[%s11471_s3 + $0x694] ss:$8 sps:$4 sm:$0xff]  }
 0x5b6   :  { %5798 = vmatprep.subr.bf16.mxu0 %v9221_v33  ;;  %v9282_v33 = vld [vmem:[%s11471_s3 + $0x690] ss:$8 sps:$4 sm:$0xff]  }
 0x5b9   :  { %5799 = vmatpush1.bf16.msra.mxu0 %v9219_v40  ;;  %v9287_v40 = vld [vmem:[%s11471_s3 + $0x6a4] ss:$8 sps:$4 sm:$0xff]  }
 0x5ba   :  { %5800 = vmatprep.subr.bf16.mxu0 %v9224_v55  ;;  %v6012_v55 = vld [vmem:[#allocation3 + $0x84] sm:$0xff] }
 0x5bb   :  { %v6014_v56 = vpack.c.bf16 %v6012_v55, %v10821_v38  ;;  %v9291_v38 = vld [vmem:[%s11471_s3 + $0x6c0] ss:$8 sps:$4 sm:$0xff]  }
 0x5bd   :  { %5801 = vmatpush1.bf16.msra.mxu0 %v9222_v16  ;;  %v9285_v16 = vld [vmem:[%s11471_s3 + $0x6a0] ss:$8 sps:$4 sm:$0xff]  }
 0x5be   :  { %5802 = vmatprep.subr.bf16.mxu0 %v9227_v28  ;;  %v9293_v28 = vld [vmem:[%s11471_s3 + $0x6c4] ss:$8 sps:$4 sm:$0xff]  }
 0x5c1   :  { %5803 = vmatpush1.bf16.msra.mxu0 %v9225_v30  ;;  %v9296_v30 = vld [vmem:[%s11471_s3 + $0x6d4] ss:$8 sps:$4 sm:$0xff]  }
 0x5c2   :  { %5804 = vmatprep.subr.bf16.mxu0 %v9230_v39  ;;  %v9294_v39 = vld [vmem:[%s11471_s3 + $0x6d0] ss:$8 sps:$4 sm:$0xff]  }
 0x5c5   :  { %5805 = vmatpush1.bf16.msra.mxu0 %v9228_v44  ;;  %v9299_v44 = vld [vmem:[%s11471_s3 + $0x6e4] ss:$8 sps:$4 sm:$0xff]  }
 0x5c6   :  { %5951 = vmatprep.subr.bf16.mxu0 %v9233_v54  ;;  %v9297_v54 = vld [vmem:[%s11471_s3 + $0x6e0] ss:$8 sps:$4 sm:$0xff]  }
 0x5c8   :  { %5823 = vmatmul.mubr.bf16.vlgmr.msra.gmra.mrb[36].mxu0 %v5691_v0  ;;  %v9240_v0 = vld [vmem:[%s11471_s3 + $0x5b0] ss:$8 sps:$4 sm:$0xff]  }
 0x5c9   :  { %5952 = vmatpush1.bf16.msra.mxu0 %v9231_v60  ;;  %5832 = vmatprep.mubr.bf16.mxu0 %v9388_v17  ;;  %v9302_v60 = vld [vmem:[%s11471_s3 + $0x6f4] ss:$8 sps:$4 sm:$0xff]  }
 0x5ca   :  { %5953 = vmatprep.subr.bf16.mxu0 %v9236_v4  ;;  %v9300_v4 = vld [vmem:[%s11471_s3 + $0x6f0] ss:$8 sps:$4 sm:$0xff]  }
 0x5cd   :  { %5954 = vmatpush1.bf16.msra.mxu0 %v9234_v18  ;;  %v9305_v18 = vld [vmem:[%s11471_s3 + $0x704] ss:$8 sps:$4 sm:$0xff]  }
 0x5ce   :  { %5955 = vmatprep.subr.bf16.mxu0 %v9239_v22  ;;  %v9303_v22 = vld [vmem:[%s11471_s3 + $0x700] ss:$8 sps:$4 sm:$0xff]  }
 0x5d0   :  { %5833 = vmatmul.mubr.bf16.gmra.mrb[40].mxu0 %v5692_v31  ;;  %v9311_v31 = vld [vmem:[%s11471_s3 + $0x724] ss:$8 sps:$4 sm:$0xff]  }
 0x5d1   :  { %5956 = vmatpush1.bf16.msra.mxu0 %v9237_v41  ;;  %5983 = vmatprep.mubr.bf16.mxu0 %v9388_v17  ;;  %v9306_v41 = vld [vmem:[%s11471_s3 + $0x710] ss:$8 sps:$4 sm:$0xff]  }
 0x5d2   :  { %5957 = vmatprep.subr.bf16.mxu0 %v9242_v13  ;;  %v6173_v13 = vld [vmem:[#allocation3 + $0x3e] sm:$0xff] }
 0x5d3   :  { %v6175_v5 = vpack.c.bf16 %v6173_v13, %v10876_v8  ;;  %v9315_v8 = vld [vmem:[%s11471_s3 + $0x740] ss:$8 sps:$4 sm:$0xff]  }
 0x5d5   :  { %5958 = vmatpush1.bf16.msra.mxu0 %v9240_v0  ;;  %v9309_v0 = vld [vmem:[%s11471_s3 + $0x720] ss:$8 sps:$4 sm:$0xff]  }
 0x5d6   :  { %5959 = vmatprep.subr.bf16.mxu0 %v9245_v47  ;;  %v9317_v47 = vld [vmem:[%s11471_s3 + $0x744] ss:$8 sps:$4 sm:$0xff]  }
 0x5d9   :  { %5960 = vmatpush1.bf16.msra.mxu0 %v9243_v10  ;;  %v9320_v10 = vld [vmem:[%s11471_s3 + $0x754] ss:$8 sps:$4 sm:$0xff]  }
 0x5da   :  { %5961 = vmatprep.subr.bf16.mxu0 %v9248_v57  ;;  %v9318_v57 = vld [vmem:[%s11471_s3 + $0x750] ss:$8 sps:$4 sm:$0xff]  }
 0x5dd   :  { %5962 = vmatpush1.bf16.msra.mxu0 %v9246_v45  ;;  %v9323_v45 = vld [vmem:[%s11471_s3 + $0x764] ss:$8 sps:$4 sm:$0xff]  }
 0x5de   :  { %5963 = vmatprep.subr.bf16.mxu0 %v9251_v23  ;;  %v9321_v23 = vld [vmem:[%s11471_s3 + $0x760] ss:$8 sps:$4 sm:$0xff]  }
 0x5e1   :  { %5964 = vmatpush1.bf16.msra.mxu0 %v9249_v59  ;;  %v9326_v59 = vld [vmem:[%s11471_s3 + $0x774] ss:$8 sps:$4 sm:$0xff]  }
 0x5e2   :  { %5965 = vmatprep.subr.bf16.mxu0 %v9254_v35  ;;  %v9324_v35 = vld [vmem:[%s11471_s3 + $0x770] ss:$8 sps:$4 sm:$0xff]  }
 0x5e5   :  { %5966 = vmatpush1.bf16.msra.mxu0 %v9252_v52  ;;  %v9329_v52 = vld [vmem:[%s11471_s3 + $0x784] ss:$8 sps:$4 sm:$0xff]  }
 0x5e6   :  { %6112 = vmatprep.subr.bf16.mxu0 %v9257_v11  ;;  %v9327_v11 = vld [vmem:[%s11471_s3 + $0x780] ss:$8 sps:$4 sm:$0xff]  }
 0x5e8   :  { %5984 = vmatmul.mubr.bf16.vlgmr.msra.gmra.mrb[36].mxu0 %v5852_v53  ;;  %v9264_v53 = vld [vmem:[%s11471_s3 + $0x630] ss:$8 sps:$4 sm:$0xff]  }
 0x5e9   :  { %6113 = vmatpush1.bf16.msra.mxu0 %v9255_v43  ;;  %5993 = vmatprep.mubr.bf16.mxu0 %v9388_v17  ;;  %v9332_v43 = vld [vmem:[%s11471_s3 + $0x794] ss:$8 sps:$4 sm:$0xff]  }
 0x5ea   :  { %6114 = vmatprep.subr.bf16.mxu0 %v9260_v15  ;;  %v9330_v15 = vld [vmem:[%s11471_s3 + $0x790] ss:$8 sps:$4 sm:$0xff]  }
 0x5ed   :  { %6115 = vmatpush1.bf16.msra.mxu0 %v9258_v25  ;;  %v9335_v25 = vld [vmem:[%s11471_s3 + $0x7a4] ss:$8 sps:$4 sm:$0xff]  }
 0x5ee   :  { %6116 = vmatprep.subr.bf16.mxu0 %v9263_v26  ;;  %v6334_v26 = vld [vmem:[#allocation3 + $0x86] sm:$0xff] }
 0x5ef   :  { %v6336_v46 = vpack.c.bf16 %v6334_v26, %v10931_v9  ;;  %v9339_v9 = vld [vmem:[%s11471_s3 + $0x7c0] ss:$8 sps:$4 sm:$0xff]  }
 0x5f0   :  { %5994 = vmatmul.mubr.bf16.gmra.mrb[40].mxu0 %v5853_v36  ;;  %v9344_v36 = vld [vmem:[%s11471_s3 + $0x7d4] ss:$8 sps:$4 sm:$0xff]  }
 0x5f1   :  { %6117 = vmatpush1.bf16.msra.mxu0 %v9261_v27  ;;  %6144 = vmatprep.mubr.bf16.mxu0 %v9388_v17  ;;  %v9341_v27 = vld [vmem:[%s11471_s3 + $0x7c4] ss:$8 sps:$4 sm:$0xff]  }
 0x5f2   :  { %6118 = vmatprep.subr.bf16.mxu0 %v9266_v42  ;;  %v9342_v42 = vld [vmem:[%s11471_s3 + $0x7d0] ss:$8 sps:$4 sm:$0xff]  }
 0x5f5   :  { %6119 = vmatpush1.bf16.msra.mxu0 %v9264_v53  ;;  %v9347_v53 = vld [vmem:[%s11471_s3 + $0x7e4] ss:$8 sps:$4 sm:$0xff]  }
 0x5f6   :  { %6120 = vmatprep.subr.bf16.mxu0 %v9269_v3  ;;  %v9345_v3 = vld [vmem:[%s11471_s3 + $0x7e0] ss:$8 sps:$4 sm:$0xff]  }
 0x5f9   :  { %6121 = vmatpush1.bf16.msra.mxu0 %v9267_v19  ;;  %v9350_v19 = vld [vmem:[%s11471_s3 + $0x7f4] ss:$8 sps:$4 sm:$0xff]  }
 0x5fa   :  { %6122 = vmatprep.subr.bf16.mxu0 %v9272_v14  ;;  %v9348_v14 = vld [vmem:[%s11471_s3 + $0x7f0] ss:$8 sps:$4 sm:$0xff]  }
 0x5fd   :  { %6123 = vmatpush1.bf16.msra.mxu0 %v9270_v24  ;;  %v11406_v24 = vld [vmem:[#allocation3] sm:$0xff] }
 0x5fe   :  { %6124 = vmatprep.subr.bf16.mxu0 %v9275_v37  ;;  %v6497_v37 = vpack.c.bf16 %v11406_v24, %v10986_v61 }
 0x601   :  { %6125 = vmatpush1.bf16.msra.mxu0 %v9273_v49 }
 0x602   :  { %6126 = vmatprep.subr.bf16.mxu0 %v9278_v34 }
 0x605   :  { %6127 = vmatpush1.bf16.msra.mxu0 %v9276_v21 }
 0x606   :  { %6273 = vmatprep.subr.bf16.mxu0 %v9281_v7 }
 0x608   :  { %6145 = vmatmul.mubr.bf16.vlgmr.msra.gmra.mrb[36].mxu0 %v6013_v63  ;;  %v9288_v63 = vld [vmem:[%s11471_s3 + $0x6b0] ss:$8 sps:$4 sm:$0xff]  }
 0x609   :  { %6274 = vmatpush1.bf16.msra.mxu0 %v9279_v50  ;;  %6154 = vmatprep.mubr.bf16.mxu0 %v9388_v17 }
 0x60a   :  { %6275 = vmatprep.subr.bf16.mxu0 %v9284_v32 }
 0x60d   :  { %6276 = vmatpush1.bf16.msra.mxu0 %v9282_v33 }
 0x60e   :  { %6277 = vmatprep.subr.bf16.mxu0 %v9287_v40 }
 0x610   :  { %6155 = vmatmul.mubr.bf16.gmra.mrb[40].mxu0 %v6014_v56 }
 0x611   :  { %6278 = vmatpush1.bf16.msra.mxu0 %v9285_v16  ;;  %6305 = vmatprep.mubr.bf16.mxu0 %v9388_v17 }
 0x612   :  { %6279 = vmatprep.subr.bf16.mxu0 %v9290_v62 }
 0x615   :  { %6280 = vmatpush1.bf16.msra.mxu0 %v9288_v63 }
 0x616   :  { %6281 = vmatprep.subr.bf16.mxu0 %v9293_v28 }
 0x619   :  { %6282 = vmatpush1.bf16.msra.mxu0 %v9291_v38 }
 0x61a   :  { %6283 = vmatprep.subr.bf16.mxu0 %v9296_v30 }
 0x61d   :  { %6284 = vmatpush1.bf16.msra.mxu0 %v9294_v39 }
 0x61e   :  { %6285 = vmatprep.subr.bf16.mxu0 %v9299_v44 }
 0x621   :  { %6286 = vmatpush1.bf16.msra.mxu0 %v9297_v54 }
 0x622   :  { %6287 = vmatprep.subr.bf16.mxu0 %v9302_v60 }
 0x625   :  { %6288 = vmatpush1.bf16.msra.mxu0 %v9300_v4 }
 0x626   :  { %6434 = vmatprep.subr.bf16.mxu0 %v9305_v18 }
 0x628   :  { %6306 = vmatmul.mubr.bf16.vlgmr.msra.gmra.mrb[36].mxu0 %v6174_v12  ;;  %v9312_v12 = vld [vmem:[%s11471_s3 + $0x730] ss:$8 sps:$4 sm:$0xff]  }
 0x629   :  { %6435 = vmatpush1.bf16.msra.mxu0 %v9303_v22  ;;  %6315 = vmatprep.mubr.bf16.mxu0 %v9388_v17 }
 0x62a   :  { %6436 = vmatprep.subr.bf16.mxu0 %v9308_v29 }
 0x62d   :  { %6437 = vmatpush1.bf16.msra.mxu0 %v9306_v41 }
 0x62e   :  { %6438 = vmatprep.subr.bf16.mxu0 %v9311_v31 }
 0x630   :  { %6316 = vmatmul.mubr.bf16.gmra.mrb[40].mxu0 %v6175_v5 }
 0x631   :  { %6439 = vmatpush1.bf16.msra.mxu0 %v9309_v0  ;;  %6466 = vmatprep.mubr.bf16.mxu0 %v9388_v17 }
 0x632   :  { %6440 = vmatprep.subr.bf16.mxu0 %v9314_v6 }
 0x635   :  { %6441 = vmatpush1.bf16.msra.mxu0 %v9312_v12 }
 0x636   :  { %6442 = vmatprep.subr.bf16.mxu0 %v9317_v47 }
 0x639   :  { %6443 = vmatpush1.bf16.msra.mxu0 %v9315_v8 }
 0x63a   :  { %6444 = vmatprep.subr.bf16.mxu0 %v9320_v10 }
 0x63d   :  { %6445 = vmatpush1.bf16.msra.mxu0 %v9318_v57 }
 0x63e   :  { %6446 = vmatprep.subr.bf16.mxu0 %v9323_v45 }
 0x641   :  { %6447 = vmatpush1.bf16.msra.mxu0 %v9321_v23 }
 0x642   :  { %6448 = vmatprep.subr.bf16.mxu0 %v9326_v59 }
 0x645   :  { %6449 = vmatpush1.bf16.msra.mxu0 %v9324_v35 }
 0x646   :  { %6595 = vmatprep.subr.bf16.mxu0 %v9329_v52 }
 0x648   :  { %6467 = vmatmul.mubr.bf16.vlgmr.msra.gmra.mrb[36].mxu0 %v6335_v58  ;;  %v9336_v58 = vld [vmem:[%s11471_s3 + $0x7b0] ss:$8 sps:$4 sm:$0xff]  }
 0x649   :  { %6596 = vmatpush1.bf16.msra.mxu0 %v9327_v11  ;;  %6476 = vmatprep.mubr.bf16.mxu0 %v9388_v17 }
 0x64a   :  { %6597 = vmatprep.subr.bf16.mxu0 %v9332_v43 }
 0x64d   :  { %6598 = vmatpush1.bf16.msra.mxu0 %v9330_v15 }
 0x64e   :  { %6599 = vmatprep.subr.bf16.mxu0 %v9335_v25 }
 0x650   :  { %6477 = vmatmul.mubr.bf16.gmra.mrb[40].mxu0 %v6336_v46 }
 0x651   :  { %6600 = vmatpush1.bf16.msra.mxu0 %v9333_v51  ;;  %6627 = vmatprep.mubr.bf16.mxu0 %v9388_v17 }
 0x652   :  { %6601 = vmatprep.subr.bf16.mxu0 %v9338_v48 }
 0x655   :  { %6602 = vmatpush1.bf16.msra.mxu0 %v9336_v58 }
 0x656   :  { %6603 = vmatprep.subr.bf16.mxu0 %v9341_v27 }
 0x659   :  { %6604 = vmatpush1.bf16.msra.mxu0 %v9339_v9 }
 0x65a   :  { %6605 = vmatprep.subr.bf16.mxu0 %v9344_v36 }
 0x65d   :  { %6606 = vmatpush1.bf16.msra.mxu0 %v9342_v42 }
 0x65e   :  { %6607 = vmatprep.subr.bf16.mxu0 %v9347_v53 }
 0x661   :  { %6608 = vmatpush1.bf16.msra.mxu0 %v9345_v3 }
 0x662   :  { %6609 = vmatprep.subr.bf16.mxu0 %v9350_v19 }
 0x665   :  { %6610 = vmatpush1.bf16.msra.mxu0 %v9348_v14 }
 0x668   :  { %6628 = vmatmul.mubr.bf16.vlgmr.msra.gmra.mrb[36].mxu0 %v6496_v20 }
 0x669   :  { %6637 = vmatprep.mubr.bf16.mxu0 %v9388_v17 }
 0x670   :  { %6638 = vmatmul.mubr.bf16.gmra.mrb[40].mxu0 %v6497_v37 }
 0x73b   :  { %v6629_v49 = vpop.f32.mrb[36].mxu0 }
 0x73c   :  { %v6631_v34 = vpop.f32.mrb[37].mxu0 }
 0x73d   :  { %v6633_v21 = vpop.f32.mrb[38].mxu0 }
 0x73e   :  { %v6656_v7 = vadd.f32 %v6633_v21, %v6629_v49  ;;  %v6635_v50 = vpop.f32.mrb[39].mxu0 }
 0x73f   :  { %v6665_v32 = vadd.f32 %v6635_v50, %v6631_v34 }
 0x743   :  { %v6639_v33 = vpop.f32.mrb[40].mxu0 }
 0x744   :  { %v6657_v40 = vadd.f32 %v6656_v7, %v6639_v33  ;;  %v6641_v55 = vpop.f32.mrb[41].mxu0 }
 0x745   :  { %v6666_v16 = vadd.f32 %v6665_v32, %v6641_v55  ;;  %v6643_v1 = vpop.f32.mrb[42].mxu0 }
 0x746   :  { %v6658_v2 = vadd.f32 %v6657_v40, %v6643_v1  ;;  %v6645_v20 = vpop.f32.mrb[43].mxu0 }
 0x747   :  { %v6667_v17 = vadd.f32 %v6666_v16, %v6645_v20 }
 0x748   :  { %v6659_v56 = vrot.slane %v6658_v2, 4 }
 0x749   :  { %v6668_v62 = vrot.slane %v6667_v17, 4 }
 0x74a   :  { %v6660_v63 = vadd.f32 %v6659_v56, %v6658_v2 }
 0x74b   :  { %v6669_v28 = vadd.f32 %v6668_v62, %v6667_v17 }
 0x74c   :  { %v6661_v61 = vrot.slane %v6660_v63, 2 }
 0x74d   :  { %v6670_v38 = vrot.slane %v6669_v28, 2 }
 0x74e   :  { %v6662_v30 = vadd.f32 %v6661_v61, %v6660_v63 }
 0x74f   :  { %v6671_v39 = vadd.f32 %v6670_v38, %v6669_v28 }
 0x750   :  { %v6663_v44 = vrot.slane %v6662_v30, 1 }
 0x751   :  { %v6672_v54 = vrot.slane %v6671_v39, 1 }
 0x752   :  { %v6664_v60 = vadd.f32 %v6663_v44, %v6662_v30 }
 0x753   :  { %v6673_v4 = vadd.f32 %v6672_v54, %v6671_v39 }
 0x754   :  { %v6675_v18 = vmul.f32 0.03125, %v6664_v60 }
 0x755   :  { %v6676_v22 = vmul.f32 0.03125, %v6673_v4 }
 0x756   :  { %v6677_v29 = vsub.f32 %v6629_v49, %v6675_v18  ;;  %v6679_v41 = vsub.f32 %v6633_v21, %v6675_v18  ;;  %v6681_v31 = vsub.f32 %v6639_v33, %v6675_v18  ;;  %v6683_v13 = vsub.f32 %v6643_v1, %v6675_v18  ;;  %v6725_v33 = vld [vmem:[%s11475_s7] sm:$0x3] }
 0x757   :  { %v6678_v0 = vsub.f32 %v6631_v34, %v6676_v22  ;;  %v6680_v5 = vsub.f32 %v6635_v50, %v6676_v22  ;;  %v6682_v6 = vsub.f32 %v6641_v55, %v6676_v22  ;;  %v6684_v12 = vsub.f32 %v6645_v20, %v6676_v22  ;;  %v6745_v55 = vld [vmem:[%s11476_s8] sm:$0x3] }
 0x758   :  { %v6685_v47 = vmul.f32 %v6677_v29, %v6677_v29  ;;  %v6687_v8 = vmul.f32 %v6679_v41, %v6679_v41  ;;  %v6689_v45 = vmul.f32 %v6681_v31, %v6681_v31  ;;  %v6691_v52 = vmul.f32 %v6683_v13, %v6683_v13 }
 0x759   :  { %v6686_v10 = vmul.f32 %v6678_v0, %v6678_v0  ;;  %v6688_v57 = vmul.f32 %v6680_v5, %v6680_v5  ;;  %v6690_v59 = vmul.f32 %v6682_v6, %v6682_v6  ;;  %v6692_v43 = vmul.f32 %v6684_v12, %v6684_v12 }
 0x75a   :  { %v6693_v23 = vadd.f32 %v6687_v8, %v6685_v47  ;;  %v6727_v49 = vlaneseq }
 0x75b   :  { %v6702_v35 = vadd.f32 %v6688_v57, %v6686_v10 }
 0x75c   :  { %v6694_v11 = vadd.f32 %v6693_v23, %v6689_v45  ;;  %v11411_v50 = vshrl.u32 %v6727_v49, 7  ;;  %v6790_v23 = vld [vmem:[%s11472_s4 + $0x8] sm:$0xff] }
 0x75d   :  { %v6703_v15 = vadd.f32 %v6702_v35, %v6690_v59 }
 0x75e   :  { %v6695_v25 = vadd.f32 %v6694_v11, %v6691_v52  ;;  %v6729_v32 = vsub.s32 0, %v11411_v50  ;;  %v6733_v40 = vsub.s32 1, %v11411_v50 }
 0x75f   :  { %v6704_v26 = vadd.f32 %v6703_v15, %v6692_v43 }
 0x760   :  { %v6696_v51 = vrot.slane %v6695_v25, 4  ;;  %v6730_v16 = vrot.slane %v6725_v33, %v6729_v32  ;;  %v6750_v2 = vrot.slane %v6745_v55, %v6729_v32  ;;  %v6734_v20 = vrot.slane %v6725_v33, %v6733_v40 }
 0x761   :  { %v6705_v46 = vrot.slane %v6704_v26, 4  ;;  %v6754_v17 = vrot.slane %v6745_v55, %v6733_v40 }
 0x762   :  { %v6697_v48 = vadd.f32 %v6696_v51, %v6695_v25 }
 0x763   :  { %v6706_v58 = vadd.f32 %v6705_v46, %v6704_v26 }
 0x764   :  { %v6698_v27 = vrot.slane %v6697_v48, 2 }
 0x765   :  { %v6707_v9 = vrot.slane %v6706_v58, 2 }
 0x766   :  { %v6699_v36 = vadd.f32 %v6698_v27, %v6697_v48  ;;  %v6796_v27 = vld [vmem:[%s11472_s4 + $0x38] sm:$0xff] }
 0x767   :  { %v6708_v42 = vadd.f32 %v6707_v9, %v6706_v58  ;;  %v6795_v58 = vld [vmem:[%s11472_s4 + $0x30] sm:$0xff] }
 0x768   :  { %v6700_v53 = vrot.slane %v6699_v36, 1 }
 0x769   :  { %v6709_v3 = vrot.slane %v6708_v42, 1 }
 0x76a   :  { %v6701_v19 = vadd.f32 %v6700_v53, %v6699_v36 }
 0x76b   :  { %v6710_v14 = vadd.f32 %v6709_v3, %v6708_v42  ;;  %v6791_v3 = vld [vmem:[%s11472_s4 + $0x10] sm:$0xff] }
 0x76c   :  { %v6711_v37 = vmul.f32 0.03125, %v6701_v19  ;;  %v6792_v19 = vld [vmem:[%s11472_s4 + $0x18] sm:$0xff] }
 0x76d   :  { %v6712_v34 = vmul.f32 0.03125, %v6710_v14 }
 0x76e   :  { %v6713_v21 = vadd.f32 1e-05, %v6711_v37 }
 0x76f   :  { %v6714_v7 = vadd.f32 1e-05, %v6712_v34 }
 0x770   :  { %9353 = vrsqrt.f32 %v6713_v21 }
 0x771   :  { %9355 = vrsqrt.f32 %v6714_v7 }
 0x77a   :  { %v9354_v1 = vpop.eup %9353 }
 0x77b   :  { %v9356_v56 = vpop.eup %9355  ;;  %v6723_v62 = vmul.f32 %v9354_v1, %v6683_v13  ;;  %v6721_v63 = vmul.f32 %v9354_v1, %v6681_v31  ;;  %v6717_v28 = vmul.f32 %v9354_v1, %v6677_v29  ;;  %v6719_v61 = vmul.f32 %v9354_v1, %v6679_v41  ;;  %v6793_v31 = vld [vmem:[%s11472_s4 + $0x20] sm:$0xff] }
 0x77c   :  { %v6724_v38 = vmul.f32 %v9356_v56, %v6684_v12  ;;  %v6722_v30 = vmul.f32 %v9356_v56, %v6682_v6  ;;  %v6718_v39 = vmul.f32 %v9356_v56, %v6678_v0  ;;  %v6720_v44 = vmul.f32 %v9356_v56, %v6680_v5  ;;  %v6794_v0 = vld [vmem:[%s11472_s4 + $0x28] sm:$0xff]  ;;  %v6789_v12 = vld [vmem:[%s11472_s4] sm:$0xff]  ;;  %s9389_s4 = smov [#allocation4]  }
 0x77d   :  { %v6743_v54 = vmul.f32 %v6730_v16, %v6723_v62  ;;  %v6741_v60 = vmul.f32 %v6730_v16, %v6721_v63  ;;  %v6737_v4 = vmul.f32 %v6730_v16, %v6717_v28  ;;  %v6739_v18 = vmul.f32 %v6730_v16, %v6719_v61  ;;  %s6912_s6 = sshll.u32 %s9389_s4, 4  ;;  %s6913_s6 = int_to_ptr.vmem [resolvable:$true] %s6912_s6 }
 0x77e   :  { %v6744_v22 = vmul.f32 %v6734_v20, %v6724_v38  ;;  %v6742_v47 = vmul.f32 %v6734_v20, %v6722_v30  ;;  %v6738_v8 = vmul.f32 %v6734_v20, %v6718_v39  ;;  %v6740_v10 = vmul.f32 %v6734_v20, %v6720_v44  ;;  %s9363_s22 = scalar_lea.vmem %s6913_s6, 16  ;;  %s9367_s23 = scalar_lea.vmem %s6913_s6, 32 }
 0x77f   :  { %v6763_v57 = vadd.f32 %v6750_v2, %v6743_v54  ;;  %v6761_v45 = vadd.f32 %v6750_v2, %v6741_v60  ;;  %v6757_v29 = vadd.f32 %v6750_v2, %v6737_v4  ;;  %v6759_v41 = vadd.f32 %v6750_v2, %v6739_v18  ;;  %p9364_p0 = scmp.ne.s32.totalorder %s6913_s6, %s9363_s22  ;;  %p9368_p1 = scmp.lt.s32.totalorder %s6913_s6, %s6913_s6 }
 0x780   :  { %v6764_v13 = vadd.f32 %v6754_v17, %v6744_v22  ;;  %v6762_v6 = vadd.f32 %v6754_v17, %v6742_v47  ;;  %v6758_v5 = vadd.f32 %v6754_v17, %v6738_v8  ;;  %v6760_v59 = vadd.f32 %v6754_v17, %v6740_v10  ;;  %p9369_p2 = scmp.lt.s32.totalorder %s9367_s23, %s9363_s22 }
 0x781   :  { %vm6769_vm0 = vcmp.gt.f32.partialorder %v6761_v45, 0.0  ;;  %v6777_v35 = vmul.f32 0.2, %v6761_v45  ;;  %vm6765_vm6 = vcmp.gt.f32.partialorder %v6757_v29, 0.0  ;;  %v6773_v52 = vmul.f32 0.2, %v6757_v29 }
 0x782   :  { %vm6770_vm7 = vcmp.gt.f32.partialorder %v6762_v6, 0.0  ;;  %v6778_v11 = vmul.f32 0.2, %v6762_v6  ;;  %vm6766_vm8 = vcmp.gt.f32.partialorder %v6758_v5, 0.0  ;;  %v6774_v43 = vmul.f32 0.2, %v6758_v5  ;;  %p9370_p3 = por %p9369_p2, %p9368_p1 }
 0x783   :  { %v6785_v15 = vsel %vm6769_vm0, %v6761_v45, %v6777_v35  ;;  %v6781_v25 = vsel %vm6765_vm6, %v6757_v29, %v6773_v52  ;;  %vm6771_vm9 = vcmp.gt.f32.partialorder %v6763_v57, 0.0  ;;  %vm6772_vm10 = vcmp.gt.f32.partialorder %v6764_v13, 0.0 }
 0x784   :  { %v6786_v26 = vsel %vm6770_vm7, %v6762_v6, %v6778_v11  ;;  %v6801_v51 = vmul.f32 %v6793_v31, %v6785_v15  ;;  %v6782_v46 = vsel %vm6766_vm8, %v6758_v5, %v6774_v43  ;;  %v6797_v48 = vmul.f32 %v6789_v12, %v6781_v25  ;;  %p9371_p4 = pnand %p9370_p3, %p9364_p0 }
 0x785   :  { %v6802_v9 = vmul.f32 %v6794_v0, %v6786_v26  ;;  %v6798_v36 = vmul.f32 %v6790_v23, %v6782_v46  ;;  %v6779_v42 = vmul.f32 0.2, %v6763_v57  ;;  %v6780_v53 = vmul.f32 0.2, %v6764_v13 }
 0x786   :  { %vm6767_vm11 = vcmp.gt.f32.partialorder %v6759_v41, 0.0  ;;  %vm6768_vm12 = vcmp.gt.f32.partialorder %v6760_v59, 0.0  ;;  %v6775_v14 = vmul.f32 0.2, %v6759_v41  ;;  %v6776_v37 = vmul.f32 0.2, %v6760_v59 }
 0x787   :  { %v6811_v34 = vadd.f32 %v6802_v9, %v6801_v51  ;;  %v6805_v21 = vadd.f32 %v6798_v36, %v6797_v48  ;;  %v6787_v7 = vsel %vm6771_vm9, %v6763_v57, %v6779_v42  ;;  %v6788_v32 = vsel %vm6772_vm10, %v6764_v13, %v6780_v53 }
 0x788   :  { %v6803_v33 = vmul.f32 %v6795_v58, %v6787_v7  ;;  %v6804_v40 = vmul.f32 %v6796_v27, %v6788_v32  ;;  %v6783_v55 = vsel %vm6767_vm11, %v6759_v41, %v6775_v14  ;;  %v6784_v16 = vsel %vm6768_vm12, %v6760_v59, %v6776_v37 }
 0x789   :  { %6812 = vadd.xlane.f32.xlu1 %v6811_v34  ;;  %6806 = vadd.xlane.f32.xlu0 %v6805_v21  ;;  %v6799_v1 = vmul.f32 %v6791_v3, %v6783_v55  ;;  %v6800_v2 = vmul.f32 %v6792_v19, %v6784_v16  ;;  %v6820_v56 = vadd.s32 16, %v11411_v50  ;;  %v6819_v62 = vadd.s32 8, %v11411_v50 }
 0x78a   :  { %v6814_v20 = vadd.f32 %v6804_v40, %v6803_v33  ;;  %v6823_v63 = vand.u32 127, %v6727_v49  ;;  %v6828_v28 = vand.u32 1, %v11411_v50  ;;  %v6821_v61 = vadd.s32 24, %v11411_v50 }
 0x78b   :  { %v6808_v17 = vadd.f32 %v6800_v2, %v6799_v1  ;;  %v6842_v38 = vand.u32 1, %v6820_v56  ;;  %v6835_v30 = vand.u32 1, %v6819_v62 }
 0x78c   :  { %vm6872_vm13 = vcmp.eq.s32.totalorder %v6828_v28, %v6823_v63  ;;  %v6849_v39 = vand.u32 1, %v6821_v61 }
 0x78d   :  { %6815 = vadd.xlane.f32.xlu1 %v6814_v20  ;;  %6809 = vadd.xlane.f32.xlu0 %v6808_v17  ;;  %vm6874_vm14 = vcmp.eq.s32.totalorder %v6842_v38, %v6823_v63  ;;  %vm6873_vm15 = vcmp.eq.s32.totalorder %v6835_v30, %v6823_v63  ;;  %v6876_v54 = vsel %vm6872_vm13, 1.0, %v11406_v24 }
 0x78e   :  { %vm6875_vm1 = vcmp.eq.s32.totalorder %v6849_v39, %v6823_v63  ;;  %v6878_v4 = vsel %vm6874_vm14, 1.0, %v11406_v24  ;;  %v6877_v18 = vsel %vm6873_vm15, 1.0, %v11406_v24 }
 0x78f   :  { %v6879_v22 = vsel %vm6875_vm1, 1.0, %v11406_v24 }
 0x816   :  { %v6813_v44 = vpop.xlane.xlu1 %6812  ;;  %v6807_v60 = vpop.xlane.xlu0 %6806 }
 0x817   :  { %v6880_v49 = vmul.f32 %v6876_v54, %v6807_v60  ;;  %v6882_v8 = vmul.f32 %v6878_v4, %v6813_v44 }
 0x819   :  { %v6885_v57 = vsel %vm6884_vm2, %v6880_v49, 0.0  ;;  %v6888_v41 = vsel %vm6884_vm2, %v6882_v8, 0.0 }
 0x81a   :  { %v6816_v50 = vpop.xlane.xlu1 %6815  ;;  %v6810_v47 = vpop.xlane.xlu0 %6809 }
 0x81b   :  { %v6881_v10 = vmul.f32 %v6877_v18, %v6810_v47  ;;  %v6883_v45 = vmul.f32 %v6879_v22, %v6816_v50 }
 0x81d   :  { %v6886_v31 = vsel %vm6884_vm2, %v6881_v10, 0.0  ;;  %v6890_v6 = vsel %vm6884_vm2, %v6883_v45, 0.0 }
 0x81e   :  { %v6887_v29 = vadd.f32 %v6886_v31, %v6885_v57 }
 0x820   :  { %v6889_v13 = vadd.f32 %v6888_v41, %v6887_v29 }
 0x822   :  { %v6891_v0 = vadd.f32 %v6890_v6, %v6889_v13 }
 0x824   :  { %v6892_v5 = vrot.slane %v6891_v0, 4 }
 0x826   :  { %v6893_v12 = vadd.f32 %v6892_v5, %v6891_v0 }
 0x828   :  { %v6894_v23 = vrot.slane %v6893_v12, 2 }
 0x82a   :  { %v6895_v59 = vadd.f32 %v6894_v23, %v6893_v12 }
 0x82c   :  { %v6896_v35 = vrot.slane %v6895_v59, 1 }
 0x82e   :  { %v6897_v52 = vadd.f32 %v6896_v35, %v6895_v59 }
 0x830   :  { %v6898_v11 = vsub.f32 0.0, %v6897_v52 }
 0x832   :  { %v6899_v24 = vmul.f32 1.442695, %v6898_v11 }
 0x834   :  { %9357 = vpow2.f32 %v6899_v24 }
 0x83e   :  { %v9358_v43 = vpop.eup %9357 }
 0x83f   :  { %v6901_v15 = vadd.f32 1.0, %v9358_v43 }
 0x841   :  { %9359 = vrcp.f32 %v6901_v15 }
 0x84b   :  { %v9360_v25 = vpop.eup %9359 }
 0x84c   :  { %6905 = vst.msk [vmem:[#allocation4] sm:$0x1] %vm6904_vm3, %v9360_v25 }
 0x84d   :  { %9374 = shalt.err (!%p9371_p4)
}
 0x84e   :  { %s9375_s25 = scalar_lea.hbm %s11477_s9, 16 }
 0x84f   :  { %p9376_p5 = scmp.ne.s32.totalorder %s11477_s9, %s9375_s25  ;;  %p9379_p6 = scmp.lt.u32.totalorder %s9375_s25, %s11477_s9 }
 0x851   :  { %p9381_p7 = pnand %p9379_p6, %p9376_p5 }
 0x853   :  { %9384 = shalt.err (!%p9381_p7)
}
 0x854   :  { %6915 = dma.vmem_to_hbm [thread:$0]  %s6913_s6, 16, %s11477_s9, [#allocation5]  }
 0x855   :  { %9385 = dma.done.wait [#allocation5], 16  }
 0x856   :  { %9386 = vsyncadd [#allocation5], 4294967280 }
 0x857   :  { %6919 = vsyncpa [#allocation5], 1 }

</bundles_post_ra>
